<compile_context>
chip_gen: v6e
topology: v6e:2x2x1
jax: 0.10.0
libtpu: 0.0.40
codegen_flags: <defaults>
</compile_context>

<pallas_src>
import functools

import jax
import jax.numpy as jnp
from jax.experimental import pallas as pl
from jax.experimental.pallas import tpu as pltpu


def _rup(x, m):
    return (x + m - 1) // m * m


def _split_dim(dim, pref, align, full_max):
    """Pick (padded_dim, tile) s.t. tile divides padded_dim and tile is either the
    full (unpadded) dim or a multiple of `align`.  For the ResNet18 shapes used
    here this never pads, so activations never take an HBM pad/slice round trip."""
    if dim <= full_max:
        return dim, dim                      # single full-dim block
    if dim % pref == 0:
        return dim, pref
    t = pref - align
    while t >= align:
        if dim % t == 0:
            return dim, t
        t -= align
    return _rup(dim, pref), pref             # generic fallback (unused for this net)


# ----------------------------------------------------------------------------
# Pallas kernel: tiled  out = act(A @ B + bias [+ residual])
#   grid = (M/tm, N/tn, K/tk); f32 accumulator in VMEM scratch; epilogue fused
#   on the last K step.  A/B are bf16 (MXU); accumulation / epilogue in f32.
# ----------------------------------------------------------------------------
def _mm_kernel(*refs, activation, has_residual):
    if has_residual:
        a_ref, b_ref, bias_ref, res_ref, o_ref, acc_ref = refs
    else:
        a_ref, b_ref, bias_ref, o_ref, acc_ref = refs
        res_ref = None

    @pl.when(pl.program_id(2) == 0)
    def _init():
        acc_ref[...] = jnp.zeros_like(acc_ref)

    acc_ref[...] += jnp.dot(a_ref[...], b_ref[...],
                            preferred_element_type=jnp.float32)

    @pl.when(pl.program_id(2) == pl.num_programs(2) - 1)
    def _finalize():
        acc = acc_ref[...] + bias_ref[...]
        if res_ref is not None:
            acc = acc + res_ref[...].astype(jnp.float32)
        if activation == "relu":
            acc = jnp.maximum(acc, 0.0)
        elif activation == "sigmoid":
            acc = jnp.clip(pl.reciprocal(1.0 + jnp.exp(-acc), approx=True), 0.0, 1.0)
        o_ref[...] = acc.astype(o_ref.dtype)


def pallas_matmul(a, b, bias, residual=None, activation="none",
                  out_dtype=jnp.bfloat16):
    """act(a @ b + bias [+ residual]); bf16 MXU operands, f32 accumulation."""
    M, K = a.shape
    _, N = b.shape

    # Tiling: 256/256/512 preferred (fills the 256x256 MXU on v6e/v7x, fine on
    # v5e); full-dim blocks when a dim is small / unaligned -> no HBM padding.
    Mp, tm = _split_dim(M, 256, 16, 256)     # 16-mult tiles for bf16 sublane packing
    Np, tn = _split_dim(N, 256, 128, 256)
    Kp, tk = _split_dim(K, 512, 128, 1024)

    a = a.astype(jnp.bfloat16)
    b = b.astype(jnp.bfloat16)
    bias2 = bias.astype(jnp.float32).reshape(1, N)
    if (Mp, Kp) != (M, K):
        a = jnp.pad(a, ((0, Mp - M), (0, Kp - K)))
    if (Kp, Np) != (K, N):
        b = jnp.pad(b, ((0, Kp - K), (0, Np - N)))
    if Np != N:
        bias2 = jnp.pad(bias2, ((0, 0), (0, Np - N)))

    operands = [a, b, bias2]
    in_specs = [
        pl.BlockSpec((tm, tk), lambda i, j, k: (i, k)),
        pl.BlockSpec((tk, tn), lambda i, j, k: (k, j)),
        pl.BlockSpec((1, tn), lambda i, j, k: (0, j)),
    ]
    has_res = residual is not None
    if has_res:
        r = residual
        if (Mp, Np) != (M, N):
            r = jnp.pad(r, ((0, Mp - M), (0, Np - N)))
        operands.append(r)
        in_specs.append(pl.BlockSpec((tm, tn), lambda i, j, k: (i, j)))

    out = pl.pallas_call(
        functools.partial(_mm_kernel, activation=activation, has_residual=has_res),
        out_shape=jax.ShapeDtypeStruct((Mp, Np), out_dtype),
        grid=(Mp // tm, Np // tn, Kp // tk),
        in_specs=in_specs,
        out_specs=pl.BlockSpec((tm, tn), lambda i, j, k: (i, j)),
        scratch_shapes=[pltpu.VMEM((tm, tn), jnp.float32)],
        # No vmem_limit override: tile footprints fit the default scoped VMEM on
        # v5e/v6e and on v7x's 64 MiB physical VMEM.
        compiler_params=pltpu.CompilerParams(
            dimension_semantics=("parallel", "parallel", "arbitrary")),
    )(*operands)

    if (Mp, Np) != (M, N):
        out = out[:M, :N]
    return out


# ----------------------------------------------------------------------------
# Fused MLP head:  sigmoid(relu(relu(x@W1+b1)@W2+b2)@W3+b3)  in ONE kernel.
# ----------------------------------------------------------------------------
def _head_kernel(x_ref, w1_ref, b1_ref, w2_ref, b2_ref, w3_ref, b3_ref, o_ref):
    h = jnp.dot(x_ref[...], w1_ref[...], preferred_element_type=jnp.float32) + b1_ref[...]
    h = jnp.maximum(h, 0.0)
    h = jnp.dot(h.astype(jnp.bfloat16), w2_ref[...],
                preferred_element_type=jnp.float32) + b2_ref[...]
    h = jnp.maximum(h, 0.0)
    z = jnp.dot(h.astype(jnp.bfloat16), w3_ref[...],
                preferred_element_type=jnp.float32) + b3_ref[...]
    o_ref[...] = jnp.clip(pl.reciprocal(1.0 + jnp.exp(-z), approx=True), 0.0, 1.0)


def mlp_head(x, params):
    w1, b1 = params["fc1"]
    w2, b2 = params["fc2"]
    w3, b3 = params["fc3"]
    B = x.shape[0]
    NOUT = 128                                   # pad final dim 1 -> 128 (lane-dense store)
    w3p = jnp.pad(w3, ((0, 0), (0, NOUT - w3.shape[1])))
    b3p = jnp.pad(b3, ((0, NOUT - b3.shape[0]),))
    out = pl.pallas_call(
        _head_kernel,
        out_shape=jax.ShapeDtypeStruct((B, NOUT), jnp.float32),
    )(x.astype(jnp.bfloat16),
      w1.astype(jnp.bfloat16), b1.astype(jnp.float32).reshape(1, -1),
      w2.astype(jnp.bfloat16), b2.astype(jnp.float32).reshape(1, -1),
      w3p.astype(jnp.bfloat16), b3p.astype(jnp.float32).reshape(1, -1))
    return out[:, :1]


# ----------------------------------------------------------------------------
# Conv / pooling glue (patch extraction feeds the tiled Pallas matmul)
# ----------------------------------------------------------------------------
def conv2d_bn(x, w_hwio, bn, stride, pad, activation="none", residual=None):
    """Conv + (folded, eval-mode) BatchNorm + optional residual + activation."""
    gamma, beta, mean, var = bn
    scale = gamma * jax.lax.rsqrt(var + 1e-5)
    bias = beta - mean * scale
    kh, kw, cin, cout = w_hwio.shape
    B = x.shape[0]

    if kh == 1 and kw == 1:
        # 1x1 conv: no im2col at all, just a (strided) reshape + matmul.
        xs = x[:, ::stride, ::stride, :] if stride > 1 else x
        _, Ho, Wo, _ = xs.shape
        patches = xs.reshape(B * Ho * Wo, cin)
        w2d = w_hwio[0, 0] * scale[None, :]                       # (cin, cout)
    else:
        # TODO(synk): stride-1 taps could be reduced fully in-kernel (shifted
        # BlockSpecs over kh*kw) to avoid materializing patches in HBM.
        patches4 = jax.lax.conv_general_dilated_patches(
            x, (kh, kw), (stride, stride), ((pad, pad), (pad, pad)),
            dimension_numbers=("NHWC", "HWIO", "NHWC"))
        _, Ho, Wo, _ = patches4.shape
        patches = patches4.reshape(B * Ho * Wo, cin * kh * kw)
        # Patch feature order is channel-major (c, kh, kw): flatten weight to match.
        w2d = jnp.transpose(w_hwio * scale[None, None, None, :], (2, 0, 1, 3))
        w2d = w2d.reshape(cin * kh * kw, cout)

    res2d = None
    if residual is not None:
        res2d = residual.reshape(B * Ho * Wo, cout)
    out = pallas_matmul(patches, w2d, bias, residual=res2d, activation=activation)
    return out.reshape(B, Ho, Wo, cout)


def maxpool_3x3_s2(x):
    # TODO(synk): 3x3/s2 maxpool kept as plain-JAX reduce_window (glue); the
    # matmul hot path is in Pallas.
    return jax.lax.reduce_window(
        x, jnp.array(-jnp.inf, x.dtype), jax.lax.max,
        window_dimensions=(1, 3, 3, 1), window_strides=(1, 2, 2, 1),
        padding=((0, 0), (1, 1), (1, 1), (0, 0)))


# ----------------------------------------------------------------------------
# Deterministic parameter init (synthetic — no checkpoint load)
# ----------------------------------------------------------------------------
def init_conv(key, kh, kw, cin, cout):
    fan_in = kh * kw * cin
    return jax.random.normal(key, (kh, kw, cin, cout), jnp.float32) * jnp.sqrt(2.0 / fan_in)


def init_bn(key, c):
    k1, k2, k3, k4 = jax.random.split(key, 4)
    gamma = 1.0 + 0.1 * jax.random.normal(k1, (c,), jnp.float32)
    beta = 0.1 * jax.random.normal(k2, (c,), jnp.float32)
    mean = 0.1 * jax.random.normal(k3, (c,), jnp.float32)
    var = 1.0 + 0.1 * jnp.abs(jax.random.normal(k4, (c,), jnp.float32))
    return (gamma, beta, mean, var)


def init_linear(key, din, dout):
    k1, k2 = jax.random.split(key)
    bound = 1.0 / jnp.sqrt(din)
    w = jax.random.uniform(k1, (din, dout), jnp.float32, -bound, bound)
    b = jax.random.uniform(k2, (dout,), jnp.float32, -bound, bound)
    return (w, b)


def init_basic_block(key, cin, cout, stride):
    ks = jax.random.split(key, 6)
    p = {
        "conv1": init_conv(ks[0], 3, 3, cin, cout),
        "bn1": init_bn(ks[1], cout),
        "conv2": init_conv(ks[2], 3, 3, cout, cout),
        "bn2": init_bn(ks[3], cout),
    }
    if stride != 1 or cin != cout:
        p["down_conv"] = init_conv(ks[4], 1, 1, cin, cout)
        p["down_bn"] = init_bn(ks[5], cout)
    return p


def init_params(key):
    keys = jax.random.split(key, 16)
    cnn = {"conv1": init_conv(keys[0], 7, 7, 3, 64), "bn1": init_bn(keys[1], 64)}
    widths = [64, 128, 256, 512]
    cin, ki = 64, 2
    for li, w in enumerate(widths):
        stride = 1 if li == 0 else 2
        cnn[f"layer{li + 1}"] = [
            init_basic_block(keys[ki], cin, w, stride),
            init_basic_block(keys[ki + 1], w, w, 1),
        ]
        ki += 2
        cin = w
    cnn["fc"] = init_linear(keys[ki], 512, 256)   # resnet18.fc replaced with 512->256
    ki += 1
    return {
        "cnn": cnn,
        "fc1": init_linear(keys[ki], 512, 512),
        "fc2": init_linear(keys[ki + 1], 512, 256),
        "fc3": init_linear(keys[ki + 2], 256, 1),
    }


# ----------------------------------------------------------------------------
# Forward pass
# ----------------------------------------------------------------------------
def basic_block(x, p, stride):
    if "down_conv" in p:
        identity = conv2d_bn(x, p["down_conv"], p["down_bn"], stride, 0, activation="none")
    else:
        identity = x
    out = conv2d_bn(x, p["conv1"], p["bn1"], stride, 1, activation="relu")
    # second conv: residual add + final ReLU fused into the Pallas kernel epilogue
    out = conv2d_bn(out, p["conv2"], p["bn2"], 1, 1, activation="relu", residual=identity)
    return out


def resnet18_forward(x_nchw, p):
    x = jnp.transpose(x_nchw, (0, 2, 3, 1)).astype(jnp.bfloat16)   # NCHW -> NHWC, bf16
    x = conv2d_bn(x, p["conv1"], p["bn1"], stride=2, pad=3, activation="relu")
    x = maxpool_3x3_s2(x)
    for li in range(4):
        stride = 1 if li == 0 else 2
        blocks = p[f"layer{li + 1}"]
        x = basic_block(x, blocks[0], stride)
        x = basic_block(x, blocks[1], 1)
    x = jnp.mean(x.astype(jnp.float32), axis=(1, 2))   # adaptive avgpool (1,1) -> (B, 512)
    w, b = p["fc"]
    return pallas_matmul(x, w, b, activation="none", out_dtype=jnp.float32)   # (B, 256)


def siamese_forward(params, input1, input2):
    B = input1.shape[0]
    # Shared-weight twin towers run as ONE batched pass (half the kernel launches).
    x = jnp.concatenate([input1, input2], axis=0)            # (2B, 3, H, W)
    emb = resnet18_forward(x, params["cnn"])                  # (2B, 256)
    combined = jnp.concatenate([emb[:B], emb[B:]], axis=1)    # (B, 512)
    return mlp_head(combined, params)                         # (B, 1), sigmoid


if __name__ == "__main__":
    key = jax.random.PRNGKey(0)
    k_params, k_x1, k_x2 = jax.random.split(key, 3)

    params = init_params(k_params)
    # Small inputs consistent with the module's NCHW RGB convention.
    x1 = jax.random.normal(k_x1, (2, 3, 32, 32), jnp.float32)
    x2 = jax.random.normal(k_x2, (2, 3, 32, 32), jnp.float32)

    fwd = jax.jit(siamese_forward)
    out = fwd(params, x1, x2)
    out = jax.block_until_ready(out)

    assert out.shape == (2, 1), out.shape
    assert bool(jnp.all(jnp.isfinite(out)))
    assert bool(jnp.all((out >= 0.0) & (out <= 1.0)))
    print("KERNEL_OK")
</pallas_src>

<mosaic_0001>
module attributes {stable_mosaic.version = 11 : i64} {
  func.func @_mm_kernel(%arg0: i32, %arg1: i32, %arg2: i32, %arg3: memref<256x147xbf16, #tpu.memory_space<vmem>>, %arg4: memref<147x64xbf16, #tpu.memory_space<vmem>>, %arg5: memref<1x64xf32, #tpu.memory_space<vmem>>, %arg6: memref<256x64xbf16, #tpu.memory_space<vmem>>, %arg7: memref<256x64xf32, #tpu.memory_space<vmem>>) attributes {dimension_semantics = [#tpu.dimension_semantics<parallel>, #tpu.dimension_semantics<parallel>, #tpu.dimension_semantics<arbitrary>], iteration_bounds = array<i64: 4, 1, 1>, scalar_prefetch = 0 : i64, scratch_operands = 1 : i64, tpu.core_type = #tpu.core_type<tc>, window_params = [{transform_indices = @transform_0, window_bounds = array<i64: 256, 147>}, {transform_indices = @transform_1, window_bounds = array<i64: 147, 64>}, {transform_indices = @transform_2, window_bounds = array<i64: 1, 64>}, {transform_indices = @transform_3, window_bounds = array<i64: 256, 64>}]} {
    %c0_i32 = arith.constant 0 : i32
    %0 = arith.cmpi eq, %arg2, %c0_i32 : i32
    %1 = arith.extui %0 : i1 to i32
    %c0_i32_0 = arith.constant 0 : i32
    %2 = arith.cmpi ne, %1, %c0_i32_0 : i32
    scf.if %2 {
      %cst_10 = arith.constant 0.000000e+00 : f32
      %12 = vector.broadcast %cst_10 : f32 to vector<256x64xf32>
      %c0_11 = arith.constant 0 : index
      %c0_12 = arith.constant 0 : index
      %13 = vector.load %arg7[%c0_11, %c0_12] : memref<256x64xf32, #tpu.memory_space<vmem>>, vector<256x64xf32>
      tpu.vector_store %arg7[%c0_11, %c0_12], %12 {strides = array<i32>} : memref<256x64xf32, #tpu.memory_space<vmem>>, vector<256x64xf32>,
    } else {
    }
    %c0 = arith.constant 0 : index
    %c0_1 = arith.constant 0 : index
    %3 = vector.load %arg7[%c0, %c0_1] : memref<256x64xf32, #tpu.memory_space<vmem>>, vector<256x64xf32>
    %c0_2 = arith.constant 0 : index
    %c0_3 = arith.constant 0 : index
    %4 = vector.load %arg3[%c0_2, %c0_3] : memref<256x147xbf16, #tpu.memory_space<vmem>>, vector<256x147xbf16>
    %c0_4 = arith.constant 0 : index
    %c0_5 = arith.constant 0 : index
    %5 = vector.load %arg4[%c0_4, %c0_5] : memref<147x64xbf16, #tpu.memory_space<vmem>>, vector<147x64xbf16>
    %cst = arith.constant dense<0.000000e+00> : vector<256x64xf32>
    %6 = tpu.matmul %4, %5, %cst {dimension_numbers = #tpu.dot_dimension_numbers<[1], [0], [0], [1], [0, 0, 1, 1], [], []>} : vector<256x147xbf16>, vector<147x64xbf16>, vector<256x64xf32> -> vector<256x64xf32>
    %7 = arith.addf %3, %6 : vector<256x64xf32>
    %c0_6 = arith.constant 0 : index
    %c0_7 = arith.constant 0 : index
    %8 = vector.load %arg7[%c0_6, %c0_7] : memref<256x64xf32, #tpu.memory_space<vmem>>, vector<256x64xf32>
    tpu.vector_store %arg7[%c0_6, %c0_7], %7 {strides = array<i32>} : memref<256x64xf32, #tpu.memory_space<vmem>>, vector<256x64xf32>,
    %c0_i32_8 = arith.constant 0 : i32
    %9 = arith.cmpi eq, %arg2, %c0_i32_8 : i32
    %10 = arith.extui %9 : i1 to i32
    %c0_i32_9 = arith.constant 0 : i32
    %11 = arith.cmpi ne, %10, %c0_i32_9 : i32
    scf.if %11 {
      %c0_10 = arith.constant 0 : index
      %c0_11 = arith.constant 0 : index
      %12 = vector.load %arg7[%c0_10, %c0_11] : memref<256x64xf32, #tpu.memory_space<vmem>>, vector<256x64xf32>
      %c0_12 = arith.constant 0 : index
      %c0_13 = arith.constant 0 : index
      %13 = vector.load %arg5[%c0_12, %c0_13] : memref<1x64xf32, #tpu.memory_space<vmem>>, vector<1x64xf32>
      %14 = vector.broadcast %13 : vector<1x64xf32> to vector<256x64xf32>
      %15 = arith.addf %12, %14 : vector<256x64xf32>
      %cst_14 = arith.constant 0.000000e+00 : f32
      %16 = vector.broadcast %cst_14 : f32 to vector<256x64xf32>
      %17 = arith.maximumf %15, %16 : vector<256x64xf32>
      %18 = arith.truncf %17 : vector<256x64xf32> to vector<256x64xbf16>
      %c0_15 = arith.constant 0 : index
      %c0_16 = arith.constant 0 : index
      %19 = vector.load %arg6[%c0_15, %c0_16] : memref<256x64xbf16, #tpu.memory_space<vmem>>, vector<256x64xbf16>
      tpu.vector_store %arg6[%c0_15, %c0_16], %18 {strides = array<i32>} : memref<256x64xbf16, #tpu.memory_space<vmem>>, vector<256x64xbf16>,
    } else {
    }
    return
  }
  func.func @transform_0(%arg0: i32, %arg1: i32, %arg2: i32) -> (i32, i32) {
    %c0_i32 = arith.constant 0 : i32
    return %arg0, %arg2 : i32, i32
  }
  func.func @transform_1(%arg0: i32, %arg1: i32, %arg2: i32) -> (i32, i32) {
    %c0_i32 = arith.constant 0 : i32
    return %arg2, %arg1 : i32, i32
  }
  func.func @transform_2(%arg0: i32, %arg1: i32, %arg2: i32) -> (i32, i32) {
    %c0_i32 = arith.constant 0 : i32
    %c0_i32_0 = arith.constant 0 : i32
    return %c0_i32, %arg1 : i32, i32
  }
  func.func @transform_3(%arg0: i32, %arg1: i32, %arg2: i32) -> (i32, i32) {
    %c0_i32 = arith.constant 0 : i32
    return %arg0, %arg1 : i32, i32
  }
}

module attributes {stable_mosaic.version = 11 : i64} {
  func.func @_mm_kernel(%arg0: i32, %arg1: i32, %arg2: i32, %arg3: memref<256x576xbf16, #tpu.memory_space<vmem>>, %arg4: memref<576x64xbf16, #tpu.memory_space<vmem>>, %arg5: memref<1x64xf32, #tpu.memory_space<vmem>>, %arg6: memref<256x64xbf16, #tpu.memory_space<vmem>>, %arg7: memref<256x64xf32, #tpu.memory_space<vmem>>) attributes {dimension_semantics = [#tpu.dimension_semantics<parallel>, #tpu.dimension_semantics<parallel>, #tpu.dimension_semantics<arbitrary>], iteration_bounds = array<i64: 1, 1, 1>, scalar_prefetch = 0 : i64, scratch_operands = 1 : i64, tpu.core_type = #tpu.core_type<tc>, window_params = [{transform_indices = @transform_0, window_bounds = array<i64: 256, 576>}, {transform_indices = @transform_1, window_bounds = array<i64: 576, 64>}, {transform_indices = @transform_2, window_bounds = array<i64: 1, 64>}, {transform_indices = @transform_3, window_bounds = array<i64: 256, 64>}]} {
    %c0_i32 = arith.constant 0 : i32
    %0 = arith.cmpi eq, %arg2, %c0_i32 : i32
    %1 = arith.extui %0 : i1 to i32
    %c0_i32_0 = arith.constant 0 : i32
    %2 = arith.cmpi ne, %1, %c0_i32_0 : i32
    scf.if %2 {
      %cst_10 = arith.constant 0.000000e+00 : f32
      %12 = vector.broadcast %cst_10 : f32 to vector<256x64xf32>
      %c0_11 = arith.constant 0 : index
      %c0_12 = arith.constant 0 : index
      %13 = vector.load %arg7[%c0_11, %c0_12] : memref<256x64xf32, #tpu.memory_space<vmem>>, vector<256x64xf32>
      tpu.vector_store %arg7[%c0_11, %c0_12], %12 {strides = array<i32>} : memref<256x64xf32, #tpu.memory_space<vmem>>, vector<256x64xf32>,
    } else {
    }
    %c0 = arith.constant 0 : index
    %c0_1 = arith.constant 0 : index
    %3 = vector.load %arg7[%c0, %c0_1] : memref<256x64xf32, #tpu.memory_space<vmem>>, vector<256x64xf32>
    %c0_2 = arith.constant 0 : index
    %c0_3 = arith.constant 0 : index
    %4 = vector.load %arg3[%c0_2, %c0_3] : memref<256x576xbf16, #tpu.memory_space<vmem>>, vector<256x576xbf16>
    %c0_4 = arith.constant 0 : index
    %c0_5 = arith.constant 0 : index
    %5 = vector.load %arg4[%c0_4, %c0_5] : memref<576x64xbf16, #tpu.memory_space<vmem>>, vector<576x64xbf16>
    %cst = arith.constant dense<0.000000e+00> : vector<256x64xf32>
    %6 = tpu.matmul %4, %5, %cst {dimension_numbers = #tpu.dot_dimension_numbers<[1], [0], [0], [1], [0, 0, 1, 1], [], []>} : vector<256x576xbf16>, vector<576x64xbf16>, vector<256x64xf32> -> vector<256x64xf32>
    %7 = arith.addf %3, %6 : vector<256x64xf32>
    %c0_6 = arith.constant 0 : index
    %c0_7 = arith.constant 0 : index
    %8 = vector.load %arg7[%c0_6, %c0_7] : memref<256x64xf32, #tpu.memory_space<vmem>>, vector<256x64xf32>
    tpu.vector_store %arg7[%c0_6, %c0_7], %7 {strides = array<i32>} : memref<256x64xf32, #tpu.memory_space<vmem>>, vector<256x64xf32>,
    %c0_i32_8 = arith.constant 0 : i32
    %9 = arith.cmpi eq, %arg2, %c0_i32_8 : i32
    %10 = arith.extui %9 : i1 to i32
    %c0_i32_9 = arith.constant 0 : i32
    %11 = arith.cmpi ne, %10, %c0_i32_9 : i32
    scf.if %11 {
      %c0_10 = arith.constant 0 : index
      %c0_11 = arith.constant 0 : index
      %12 = vector.load %arg7[%c0_10, %c0_11] : memref<256x64xf32, #tpu.memory_space<vmem>>, vector<256x64xf32>
      %c0_12 = arith.constant 0 : index
      %c0_13 = arith.constant 0 : index
      %13 = vector.load %arg5[%c0_12, %c0_13] : memref<1x64xf32, #tpu.memory_space<vmem>>, vector<1x64xf32>
      %14 = vector.broadcast %13 : vector<1x64xf32> to vector<256x64xf32>
      %15 = arith.addf %12, %14 : vector<256x64xf32>
      %cst_14 = arith.constant 0.000000e+00 : f32
      %16 = vector.broadcast %cst_14 : f32 to vector<256x64xf32>
      %17 = arith.maximumf %15, %16 : vector<256x64xf32>
      %18 = arith.truncf %17 : vector<256x64xf32> to vector<256x64xbf16>
      %c0_15 = arith.constant 0 : index
      %c0_16 = arith.constant 0 : index
      %19 = vector.load %arg6[%c0_15, %c0_16] : memref<256x64xbf16, #tpu.memory_space<vmem>>, vector<256x64xbf16>
      tpu.vector_store %arg6[%c0_15, %c0_16], %18 {strides = array<i32>} : memref<256x64xbf16, #tpu.memory_space<vmem>>, vector<256x64xbf16>,
    } else {
    }
    return
  }
  func.func @transform_0(%arg0: i32, %arg1: i32, %arg2: i32) -> (i32, i32) {
    %c0_i32 = arith.constant 0 : i32
    return %arg0, %arg2 : i32, i32
  }
  func.func @transform_1(%arg0: i32, %arg1: i32, %arg2: i32) -> (i32, i32) {
    %c0_i32 = arith.constant 0 : i32
    return %arg2, %arg1 : i32, i32
  }
  func.func @transform_2(%arg0: i32, %arg1: i32, %arg2: i32) -> (i32, i32) {
    %c0_i32 = arith.constant 0 : i32
    %c0_i32_0 = arith.constant 0 : i32
    return %c0_i32, %arg1 : i32, i32
  }
  func.func @transform_3(%arg0: i32, %arg1: i32, %arg2: i32) -> (i32, i32) {
    %c0_i32 = arith.constant 0 : i32
    return %arg0, %arg1 : i32, i32
  }
}

module attributes {stable_mosaic.version = 11 : i64} {
  func.func @_mm_kernel(%arg0: i32, %arg1: i32, %arg2: i32, %arg3: memref<256x576xbf16, #tpu.memory_space<vmem>>, %arg4: memref<576x64xbf16, #tpu.memory_space<vmem>>, %arg5: memref<1x64xf32, #tpu.memory_space<vmem>>, %arg6: memref<256x64xbf16, #tpu.memory_space<vmem>>, %arg7: memref<256x64xbf16, #tpu.memory_space<vmem>>, %arg8: memref<256x64xf32, #tpu.memory_space<vmem>>) attributes {dimension_semantics = [#tpu.dimension_semantics<parallel>, #tpu.dimension_semantics<parallel>, #tpu.dimension_semantics<arbitrary>], iteration_bounds = array<i64: 1, 1, 1>, scalar_prefetch = 0 : i64, scratch_operands = 1 : i64, tpu.core_type = #tpu.core_type<tc>, window_params = [{transform_indices = @transform_0, window_bounds = array<i64: 256, 576>}, {transform_indices = @transform_1, window_bounds = array<i64: 576, 64>}, {transform_indices = @transform_2, window_bounds = array<i64: 1, 64>}, {transform_indices = @transform_3, window_bounds = array<i64: 256, 64>}, {transform_indices = @transform_4, window_bounds = array<i64: 256, 64>}]} {
    %c0_i32 = arith.constant 0 : i32
    %0 = arith.cmpi eq, %arg2, %c0_i32 : i32
    %1 = arith.extui %0 : i1 to i32
    %c0_i32_0 = arith.constant 0 : i32
    %2 = arith.cmpi ne, %1, %c0_i32_0 : i32
    scf.if %2 {
      %cst_10 = arith.constant 0.000000e+00 : f32
      %12 = vector.broadcast %cst_10 : f32 to vector<256x64xf32>
      %c0_11 = arith.constant 0 : index
      %c0_12 = arith.constant 0 : index
      %13 = vector.load %arg8[%c0_11, %c0_12] : memref<256x64xf32, #tpu.memory_space<vmem>>, vector<256x64xf32>
      tpu.vector_store %arg8[%c0_11, %c0_12], %12 {strides = array<i32>} : memref<256x64xf32, #tpu.memory_space<vmem>>, vector<256x64xf32>,
    } else {
    }
    %c0 = arith.constant 0 : index
    %c0_1 = arith.constant 0 : index
    %3 = vector.load %arg8[%c0, %c0_1] : memref<256x64xf32, #tpu.memory_space<vmem>>, vector<256x64xf32>
    %c0_2 = arith.constant 0 : index
    %c0_3 = arith.constant 0 : index
    %4 = vector.load %arg3[%c0_2, %c0_3] : memref<256x576xbf16, #tpu.memory_space<vmem>>, vector<256x576xbf16>
    %c0_4 = arith.constant 0 : index
    %c0_5 = arith.constant 0 : index
    %5 = vector.load %arg4[%c0_4, %c0_5] : memref<576x64xbf16, #tpu.memory_space<vmem>>, vector<576x64xbf16>
    %cst = arith.constant dense<0.000000e+00> : vector<256x64xf32>
    %6 = tpu.matmul %4, %5, %cst {dimension_numbers = #tpu.dot_dimension_numbers<[1], [0], [0], [1], [0, 0, 1, 1], [], []>} : vector<256x576xbf16>, vector<576x64xbf16>, vector<256x64xf32> -> vector<256x64xf32>
    %7 = arith.addf %3, %6 : vector<256x64xf32>
    %c0_6 = arith.constant 0 : index
    %c0_7 = arith.constant 0 : index
    %8 = vector.load %arg8[%c0_6, %c0_7] : memref<256x64xf32, #tpu.memory_space<vmem>>, vector<256x64xf32>
    tpu.vector_store %arg8[%c0_6, %c0_7], %7 {strides = array<i32>} : memref<256x64xf32, #tpu.memory_space<vmem>>, vector<256x64xf32>,
    %c0_i32_8 = arith.constant 0 : i32
    %9 = arith.cmpi eq, %arg2, %c0_i32_8 : i32
    %10 = arith.extui %9 : i1 to i32
    %c0_i32_9 = arith.constant 0 : i32
    %11 = arith.cmpi ne, %10, %c0_i32_9 : i32
    scf.if %11 {
      %c0_10 = arith.constant 0 : index
      %c0_11 = arith.constant 0 : index
      %12 = vector.load %arg8[%c0_10, %c0_11] : memref<256x64xf32, #tpu.memory_space<vmem>>, vector<256x64xf32>
      %c0_12 = arith.constant 0 : index
      %c0_13 = arith.constant 0 : index
      %13 = vector.load %arg5[%c0_12, %c0_13] : memref<1x64xf32, #tpu.memory_space<vmem>>, vector<1x64xf32>
      %14 = vector.broadcast %13 : vector<1x64xf32> to vector<256x64xf32>
      %15 = arith.addf %12, %14 : vector<256x64xf32>
      %c0_14 = arith.constant 0 : index
      %c0_15 = arith.constant 0 : index
      %16 = vector.load %arg6[%c0_14, %c0_15] : memref<256x64xbf16, #tpu.memory_space<vmem>>, vector<256x64xbf16>
      %17 = arith.extf %16 : vector<256x64xbf16> to vector<256x64xf32>
      %18 = arith.addf %15, %17 : vector<256x64xf32>
      %cst_16 = arith.constant 0.000000e+00 : f32
      %19 = vector.broadcast %cst_16 : f32 to vector<256x64xf32>
      %20 = arith.maximumf %18, %19 : vector<256x64xf32>
      %21 = arith.truncf %20 : vector<256x64xf32> to vector<256x64xbf16>
      %c0_17 = arith.constant 0 : index
      %c0_18 = arith.constant 0 : index
      %22 = vector.load %arg7[%c0_17, %c0_18] : memref<256x64xbf16, #tpu.memory_space<vmem>>, vector<256x64xbf16>
      tpu.vector_store %arg7[%c0_17, %c0_18], %21 {strides = array<i32>} : memref<256x64xbf16, #tpu.memory_space<vmem>>, vector<256x64xbf16>,
    } else {
    }
    return
  }
  func.func @transform_0(%arg0: i32, %arg1: i32, %arg2: i32) -> (i32, i32) {
    %c0_i32 = arith.constant 0 : i32
    return %arg0, %arg2 : i32, i32
  }
  func.func @transform_1(%arg0: i32, %arg1: i32, %arg2: i32) -> (i32, i32) {
    %c0_i32 = arith.constant 0 : i32
    return %arg2, %arg1 : i32, i32
  }
  func.func @transform_2(%arg0: i32, %arg1: i32, %arg2: i32) -> (i32, i32) {
    %c0_i32 = arith.constant 0 : i32
    %c0_i32_0 = arith.constant 0 : i32
    return %c0_i32, %arg1 : i32, i32
  }
  func.func @transform_3(%arg0: i32, %arg1: i32, %arg2: i32) -> (i32, i32) {
    %c0_i32 = arith.constant 0 : i32
    return %arg0, %arg1 : i32, i32
  }
  func.func @transform_4(%arg0: i32, %arg1: i32, %arg2: i32) -> (i32, i32) {
    %c0_i32 = arith.constant 0 : i32
    return %arg0, %arg1 : i32, i32
  }
}

module attributes {stable_mosaic.version = 11 : i64} {
  func.func @_mm_kernel(%arg0: i32, %arg1: i32, %arg2: i32, %arg3: memref<64x576xbf16, #tpu.memory_space<vmem>>, %arg4: memref<576x128xbf16, #tpu.memory_space<vmem>>, %arg5: memref<1x128xf32, #tpu.memory_space<vmem>>, %arg6: memref<64x128xbf16, #tpu.memory_space<vmem>>, %arg7: memref<64x128xf32, #tpu.memory_space<vmem>>) attributes {dimension_semantics = [#tpu.dimension_semantics<parallel>, #tpu.dimension_semantics<parallel>, #tpu.dimension_semantics<arbitrary>], iteration_bounds = array<i64: 1, 1, 1>, scalar_prefetch = 0 : i64, scratch_operands = 1 : i64, tpu.core_type = #tpu.core_type<tc>, window_params = [{transform_indices = @transform_0, window_bounds = array<i64: 64, 576>}, {transform_indices = @transform_1, window_bounds = array<i64: 576, 128>}, {transform_indices = @transform_2, window_bounds = array<i64: 1, 128>}, {transform_indices = @transform_3, window_bounds = array<i64: 64, 128>}]} {
    %c0_i32 = arith.constant 0 : i32
    %0 = arith.cmpi eq, %arg2, %c0_i32 : i32
    %1 = arith.extui %0 : i1 to i32
    %c0_i32_0 = arith.constant 0 : i32
    %2 = arith.cmpi ne, %1, %c0_i32_0 : i32
    scf.if %2 {
      %cst_10 = arith.constant 0.000000e+00 : f32
      %12 = vector.broadcast %cst_10 : f32 to vector<64x128xf32>
      %c0_11 = arith.constant 0 : index
      %c0_12 = arith.constant 0 : index
      %13 = vector.load %arg7[%c0_11, %c0_12] : memref<64x128xf32, #tpu.memory_space<vmem>>, vector<64x128xf32>
      tpu.vector_store %arg7[%c0_11, %c0_12], %12 {strides = array<i32>} : memref<64x128xf32, #tpu.memory_space<vmem>>, vector<64x128xf32>,
    } else {
    }
    %c0 = arith.constant 0 : index
    %c0_1 = arith.constant 0 : index
    %3 = vector.load %arg7[%c0, %c0_1] : memref<64x128xf32, #tpu.memory_space<vmem>>, vector<64x128xf32>
    %c0_2 = arith.constant 0 : index
    %c0_3 = arith.constant 0 : index
    %4 = vector.load %arg3[%c0_2, %c0_3] : memref<64x576xbf16, #tpu.memory_space<vmem>>, vector<64x576xbf16>
    %c0_4 = arith.constant 0 : index
    %c0_5 = arith.constant 0 : index
    %5 = vector.load %arg4[%c0_4, %c0_5] : memref<576x128xbf16, #tpu.memory_space<vmem>>, vector<576x128xbf16>
    %cst = arith.constant dense<0.000000e+00> : vector<64x128xf32>
    %6 = tpu.matmul %4, %5, %cst {dimension_numbers = #tpu.dot_dimension_numbers<[1], [0], [0], [1], [0, 0, 1, 1], [], []>} : vector<64x576xbf16>, vector<576x128xbf16>, vector<64x128xf32> -> vector<64x128xf32>
    %7 = arith.addf %3, %6 : vector<64x128xf32>
    %c0_6 = arith.constant 0 : index
    %c0_7 = arith.constant 0 : index
    %8 = vector.load %arg7[%c0_6, %c0_7] : memref<64x128xf32, #tpu.memory_space<vmem>>, vector<64x128xf32>
    tpu.vector_store %arg7[%c0_6, %c0_7], %7 {strides = array<i32>} : memref<64x128xf32, #tpu.memory_space<vmem>>, vector<64x128xf32>,
    %c0_i32_8 = arith.constant 0 : i32
    %9 = arith.cmpi eq, %arg2, %c0_i32_8 : i32
    %10 = arith.extui %9 : i1 to i32
    %c0_i32_9 = arith.constant 0 : i32
    %11 = arith.cmpi ne, %10, %c0_i32_9 : i32
    scf.if %11 {
      %c0_10 = arith.constant 0 : index
      %c0_11 = arith.constant 0 : index
      %12 = vector.load %arg7[%c0_10, %c0_11] : memref<64x128xf32, #tpu.memory_space<vmem>>, vector<64x128xf32>
      %c0_12 = arith.constant 0 : index
      %c0_13 = arith.constant 0 : index
      %13 = vector.load %arg5[%c0_12, %c0_13] : memref<1x128xf32, #tpu.memory_space<vmem>>, vector<1x128xf32>
      %14 = vector.broadcast %13 : vector<1x128xf32> to vector<64x128xf32>
      %15 = arith.addf %12, %14 : vector<64x128xf32>
      %cst_14 = arith.constant 0.000000e+00 : f32
      %16 = vector.broadcast %cst_14 : f32 to vector<64x128xf32>
      %17 = arith.maximumf %15, %16 : vector<64x128xf32>
      %18 = arith.truncf %17 : vector<64x128xf32> to vector<64x128xbf16>
      %c0_15 = arith.constant 0 : index
      %c0_16 = arith.constant 0 : index
      %19 = vector.load %arg6[%c0_15, %c0_16] : memref<64x128xbf16, #tpu.memory_space<vmem>>, vector<64x128xbf16>
      tpu.vector_store %arg6[%c0_15, %c0_16], %18 {strides = array<i32>} : memref<64x128xbf16, #tpu.memory_space<vmem>>, vector<64x128xbf16>,
    } else {
    }
    return
  }
  func.func @transform_0(%arg0: i32, %arg1: i32, %arg2: i32) -> (i32, i32) {
    %c0_i32 = arith.constant 0 : i32
    return %arg0, %arg2 : i32, i32
  }
  func.func @transform_1(%arg0: i32, %arg1: i32, %arg2: i32) -> (i32, i32) {
    %c0_i32 = arith.constant 0 : i32
    return %arg2, %arg1 : i32, i32
  }
  func.func @transform_2(%arg0: i32, %arg1: i32, %arg2: i32) -> (i32, i32) {
    %c0_i32 = arith.constant 0 : i32
    %c0_i32_0 = arith.constant 0 : i32
    return %c0_i32, %arg1 : i32, i32
  }
  func.func @transform_3(%arg0: i32, %arg1: i32, %arg2: i32) -> (i32, i32) {
    %c0_i32 = arith.constant 0 : i32
    return %arg0, %arg1 : i32, i32
  }
}

module attributes {stable_mosaic.version = 11 : i64} {
  func.func @_mm_kernel(%arg0: i32, %arg1: i32, %arg2: i32, %arg3: memref<64x64xbf16, #tpu.memory_space<vmem>>, %arg4: memref<64x128xbf16, #tpu.memory_space<vmem>>, %arg5: memref<1x128xf32, #tpu.memory_space<vmem>>, %arg6: memref<64x128xbf16, #tpu.memory_space<vmem>>, %arg7: memref<64x128xf32, #tpu.memory_space<vmem>>) attributes {dimension_semantics = [#tpu.dimension_semantics<parallel>, #tpu.dimension_semantics<parallel>, #tpu.dimension_semantics<arbitrary>], iteration_bounds = array<i64: 1, 1, 1>, scalar_prefetch = 0 : i64, scratch_operands = 1 : i64, tpu.core_type = #tpu.core_type<tc>, window_params = [{transform_indices = @transform_0, window_bounds = array<i64: 64, 64>}, {transform_indices = @transform_1, window_bounds = array<i64: 64, 128>}, {transform_indices = @transform_2, window_bounds = array<i64: 1, 128>}, {transform_indices = @transform_3, window_bounds = array<i64: 64, 128>}]} {
    %c0_i32 = arith.constant 0 : i32
    %0 = arith.cmpi eq, %arg2, %c0_i32 : i32
    %1 = arith.extui %0 : i1 to i32
    %c0_i32_0 = arith.constant 0 : i32
    %2 = arith.cmpi ne, %1, %c0_i32_0 : i32
    scf.if %2 {
      %cst_10 = arith.constant 0.000000e+00 : f32
      %12 = vector.broadcast %cst_10 : f32 to vector<64x128xf32>
      %c0_11 = arith.constant 0 : index
      %c0_12 = arith.constant 0 : index
      %13 = vector.load %arg7[%c0_11, %c0_12] : memref<64x128xf32, #tpu.memory_space<vmem>>, vector<64x128xf32>
      tpu.vector_store %arg7[%c0_11, %c0_12], %12 {strides = array<i32>} : memref<64x128xf32, #tpu.memory_space<vmem>>, vector<64x128xf32>,
    } else {
    }
    %c0 = arith.constant 0 : index
    %c0_1 = arith.constant 0 : index
    %3 = vector.load %arg7[%c0, %c0_1] : memref<64x128xf32, #tpu.memory_space<vmem>>, vector<64x128xf32>
    %c0_2 = arith.constant 0 : index
    %c0_3 = arith.constant 0 : index
    %4 = vector.load %arg3[%c0_2, %c0_3] : memref<64x64xbf16, #tpu.memory_space<vmem>>, vector<64x64xbf16>
    %c0_4 = arith.constant 0 : index
    %c0_5 = arith.constant 0 : index
    %5 = vector.load %arg4[%c0_4, %c0_5] : memref<64x128xbf16, #tpu.memory_space<vmem>>, vector<64x128xbf16>
    %cst = arith.constant dense<0.000000e+00> : vector<64x128xf32>
    %6 = tpu.matmul %4, %5, %cst {dimension_numbers = #tpu.dot_dimension_numbers<[1], [0], [0], [1], [0, 0, 1, 1], [], []>} : vector<64x64xbf16>, vector<64x128xbf16>, vector<64x128xf32> -> vector<64x128xf32>
    %7 = arith.addf %3, %6 : vector<64x128xf32>
    %c0_6 = arith.constant 0 : index
    %c0_7 = arith.constant 0 : index
    %8 = vector.load %arg7[%c0_6, %c0_7] : memref<64x128xf32, #tpu.memory_space<vmem>>, vector<64x128xf32>
    tpu.vector_store %arg7[%c0_6, %c0_7], %7 {strides = array<i32>} : memref<64x128xf32, #tpu.memory_space<vmem>>, vector<64x128xf32>,
    %c0_i32_8 = arith.constant 0 : i32
    %9 = arith.cmpi eq, %arg2, %c0_i32_8 : i32
    %10 = arith.extui %9 : i1 to i32
    %c0_i32_9 = arith.constant 0 : i32
    %11 = arith.cmpi ne, %10, %c0_i32_9 : i32
    scf.if %11 {
      %c0_10 = arith.constant 0 : index
      %c0_11 = arith.constant 0 : index
      %12 = vector.load %arg7[%c0_10, %c0_11] : memref<64x128xf32, #tpu.memory_space<vmem>>, vector<64x128xf32>
      %c0_12 = arith.constant 0 : index
      %c0_13 = arith.constant 0 : index
      %13 = vector.load %arg5[%c0_12, %c0_13] : memref<1x128xf32, #tpu.memory_space<vmem>>, vector<1x128xf32>
      %14 = vector.broadcast %13 : vector<1x128xf32> to vector<64x128xf32>
      %15 = arith.addf %12, %14 : vector<64x128xf32>
      %16 = arith.truncf %15 : vector<64x128xf32> to vector<64x128xbf16>
      %c0_14 = arith.constant 0 : index
      %c0_15 = arith.constant 0 : index
      %17 = vector.load %arg6[%c0_14, %c0_15] : memref<64x128xbf16, #tpu.memory_space<vmem>>, vector<64x128xbf16>
      tpu.vector_store %arg6[%c0_14, %c0_15], %16 {strides = array<i32>} : memref<64x128xbf16, #tpu.memory_space<vmem>>, vector<64x128xbf16>,
    } else {
    }
    return
  }
  func.func @transform_0(%arg0: i32, %arg1: i32, %arg2: i32) -> (i32, i32) {
    %c0_i32 = arith.constant 0 : i32
    return %arg0, %arg2 : i32, i32
  }
  func.func @transform_1(%arg0: i32, %arg1: i32, %arg2: i32) -> (i32, i32) {
    %c0_i32 = arith.constant 0 : i32
    return %arg2, %arg1 : i32, i32
  }
  func.func @transform_2(%arg0: i32, %arg1: i32, %arg2: i32) -> (i32, i32) {
    %c0_i32 = arith.constant 0 : i32
    %c0_i32_0 = arith.constant 0 : i32
    return %c0_i32, %arg1 : i32, i32
  }
  func.func @transform_3(%arg0: i32, %arg1: i32, %arg2: i32) -> (i32, i32) {
    %c0_i32 = arith.constant 0 : i32
    return %arg0, %arg1 : i32, i32
  }
}

module attributes {stable_mosaic.version = 11 : i64} {
  func.func @_mm_kernel(%arg0: i32, %arg1: i32, %arg2: i32, %arg3: memref<64x384xbf16, #tpu.memory_space<vmem>>, %arg4: memref<384x128xbf16, #tpu.memory_space<vmem>>, %arg5: memref<1x128xf32, #tpu.memory_space<vmem>>, %arg6: memref<64x128xbf16, #tpu.memory_space<vmem>>, %arg7: memref<64x128xbf16, #tpu.memory_space<vmem>>, %arg8: memref<64x128xf32, #tpu.memory_space<vmem>>) attributes {dimension_semantics = [#tpu.dimension_semantics<parallel>, #tpu.dimension_semantics<parallel>, #tpu.dimension_semantics<arbitrary>], iteration_bounds = array<i64: 1, 1, 3>, scalar_prefetch = 0 : i64, scratch_operands = 1 : i64, tpu.core_type = #tpu.core_type<tc>, window_params = [{transform_indices = @transform_0, window_bounds = array<i64: 64, 384>}, {transform_indices = @transform_1, window_bounds = array<i64: 384, 128>}, {transform_indices = @transform_2, window_bounds = array<i64: 1, 128>}, {transform_indices = @transform_3, window_bounds = array<i64: 64, 128>}, {transform_indices = @transform_4, window_bounds = array<i64: 64, 128>}]} {
    %c0_i32 = arith.constant 0 : i32
    %0 = arith.cmpi eq, %arg2, %c0_i32 : i32
    %1 = arith.extui %0 : i1 to i32
    %c0_i32_0 = arith.constant 0 : i32
    %2 = arith.cmpi ne, %1, %c0_i32_0 : i32
    scf.if %2 {
      %cst_9 = arith.constant 0.000000e+00 : f32
      %12 = vector.broadcast %cst_9 : f32 to vector<64x128xf32>
      %c0_10 = arith.constant 0 : index
      %c0_11 = arith.constant 0 : index
      %13 = vector.load %arg8[%c0_10, %c0_11] : memref<64x128xf32, #tpu.memory_space<vmem>>, vector<64x128xf32>
      tpu.vector_store %arg8[%c0_10, %c0_11], %12 {strides = array<i32>} : memref<64x128xf32, #tpu.memory_space<vmem>>, vector<64x128xf32>,
    } else {
    }
    %c0 = arith.constant 0 : index
    %c0_1 = arith.constant 0 : index
    %3 = vector.load %arg8[%c0, %c0_1] : memref<64x128xf32, #tpu.memory_space<vmem>>, vector<64x128xf32>
    %c0_2 = arith.constant 0 : index
    %c0_3 = arith.constant 0 : index
    %4 = vector.load %arg3[%c0_2, %c0_3] : memref<64x384xbf16, #tpu.memory_space<vmem>>, vector<64x384xbf16>
    %c0_4 = arith.constant 0 : index
    %c0_5 = arith.constant 0 : index
    %5 = vector.load %arg4[%c0_4, %c0_5] : memref<384x128xbf16, #tpu.memory_space<vmem>>, vector<384x128xbf16>
    %cst = arith.constant dense<0.000000e+00> : vector<64x128xf32>
    %6 = tpu.matmul %4, %5, %cst {dimension_numbers = #tpu.dot_dimension_numbers<[1], [0], [0], [1], [0, 0, 1, 1], [], []>} : vector<64x384xbf16>, vector<384x128xbf16>, vector<64x128xf32> -> vector<64x128xf32>
    %7 = arith.addf %3, %6 : vector<64x128xf32>
    %c0_6 = arith.constant 0 : index
    %c0_7 = arith.constant 0 : index
    %8 = vector.load %arg8[%c0_6, %c0_7] : memref<64x128xf32, #tpu.memory_space<vmem>>, vector<64x128xf32>
    tpu.vector_store %arg8[%c0_6, %c0_7], %7 {strides = array<i32>} : memref<64x128xf32, #tpu.memory_space<vmem>>, vector<64x128xf32>,
    %c2_i32 = arith.constant 2 : i32
    %9 = arith.cmpi eq, %arg2, %c2_i32 : i32
    %10 = arith.extui %9 : i1 to i32
    %c0_i32_8 = arith.constant 0 : i32
    %11 = arith.cmpi ne, %10, %c0_i32_8 : i32
    scf.if %11 {
      %c0_9 = arith.constant 0 : index
      %c0_10 = arith.constant 0 : index
      %12 = vector.load %arg8[%c0_9, %c0_10] : memref<64x128xf32, #tpu.memory_space<vmem>>, vector<64x128xf32>
      %c0_11 = arith.constant 0 : index
      %c0_12 = arith.constant 0 : index
      %13 = vector.load %arg5[%c0_11, %c0_12] : memref<1x128xf32, #tpu.memory_space<vmem>>, vector<1x128xf32>
      %14 = vector.broadcast %13 : vector<1x128xf32> to vector<64x128xf32>
      %15 = arith.addf %12, %14 : vector<64x128xf32>
      %c0_13 = arith.constant 0 : index
      %c0_14 = arith.constant 0 : index
      %16 = vector.load %arg6[%c0_13, %c0_14] : memref<64x128xbf16, #tpu.memory_space<vmem>>, vector<64x128xbf16>
      %17 = arith.extf %16 : vector<64x128xbf16> to vector<64x128xf32>
      %18 = arith.addf %15, %17 : vector<64x128xf32>
      %cst_15 = arith.constant 0.000000e+00 : f32
      %19 = vector.broadcast %cst_15 : f32 to vector<64x128xf32>
      %20 = arith.maximumf %18, %19 : vector<64x128xf32>
      %21 = arith.truncf %20 : vector<64x128xf32> to vector<64x128xbf16>
      %c0_16 = arith.constant 0 : index
      %c0_17 = arith.constant 0 : index
      %22 = vector.load %arg7[%c0_16, %c0_17] : memref<64x128xbf16, #tpu.memory_space<vmem>>, vector<64x128xbf16>
      tpu.vector_store %arg7[%c0_16, %c0_17], %21 {strides = array<i32>} : memref<64x128xbf16, #tpu.memory_space<vmem>>, vector<64x128xbf16>,
    } else {
    }
    return
  }
  func.func @transform_0(%arg0: i32, %arg1: i32, %arg2: i32) -> (i32, i32) {
    %c0_i32 = arith.constant 0 : i32
    return %arg0, %arg2 : i32, i32
  }
  func.func @transform_1(%arg0: i32, %arg1: i32, %arg2: i32) -> (i32, i32) {
    %c0_i32 = arith.constant 0 : i32
    return %arg2, %arg1 : i32, i32
  }
  func.func @transform_2(%arg0: i32, %arg1: i32, %arg2: i32) -> (i32, i32) {
    %c0_i32 = arith.constant 0 : i32
    %c0_i32_0 = arith.constant 0 : i32
    return %c0_i32, %arg1 : i32, i32
  }
  func.func @transform_3(%arg0: i32, %arg1: i32, %arg2: i32) -> (i32, i32) {
    %c0_i32 = arith.constant 0 : i32
    return %arg0, %arg1 : i32, i32
  }
  func.func @transform_4(%arg0: i32, %arg1: i32, %arg2: i32) -> (i32, i32) {
    %c0_i32 = arith.constant 0 : i32
    return %arg0, %arg1 : i32, i32
  }
}

module attributes {stable_mosaic.version = 11 : i64} {
  func.func @_mm_kernel(%arg0: i32, %arg1: i32, %arg2: i32, %arg3: memref<64x384xbf16, #tpu.memory_space<vmem>>, %arg4: memref<384x128xbf16, #tpu.memory_space<vmem>>, %arg5: memref<1x128xf32, #tpu.memory_space<vmem>>, %arg6: memref<64x128xbf16, #tpu.memory_space<vmem>>, %arg7: memref<64x128xf32, #tpu.memory_space<vmem>>) attributes {dimension_semantics = [#tpu.dimension_semantics<parallel>, #tpu.dimension_semantics<parallel>, #tpu.dimension_semantics<arbitrary>], iteration_bounds = array<i64: 1, 1, 3>, scalar_prefetch = 0 : i64, scratch_operands = 1 : i64, tpu.core_type = #tpu.core_type<tc>, window_params = [{transform_indices = @transform_0, window_bounds = array<i64: 64, 384>}, {transform_indices = @transform_1, window_bounds = array<i64: 384, 128>}, {transform_indices = @transform_2, window_bounds = array<i64: 1, 128>}, {transform_indices = @transform_3, window_bounds = array<i64: 64, 128>}]} {
    %c0_i32 = arith.constant 0 : i32
    %0 = arith.cmpi eq, %arg2, %c0_i32 : i32
    %1 = arith.extui %0 : i1 to i32
    %c0_i32_0 = arith.constant 0 : i32
    %2 = arith.cmpi ne, %1, %c0_i32_0 : i32
    scf.if %2 {
      %cst_9 = arith.constant 0.000000e+00 : f32
      %12 = vector.broadcast %cst_9 : f32 to vector<64x128xf32>
      %c0_10 = arith.constant 0 : index
      %c0_11 = arith.constant 0 : index
      %13 = vector.load %arg7[%c0_10, %c0_11] : memref<64x128xf32, #tpu.memory_space<vmem>>, vector<64x128xf32>
      tpu.vector_store %arg7[%c0_10, %c0_11], %12 {strides = array<i32>} : memref<64x128xf32, #tpu.memory_space<vmem>>, vector<64x128xf32>,
    } else {
    }
    %c0 = arith.constant 0 : index
    %c0_1 = arith.constant 0 : index
    %3 = vector.load %arg7[%c0, %c0_1] : memref<64x128xf32, #tpu.memory_space<vmem>>, vector<64x128xf32>
    %c0_2 = arith.constant 0 : index
    %c0_3 = arith.constant 0 : index
    %4 = vector.load %arg3[%c0_2, %c0_3] : memref<64x384xbf16, #tpu.memory_space<vmem>>, vector<64x384xbf16>
    %c0_4 = arith.constant 0 : index
    %c0_5 = arith.constant 0 : index
    %5 = vector.load %arg4[%c0_4, %c0_5] : memref<384x128xbf16, #tpu.memory_space<vmem>>, vector<384x128xbf16>
    %cst = arith.constant dense<0.000000e+00> : vector<64x128xf32>
    %6 = tpu.matmul %4, %5, %cst {dimension_numbers = #tpu.dot_dimension_numbers<[1], [0], [0], [1], [0, 0, 1, 1], [], []>} : vector<64x384xbf16>, vector<384x128xbf16>, vector<64x128xf32> -> vector<64x128xf32>
    %7 = arith.addf %3, %6 : vector<64x128xf32>
    %c0_6 = arith.constant 0 : index
    %c0_7 = arith.constant 0 : index
    %8 = vector.load %arg7[%c0_6, %c0_7] : memref<64x128xf32, #tpu.memory_space<vmem>>, vector<64x128xf32>
    tpu.vector_store %arg7[%c0_6, %c0_7], %7 {strides = array<i32>} : memref<64x128xf32, #tpu.memory_space<vmem>>, vector<64x128xf32>,
    %c2_i32 = arith.constant 2 : i32
    %9 = arith.cmpi eq, %arg2, %c2_i32 : i32
    %10 = arith.extui %9 : i1 to i32
    %c0_i32_8 = arith.constant 0 : i32
    %11 = arith.cmpi ne, %10, %c0_i32_8 : i32
    scf.if %11 {
      %c0_9 = arith.constant 0 : index
      %c0_10 = arith.constant 0 : index
      %12 = vector.load %arg7[%c0_9, %c0_10] : memref<64x128xf32, #tpu.memory_space<vmem>>, vector<64x128xf32>
      %c0_11 = arith.constant 0 : index
      %c0_12 = arith.constant 0 : index
      %13 = vector.load %arg5[%c0_11, %c0_12] : memref<1x128xf32, #tpu.memory_space<vmem>>, vector<1x128xf32>
      %14 = vector.broadcast %13 : vector<1x128xf32> to vector<64x128xf32>
      %15 = arith.addf %12, %14 : vector<64x128xf32>
      %cst_13 = arith.constant 0.000000e+00 : f32
      %16 = vector.broadcast %cst_13 : f32 to vector<64x128xf32>
      %17 = arith.maximumf %15, %16 : vector<64x128xf32>
      %18 = arith.truncf %17 : vector<64x128xf32> to vector<64x128xbf16>
      %c0_14 = arith.constant 0 : index
      %c0_15 = arith.constant 0 : index
      %19 = vector.load %arg6[%c0_14, %c0_15] : memref<64x128xbf16, #tpu.memory_space<vmem>>, vector<64x128xbf16>
      tpu.vector_store %arg6[%c0_14, %c0_15], %18 {strides = array<i32>} : memref<64x128xbf16, #tpu.memory_space<vmem>>, vector<64x128xbf16>,
    } else {
    }
    return
  }
  func.func @transform_0(%arg0: i32, %arg1: i32, %arg2: i32) -> (i32, i32) {
    %c0_i32 = arith.constant 0 : i32
    return %arg0, %arg2 : i32, i32
  }
  func.func @transform_1(%arg0: i32, %arg1: i32, %arg2: i32) -> (i32, i32) {
    %c0_i32 = arith.constant 0 : i32
    return %arg2, %arg1 : i32, i32
  }
  func.func @transform_2(%arg0: i32, %arg1: i32, %arg2: i32) -> (i32, i32) {
    %c0_i32 = arith.constant 0 : i32
    %c0_i32_0 = arith.constant 0 : i32
    return %c0_i32, %arg1 : i32, i32
  }
  func.func @transform_3(%arg0: i32, %arg1: i32, %arg2: i32) -> (i32, i32) {
    %c0_i32 = arith.constant 0 : i32
    return %arg0, %arg1 : i32, i32
  }
}

module attributes {stable_mosaic.version = 11 : i64} {
  func.func @_mm_kernel(%arg0: i32, %arg1: i32, %arg2: i32, %arg3: memref<16x384xbf16, #tpu.memory_space<vmem>>, %arg4: memref<384x256xbf16, #tpu.memory_space<vmem>>, %arg5: memref<1x256xf32, #tpu.memory_space<vmem>>, %arg6: memref<16x256xbf16, #tpu.memory_space<vmem>>, %arg7: memref<16x256xf32, #tpu.memory_space<vmem>>) attributes {dimension_semantics = [#tpu.dimension_semantics<parallel>, #tpu.dimension_semantics<parallel>, #tpu.dimension_semantics<arbitrary>], iteration_bounds = array<i64: 1, 1, 3>, scalar_prefetch = 0 : i64, scratch_operands = 1 : i64, tpu.core_type = #tpu.core_type<tc>, window_params = [{transform_indices = @transform_0, window_bounds = array<i64: 16, 384>}, {transform_indices = @transform_1, window_bounds = array<i64: 384, 256>}, {transform_indices = @transform_2, window_bounds = array<i64: 1, 256>}, {transform_indices = @transform_3, window_bounds = array<i64: 16, 256>}]} {
    %c0_i32 = arith.constant 0 : i32
    %0 = arith.cmpi eq, %arg2, %c0_i32 : i32
    %1 = arith.extui %0 : i1 to i32
    %c0_i32_0 = arith.constant 0 : i32
    %2 = arith.cmpi ne, %1, %c0_i32_0 : i32
    scf.if %2 {
      %cst_9 = arith.constant 0.000000e+00 : f32
      %12 = vector.broadcast %cst_9 : f32 to vector<16x256xf32>
      %c0_10 = arith.constant 0 : index
      %c0_11 = arith.constant 0 : index
      %13 = vector.load %arg7[%c0_10, %c0_11] : memref<16x256xf32, #tpu.memory_space<vmem>>, vector<16x256xf32>
      tpu.vector_store %arg7[%c0_10, %c0_11], %12 {strides = array<i32>} : memref<16x256xf32, #tpu.memory_space<vmem>>, vector<16x256xf32>,
    } else {
    }
    %c0 = arith.constant 0 : index
    %c0_1 = arith.constant 0 : index
    %3 = vector.load %arg7[%c0, %c0_1] : memref<16x256xf32, #tpu.memory_space<vmem>>, vector<16x256xf32>
    %c0_2 = arith.constant 0 : index
    %c0_3 = arith.constant 0 : index
    %4 = vector.load %arg3[%c0_2, %c0_3] : memref<16x384xbf16, #tpu.memory_space<vmem>>, vector<16x384xbf16>
    %c0_4 = arith.constant 0 : index
    %c0_5 = arith.constant 0 : index
    %5 = vector.load %arg4[%c0_4, %c0_5] : memref<384x256xbf16, #tpu.memory_space<vmem>>, vector<384x256xbf16>
    %cst = arith.constant dense<0.000000e+00> : vector<16x256xf32>
    %6 = tpu.matmul %4, %5, %cst {dimension_numbers = #tpu.dot_dimension_numbers<[1], [0], [0], [1], [0, 0, 1, 1], [], []>} : vector<16x384xbf16>, vector<384x256xbf16>, vector<16x256xf32> -> vector<16x256xf32>
    %7 = arith.addf %3, %6 : vector<16x256xf32>
    %c0_6 = arith.constant 0 : index
    %c0_7 = arith.constant 0 : index
    %8 = vector.load %arg7[%c0_6, %c0_7] : memref<16x256xf32, #tpu.memory_space<vmem>>, vector<16x256xf32>
    tpu.vector_store %arg7[%c0_6, %c0_7], %7 {strides = array<i32>} : memref<16x256xf32, #tpu.memory_space<vmem>>, vector<16x256xf32>,
    %c2_i32 = arith.constant 2 : i32
    %9 = arith.cmpi eq, %arg2, %c2_i32 : i32
    %10 = arith.extui %9 : i1 to i32
    %c0_i32_8 = arith.constant 0 : i32
    %11 = arith.cmpi ne, %10, %c0_i32_8 : i32
    scf.if %11 {
      %c0_9 = arith.constant 0 : index
      %c0_10 = arith.constant 0 : index
      %12 = vector.load %arg7[%c0_9, %c0_10] : memref<16x256xf32, #tpu.memory_space<vmem>>, vector<16x256xf32>
      %c0_11 = arith.constant 0 : index
      %c0_12 = arith.constant 0 : index
      %13 = vector.load %arg5[%c0_11, %c0_12] : memref<1x256xf32, #tpu.memory_space<vmem>>, vector<1x256xf32>
      %14 = vector.broadcast %13 : vector<1x256xf32> to vector<16x256xf32>
      %15 = arith.addf %12, %14 : vector<16x256xf32>
      %cst_13 = arith.constant 0.000000e+00 : f32
      %16 = vector.broadcast %cst_13 : f32 to vector<16x256xf32>
      %17 = arith.maximumf %15, %16 : vector<16x256xf32>
      %18 = arith.truncf %17 : vector<16x256xf32> to vector<16x256xbf16>
      %c0_14 = arith.constant 0 : index
      %c0_15 = arith.constant 0 : index
      %19 = vector.load %arg6[%c0_14, %c0_15] : memref<16x256xbf16, #tpu.memory_space<vmem>>, vector<16x256xbf16>
      tpu.vector_store %arg6[%c0_14, %c0_15], %18 {strides = array<i32>} : memref<16x256xbf16, #tpu.memory_space<vmem>>, vector<16x256xbf16>,
    } else {
    }
    return
  }
  func.func @transform_0(%arg0: i32, %arg1: i32, %arg2: i32) -> (i32, i32) {
    %c0_i32 = arith.constant 0 : i32
    return %arg0, %arg2 : i32, i32
  }
  func.func @transform_1(%arg0: i32, %arg1: i32, %arg2: i32) -> (i32, i32) {
    %c0_i32 = arith.constant 0 : i32
    return %arg2, %arg1 : i32, i32
  }
  func.func @transform_2(%arg0: i32, %arg1: i32, %arg2: i32) -> (i32, i32) {
    %c0_i32 = arith.constant 0 : i32
    %c0_i32_0 = arith.constant 0 : i32
    return %c0_i32, %arg1 : i32, i32
  }
  func.func @transform_3(%arg0: i32, %arg1: i32, %arg2: i32) -> (i32, i32) {
    %c0_i32 = arith.constant 0 : i32
    return %arg0, %arg1 : i32, i32
  }
}

module attributes {stable_mosaic.version = 11 : i64} {
  func.func @_mm_kernel(%arg0: i32, %arg1: i32, %arg2: i32, %arg3: memref<16x128xbf16, #tpu.memory_space<vmem>>, %arg4: memref<128x256xbf16, #tpu.memory_space<vmem>>, %arg5: memref<1x256xf32, #tpu.memory_space<vmem>>, %arg6: memref<16x256xbf16, #tpu.memory_space<vmem>>, %arg7: memref<16x256xf32, #tpu.memory_space<vmem>>) attributes {dimension_semantics = [#tpu.dimension_semantics<parallel>, #tpu.dimension_semantics<parallel>, #tpu.dimension_semantics<arbitrary>], iteration_bounds = array<i64: 1, 1, 1>, scalar_prefetch = 0 : i64, scratch_operands = 1 : i64, tpu.core_type = #tpu.core_type<tc>, window_params = [{transform_indices = @transform_0, window_bounds = array<i64: 16, 128>}, {transform_indices = @transform_1, window_bounds = array<i64: 128, 256>}, {transform_indices = @transform_2, window_bounds = array<i64: 1, 256>}, {transform_indices = @transform_3, window_bounds = array<i64: 16, 256>}]} {
    %c0_i32 = arith.constant 0 : i32
    %0 = arith.cmpi eq, %arg2, %c0_i32 : i32
    %1 = arith.extui %0 : i1 to i32
    %c0_i32_0 = arith.constant 0 : i32
    %2 = arith.cmpi ne, %1, %c0_i32_0 : i32
    scf.if %2 {
      %cst_10 = arith.constant 0.000000e+00 : f32
      %12 = vector.broadcast %cst_10 : f32 to vector<16x256xf32>
      %c0_11 = arith.constant 0 : index
      %c0_12 = arith.constant 0 : index
      %13 = vector.load %arg7[%c0_11, %c0_12] : memref<16x256xf32, #tpu.memory_space<vmem>>, vector<16x256xf32>
      tpu.vector_store %arg7[%c0_11, %c0_12], %12 {strides = array<i32>} : memref<16x256xf32, #tpu.memory_space<vmem>>, vector<16x256xf32>,
    } else {
    }
    %c0 = arith.constant 0 : index
    %c0_1 = arith.constant 0 : index
    %3 = vector.load %arg7[%c0, %c0_1] : memref<16x256xf32, #tpu.memory_space<vmem>>, vector<16x256xf32>
    %c0_2 = arith.constant 0 : index
    %c0_3 = arith.constant 0 : index
    %4 = vector.load %arg3[%c0_2, %c0_3] : memref<16x128xbf16, #tpu.memory_space<vmem>>, vector<16x128xbf16>
    %c0_4 = arith.constant 0 : index
    %c0_5 = arith.constant 0 : index
    %5 = vector.load %arg4[%c0_4, %c0_5] : memref<128x256xbf16, #tpu.memory_space<vmem>>, vector<128x256xbf16>
    %cst = arith.constant dense<0.000000e+00> : vector<16x256xf32>
    %6 = tpu.matmul %4, %5, %cst {dimension_numbers = #tpu.dot_dimension_numbers<[1], [0], [0], [1], [0, 0, 1, 1], [], []>} : vector<16x128xbf16>, vector<128x256xbf16>, vector<16x256xf32> -> vector<16x256xf32>
    %7 = arith.addf %3, %6 : vector<16x256xf32>
    %c0_6 = arith.constant 0 : index
    %c0_7 = arith.constant 0 : index
    %8 = vector.load %arg7[%c0_6, %c0_7] : memref<16x256xf32, #tpu.memory_space<vmem>>, vector<16x256xf32>
    tpu.vector_store %arg7[%c0_6, %c0_7], %7 {strides = array<i32>} : memref<16x256xf32, #tpu.memory_space<vmem>>, vector<16x256xf32>,
    %c0_i32_8 = arith.constant 0 : i32
    %9 = arith.cmpi eq, %arg2, %c0_i32_8 : i32
    %10 = arith.extui %9 : i1 to i32
    %c0_i32_9 = arith.constant 0 : i32
    %11 = arith.cmpi ne, %10, %c0_i32_9 : i32
    scf.if %11 {
      %c0_10 = arith.constant 0 : index
      %c0_11 = arith.constant 0 : index
      %12 = vector.load %arg7[%c0_10, %c0_11] : memref<16x256xf32, #tpu.memory_space<vmem>>, vector<16x256xf32>
      %c0_12 = arith.constant 0 : index
      %c0_13 = arith.constant 0 : index
      %13 = vector.load %arg5[%c0_12, %c0_13] : memref<1x256xf32, #tpu.memory_space<vmem>>, vector<1x256xf32>
      %14 = vector.broadcast %13 : vector<1x256xf32> to vector<16x256xf32>
      %15 = arith.addf %12, %14 : vector<16x256xf32>
      %16 = arith.truncf %15 : vector<16x256xf32> to vector<16x256xbf16>
      %c0_14 = arith.constant 0 : index
      %c0_15 = arith.constant 0 : index
      %17 = vector.load %arg6[%c0_14, %c0_15] : memref<16x256xbf16, #tpu.memory_space<vmem>>, vector<16x256xbf16>
      tpu.vector_store %arg6[%c0_14, %c0_15], %16 {strides = array<i32>} : memref<16x256xbf16, #tpu.memory_space<vmem>>, vector<16x256xbf16>,
    } else {
    }
    return
  }
  func.func @transform_0(%arg0: i32, %arg1: i32, %arg2: i32) -> (i32, i32) {
    %c0_i32 = arith.constant 0 : i32
    return %arg0, %arg2 : i32, i32
  }
  func.func @transform_1(%arg0: i32, %arg1: i32, %arg2: i32) -> (i32, i32) {
    %c0_i32 = arith.constant 0 : i32
    return %arg2, %arg1 : i32, i32
  }
  func.func @transform_2(%arg0: i32, %arg1: i32, %arg2: i32) -> (i32, i32) {
    %c0_i32 = arith.constant 0 : i32
    %c0_i32_0 = arith.constant 0 : i32
    return %c0_i32, %arg1 : i32, i32
  }
  func.func @transform_3(%arg0: i32, %arg1: i32, %arg2: i32) -> (i32, i32) {
    %c0_i32 = arith.constant 0 : i32
    return %arg0, %arg1 : i32, i32
  }
}

module attributes {stable_mosaic.version = 11 : i64} {
  func.func @_mm_kernel(%arg0: i32, %arg1: i32, %arg2: i32, %arg3: memref<16x384xbf16, #tpu.memory_space<vmem>>, %arg4: memref<384x256xbf16, #tpu.memory_space<vmem>>, %arg5: memref<1x256xf32, #tpu.memory_space<vmem>>, %arg6: memref<16x256xbf16, #tpu.memory_space<vmem>>, %arg7: memref<16x256xbf16, #tpu.memory_space<vmem>>, %arg8: memref<16x256xf32, #tpu.memory_space<vmem>>) attributes {dimension_semantics = [#tpu.dimension_semantics<parallel>, #tpu.dimension_semantics<parallel>, #tpu.dimension_semantics<arbitrary>], iteration_bounds = array<i64: 1, 1, 6>, scalar_prefetch = 0 : i64, scratch_operands = 1 : i64, tpu.core_type = #tpu.core_type<tc>, window_params = [{transform_indices = @transform_0, window_bounds = array<i64: 16, 384>}, {transform_indices = @transform_1, window_bounds = array<i64: 384, 256>}, {transform_indices = @transform_2, window_bounds = array<i64: 1, 256>}, {transform_indices = @transform_3, window_bounds = array<i64: 16, 256>}, {transform_indices = @transform_4, window_bounds = array<i64: 16, 256>}]} {
    %c0_i32 = arith.constant 0 : i32
    %0 = arith.cmpi eq, %arg2, %c0_i32 : i32
    %1 = arith.extui %0 : i1 to i32
    %c0_i32_0 = arith.constant 0 : i32
    %2 = arith.cmpi ne, %1, %c0_i32_0 : i32
    scf.if %2 {
      %cst_9 = arith.constant 0.000000e+00 : f32
      %12 = vector.broadcast %cst_9 : f32 to vector<16x256xf32>
      %c0_10 = arith.constant 0 : index
      %c0_11 = arith.constant 0 : index
      %13 = vector.load %arg8[%c0_10, %c0_11] : memref<16x256xf32, #tpu.memory_space<vmem>>, vector<16x256xf32>
      tpu.vector_store %arg8[%c0_10, %c0_11], %12 {strides = array<i32>} : memref<16x256xf32, #tpu.memory_space<vmem>>, vector<16x256xf32>,
    } else {
    }
    %c0 = arith.constant 0 : index
    %c0_1 = arith.constant 0 : index
    %3 = vector.load %arg8[%c0, %c0_1] : memref<16x256xf32, #tpu.memory_space<vmem>>, vector<16x256xf32>
    %c0_2 = arith.constant 0 : index
    %c0_3 = arith.constant 0 : index
    %4 = vector.load %arg3[%c0_2, %c0_3] : memref<16x384xbf16, #tpu.memory_space<vmem>>, vector<16x384xbf16>
    %c0_4 = arith.constant 0 : index
    %c0_5 = arith.constant 0 : index
    %5 = vector.load %arg4[%c0_4, %c0_5] : memref<384x256xbf16, #tpu.memory_space<vmem>>, vector<384x256xbf16>
    %cst = arith.constant dense<0.000000e+00> : vector<16x256xf32>
    %6 = tpu.matmul %4, %5, %cst {dimension_numbers = #tpu.dot_dimension_numbers<[1], [0], [0], [1], [0, 0, 1, 1], [], []>} : vector<16x384xbf16>, vector<384x256xbf16>, vector<16x256xf32> -> vector<16x256xf32>
    %7 = arith.addf %3, %6 : vector<16x256xf32>
    %c0_6 = arith.constant 0 : index
    %c0_7 = arith.constant 0 : index
    %8 = vector.load %arg8[%c0_6, %c0_7] : memref<16x256xf32, #tpu.memory_space<vmem>>, vector<16x256xf32>
    tpu.vector_store %arg8[%c0_6, %c0_7], %7 {strides = array<i32>} : memref<16x256xf32, #tpu.memory_space<vmem>>, vector<16x256xf32>,
    %c5_i32 = arith.constant 5 : i32
    %9 = arith.cmpi eq, %arg2, %c5_i32 : i32
    %10 = arith.extui %9 : i1 to i32
    %c0_i32_8 = arith.constant 0 : i32
    %11 = arith.cmpi ne, %10, %c0_i32_8 : i32
    scf.if %11 {
      %c0_9 = arith.constant 0 : index
      %c0_10 = arith.constant 0 : index
      %12 = vector.load %arg8[%c0_9, %c0_10] : memref<16x256xf32, #tpu.memory_space<vmem>>, vector<16x256xf32>
      %c0_11 = arith.constant 0 : index
      %c0_12 = arith.constant 0 : index
      %13 = vector.load %arg5[%c0_11, %c0_12] : memref<1x256xf32, #tpu.memory_space<vmem>>, vector<1x256xf32>
      %14 = vector.broadcast %13 : vector<1x256xf32> to vector<16x256xf32>
      %15 = arith.addf %12, %14 : vector<16x256xf32>
      %c0_13 = arith.constant 0 : index
      %c0_14 = arith.constant 0 : index
      %16 = vector.load %arg6[%c0_13, %c0_14] : memref<16x256xbf16, #tpu.memory_space<vmem>>, vector<16x256xbf16>
      %17 = arith.extf %16 : vector<16x256xbf16> to vector<16x256xf32>
      %18 = arith.addf %15, %17 : vector<16x256xf32>
      %cst_15 = arith.constant 0.000000e+00 : f32
      %19 = vector.broadcast %cst_15 : f32 to vector<16x256xf32>
      %20 = arith.maximumf %18, %19 : vector<16x256xf32>
      %21 = arith.truncf %20 : vector<16x256xf32> to vector<16x256xbf16>
      %c0_16 = arith.constant 0 : index
      %c0_17 = arith.constant 0 : index
      %22 = vector.load %arg7[%c0_16, %c0_17] : memref<16x256xbf16, #tpu.memory_space<vmem>>, vector<16x256xbf16>
      tpu.vector_store %arg7[%c0_16, %c0_17], %21 {strides = array<i32>} : memref<16x256xbf16, #tpu.memory_space<vmem>>, vector<16x256xbf16>,
    } else {
    }
    return
  }
  func.func @transform_0(%arg0: i32, %arg1: i32, %arg2: i32) -> (i32, i32) {
    %c0_i32 = arith.constant 0 : i32
    return %arg0, %arg2 : i32, i32
  }
  func.func @transform_1(%arg0: i32, %arg1: i32, %arg2: i32) -> (i32, i32) {
    %c0_i32 = arith.constant 0 : i32
    return %arg2, %arg1 : i32, i32
  }
  func.func @transform_2(%arg0: i32, %arg1: i32, %arg2: i32) -> (i32, i32) {
    %c0_i32 = arith.constant 0 : i32
    %c0_i32_0 = arith.constant 0 : i32
    return %c0_i32, %arg1 : i32, i32
  }
  func.func @transform_3(%arg0: i32, %arg1: i32, %arg2: i32) -> (i32, i32) {
    %c0_i32 = arith.constant 0 : i32
    return %arg0, %arg1 : i32, i32
  }
  func.func @transform_4(%arg0: i32, %arg1: i32, %arg2: i32) -> (i32, i32) {
    %c0_i32 = arith.constant 0 : i32
    return %arg0, %arg1 : i32, i32
  }
}

module attributes {stable_mosaic.version = 11 : i64} {
  func.func @_mm_kernel(%arg0: i32, %arg1: i32, %arg2: i32, %arg3: memref<16x384xbf16, #tpu.memory_space<vmem>>, %arg4: memref<384x256xbf16, #tpu.memory_space<vmem>>, %arg5: memref<1x256xf32, #tpu.memory_space<vmem>>, %arg6: memref<16x256xbf16, #tpu.memory_space<vmem>>, %arg7: memref<16x256xf32, #tpu.memory_space<vmem>>) attributes {dimension_semantics = [#tpu.dimension_semantics<parallel>, #tpu.dimension_semantics<parallel>, #tpu.dimension_semantics<arbitrary>], iteration_bounds = array<i64: 1, 1, 6>, scalar_prefetch = 0 : i64, scratch_operands = 1 : i64, tpu.core_type = #tpu.core_type<tc>, window_params = [{transform_indices = @transform_0, window_bounds = array<i64: 16, 384>}, {transform_indices = @transform_1, window_bounds = array<i64: 384, 256>}, {transform_indices = @transform_2, window_bounds = array<i64: 1, 256>}, {transform_indices = @transform_3, window_bounds = array<i64: 16, 256>}]} {
    %c0_i32 = arith.constant 0 : i32
    %0 = arith.cmpi eq, %arg2, %c0_i32 : i32
    %1 = arith.extui %0 : i1 to i32
    %c0_i32_0 = arith.constant 0 : i32
    %2 = arith.cmpi ne, %1, %c0_i32_0 : i32
    scf.if %2 {
      %cst_9 = arith.constant 0.000000e+00 : f32
      %12 = vector.broadcast %cst_9 : f32 to vector<16x256xf32>
      %c0_10 = arith.constant 0 : index
      %c0_11 = arith.constant 0 : index
      %13 = vector.load %arg7[%c0_10, %c0_11] : memref<16x256xf32, #tpu.memory_space<vmem>>, vector<16x256xf32>
      tpu.vector_store %arg7[%c0_10, %c0_11], %12 {strides = array<i32>} : memref<16x256xf32, #tpu.memory_space<vmem>>, vector<16x256xf32>,
    } else {
    }
    %c0 = arith.constant 0 : index
    %c0_1 = arith.constant 0 : index
    %3 = vector.load %arg7[%c0, %c0_1] : memref<16x256xf32, #tpu.memory_space<vmem>>, vector<16x256xf32>
    %c0_2 = arith.constant 0 : index
    %c0_3 = arith.constant 0 : index
    %4 = vector.load %arg3[%c0_2, %c0_3] : memref<16x384xbf16, #tpu.memory_space<vmem>>, vector<16x384xbf16>
    %c0_4 = arith.constant 0 : index
    %c0_5 = arith.constant 0 : index
    %5 = vector.load %arg4[%c0_4, %c0_5] : memref<384x256xbf16, #tpu.memory_space<vmem>>, vector<384x256xbf16>
    %cst = arith.constant dense<0.000000e+00> : vector<16x256xf32>
    %6 = tpu.matmul %4, %5, %cst {dimension_numbers = #tpu.dot_dimension_numbers<[1], [0], [0], [1], [0, 0, 1, 1], [], []>} : vector<16x384xbf16>, vector<384x256xbf16>, vector<16x256xf32> -> vector<16x256xf32>
    %7 = arith.addf %3, %6 : vector<16x256xf32>
    %c0_6 = arith.constant 0 : index
    %c0_7 = arith.constant 0 : index
    %8 = vector.load %arg7[%c0_6, %c0_7] : memref<16x256xf32, #tpu.memory_space<vmem>>, vector<16x256xf32>
    tpu.vector_store %arg7[%c0_6, %c0_7], %7 {strides = array<i32>} : memref<16x256xf32, #tpu.memory_space<vmem>>, vector<16x256xf32>,
    %c5_i32 = arith.constant 5 : i32
    %9 = arith.cmpi eq, %arg2, %c5_i32 : i32
    %10 = arith.extui %9 : i1 to i32
    %c0_i32_8 = arith.constant 0 : i32
    %11 = arith.cmpi ne, %10, %c0_i32_8 : i32
    scf.if %11 {
      %c0_9 = arith.constant 0 : index
      %c0_10 = arith.constant 0 : index
      %12 = vector.load %arg7[%c0_9, %c0_10] : memref<16x256xf32, #tpu.memory_space<vmem>>, vector<16x256xf32>
      %c0_11 = arith.constant 0 : index
      %c0_12 = arith.constant 0 : index
      %13 = vector.load %arg5[%c0_11, %c0_12] : memref<1x256xf32, #tpu.memory_space<vmem>>, vector<1x256xf32>
      %14 = vector.broadcast %13 : vector<1x256xf32> to vector<16x256xf32>
      %15 = arith.addf %12, %14 : vector<16x256xf32>
      %cst_13 = arith.constant 0.000000e+00 : f32
      %16 = vector.broadcast %cst_13 : f32 to vector<16x256xf32>
      %17 = arith.maximumf %15, %16 : vector<16x256xf32>
      %18 = arith.truncf %17 : vector<16x256xf32> to vector<16x256xbf16>
      %c0_14 = arith.constant 0 : index
      %c0_15 = arith.constant 0 : index
      %19 = vector.load %arg6[%c0_14, %c0_15] : memref<16x256xbf16, #tpu.memory_space<vmem>>, vector<16x256xbf16>
      tpu.vector_store %arg6[%c0_14, %c0_15], %18 {strides = array<i32>} : memref<16x256xbf16, #tpu.memory_space<vmem>>, vector<16x256xbf16>,
    } else {
    }
    return
  }
  func.func @transform_0(%arg0: i32, %arg1: i32, %arg2: i32) -> (i32, i32) {
    %c0_i32 = arith.constant 0 : i32
    return %arg0, %arg2 : i32, i32
  }
  func.func @transform_1(%arg0: i32, %arg1: i32, %arg2: i32) -> (i32, i32) {
    %c0_i32 = arith.constant 0 : i32
    return %arg2, %arg1 : i32, i32
  }
  func.func @transform_2(%arg0: i32, %arg1: i32, %arg2: i32) -> (i32, i32) {
    %c0_i32 = arith.constant 0 : i32
    %c0_i32_0 = arith.constant 0 : i32
    return %c0_i32, %arg1 : i32, i32
  }
  func.func @transform_3(%arg0: i32, %arg1: i32, %arg2: i32) -> (i32, i32) {
    %c0_i32 = arith.constant 0 : i32
    return %arg0, %arg1 : i32, i32
  }
}

module attributes {stable_mosaic.version = 11 : i64} {
  func.func @_mm_kernel(%arg0: i32, %arg1: i32, %arg2: i32, %arg3: memref<4x384xbf16, #tpu.memory_space<vmem>>, %arg4: memref<384x256xbf16, #tpu.memory_space<vmem>>, %arg5: memref<1x256xf32, #tpu.memory_space<vmem>>, %arg6: memref<4x256xbf16, #tpu.memory_space<vmem>>, %arg7: memref<4x256xf32, #tpu.memory_space<vmem>>) attributes {dimension_semantics = [#tpu.dimension_semantics<parallel>, #tpu.dimension_semantics<parallel>, #tpu.dimension_semantics<arbitrary>], iteration_bounds = array<i64: 1, 2, 6>, scalar_prefetch = 0 : i64, scratch_operands = 1 : i64, tpu.core_type = #tpu.core_type<tc>, window_params = [{transform_indices = @transform_0, window_bounds = array<i64: 4, 384>}, {transform_indices = @transform_1, window_bounds = array<i64: 384, 256>}, {transform_indices = @transform_2, window_bounds = array<i64: 1, 256>}, {transform_indices = @transform_3, window_bounds = array<i64: 4, 256>}]} {
    %c0_i32 = arith.constant 0 : i32
    %0 = arith.cmpi eq, %arg2, %c0_i32 : i32
    %1 = arith.extui %0 : i1 to i32
    %c0_i32_0 = arith.constant 0 : i32
    %2 = arith.cmpi ne, %1, %c0_i32_0 : i32
    scf.if %2 {
      %cst_9 = arith.constant 0.000000e+00 : f32
      %12 = vector.broadcast %cst_9 : f32 to vector<4x256xf32>
      %c0_10 = arith.constant 0 : index
      %c0_11 = arith.constant 0 : index
      %13 = vector.load %arg7[%c0_10, %c0_11] : memref<4x256xf32, #tpu.memory_space<vmem>>, vector<4x256xf32>
      tpu.vector_store %arg7[%c0_10, %c0_11], %12 {strides = array<i32>} : memref<4x256xf32, #tpu.memory_space<vmem>>, vector<4x256xf32>,
    } else {
    }
    %c0 = arith.constant 0 : index
    %c0_1 = arith.constant 0 : index
    %3 = vector.load %arg7[%c0, %c0_1] : memref<4x256xf32, #tpu.memory_space<vmem>>, vector<4x256xf32>
    %c0_2 = arith.constant 0 : index
    %c0_3 = arith.constant 0 : index
    %4 = vector.load %arg3[%c0_2, %c0_3] : memref<4x384xbf16, #tpu.memory_space<vmem>>, vector<4x384xbf16>
    %c0_4 = arith.constant 0 : index
    %c0_5 = arith.constant 0 : index
    %5 = vector.load %arg4[%c0_4, %c0_5] : memref<384x256xbf16, #tpu.memory_space<vmem>>, vector<384x256xbf16>
    %cst = arith.constant dense<0.000000e+00> : vector<4x256xf32>
    %6 = tpu.matmul %4, %5, %cst {dimension_numbers = #tpu.dot_dimension_numbers<[1], [0], [0], [1], [0, 0, 1, 1], [], []>} : vector<4x384xbf16>, vector<384x256xbf16>, vector<4x256xf32> -> vector<4x256xf32>
    %7 = arith.addf %3, %6 : vector<4x256xf32>
    %c0_6 = arith.constant 0 : index
    %c0_7 = arith.constant 0 : index
    %8 = vector.load %arg7[%c0_6, %c0_7] : memref<4x256xf32, #tpu.memory_space<vmem>>, vector<4x256xf32>
    tpu.vector_store %arg7[%c0_6, %c0_7], %7 {strides = array<i32>} : memref<4x256xf32, #tpu.memory_space<vmem>>, vector<4x256xf32>,
    %c5_i32 = arith.constant 5 : i32
    %9 = arith.cmpi eq, %arg2, %c5_i32 : i32
    %10 = arith.extui %9 : i1 to i32
    %c0_i32_8 = arith.constant 0 : i32
    %11 = arith.cmpi ne, %10, %c0_i32_8 : i32
    scf.if %11 {
      %c0_9 = arith.constant 0 : index
      %c0_10 = arith.constant 0 : index
      %12 = vector.load %arg7[%c0_9, %c0_10] : memref<4x256xf32, #tpu.memory_space<vmem>>, vector<4x256xf32>
      %c0_11 = arith.constant 0 : index
      %c0_12 = arith.constant 0 : index
      %13 = vector.load %arg5[%c0_11, %c0_12] : memref<1x256xf32, #tpu.memory_space<vmem>>, vector<1x256xf32>
      %14 = vector.broadcast %13 : vector<1x256xf32> to vector<4x256xf32>
      %15 = arith.addf %12, %14 : vector<4x256xf32>
      %cst_13 = arith.constant 0.000000e+00 : f32
      %16 = vector.broadcast %cst_13 : f32 to vector<4x256xf32>
      %17 = arith.maximumf %15, %16 : vector<4x256xf32>
      %18 = arith.truncf %17 : vector<4x256xf32> to vector<4x256xbf16>
      %c0_14 = arith.constant 0 : index
      %c0_15 = arith.constant 0 : index
      %19 = vector.load %arg6[%c0_14, %c0_15] : memref<4x256xbf16, #tpu.memory_space<vmem>>, vector<4x256xbf16>
      tpu.vector_store %arg6[%c0_14, %c0_15], %18 {strides = array<i32>} : memref<4x256xbf16, #tpu.memory_space<vmem>>, vector<4x256xbf16>,
    } else {
    }
    return
  }
  func.func @transform_0(%arg0: i32, %arg1: i32, %arg2: i32) -> (i32, i32) {
    %c0_i32 = arith.constant 0 : i32
    return %arg0, %arg2 : i32, i32
  }
  func.func @transform_1(%arg0: i32, %arg1: i32, %arg2: i32) -> (i32, i32) {
    %c0_i32 = arith.constant 0 : i32
    return %arg2, %arg1 : i32, i32
  }
  func.func @transform_2(%arg0: i32, %arg1: i32, %arg2: i32) -> (i32, i32) {
    %c0_i32 = arith.constant 0 : i32
    %c0_i32_0 = arith.constant 0 : i32
    return %c0_i32, %arg1 : i32, i32
  }
  func.func @transform_3(%arg0: i32, %arg1: i32, %arg2: i32) -> (i32, i32) {
    %c0_i32 = arith.constant 0 : i32
    return %arg0, %arg1 : i32, i32
  }
}

module attributes {stable_mosaic.version = 11 : i64} {
  func.func @_mm_kernel(%arg0: i32, %arg1: i32, %arg2: i32, %arg3: memref<4x256xbf16, #tpu.memory_space<vmem>>, %arg4: memref<256x256xbf16, #tpu.memory_space<vmem>>, %arg5: memref<1x256xf32, #tpu.memory_space<vmem>>, %arg6: memref<4x256xbf16, #tpu.memory_space<vmem>>, %arg7: memref<4x256xf32, #tpu.memory_space<vmem>>) attributes {dimension_semantics = [#tpu.dimension_semantics<parallel>, #tpu.dimension_semantics<parallel>, #tpu.dimension_semantics<arbitrary>], iteration_bounds = array<i64: 1, 2, 1>, scalar_prefetch = 0 : i64, scratch_operands = 1 : i64, tpu.core_type = #tpu.core_type<tc>, window_params = [{transform_indices = @transform_0, window_bounds = array<i64: 4, 256>}, {transform_indices = @transform_1, window_bounds = array<i64: 256, 256>}, {transform_indices = @transform_2, window_bounds = array<i64: 1, 256>}, {transform_indices = @transform_3, window_bounds = array<i64: 4, 256>}]} {
    %c0_i32 = arith.constant 0 : i32
    %0 = arith.cmpi eq, %arg2, %c0_i32 : i32
    %1 = arith.extui %0 : i1 to i32
    %c0_i32_0 = arith.constant 0 : i32
    %2 = arith.cmpi ne, %1, %c0_i32_0 : i32
    scf.if %2 {
      %cst_10 = arith.constant 0.000000e+00 : f32
      %12 = vector.broadcast %cst_10 : f32 to vector<4x256xf32>
      %c0_11 = arith.constant 0 : index
      %c0_12 = arith.constant 0 : index
      %13 = vector.load %arg7[%c0_11, %c0_12] : memref<4x256xf32, #tpu.memory_space<vmem>>, vector<4x256xf32>
      tpu.vector_store %arg7[%c0_11, %c0_12], %12 {strides = array<i32>} : memref<4x256xf32, #tpu.memory_space<vmem>>, vector<4x256xf32>,
    } else {
    }
    %c0 = arith.constant 0 : index
    %c0_1 = arith.constant 0 : index
    %3 = vector.load %arg7[%c0, %c0_1] : memref<4x256xf32, #tpu.memory_space<vmem>>, vector<4x256xf32>
    %c0_2 = arith.constant 0 : index
    %c0_3 = arith.constant 0 : index
    %4 = vector.load %arg3[%c0_2, %c0_3] : memref<4x256xbf16, #tpu.memory_space<vmem>>, vector<4x256xbf16>
    %c0_4 = arith.constant 0 : index
    %c0_5 = arith.constant 0 : index
    %5 = vector.load %arg4[%c0_4, %c0_5] : memref<256x256xbf16, #tpu.memory_space<vmem>>, vector<256x256xbf16>
    %cst = arith.constant dense<0.000000e+00> : vector<4x256xf32>
    %6 = tpu.matmul %4, %5, %cst {dimension_numbers = #tpu.dot_dimension_numbers<[1], [0], [0], [1], [0, 0, 1, 1], [], []>} : vector<4x256xbf16>, vector<256x256xbf16>, vector<4x256xf32> -> vector<4x256xf32>
    %7 = arith.addf %3, %6 : vector<4x256xf32>
    %c0_6 = arith.constant 0 : index
    %c0_7 = arith.constant 0 : index
    %8 = vector.load %arg7[%c0_6, %c0_7] : memref<4x256xf32, #tpu.memory_space<vmem>>, vector<4x256xf32>
    tpu.vector_store %arg7[%c0_6, %c0_7], %7 {strides = array<i32>} : memref<4x256xf32, #tpu.memory_space<vmem>>, vector<4x256xf32>,
    %c0_i32_8 = arith.constant 0 : i32
    %9 = arith.cmpi eq, %arg2, %c0_i32_8 : i32
    %10 = arith.extui %9 : i1 to i32
    %c0_i32_9 = arith.constant 0 : i32
    %11 = arith.cmpi ne, %10, %c0_i32_9 : i32
    scf.if %11 {
      %c0_10 = arith.constant 0 : index
      %c0_11 = arith.constant 0 : index
      %12 = vector.load %arg7[%c0_10, %c0_11] : memref<4x256xf32, #tpu.memory_space<vmem>>, vector<4x256xf32>
      %c0_12 = arith.constant 0 : index
      %c0_13 = arith.constant 0 : index
      %13 = vector.load %arg5[%c0_12, %c0_13] : memref<1x256xf32, #tpu.memory_space<vmem>>, vector<1x256xf32>
      %14 = vector.broadcast %13 : vector<1x256xf32> to vector<4x256xf32>
      %15 = arith.addf %12, %14 : vector<4x256xf32>
      %16 = arith.truncf %15 : vector<4x256xf32> to vector<4x256xbf16>
      %c0_14 = arith.constant 0 : index
      %c0_15 = arith.constant 0 : index
      %17 = vector.load %arg6[%c0_14, %c0_15] : memref<4x256xbf16, #tpu.memory_space<vmem>>, vector<4x256xbf16>
      tpu.vector_store %arg6[%c0_14, %c0_15], %16 {strides = array<i32>} : memref<4x256xbf16, #tpu.memory_space<vmem>>, vector<4x256xbf16>,
    } else {
    }
    return
  }
  func.func @transform_0(%arg0: i32, %arg1: i32, %arg2: i32) -> (i32, i32) {
    %c0_i32 = arith.constant 0 : i32
    return %arg0, %arg2 : i32, i32
  }
  func.func @transform_1(%arg0: i32, %arg1: i32, %arg2: i32) -> (i32, i32) {
    %c0_i32 = arith.constant 0 : i32
    return %arg2, %arg1 : i32, i32
  }
  func.func @transform_2(%arg0: i32, %arg1: i32, %arg2: i32) -> (i32, i32) {
    %c0_i32 = arith.constant 0 : i32
    %c0_i32_0 = arith.constant 0 : i32
    return %c0_i32, %arg1 : i32, i32
  }
  func.func @transform_3(%arg0: i32, %arg1: i32, %arg2: i32) -> (i32, i32) {
    %c0_i32 = arith.constant 0 : i32
    return %arg0, %arg1 : i32, i32
  }
}

module attributes {stable_mosaic.version = 11 : i64} {
  func.func @_mm_kernel(%arg0: i32, %arg1: i32, %arg2: i32, %arg3: memref<4x512xbf16, #tpu.memory_space<vmem>>, %arg4: memref<512x256xbf16, #tpu.memory_space<vmem>>, %arg5: memref<1x256xf32, #tpu.memory_space<vmem>>, %arg6: memref<4x256xbf16, #tpu.memory_space<vmem>>, %arg7: memref<4x256xbf16, #tpu.memory_space<vmem>>, %arg8: memref<4x256xf32, #tpu.memory_space<vmem>>) attributes {dimension_semantics = [#tpu.dimension_semantics<parallel>, #tpu.dimension_semantics<parallel>, #tpu.dimension_semantics<arbitrary>], iteration_bounds = array<i64: 1, 2, 9>, scalar_prefetch = 0 : i64, scratch_operands = 1 : i64, tpu.core_type = #tpu.core_type<tc>, window_params = [{transform_indices = @transform_0, window_bounds = array<i64: 4, 512>}, {transform_indices = @transform_1, window_bounds = array<i64: 512, 256>}, {transform_indices = @transform_2, window_bounds = array<i64: 1, 256>}, {transform_indices = @transform_3, window_bounds = array<i64: 4, 256>}, {transform_indices = @transform_4, window_bounds = array<i64: 4, 256>}]} {
    %c0_i32 = arith.constant 0 : i32
    %0 = arith.cmpi eq, %arg2, %c0_i32 : i32
    %1 = arith.extui %0 : i1 to i32
    %c0_i32_0 = arith.constant 0 : i32
    %2 = arith.cmpi ne, %1, %c0_i32_0 : i32
    scf.if %2 {
      %cst_9 = arith.constant 0.000000e+00 : f32
      %12 = vector.broadcast %cst_9 : f32 to vector<4x256xf32>
      %c0_10 = arith.constant 0 : index
      %c0_11 = arith.constant 0 : index
      %13 = vector.load %arg8[%c0_10, %c0_11] : memref<4x256xf32, #tpu.memory_space<vmem>>, vector<4x256xf32>
      tpu.vector_store %arg8[%c0_10, %c0_11], %12 {strides = array<i32>} : memref<4x256xf32, #tpu.memory_space<vmem>>, vector<4x256xf32>,
    } else {
    }
    %c0 = arith.constant 0 : index
    %c0_1 = arith.constant 0 : index
    %3 = vector.load %arg8[%c0, %c0_1] : memref<4x256xf32, #tpu.memory_space<vmem>>, vector<4x256xf32>
    %c0_2 = arith.constant 0 : index
    %c0_3 = arith.constant 0 : index
    %4 = vector.load %arg3[%c0_2, %c0_3] : memref<4x512xbf16, #tpu.memory_space<vmem>>, vector<4x512xbf16>
    %c0_4 = arith.constant 0 : index
    %c0_5 = arith.constant 0 : index
    %5 = vector.load %arg4[%c0_4, %c0_5] : memref<512x256xbf16, #tpu.memory_space<vmem>>, vector<512x256xbf16>
    %cst = arith.constant dense<0.000000e+00> : vector<4x256xf32>
    %6 = tpu.matmul %4, %5, %cst {dimension_numbers = #tpu.dot_dimension_numbers<[1], [0], [0], [1], [0, 0, 1, 1], [], []>} : vector<4x512xbf16>, vector<512x256xbf16>, vector<4x256xf32> -> vector<4x256xf32>
    %7 = arith.addf %3, %6 : vector<4x256xf32>
    %c0_6 = arith.constant 0 : index
    %c0_7 = arith.constant 0 : index
    %8 = vector.load %arg8[%c0_6, %c0_7] : memref<4x256xf32, #tpu.memory_space<vmem>>, vector<4x256xf32>
    tpu.vector_store %arg8[%c0_6, %c0_7], %7 {strides = array<i32>} : memref<4x256xf32, #tpu.memory_space<vmem>>, vector<4x256xf32>,
    %c8_i32 = arith.constant 8 : i32
    %9 = arith.cmpi eq, %arg2, %c8_i32 : i32
    %10 = arith.extui %9 : i1 to i32
    %c0_i32_8 = arith.constant 0 : i32
    %11 = arith.cmpi ne, %10, %c0_i32_8 : i32
    scf.if %11 {
      %c0_9 = arith.constant 0 : index
      %c0_10 = arith.constant 0 : index
      %12 = vector.load %arg8[%c0_9, %c0_10] : memref<4x256xf32, #tpu.memory_space<vmem>>, vector<4x256xf32>
      %c0_11 = arith.constant 0 : index
      %c0_12 = arith.constant 0 : index
      %13 = vector.load %arg5[%c0_11, %c0_12] : memref<1x256xf32, #tpu.memory_space<vmem>>, vector<1x256xf32>
      %14 = vector.broadcast %13 : vector<1x256xf32> to vector<4x256xf32>
      %15 = arith.addf %12, %14 : vector<4x256xf32>
      %c0_13 = arith.constant 0 : index
      %c0_14 = arith.constant 0 : index
      %16 = vector.load %arg6[%c0_13, %c0_14] : memref<4x256xbf16, #tpu.memory_space<vmem>>, vector<4x256xbf16>
      %17 = arith.extf %16 : vector<4x256xbf16> to vector<4x256xf32>
      %18 = arith.addf %15, %17 : vector<4x256xf32>
      %cst_15 = arith.constant 0.000000e+00 : f32
      %19 = vector.broadcast %cst_15 : f32 to vector<4x256xf32>
      %20 = arith.maximumf %18, %19 : vector<4x256xf32>
      %21 = arith.truncf %20 : vector<4x256xf32> to vector<4x256xbf16>
      %c0_16 = arith.constant 0 : index
      %c0_17 = arith.constant 0 : index
      %22 = vector.load %arg7[%c0_16, %c0_17] : memref<4x256xbf16, #tpu.memory_space<vmem>>, vector<4x256xbf16>
      tpu.vector_store %arg7[%c0_16, %c0_17], %21 {strides = array<i32>} : memref<4x256xbf16, #tpu.memory_space<vmem>>, vector<4x256xbf16>,
    } else {
    }
    return
  }
  func.func @transform_0(%arg0: i32, %arg1: i32, %arg2: i32) -> (i32, i32) {
    %c0_i32 = arith.constant 0 : i32
    return %arg0, %arg2 : i32, i32
  }
  func.func @transform_1(%arg0: i32, %arg1: i32, %arg2: i32) -> (i32, i32) {
    %c0_i32 = arith.constant 0 : i32
    return %arg2, %arg1 : i32, i32
  }
  func.func @transform_2(%arg0: i32, %arg1: i32, %arg2: i32) -> (i32, i32) {
    %c0_i32 = arith.constant 0 : i32
    %c0_i32_0 = arith.constant 0 : i32
    return %c0_i32, %arg1 : i32, i32
  }
  func.func @transform_3(%arg0: i32, %arg1: i32, %arg2: i32) -> (i32, i32) {
    %c0_i32 = arith.constant 0 : i32
    return %arg0, %arg1 : i32, i32
  }
  func.func @transform_4(%arg0: i32, %arg1: i32, %arg2: i32) -> (i32, i32) {
    %c0_i32 = arith.constant 0 : i32
    return %arg0, %arg1 : i32, i32
  }
}

module attributes {stable_mosaic.version = 11 : i64} {
  func.func @_mm_kernel(%arg0: i32, %arg1: i32, %arg2: i32, %arg3: memref<4x512xbf16, #tpu.memory_space<vmem>>, %arg4: memref<512x256xbf16, #tpu.memory_space<vmem>>, %arg5: memref<1x256xf32, #tpu.memory_space<vmem>>, %arg6: memref<4x256xbf16, #tpu.memory_space<vmem>>, %arg7: memref<4x256xf32, #tpu.memory_space<vmem>>) attributes {dimension_semantics = [#tpu.dimension_semantics<parallel>, #tpu.dimension_semantics<parallel>, #tpu.dimension_semantics<arbitrary>], iteration_bounds = array<i64: 1, 2, 9>, scalar_prefetch = 0 : i64, scratch_operands = 1 : i64, tpu.core_type = #tpu.core_type<tc>, window_params = [{transform_indices = @transform_0, window_bounds = array<i64: 4, 512>}, {transform_indices = @transform_1, window_bounds = array<i64: 512, 256>}, {transform_indices = @transform_2, window_bounds = array<i64: 1, 256>}, {transform_indices = @transform_3, window_bounds = array<i64: 4, 256>}]} {
    %c0_i32 = arith.constant 0 : i32
    %0 = arith.cmpi eq, %arg2, %c0_i32 : i32
    %1 = arith.extui %0 : i1 to i32
    %c0_i32_0 = arith.constant 0 : i32
    %2 = arith.cmpi ne, %1, %c0_i32_0 : i32
    scf.if %2 {
      %cst_9 = arith.constant 0.000000e+00 : f32
      %12 = vector.broadcast %cst_9 : f32 to vector<4x256xf32>
      %c0_10 = arith.constant 0 : index
      %c0_11 = arith.constant 0 : index
      %13 = vector.load %arg7[%c0_10, %c0_11] : memref<4x256xf32, #tpu.memory_space<vmem>>, vector<4x256xf32>
      tpu.vector_store %arg7[%c0_10, %c0_11], %12 {strides = array<i32>} : memref<4x256xf32, #tpu.memory_space<vmem>>, vector<4x256xf32>,
    } else {
    }
    %c0 = arith.constant 0 : index
    %c0_1 = arith.constant 0 : index
    %3 = vector.load %arg7[%c0, %c0_1] : memref<4x256xf32, #tpu.memory_space<vmem>>, vector<4x256xf32>
    %c0_2 = arith.constant 0 : index
    %c0_3 = arith.constant 0 : index
    %4 = vector.load %arg3[%c0_2, %c0_3] : memref<4x512xbf16, #tpu.memory_space<vmem>>, vector<4x512xbf16>
    %c0_4 = arith.constant 0 : index
    %c0_5 = arith.constant 0 : index
    %5 = vector.load %arg4[%c0_4, %c0_5] : memref<512x256xbf16, #tpu.memory_space<vmem>>, vector<512x256xbf16>
    %cst = arith.constant dense<0.000000e+00> : vector<4x256xf32>
    %6 = tpu.matmul %4, %5, %cst {dimension_numbers = #tpu.dot_dimension_numbers<[1], [0], [0], [1], [0, 0, 1, 1], [], []>} : vector<4x512xbf16>, vector<512x256xbf16>, vector<4x256xf32> -> vector<4x256xf32>
    %7 = arith.addf %3, %6 : vector<4x256xf32>
    %c0_6 = arith.constant 0 : index
    %c0_7 = arith.constant 0 : index
    %8 = vector.load %arg7[%c0_6, %c0_7] : memref<4x256xf32, #tpu.memory_space<vmem>>, vector<4x256xf32>
    tpu.vector_store %arg7[%c0_6, %c0_7], %7 {strides = array<i32>} : memref<4x256xf32, #tpu.memory_space<vmem>>, vector<4x256xf32>,
    %c8_i32 = arith.constant 8 : i32
    %9 = arith.cmpi eq, %arg2, %c8_i32 : i32
    %10 = arith.extui %9 : i1 to i32
    %c0_i32_8 = arith.constant 0 : i32
    %11 = arith.cmpi ne, %10, %c0_i32_8 : i32
    scf.if %11 {
      %c0_9 = arith.constant 0 : index
      %c0_10 = arith.constant 0 : index
      %12 = vector.load %arg7[%c0_9, %c0_10] : memref<4x256xf32, #tpu.memory_space<vmem>>, vector<4x256xf32>
      %c0_11 = arith.constant 0 : index
      %c0_12 = arith.constant 0 : index
      %13 = vector.load %arg5[%c0_11, %c0_12] : memref<1x256xf32, #tpu.memory_space<vmem>>, vector<1x256xf32>
      %14 = vector.broadcast %13 : vector<1x256xf32> to vector<4x256xf32>
      %15 = arith.addf %12, %14 : vector<4x256xf32>
      %cst_13 = arith.constant 0.000000e+00 : f32
      %16 = vector.broadcast %cst_13 : f32 to vector<4x256xf32>
      %17 = arith.maximumf %15, %16 : vector<4x256xf32>
      %18 = arith.truncf %17 : vector<4x256xf32> to vector<4x256xbf16>
      %c0_14 = arith.constant 0 : index
      %c0_15 = arith.constant 0 : index
      %19 = vector.load %arg6[%c0_14, %c0_15] : memref<4x256xbf16, #tpu.memory_space<vmem>>, vector<4x256xbf16>
      tpu.vector_store %arg6[%c0_14, %c0_15], %18 {strides = array<i32>} : memref<4x256xbf16, #tpu.memory_space<vmem>>, vector<4x256xbf16>,
    } else {
    }
    return
  }
  func.func @transform_0(%arg0: i32, %arg1: i32, %arg2: i32) -> (i32, i32) {
    %c0_i32 = arith.constant 0 : i32
    return %arg0, %arg2 : i32, i32
  }
  func.func @transform_1(%arg0: i32, %arg1: i32, %arg2: i32) -> (i32, i32) {
    %c0_i32 = arith.constant 0 : i32
    return %arg2, %arg1 : i32, i32
  }
  func.func @transform_2(%arg0: i32, %arg1: i32, %arg2: i32) -> (i32, i32) {
    %c0_i32 = arith.constant 0 : i32
    %c0_i32_0 = arith.constant 0 : i32
    return %c0_i32, %arg1 : i32, i32
  }
  func.func @transform_3(%arg0: i32, %arg1: i32, %arg2: i32) -> (i32, i32) {
    %c0_i32 = arith.constant 0 : i32
    return %arg0, %arg1 : i32, i32
  }
}

module attributes {stable_mosaic.version = 11 : i64} {
  func.func @_mm_kernel(%arg0: i32, %arg1: i32, %arg2: i32, %arg3: memref<4x512xbf16, #tpu.memory_space<vmem>>, %arg4: memref<512x256xbf16, #tpu.memory_space<vmem>>, %arg5: memref<1x256xf32, #tpu.memory_space<vmem>>, %arg6: memref<4x256xf32, #tpu.memory_space<vmem>>, %arg7: memref<4x256xf32, #tpu.memory_space<vmem>>) attributes {dimension_semantics = [#tpu.dimension_semantics<parallel>, #tpu.dimension_semantics<parallel>, #tpu.dimension_semantics<arbitrary>], iteration_bounds = array<i64: 1, 1, 1>, scalar_prefetch = 0 : i64, scratch_operands = 1 : i64, tpu.core_type = #tpu.core_type<tc>, window_params = [{transform_indices = @transform_0, window_bounds = array<i64: 4, 512>}, {transform_indices = @transform_1, window_bounds = array<i64: 512, 256>}, {transform_indices = @transform_2, window_bounds = array<i64: 1, 256>}, {transform_indices = @transform_3, window_bounds = array<i64: 4, 256>}]} {
    %c0_i32 = arith.constant 0 : i32
    %0 = arith.cmpi eq, %arg2, %c0_i32 : i32
    %1 = arith.extui %0 : i1 to i32
    %c0_i32_0 = arith.constant 0 : i32
    %2 = arith.cmpi ne, %1, %c0_i32_0 : i32
    scf.if %2 {
      %cst_10 = arith.constant 0.000000e+00 : f32
      %12 = vector.broadcast %cst_10 : f32 to vector<4x256xf32>
      %c0_11 = arith.constant 0 : index
      %c0_12 = arith.constant 0 : index
      %13 = vector.load %arg7[%c0_11, %c0_12] : memref<4x256xf32, #tpu.memory_space<vmem>>, vector<4x256xf32>
      tpu.vector_store %arg7[%c0_11, %c0_12], %12 {strides = array<i32>} : memref<4x256xf32, #tpu.memory_space<vmem>>, vector<4x256xf32>,
    } else {
    }
    %c0 = arith.constant 0 : index
    %c0_1 = arith.constant 0 : index
    %3 = vector.load %arg7[%c0, %c0_1] : memref<4x256xf32, #tpu.memory_space<vmem>>, vector<4x256xf32>
    %c0_2 = arith.constant 0 : index
    %c0_3 = arith.constant 0 : index
    %4 = vector.load %arg3[%c0_2, %c0_3] : memref<4x512xbf16, #tpu.memory_space<vmem>>, vector<4x512xbf16>
    %c0_4 = arith.constant 0 : index
    %c0_5 = arith.constant 0 : index
    %5 = vector.load %arg4[%c0_4, %c0_5] : memref<512x256xbf16, #tpu.memory_space<vmem>>, vector<512x256xbf16>
    %cst = arith.constant dense<0.000000e+00> : vector<4x256xf32>
    %6 = tpu.matmul %4, %5, %cst {dimension_numbers = #tpu.dot_dimension_numbers<[1], [0], [0], [1], [0, 0, 1, 1], [], []>} : vector<4x512xbf16>, vector<512x256xbf16>, vector<4x256xf32> -> vector<4x256xf32>
    %7 = arith.addf %3, %6 : vector<4x256xf32>
    %c0_6 = arith.constant 0 : index
    %c0_7 = arith.constant 0 : index
    %8 = vector.load %arg7[%c0_6, %c0_7] : memref<4x256xf32, #tpu.memory_space<vmem>>, vector<4x256xf32>
    tpu.vector_store %arg7[%c0_6, %c0_7], %7 {strides = array<i32>} : memref<4x256xf32, #tpu.memory_space<vmem>>, vector<4x256xf32>,
    %c0_i32_8 = arith.constant 0 : i32
    %9 = arith.cmpi eq, %arg2, %c0_i32_8 : i32
    %10 = arith.extui %9 : i1 to i32
    %c0_i32_9 = arith.constant 0 : i32
    %11 = arith.cmpi ne, %10, %c0_i32_9 : i32
    scf.if %11 {
      %c0_10 = arith.constant 0 : index
      %c0_11 = arith.constant 0 : index
      %12 = vector.load %arg7[%c0_10, %c0_11] : memref<4x256xf32, #tpu.memory_space<vmem>>, vector<4x256xf32>
      %c0_12 = arith.constant 0 : index
      %c0_13 = arith.constant 0 : index
      %13 = vector.load %arg5[%c0_12, %c0_13] : memref<1x256xf32, #tpu.memory_space<vmem>>, vector<1x256xf32>
      %14 = vector.broadcast %13 : vector<1x256xf32> to vector<4x256xf32>
      %15 = arith.addf %12, %14 : vector<4x256xf32>
      %c0_14 = arith.constant 0 : index
      %c0_15 = arith.constant 0 : index
      %16 = vector.load %arg6[%c0_14, %c0_15] : memref<4x256xf32, #tpu.memory_space<vmem>>, vector<4x256xf32>
      tpu.vector_store %arg6[%c0_14, %c0_15], %15 {strides = array<i32>} : memref<4x256xf32, #tpu.memory_space<vmem>>, vector<4x256xf32>,
    } else {
    }
    return
  }
  func.func @transform_0(%arg0: i32, %arg1: i32, %arg2: i32) -> (i32, i32) {
    %c0_i32 = arith.constant 0 : i32
    return %arg0, %arg2 : i32, i32
  }
  func.func @transform_1(%arg0: i32, %arg1: i32, %arg2: i32) -> (i32, i32) {
    %c0_i32 = arith.constant 0 : i32
    return %arg2, %arg1 : i32, i32
  }
  func.func @transform_2(%arg0: i32, %arg1: i32, %arg2: i32) -> (i32, i32) {
    %c0_i32 = arith.constant 0 : i32
    %c0_i32_0 = arith.constant 0 : i32
    return %c0_i32, %arg1 : i32, i32
  }
  func.func @transform_3(%arg0: i32, %arg1: i32, %arg2: i32) -> (i32, i32) {
    %c0_i32 = arith.constant 0 : i32
    return %arg0, %arg1 : i32, i32
  }
}

module attributes {stable_mosaic.version = 11 : i64} {
  func.func @_head_kernel(%arg0: memref<2x512xbf16, #tpu.memory_space<vmem>>, %arg1: memref<512x512xbf16, #tpu.memory_space<vmem>>, %arg2: memref<1x512xf32, #tpu.memory_space<vmem>>, %arg3: memref<512x256xbf16, #tpu.memory_space<vmem>>, %arg4: memref<1x256xf32, #tpu.memory_space<vmem>>, %arg5: memref<256x128xbf16, #tpu.memory_space<vmem>>, %arg6: memref<1x128xf32, #tpu.memory_space<vmem>>, %arg7: memref<2x128xf32, #tpu.memory_space<vmem>>) attributes {dimension_semantics = [], scalar_prefetch = 0 : i64, scratch_operands = 0 : i64, tpu.core_type = #tpu.core_type<tc>} {
    %c0 = arith.constant 0 : index
    %c0_0 = arith.constant 0 : index
    %0 = vector.load %arg0[%c0, %c0_0] : memref<2x512xbf16, #tpu.memory_space<vmem>>, vector<2x512xbf16>
    %c0_1 = arith.constant 0 : index
    %c0_2 = arith.constant 0 : index
    %1 = vector.load %arg1[%c0_1, %c0_2] : memref<512x512xbf16, #tpu.memory_space<vmem>>, vector<512x512xbf16>
    %cst = arith.constant dense<0.000000e+00> : vector<2x512xf32>
    %2 = tpu.matmul %0, %1, %cst {dimension_numbers = #tpu.dot_dimension_numbers<[1], [0], [0], [1], [0, 0, 1, 1], [], []>} : vector<2x512xbf16>, vector<512x512xbf16>, vector<2x512xf32> -> vector<2x512xf32>
    %c0_3 = arith.constant 0 : index
    %c0_4 = arith.constant 0 : index
    %3 = vector.load %arg2[%c0_3, %c0_4] : memref<1x512xf32, #tpu.memory_space<vmem>>, vector<1x512xf32>
    %4 = vector.broadcast %3 : vector<1x512xf32> to vector<2x512xf32>
    %5 = arith.addf %2, %4 : vector<2x512xf32>
    %cst_5 = arith.constant 0.000000e+00 : f32
    %6 = vector.broadcast %cst_5 : f32 to vector<2x512xf32>
    %7 = arith.maximumf %5, %6 : vector<2x512xf32>
    %8 = arith.truncf %7 : vector<2x512xf32> to vector<2x512xbf16>
    %c0_6 = arith.constant 0 : index
    %c0_7 = arith.constant 0 : index
    %9 = vector.load %arg3[%c0_6, %c0_7] : memref<512x256xbf16, #tpu.memory_space<vmem>>, vector<512x256xbf16>
    %cst_8 = arith.constant dense<0.000000e+00> : vector<2x256xf32>
    %10 = tpu.matmul %8, %9, %cst_8 {dimension_numbers = #tpu.dot_dimension_numbers<[1], [0], [0], [1], [0, 0, 1, 1], [], []>} : vector<2x512xbf16>, vector<512x256xbf16>, vector<2x256xf32> -> vector<2x256xf32>
    %c0_9 = arith.constant 0 : index
    %c0_10 = arith.constant 0 : index
    %11 = vector.load %arg4[%c0_9, %c0_10] : memref<1x256xf32, #tpu.memory_space<vmem>>, vector<1x256xf32>
    %12 = vector.broadcast %11 : vector<1x256xf32> to vector<2x256xf32>
    %13 = arith.addf %10, %12 : vector<2x256xf32>
    %cst_11 = arith.constant 0.000000e+00 : f32
    %14 = vector.broadcast %cst_11 : f32 to vector<2x256xf32>
    %15 = arith.maximumf %13, %14 : vector<2x256xf32>
    %16 = arith.truncf %15 : vector<2x256xf32> to vector<2x256xbf16>
    %c0_12 = arith.constant 0 : index
    %c0_13 = arith.constant 0 : index
    %17 = vector.load %arg5[%c0_12, %c0_13] : memref<256x128xbf16, #tpu.memory_space<vmem>>, vector<256x128xbf16>
    %cst_14 = arith.constant dense<0.000000e+00> : vector<2x128xf32>
    %18 = tpu.matmul %16, %17, %cst_14 {dimension_numbers = #tpu.dot_dimension_numbers<[1], [0], [0], [1], [0, 0, 1, 1], [], []>} : vector<2x256xbf16>, vector<256x128xbf16>, vector<2x128xf32> -> vector<2x128xf32>
    %c0_15 = arith.constant 0 : index
    %c0_16 = arith.constant 0 : index
    %19 = vector.load %arg6[%c0_15, %c0_16] : memref<1x128xf32, #tpu.memory_space<vmem>>, vector<1x128xf32>
    %20 = vector.broadcast %19 : vector<1x128xf32> to vector<2x128xf32>
    %21 = arith.addf %18, %20 : vector<2x128xf32>
    %cst_17 = arith.constant 0.000000e+00 : f32
    %22 = vector.broadcast %cst_17 : f32 to vector<2x128xf32>
    %23 = arith.subf %22, %21 : vector<2x128xf32>
    %24 = math.exp %23 : vector<2x128xf32>
    %cst_18 = arith.constant 1.000000e+00 : f32
    %25 = vector.broadcast %cst_18 : f32 to vector<2x128xf32>
    %26 = arith.addf %25, %24 : vector<2x128xf32>
    %27 = tpu.reciprocal %26 {approx = true} : vector<2x128xf32> -> vector<2x128xf32>
    %cst_19 = arith.constant 0.000000e+00 : f32
    %cst_20 = arith.constant 1.000000e+00 : f32
    %28 = vector.broadcast %cst_19 : f32 to vector<2x128xf32>
    %29 = arith.maximumf %28, %27 : vector<2x128xf32>
    %30 = vector.broadcast %cst_20 : f32 to vector<2x128xf32>
    %31 = arith.minimumf %30, %29 : vector<2x128xf32>
    %c0_21 = arith.constant 0 : index
    %c0_22 = arith.constant 0 : index
    %32 = vector.load %arg7[%c0_21, %c0_22] : memref<2x128xf32, #tpu.memory_space<vmem>>, vector<2x128xf32>
    tpu.vector_store %arg7[%c0_21, %c0_22], %31 {strides = array<i32>} : memref<2x128xf32, #tpu.memory_space<vmem>>, vector<2x128xf32>,
    return
  }
}

</mosaic_0001>

<bundles_post_ra>
// kernel: siamese_forward.22
= control target key start
LH: loop header
LB: loop body
LE: loop exit
PB: predicated region body
PF: predicated region fallthrough
CT: control target
= control target key end

     0   :  { %s1542_s12 = smov 0   ;;  %s1544_s13 = smov 0   ;;  %s1848_s0 = inlined_call_operand.vmem [shape: bf16[1024,147], index: 0, kind: input, shape index: {}]   ;;  %s1849_s1 = inlined_call_operand.vmem [shape: bf16[147,64], index: 1, kind: input, shape index: {}]   ;;  %s1850_s2 = inlined_call_operand.vmem [shape: f32[1,64], index: 2, kind: input, shape index: {}]   ;;  %s1851_s3 = inlined_call_operand.vmem [shape: bf16[1024,64], index: 3, kind: output, shape index: {}]  }
   0x1   :  { %s1546_s14 = smov 0  }
   0x2 LB: > { %s32_s15 = sadd.s32 1, %s1513_s13  ;;  %p1258_p0 = scmp.ge.s32.totalorder %s1517_s14, 1  ;;  %s1517_s14 = sphi %s1546_s14, %s13_s14   ;;  %s1513_s13 = sphi %s1544_s13, %s1853_s13   ;;  %s1509_s12 = sphi %s1542_s12, %s1852_s12  }
   0x3   : > { %p34_p1 = scmp.ge.s32.totalorder %s32_s15, 4  ;;  %p191_p2 = scmp.lt.s32.totalorder %s1517_s14, 5 }
   0x5   : > { %s1855_s15 = smov (%p34_p1, %s32_s15), 0  ;;  %p192_p3 = pnand %p1258_p0, %p191_p2 }
   0x6   : > { %s1259_s22 = sshll.u32 (!%p192_p3), %s1509_s12, 5 }
   0x7   : > { %195 = sbr.rel (%p192_p3) target bundleno = 324 (0x144), region = 32  ;;  %p236_p4 = scmp.lt.s32.totalorder (!%p192_p3), %s1259_s22, 127 }
   0xc   : > { %v1437_v0 = vld [vmem:[%s1849_s1 + $0x38] sm:$0xff]   ;;  %v1519_v1 = vmov 0   ;;  %v1438_v2 = vld [vmem:[%s1849_s1 + $0x30] sm:$0xff]   ;;  %v1439_v3 = vld [vmem:[%s1849_s1 + $0x28] sm:$0xff]   ;;  %s1857_s22 = smov (!%p236_p4, %s1259_s22), 127  ;;  %vm272_vm0 = vcmask 523264  }
   0xd   : > { %645 = vmatprep.subr.bf16.mxu0 %v1519_v1  ;;  %1390 = vmatprep.subr.bf16.mxu1 %v1519_v1  ;;  %v1440_v4 = vld [vmem:[%s1849_s1 + $0x20] sm:$0xff]   ;;  %s1357_s25 = sshll.u32 %s1857_s22, 3  ;;  %v1520_v5 = vmov 0.0   ;;  %v1441_v6 = vld [vmem:[%s1849_s1 + $0x18] sm:$0xff]   ;;  %vm589_vm1 = vcmask 154624   ;;  %v1442_v9 = vld [vmem:[%s1849_s1 + $0x10] sm:$0xff]  }
   0xe   : > { %646 = vmatpush1.bf16.msra.mxu0 %v1437_v0  ;;  %1400 = vmatpush1.bf16.msra.mxu1 %v1437_v0  ;;  %273 = vst.msk [vmem:[#allocation2] sm:$0xff] %vm272_vm0, %v1520_v5  ;;  %274 = vst.msk [vmem:[#allocation2 + $0x8] sm:$0xff] %vm272_vm0, %v1520_v5  ;;  %s1620_s28 = scalar_lea.vmem %s1848_s0, %s1357_s25  ;;  %vm638_vm2 = vcmask 1040384   ;;  %v1443_v10 = vld [vmem:[%s1849_s1 + $0x8] sm:$0xff]   ;;  %vm639_vm3 = vcmask 1041408   ;;  %v1521_v11 = vmov 65535  }
   0xf   : > { %647 = vmatprep.subr.bf16.mxu0 %v1519_v1  ;;  %1391 = vmatprep.subr.bf16.mxu1 %v1519_v1  ;;  %275 = vst.msk [vmem:[#allocation2 + $0x10] sm:$0xff] %vm272_vm0, %v1520_v5  ;;  %276 = vst.msk [vmem:[#allocation2 + $0x18] sm:$0xff] %vm272_vm0, %v1520_v5  ;;  %v1449_v7 = vld [vmem:[%s1620_s28 + $0x4] ss:$8 sps:$4 sm:$0xff]   ;;  %v640_v12 = vsel %vm638_vm2, 4294967295, %v1521_v11  ;;  %s1263_s19 = sshll.u32 %s1857_s22, 2 }
  0x10   : > { %277 = vst.msk [vmem:[#allocation2 + $0x20] sm:$0xff] %vm272_vm0, %v1520_v5  ;;  %278 = vst.msk [vmem:[#allocation2 + $0x28] sm:$0xff] %vm272_vm0, %v1520_v5  ;;  %v1452_v8 = vld [vmem:[%s1620_s28 + $0x84] ss:$8 sps:$4 sm:$0xff]   ;;  %1306 = vmatprep.mubr.msk.bf16.mxu0 %vm589_vm1, %v1449_v7  ;;  %v641_v15 = vsel %vm639_vm3, %v640_v12, 0  ;;  %s1717_s23 = scalar_lea.vmem %s1851_s3, %s1263_s19  ;;  %vm1105_vm4 = vcmask 519168  }
  0x11   : > { %279 = vst.msk [vmem:[#allocation2 + $0x30] sm:$0xff] %vm272_vm0, %v1520_v5  ;;  %280 = vst.msk [vmem:[#allocation2 + $0x38] sm:$0xff] %vm272_vm0, %v1520_v5  ;;  %1314 = vmatprep.mubr.msk.bf16.mxu1 %vm589_vm1, %v1452_v8  ;;  %v1444_v13 = vld [vmem:[%s1849_s1] sm:$0xff]   ;;  %v1445_v14 = vld [vmem:[%s1849_s1 + $0x48] ss:$0 sps:$4 sm:$0x33]  }
  0x12   : > { %648 = vmatpush1.bf16.msra.mxu0 %v1438_v2  ;;  %1401 = vmatpush1.bf16.msra.mxu1 %v1438_v2  ;;  %281 = vst.msk [vmem:[#allocation2 + $0x40] sm:$0xff] %vm272_vm0, %v1520_v5  ;;  %282 = vst.msk [vmem:[#allocation2 + $0x48] sm:$0xff] %vm272_vm0, %v1520_v5  ;;  %v643_v16 = vand.u32 %v1445_v14, %v641_v15  ;;  %v1446_v17 = vld [vmem:[%s1849_s1 + $0x40] sm:$0xff]   ;;  %v1453_v20 = vld [vmem:[%s1620_s28 + $0x14] ss:$8 sps:$4 sm:$0xff]  }
  0x13   : > { %649 = vmatprep.subr.bf16.mxu0 %v1519_v1  ;;  %1392 = vmatprep.subr.bf16.mxu1 %v1519_v1  ;;  %283 = vst.msk [vmem:[#allocation2 + $0x50] sm:$0xff] %vm272_vm0, %v1520_v5  ;;  %284 = vst.msk [vmem:[#allocation2 + $0x58] sm:$0xff] %vm272_vm0, %v1520_v5  ;;  %v1447_v18 = vld [vmem:[%s1620_s28] ss:$8 sps:$4 sm:$0xff]   ;;  %v1455_v21 = vld [vmem:[%s1620_s28 + $0x94] ss:$8 sps:$4 sm:$0xff]  }
  0x14   : > { %285 = vst.msk [vmem:[#allocation2 + $0x60] sm:$0xff] %vm272_vm0, %v1520_v5  ;;  %286 = vst.msk [vmem:[#allocation2 + $0x68] sm:$0xff] %vm272_vm0, %v1520_v5  ;;  %v1450_v19 = vld [vmem:[%s1620_s28 + $0x80] ss:$8 sps:$4 sm:$0xff]   ;;  %v1457_v22 = vld [vmem:[%s1620_s28 + $0x10] ss:$8 sps:$4 sm:$0xff]  }
  0x15   : > { %287 = vst.msk [vmem:[#allocation2 + $0x70] sm:$0xff] %vm272_vm0, %v1520_v5  ;;  %288 = vst.msk [vmem:[#allocation2 + $0x78] sm:$0xff] %vm272_vm0, %v1520_v5  ;;  %v1458_v23 = vld [vmem:[%s1620_s28 + $0x90] ss:$8 sps:$4 sm:$0xff]   ;;  %v1459_v24 = vld [vmem:[%s1620_s28 + $0x24] ss:$8 sps:$4 sm:$0xff]  }
  0x16   : > { %650 = vmatpush1.bf16.msra.mxu0 %v1439_v3  ;;  %1402 = vmatpush1.bf16.msra.mxu1 %v1439_v3  ;;  %289 = vst.msk [vmem:[#allocation2 + $0x80] sm:$0xff] %vm272_vm0, %v1520_v5  ;;  %290 = vst.msk [vmem:[#allocation2 + $0x88] sm:$0xff] %vm272_vm0, %v1520_v5  ;;  %v1461_v25 = vld [vmem:[%s1620_s28 + $0xa4] ss:$8 sps:$4 sm:$0xff]   ;;  %v1463_v26 = vld [vmem:[%s1620_s28 + $0x20] ss:$8 sps:$4 sm:$0xff]  }
  0x17   : > { %651 = vmatprep.subr.bf16.mxu0 %v1519_v1  ;;  %1393 = vmatprep.subr.bf16.mxu1 %v1519_v1  ;;  %291 = vst.msk [vmem:[#allocation2 + $0x90] sm:$0xff] %vm272_vm0, %v1520_v5  ;;  %292 = vst.msk [vmem:[#allocation2 + $0x98] sm:$0xff] %vm272_vm0, %v1520_v5  ;;  %v1464_v27 = vld [vmem:[%s1620_s28 + $0xa0] ss:$8 sps:$4 sm:$0xff]   ;;  %v1465_v28 = vld [vmem:[%s1620_s28 + $0x34] ss:$8 sps:$4 sm:$0xff]  }
  0x18   : > { %293 = vst.msk [vmem:[#allocation2 + $0xa0] sm:$0xff] %vm272_vm0, %v1520_v5  ;;  %294 = vst.msk [vmem:[#allocation2 + $0xa8] sm:$0xff] %vm272_vm0, %v1520_v5  ;;  %v1467_v29 = vld [vmem:[%s1620_s28 + $0xb4] ss:$8 sps:$4 sm:$0xff]   ;;  %v1469_v30 = vld [vmem:[%s1620_s28 + $0x30] ss:$8 sps:$4 sm:$0xff]  }
  0x19   : > { %295 = vst.msk [vmem:[#allocation2 + $0xb0] sm:$0xff] %vm272_vm0, %v1520_v5  ;;  %296 = vst.msk [vmem:[#allocation2 + $0xb8] sm:$0xff] %vm272_vm0, %v1520_v5  ;;  %v1470_v31 = vld [vmem:[%s1620_s28 + $0xb0] ss:$8 sps:$4 sm:$0xff]   ;;  %v1471_v32 = vld [vmem:[%s1620_s28 + $0x44] ss:$8 sps:$4 sm:$0xff]  }
  0x1a   : > { %297 = vst.msk [vmem:[#allocation2 + $0xc0] sm:$0xff] %vm272_vm0, %v1520_v5  ;;  %298 = vst.msk [vmem:[#allocation2 + $0xc8] sm:$0xff] %vm272_vm0, %v1520_v5  ;;  %652 = vmatpush1.bf16.msra.mxu0 %v1440_v4  ;;  %1403 = vmatpush1.bf16.msra.mxu1 %v1440_v4  ;;  %v1473_v33 = vld [vmem:[%s1620_s28 + $0xc4] ss:$8 sps:$4 sm:$0xff]   ;;  %v1475_v34 = vld [vmem:[%s1620_s28 + $0x40] ss:$8 sps:$4 sm:$0xff]  }
  0x1b   : > { %299 = vst.msk [vmem:[#allocation2 + $0xd0] sm:$0xff] %vm272_vm0, %v1520_v5  ;;  %300 = vst.msk [vmem:[#allocation2 + $0xd8] sm:$0xff] %vm272_vm0, %v1520_v5  ;;  %653 = vmatprep.subr.bf16.mxu0 %v1519_v1  ;;  %1394 = vmatprep.subr.bf16.mxu1 %v1519_v1  ;;  %v1476_v35 = vld [vmem:[%s1620_s28 + $0xc0] ss:$8 sps:$4 sm:$0xff]   ;;  %v1477_v36 = vld [vmem:[%s1620_s28 + $0x54] ss:$8 sps:$4 sm:$0xff]  }
  0x1c   : > { %301 = vst.msk [vmem:[#allocation2 + $0xe0] sm:$0xff] %vm272_vm0, %v1520_v5  ;;  %302 = vst.msk [vmem:[#allocation2 + $0xe8] sm:$0xff] %vm272_vm0, %v1520_v5  ;;  %v1479_v37 = vld [vmem:[%s1620_s28 + $0xd4] ss:$8 sps:$4 sm:$0xff]   ;;  %v1481_v38 = vld [vmem:[%s1620_s28 + $0x50] ss:$8 sps:$4 sm:$0xff]  }
  0x1d   : > { %303 = vst.msk [vmem:[#allocation2 + $0xf0] sm:$0xff] %vm272_vm0, %v1520_v5  ;;  %304 = vst.msk [vmem:[#allocation2 + $0xf8] sm:$0xff] %vm272_vm0, %v1520_v5  ;;  %v1482_v39 = vld [vmem:[%s1620_s28 + $0xd0] ss:$8 sps:$4 sm:$0xff]   ;;  %v1483_v40 = vld [vmem:[%s1620_s28 + $0x64] ss:$8 sps:$4 sm:$0xff]  }
  0x1e   : > { %654 = vmatpush1.bf16.msra.mxu0 %v1441_v6  ;;  %1404 = vmatpush1.bf16.msra.mxu1 %v1441_v6  ;;  %v1485_v41 = vld [vmem:[%s1620_s28 + $0xe4] ss:$8 sps:$4 sm:$0xff]   ;;  %v1487_v42 = vld [vmem:[%s1620_s28 + $0x60] ss:$8 sps:$4 sm:$0xff]   ;;  %v1489_v44 = vld [vmem:[%s1620_s28 + $0x74] ss:$8 sps:$4 sm:$0xff]  }
  0x1f   : > { %655 = vmatprep.subr.bf16.mxu0 %v1519_v1  ;;  %1395 = vmatprep.subr.bf16.mxu1 %v1519_v1  ;;  %v1488_v43 = vld [vmem:[%s1620_s28 + $0xe0] ss:$8 sps:$4 sm:$0xff]   ;;  %v1491_v45 = vld [vmem:[%s1620_s28 + $0xf4] ss:$8 sps:$4 sm:$0xff]   ;;  %v1493_v46 = vld [vmem:[%s1620_s28 + $0x70] ss:$8 sps:$4 sm:$0xff]  }
  0x20   : > { %v1494_v47 = vld [vmem:[%s1620_s28 + $0xf0] ss:$8 sps:$4 sm:$0xff]   ;;  %v305_v48 = vld [vmem:[#allocation2] sm:$0xff]  ;;  %v306_v56 = vld [vmem:[#allocation2 + $0x8] sm:$0xff] }
  0x21   : > { %v321_v49 = vld [vmem:[#allocation2 + $0x80] sm:$0xff]  ;;  %v322_v57 = vld [vmem:[#allocation2 + $0x88] sm:$0xff]  ;;  %v307_v0 = vld [vmem:[#allocation2 + $0x10] sm:$0xff] }
  0x22   : > { %656 = vmatpush1.bf16.msra.mxu0 %v1442_v9  ;;  %1405 = vmatpush1.bf16.msra.mxu1 %v1442_v9  ;;  %v1707_v2 = vld [vmem:[%s1850_s2] ss:$0 sm:$0xff]  ;;  %v308_v7 = vld [vmem:[#allocation2 + $0x18] sm:$0xff] }
  0x23   : > { %657 = vmatprep.subr.bf16.mxu0 %v1519_v1  ;;  %1396 = vmatprep.subr.bf16.mxu1 %v1519_v1  ;;  %v324_v12 = vld [vmem:[#allocation2 + $0x98] sm:$0xff] }
  0x26   : > { %658 = vmatpush1.bf16.msra.mxu0 %v1443_v10  ;;  %1406 = vmatpush1.bf16.msra.mxu1 %v1443_v10 }
  0x27   : > { %659 = vmatprep.subr.bf16.mxu0 %v1519_v1  ;;  %1397 = vmatprep.subr.bf16.mxu1 %v1519_v1 }
  0x2a   : > { %660 = vmatpush1.bf16.msra.mxu0 %v1444_v13  ;;  %1407 = vmatpush1.bf16.msra.mxu1 %v1444_v13 }
  0x2b   : > { %673 = vmatprep.subr.bf16.mxu0 %v1519_v1  ;;  %1398 = vmatprep.subr.bf16.mxu1 %v1519_v1 }
  0x2e   : > { %674 = vmatpush2.bf16.msra.mxu0 %v643_v16  ;;  %1408 = vmatpush2.bf16.msra.mxu1 %v643_v16 }
  0x2f   : > { %675 = vmatprep.subr.bf16.mxu0 %v1519_v1  ;;  %1399 = vmatprep.subr.bf16.mxu1 %v1519_v1  ;;  %v323_v1 = vld [vmem:[#allocation2 + $0x90] sm:$0xff] }
  0x32   : > { %676 = vmatpush2.bf16.msra.mxu0 %v1446_v17  ;;  %1409 = vmatpush2.bf16.msra.mxu1 %v1446_v17 }
  0x35   : > { %678 = vmatmul.mubr.bf16.vlgmr.msra.gmra.mxu0 %v1447_v18  ;;  %742 = vmatmul.mubr.bf16.vlgmr.msra.gmra.mxu1 %v1450_v19 }
  0x36   : > { %1307 = vmatprep.mubr.msk.bf16.mxu0 %vm589_vm1, %v1453_v20  ;;  %1315 = vmatprep.mubr.msk.bf16.mxu1 %vm589_vm1, %v1455_v21  ;;  %v309_v21 = vld [vmem:[#allocation2 + $0x20] sm:$0xff] }
  0x3d   : > { %686 = vmatmul.mubr.bf16.gmra.mxu0 %v1457_v22  ;;  %750 = vmatmul.mubr.bf16.gmra.mxu1 %v1458_v23 }
  0x3e   : > { %1308 = vmatprep.mubr.msk.bf16.mxu0 %vm589_vm1, %v1459_v24  ;;  %1316 = vmatprep.mubr.msk.bf16.mxu1 %vm589_vm1, %v1461_v25 }
  0x45   : > { %694 = vmatmul.mubr.bf16.gmra.mxu0 %v1463_v26  ;;  %758 = vmatmul.mubr.bf16.gmra.mxu1 %v1464_v27  ;;  %v325_v26 = vld [vmem:[#allocation2 + $0xa0] sm:$0xff] }
  0x46   : > { %1309 = vmatprep.mubr.msk.bf16.mxu0 %vm589_vm1, %v1465_v28  ;;  %1317 = vmatprep.mubr.msk.bf16.mxu1 %vm589_vm1, %v1467_v29 }
  0x4d   : > { %702 = vmatmul.mubr.bf16.gmra.mxu0 %v1469_v30  ;;  %766 = vmatmul.mubr.bf16.gmra.mxu1 %v1470_v31 }
  0x4e   : > { %1310 = vmatprep.mubr.msk.bf16.mxu0 %vm589_vm1, %v1471_v32  ;;  %1318 = vmatprep.mubr.msk.bf16.mxu1 %vm589_vm1, %v1473_v33 }
  0x55   : > { %710 = vmatmul.mubr.bf16.gmra.mxu0 %v1475_v34  ;;  %774 = vmatmul.mubr.bf16.gmra.mxu1 %v1476_v35 }
  0x56   : > { %1311 = vmatprep.mubr.msk.bf16.mxu0 %vm589_vm1, %v1477_v36  ;;  %1319 = vmatprep.mubr.msk.bf16.mxu1 %vm589_vm1, %v1479_v37  ;;  %v310_v37 = vld [vmem:[#allocation2 + $0x28] sm:$0xff] }
  0x5d   : > { %718 = vmatmul.mubr.bf16.gmra.mxu0 %v1481_v38  ;;  %782 = vmatmul.mubr.bf16.gmra.mxu1 %v1482_v39 }
  0x5e   : > { %1312 = vmatprep.mubr.msk.bf16.mxu0 %vm589_vm1, %v1483_v40  ;;  %1320 = vmatprep.mubr.msk.bf16.mxu1 %vm589_vm1, %v1485_v41 }
  0x65   : > { %726 = vmatmul.mubr.bf16.gmra.mxu0 %v1487_v42  ;;  %790 = vmatmul.mubr.bf16.gmra.mxu1 %v1488_v43  ;;  %v326_v42 = vld [vmem:[#allocation2 + $0xa8] sm:$0xff] }
  0x66   : > { %1313 = vmatprep.mubr.msk.bf16.mxu0 %vm589_vm1, %v1489_v44  ;;  %1321 = vmatprep.mubr.msk.bf16.mxu1 %vm589_vm1, %v1491_v45 }
  0x6d   : > { %734 = vmatmul.mubr.bf16.gmra.mxu0 %v1493_v46  ;;  %798 = vmatmul.mubr.bf16.gmra.mxu1 %v1494_v47 }
  0xf5   : > { %v679_v50 = vpop.f32.mrf.mxu0  ;;  %v743_v51 = vpop.f32.mrf.mxu1 }
  0xf6   : > { %v806_v52 = vadd.f32 %v679_v50, %v305_v48  ;;  %v822_v53 = vadd.f32 %v743_v51, %v321_v49 }
  0xf7   : > { %v681_v54 = vpop.f32.mrf.mxu0  ;;  %v745_v55 = vpop.f32.mrf.mxu1 }
  0xf8   : > { %839 = vst.msk [vmem:[#allocation2] sm:$0xff] %vm272_vm0, %v806_v52  ;;  %855 = vst.msk [vmem:[#allocation2 + $0x80] sm:$0xff] %vm272_vm0, %v822_v53  ;;  %v311_v53 = vld [vmem:[#allocation2 + $0x30] sm:$0xff] }
  0xf9   : > { %v682_v58 = vpop.f32.mrf.mxu0  ;;  %v746_v59 = vpop.f32.mrf.mxu1 }
  0xfa   : > { %v807_v60 = vadd.f32 %v682_v58, %v306_v56  ;;  %v823_v61 = vadd.f32 %v746_v59, %v322_v57  ;;  %v327_v58 = vld [vmem:[#allocation2 + $0xb0] sm:$0xff] }
  0xfb   : > { %v684_v62 = vpop.f32.mrf.mxu0  ;;  %v748_v63 = vpop.f32.mrf.mxu1 }
  0xfc   : > { %840 = vst.msk [vmem:[#allocation2 + $0x8] sm:$0xff] %vm272_vm0, %v807_v60  ;;  %856 = vst.msk [vmem:[#allocation2 + $0x88] sm:$0xff] %vm272_vm0, %v823_v61 }
  0xfd   : > { %v687_v3 = vpop.f32.mrf.mxu0  ;;  %v751_v4 = vpop.f32.mrf.mxu1 }
  0xfe   : > { %v808_v5 = vadd.f32 %v687_v3, %v307_v0  ;;  %v824_v6 = vadd.f32 %v751_v4, %v323_v1 }
  0xff   : > { %v874_v8 = vld [vmem:[#allocation2] sm:$0xff]  ;;  %v689_v10 = vpop.f32.mrf.mxu0  ;;  %v753_v11 = vpop.f32.mrf.mxu1 }
 0x100   : > { %v890_v9 = vld [vmem:[#allocation2 + $0x80] sm:$0xff]  ;;  %v913_v13 = vadd.f32 %v1707_v2, %v874_v8  ;;  %841 = vst.msk [vmem:[#allocation2 + $0x10] sm:$0xff] %vm272_vm0, %v808_v5  ;;  %857 = vst.msk [vmem:[#allocation2 + $0x90] sm:$0xff] %vm272_vm0, %v824_v6  ;;  %v312_v6 = vld [vmem:[#allocation2 + $0x38] sm:$0xff] }
 0x101   : > { %v929_v14 = vadd.f32 %v1707_v2, %v890_v9  ;;  %v690_v15 = vpop.f32.mrf.mxu0  ;;  %v754_v16 = vpop.f32.mrf.mxu1  ;;  %v328_v11 = vld [vmem:[#allocation2 + $0xb8] sm:$0xff] }
 0x102   : > { %v945_v17 = vmax.f32 %v913_v13, 0.0  ;;  %v809_v19 = vadd.f32 %v690_v15, %v308_v7  ;;  %v825_v20 = vadd.f32 %v754_v16, %v324_v12 }
 0x103   : > { %v961_v18 = vmax.f32 %v929_v14, 0.0  ;;  %v875_v22 = vld [vmem:[#allocation2 + $0x8] sm:$0xff]  ;;  %v692_v24 = vpop.f32.mrf.mxu0  ;;  %v756_v25 = vpop.f32.mrf.mxu1 }
 0x104   : > { %v891_v23 = vld [vmem:[#allocation2 + $0x88] sm:$0xff]  ;;  %v1358_v27 = vpack.c.bf16 %v945_v17, %v945_v17  ;;  %v914_v29 = vadd.f32 %v1707_v2, %v875_v22  ;;  %842 = vst.msk [vmem:[#allocation2 + $0x18] sm:$0xff] %vm272_vm0, %v809_v19  ;;  %858 = vst.msk [vmem:[#allocation2 + $0x98] sm:$0xff] %vm272_vm0, %v825_v20  ;;  %v313_v22 = vld [vmem:[#allocation2 + $0x40] sm:$0xff] }
 0x105   : > { %v1374_v28 = vpack.c.bf16 %v961_v18, %v961_v18  ;;  %v930_v30 = vadd.f32 %v1707_v2, %v891_v23  ;;  %v695_v31 = vpop.f32.mrf.mxu0  ;;  %v759_v32 = vpop.f32.mrf.mxu1 }
 0x106   : > { %1106 = vst.msk [vmem:[%s1717_s23] sm:$0xf] %vm1105_vm4, %v1358_v27  ;;  %v946_v33 = vmax.f32 %v914_v29, 0.0  ;;  %v810_v35 = vadd.f32 %v695_v31, %v309_v21  ;;  %v826_v36 = vadd.f32 %v759_v32, %v325_v26  ;;  %v329_v27 = vld [vmem:[#allocation2 + $0xc0] sm:$0xff] }
 0x107   : > { %1122 = vst.msk [vmem:[%s1717_s23 + $0x40] sm:$0xf] %vm1105_vm4, %v1374_v28  ;;  %v962_v34 = vmax.f32 %v930_v30, 0.0  ;;  %v876_v38 = vld [vmem:[#allocation2 + $0x10] sm:$0xff]  ;;  %v697_v40 = vpop.f32.mrf.mxu0  ;;  %v761_v41 = vpop.f32.mrf.mxu1 }
 0x108   : > { %v892_v39 = vld [vmem:[#allocation2 + $0x90] sm:$0xff]  ;;  %v1359_v43 = vpack.c.bf16 %v946_v33, %v946_v33  ;;  %v915_v45 = vadd.f32 %v1707_v2, %v876_v38  ;;  %843 = vst.msk [vmem:[#allocation2 + $0x20] sm:$0xff] %vm272_vm0, %v810_v35  ;;  %859 = vst.msk [vmem:[#allocation2 + $0xa0] sm:$0xff] %vm272_vm0, %v826_v36  ;;  %v314_v38 = vld [vmem:[#allocation2 + $0x48] sm:$0xff] }
 0x109   : > { %v1375_v44 = vpack.c.bf16 %v962_v34, %v962_v34  ;;  %v931_v46 = vadd.f32 %v1707_v2, %v892_v39  ;;  %v698_v47 = vpop.f32.mrf.mxu0  ;;  %v762_v48 = vpop.f32.mrf.mxu1 }
 0x10a   : > { %1107 = vst.msk [vmem:[%s1717_s23 + $0x4] sm:$0xf] %vm1105_vm4, %v1359_v43  ;;  %v947_v49 = vmax.f32 %v915_v45, 0.0  ;;  %v811_v51 = vadd.f32 %v698_v47, %v310_v37  ;;  %v827_v52 = vadd.f32 %v762_v48, %v326_v42  ;;  %v330_v43 = vld [vmem:[#allocation2 + $0xc8] sm:$0xff] }
 0x10b   : > { %1123 = vst.msk [vmem:[%s1717_s23 + $0x44] sm:$0xf] %vm1105_vm4, %v1375_v44  ;;  %v963_v50 = vmax.f32 %v931_v46, 0.0  ;;  %v877_v54 = vld [vmem:[#allocation2 + $0x18] sm:$0xff]  ;;  %v700_v56 = vpop.f32.mrf.mxu0  ;;  %v764_v57 = vpop.f32.mrf.mxu1 }
 0x10c   : > { %v893_v55 = vld [vmem:[#allocation2 + $0x98] sm:$0xff]  ;;  %v1360_v59 = vpack.c.bf16 %v947_v49, %v947_v49  ;;  %v916_v61 = vadd.f32 %v1707_v2, %v877_v54  ;;  %844 = vst.msk [vmem:[#allocation2 + $0x28] sm:$0xff] %vm272_vm0, %v811_v51  ;;  %860 = vst.msk [vmem:[#allocation2 + $0xa8] sm:$0xff] %vm272_vm0, %v827_v52  ;;  %v315_v54 = vld [vmem:[#allocation2 + $0x50] sm:$0xff] }
 0x10d   : > { %v1376_v60 = vpack.c.bf16 %v963_v50, %v963_v50  ;;  %v932_v62 = vadd.f32 %v1707_v2, %v893_v55  ;;  %v703_v63 = vpop.f32.mrf.mxu0  ;;  %v767_v0 = vpop.f32.mrf.mxu1 }
 0x10e   : > { %1108 = vst.msk [vmem:[%s1717_s23 + $0x8] sm:$0xf] %vm1105_vm4, %v1360_v59  ;;  %v948_v1 = vmax.f32 %v916_v61, 0.0  ;;  %v812_v4 = vadd.f32 %v703_v63, %v311_v53  ;;  %v828_v5 = vadd.f32 %v767_v0, %v327_v58  ;;  %v331_v59 = vld [vmem:[#allocation2 + $0xd0] sm:$0xff] }
 0x10f   : > { %1124 = vst.msk [vmem:[%s1717_s23 + $0x48] sm:$0xf] %vm1105_vm4, %v1376_v60  ;;  %v964_v3 = vmax.f32 %v932_v62, 0.0  ;;  %v878_v7 = vld [vmem:[#allocation2 + $0x20] sm:$0xff]  ;;  %v705_v9 = vpop.f32.mrf.mxu0  ;;  %v769_v10 = vpop.f32.mrf.mxu1 }
 0x110   : > { %v894_v8 = vld [vmem:[#allocation2 + $0xa0] sm:$0xff]  ;;  %v1361_v12 = vpack.c.bf16 %v948_v1, %v948_v1  ;;  %v917_v14 = vadd.f32 %v1707_v2, %v878_v7  ;;  %845 = vst.msk [vmem:[#allocation2 + $0x30] sm:$0xff] %vm272_vm0, %v812_v4  ;;  %861 = vst.msk [vmem:[#allocation2 + $0xb0] sm:$0xff] %vm272_vm0, %v828_v5  ;;  %v316_v7 = vld [vmem:[#allocation2 + $0x58] sm:$0xff] }
 0x111   : > { %v1377_v13 = vpack.c.bf16 %v964_v3, %v964_v3  ;;  %v933_v15 = vadd.f32 %v1707_v2, %v894_v8  ;;  %v706_v16 = vpop.f32.mrf.mxu0  ;;  %v770_v17 = vpop.f32.mrf.mxu1 }
 0x112   : > { %1109 = vst.msk [vmem:[%s1717_s23 + $0xc] sm:$0xf] %vm1105_vm4, %v1361_v12  ;;  %v949_v18 = vmax.f32 %v917_v14, 0.0  ;;  %v813_v20 = vadd.f32 %v706_v16, %v312_v6  ;;  %v829_v21 = vadd.f32 %v770_v17, %v328_v11  ;;  %v332_v12 = vld [vmem:[#allocation2 + $0xd8] sm:$0xff] }
 0x113   : > { %1125 = vst.msk [vmem:[%s1717_s23 + $0x4c] sm:$0xf] %vm1105_vm4, %v1377_v13  ;;  %v965_v19 = vmax.f32 %v933_v15, 0.0  ;;  %v879_v23 = vld [vmem:[#allocation2 + $0x28] sm:$0xff]  ;;  %v708_v25 = vpop.f32.mrf.mxu0  ;;  %v772_v26 = vpop.f32.mrf.mxu1 }
 0x114   : > { %v895_v24 = vld [vmem:[#allocation2 + $0xa8] sm:$0xff]  ;;  %v1362_v28 = vpack.c.bf16 %v949_v18, %v949_v18  ;;  %v918_v30 = vadd.f32 %v1707_v2, %v879_v23  ;;  %846 = vst.msk [vmem:[#allocation2 + $0x38] sm:$0xff] %vm272_vm0, %v813_v20  ;;  %862 = vst.msk [vmem:[#allocation2 + $0xb8] sm:$0xff] %vm272_vm0, %v829_v21  ;;  %v317_v23 = vld [vmem:[#allocation2 + $0x60] sm:$0xff] }
 0x115   : > { %v1378_v29 = vpack.c.bf16 %v965_v19, %v965_v19  ;;  %v934_v31 = vadd.f32 %v1707_v2, %v895_v24  ;;  %v711_v32 = vpop.f32.mrf.mxu0  ;;  %v775_v33 = vpop.f32.mrf.mxu1 }
 0x116   : > { %1110 = vst.msk [vmem:[%s1717_s23 + $0x10] sm:$0xf] %vm1105_vm4, %v1362_v28  ;;  %v950_v34 = vmax.f32 %v918_v30, 0.0  ;;  %v814_v36 = vadd.f32 %v711_v32, %v313_v22  ;;  %v830_v37 = vadd.f32 %v775_v33, %v329_v27  ;;  %v333_v28 = vld [vmem:[#allocation2 + $0xe0] sm:$0xff] }
 0x117   : > { %1126 = vst.msk [vmem:[%s1717_s23 + $0x50] sm:$0xf] %vm1105_vm4, %v1378_v29  ;;  %v966_v35 = vmax.f32 %v934_v31, 0.0  ;;  %v880_v39 = vld [vmem:[#allocation2 + $0x30] sm:$0xff]  ;;  %v713_v41 = vpop.f32.mrf.mxu0  ;;  %v777_v42 = vpop.f32.mrf.mxu1 }
 0x118   : > { %v896_v40 = vld [vmem:[#allocation2 + $0xb0] sm:$0xff]  ;;  %v1363_v44 = vpack.c.bf16 %v950_v34, %v950_v34  ;;  %v919_v46 = vadd.f32 %v1707_v2, %v880_v39  ;;  %847 = vst.msk [vmem:[#allocation2 + $0x40] sm:$0xff] %vm272_vm0, %v814_v36  ;;  %863 = vst.msk [vmem:[#allocation2 + $0xc0] sm:$0xff] %vm272_vm0, %v830_v37  ;;  %v318_v39 = vld [vmem:[#allocation2 + $0x68] sm:$0xff] }
 0x119   : > { %v1379_v45 = vpack.c.bf16 %v966_v35, %v966_v35  ;;  %v935_v47 = vadd.f32 %v1707_v2, %v896_v40  ;;  %v714_v48 = vpop.f32.mrf.mxu0  ;;  %v778_v49 = vpop.f32.mrf.mxu1 }
 0x11a   : > { %1111 = vst.msk [vmem:[%s1717_s23 + $0x14] sm:$0xf] %vm1105_vm4, %v1363_v44  ;;  %v951_v50 = vmax.f32 %v919_v46, 0.0  ;;  %v815_v52 = vadd.f32 %v714_v48, %v314_v38  ;;  %v831_v53 = vadd.f32 %v778_v49, %v330_v43  ;;  %v334_v44 = vld [vmem:[#allocation2 + $0xe8] sm:$0xff] }
 0x11b   : > { %1127 = vst.msk [vmem:[%s1717_s23 + $0x54] sm:$0xf] %vm1105_vm4, %v1379_v45  ;;  %v967_v51 = vmax.f32 %v935_v47, 0.0  ;;  %v881_v55 = vld [vmem:[#allocation2 + $0x38] sm:$0xff]  ;;  %v716_v57 = vpop.f32.mrf.mxu0  ;;  %v780_v58 = vpop.f32.mrf.mxu1 }
 0x11c   : > { %v897_v56 = vld [vmem:[#allocation2 + $0xb8] sm:$0xff]  ;;  %v1364_v60 = vpack.c.bf16 %v951_v50, %v951_v50  ;;  %v920_v62 = vadd.f32 %v1707_v2, %v881_v55  ;;  %848 = vst.msk [vmem:[#allocation2 + $0x48] sm:$0xff] %vm272_vm0, %v815_v52  ;;  %864 = vst.msk [vmem:[#allocation2 + $0xc8] sm:$0xff] %vm272_vm0, %v831_v53  ;;  %v319_v55 = vld [vmem:[#allocation2 + $0x70] sm:$0xff] }
 0x11d   : > { %v1380_v61 = vpack.c.bf16 %v967_v51, %v967_v51  ;;  %v936_v63 = vadd.f32 %v1707_v2, %v897_v56  ;;  %v719_v0 = vpop.f32.mrf.mxu0  ;;  %v783_v1 = vpop.f32.mrf.mxu1 }
 0x11e   : > { %1112 = vst.msk [vmem:[%s1717_s23 + $0x18] sm:$0xf] %vm1105_vm4, %v1364_v60  ;;  %v952_v3 = vmax.f32 %v920_v62, 0.0  ;;  %v816_v5 = vadd.f32 %v719_v0, %v315_v54  ;;  %v832_v6 = vadd.f32 %v783_v1, %v331_v59  ;;  %v335_v60 = vld [vmem:[#allocation2 + $0xf0] sm:$0xff] }
 0x11f   : > { %1128 = vst.msk [vmem:[%s1717_s23 + $0x58] sm:$0xf] %vm1105_vm4, %v1380_v61  ;;  %v968_v4 = vmax.f32 %v936_v63, 0.0  ;;  %v882_v8 = vld [vmem:[#allocation2 + $0x40] sm:$0xff]  ;;  %v721_v10 = vpop.f32.mrf.mxu0  ;;  %v785_v11 = vpop.f32.mrf.mxu1 }
 0x120   : > { %v898_v9 = vld [vmem:[#allocation2 + $0xc0] sm:$0xff]  ;;  %v1365_v13 = vpack.c.bf16 %v952_v3, %v952_v3  ;;  %v921_v15 = vadd.f32 %v1707_v2, %v882_v8  ;;  %849 = vst.msk [vmem:[#allocation2 + $0x50] sm:$0xff] %vm272_vm0, %v816_v5  ;;  %865 = vst.msk [vmem:[#allocation2 + $0xd0] sm:$0xff] %vm272_vm0, %v832_v6  ;;  %v320_v8 = vld [vmem:[#allocation2 + $0x78] sm:$0xff] }
 0x121   : > { %v1381_v14 = vpack.c.bf16 %v968_v4, %v968_v4  ;;  %v937_v16 = vadd.f32 %v1707_v2, %v898_v9  ;;  %v722_v17 = vpop.f32.mrf.mxu0  ;;  %v786_v18 = vpop.f32.mrf.mxu1 }
 0x122   : > { %1113 = vst.msk [vmem:[%s1717_s23 + $0x1c] sm:$0xf] %vm1105_vm4, %v1365_v13  ;;  %v953_v19 = vmax.f32 %v921_v15, 0.0  ;;  %v817_v21 = vadd.f32 %v722_v17, %v316_v7  ;;  %v833_v22 = vadd.f32 %v786_v18, %v332_v12  ;;  %v336_v13 = vld [vmem:[#allocation2 + $0xf8] sm:$0xff] }
 0x123   : > { %1129 = vst.msk [vmem:[%s1717_s23 + $0x5c] sm:$0xf] %vm1105_vm4, %v1381_v14  ;;  %v969_v20 = vmax.f32 %v937_v16, 0.0  ;;  %v883_v24 = vld [vmem:[#allocation2 + $0x48] sm:$0xff]  ;;  %v724_v26 = vpop.f32.mrf.mxu0  ;;  %v788_v27 = vpop.f32.mrf.mxu1 }
 0x124   : > { %v899_v25 = vld [vmem:[#allocation2 + $0xc8] sm:$0xff]  ;;  %v1366_v29 = vpack.c.bf16 %v953_v19, %v953_v19  ;;  %v922_v31 = vadd.f32 %v1707_v2, %v883_v24  ;;  %850 = vst.msk [vmem:[#allocation2 + $0x58] sm:$0xff] %vm272_vm0, %v817_v21  ;;  %866 = vst.msk [vmem:[#allocation2 + $0xd8] sm:$0xff] %vm272_vm0, %v833_v22 }
 0x125   : > { %v1382_v30 = vpack.c.bf16 %v969_v20, %v969_v20  ;;  %v938_v32 = vadd.f32 %v1707_v2, %v899_v25  ;;  %v727_v33 = vpop.f32.mrf.mxu0  ;;  %v791_v34 = vpop.f32.mrf.mxu1 }
 0x126   : > { %1114 = vst.msk [vmem:[%s1717_s23 + $0x20] sm:$0xf] %vm1105_vm4, %v1366_v29  ;;  %v954_v35 = vmax.f32 %v922_v31, 0.0  ;;  %v818_v37 = vadd.f32 %v727_v33, %v317_v23  ;;  %v834_v38 = vadd.f32 %v791_v34, %v333_v28 }
 0x127   : > { %1130 = vst.msk [vmem:[%s1717_s23 + $0x60] sm:$0xf] %vm1105_vm4, %v1382_v30  ;;  %v970_v36 = vmax.f32 %v938_v32, 0.0  ;;  %v884_v40 = vld [vmem:[#allocation2 + $0x50] sm:$0xff]  ;;  %v729_v42 = vpop.f32.mrf.mxu0  ;;  %v793_v43 = vpop.f32.mrf.mxu1 }
 0x128   : > { %v900_v41 = vld [vmem:[#allocation2 + $0xd0] sm:$0xff]  ;;  %v1367_v45 = vpack.c.bf16 %v954_v35, %v954_v35  ;;  %v923_v47 = vadd.f32 %v1707_v2, %v884_v40  ;;  %851 = vst.msk [vmem:[#allocation2 + $0x60] sm:$0xff] %vm272_vm0, %v818_v37  ;;  %867 = vst.msk [vmem:[#allocation2 + $0xe0] sm:$0xff] %vm272_vm0, %v834_v38 }
 0x129   : > { %v1383_v46 = vpack.c.bf16 %v970_v36, %v970_v36  ;;  %v939_v48 = vadd.f32 %v1707_v2, %v900_v41  ;;  %v730_v49 = vpop.f32.mrf.mxu0  ;;  %v794_v50 = vpop.f32.mrf.mxu1 }
 0x12a   : > { %1115 = vst.msk [vmem:[%s1717_s23 + $0x24] sm:$0xf] %vm1105_vm4, %v1367_v45  ;;  %v955_v51 = vmax.f32 %v923_v47, 0.0  ;;  %v819_v53 = vadd.f32 %v730_v49, %v318_v39  ;;  %v835_v54 = vadd.f32 %v794_v50, %v334_v44 }
 0x12b   : > { %1131 = vst.msk [vmem:[%s1717_s23 + $0x64] sm:$0xf] %vm1105_vm4, %v1383_v46  ;;  %v971_v52 = vmax.f32 %v939_v48, 0.0  ;;  %v885_v56 = vld [vmem:[#allocation2 + $0x58] sm:$0xff]  ;;  %v732_v58 = vpop.f32.mrf.mxu0  ;;  %v796_v59 = vpop.f32.mrf.mxu1 }
 0x12c   : > { %v901_v57 = vld [vmem:[#allocation2 + $0xd8] sm:$0xff]  ;;  %v1368_v61 = vpack.c.bf16 %v955_v51, %v955_v51  ;;  %v924_v63 = vadd.f32 %v1707_v2, %v885_v56  ;;  %852 = vst.msk [vmem:[#allocation2 + $0x68] sm:$0xff] %vm272_vm0, %v819_v53  ;;  %868 = vst.msk [vmem:[#allocation2 + $0xe8] sm:$0xff] %vm272_vm0, %v835_v54 }
 0x12d   : > { %v1384_v62 = vpack.c.bf16 %v971_v52, %v971_v52  ;;  %v940_v0 = vadd.f32 %v1707_v2, %v901_v57  ;;  %v735_v1 = vpop.f32.mrf.mxu0  ;;  %v799_v3 = vpop.f32.mrf.mxu1 }
 0x12e   : > { %1116 = vst.msk [vmem:[%s1717_s23 + $0x28] sm:$0xf] %vm1105_vm4, %v1368_v61  ;;  %v956_v4 = vmax.f32 %v924_v63, 0.0  ;;  %v820_v6 = vadd.f32 %v735_v1, %v319_v55  ;;  %v836_v7 = vadd.f32 %v799_v3, %v335_v60 }
 0x12f   : > { %1132 = vst.msk [vmem:[%s1717_s23 + $0x68] sm:$0xf] %vm1105_vm4, %v1384_v62  ;;  %v972_v5 = vmax.f32 %v940_v0, 0.0  ;;  %v886_v9 = vld [vmem:[#allocation2 + $0x60] sm:$0xff]  ;;  %v737_v11 = vpop.f32.mrf.mxu0  ;;  %v801_v12 = vpop.f32.mrf.mxu1 }
 0x130   : > { %v902_v10 = vld [vmem:[#allocation2 + $0xe0] sm:$0xff]  ;;  %v1369_v14 = vpack.c.bf16 %v956_v4, %v956_v4  ;;  %v925_v16 = vadd.f32 %v1707_v2, %v886_v9  ;;  %853 = vst.msk [vmem:[#allocation2 + $0x70] sm:$0xff] %vm272_vm0, %v820_v6  ;;  %869 = vst.msk [vmem:[#allocation2 + $0xf0] sm:$0xff] %vm272_vm0, %v836_v7 }
 0x131   : > { %v1385_v15 = vpack.c.bf16 %v972_v5, %v972_v5  ;;  %v941_v17 = vadd.f32 %v1707_v2, %v902_v10  ;;  %v738_v18 = vpop.f32.mrf.mxu0  ;;  %v802_v19 = vpop.f32.mrf.mxu1 }
 0x132   : > { %1117 = vst.msk [vmem:[%s1717_s23 + $0x2c] sm:$0xf] %vm1105_vm4, %v1369_v14  ;;  %v957_v20 = vmax.f32 %v925_v16, 0.0  ;;  %v821_v22 = vadd.f32 %v738_v18, %v320_v8  ;;  %v837_v23 = vadd.f32 %v802_v19, %v336_v13 }
 0x133   : > { %1133 = vst.msk [vmem:[%s1717_s23 + $0x6c] sm:$0xf] %vm1105_vm4, %v1385_v15  ;;  %v973_v21 = vmax.f32 %v941_v17, 0.0  ;;  %v887_v24 = vld [vmem:[#allocation2 + $0x68] sm:$0xff]  ;;  %v740_v26 = vpop.f32.mrf.mxu0  ;;  %v804_v27 = vpop.f32.mrf.mxu1 }
 0x134   : > { %v903_v25 = vld [vmem:[#allocation2 + $0xe8] sm:$0xff]  ;;  %v1370_v28 = vpack.c.bf16 %v957_v20, %v957_v20  ;;  %v926_v30 = vadd.f32 %v1707_v2, %v887_v24  ;;  %854 = vst.msk [vmem:[#allocation2 + $0x78] sm:$0xff] %vm272_vm0, %v821_v22  ;;  %870 = vst.msk [vmem:[#allocation2 + $0xf8] sm:$0xff] %vm272_vm0, %v837_v23 }
 0x135   : > { %v1386_v29 = vpack.c.bf16 %v973_v21, %v973_v21  ;;  %v942_v31 = vadd.f32 %v1707_v2, %v903_v25 }
 0x136   : > { %1118 = vst.msk [vmem:[%s1717_s23 + $0x30] sm:$0xf] %vm1105_vm4, %v1370_v28  ;;  %v958_v32 = vmax.f32 %v926_v30, 0.0 }
 0x137   : > { %1134 = vst.msk [vmem:[%s1717_s23 + $0x70] sm:$0xf] %vm1105_vm4, %v1386_v29  ;;  %v974_v33 = vmax.f32 %v942_v31, 0.0  ;;  %v888_v34 = vld [vmem:[#allocation2 + $0x70] sm:$0xff] }
 0x138   : > { %v904_v35 = vld [vmem:[#allocation2 + $0xf0] sm:$0xff]  ;;  %v1371_v36 = vpack.c.bf16 %v958_v32, %v958_v32  ;;  %v927_v38 = vadd.f32 %v1707_v2, %v888_v34 }
 0x139   : > { %v1387_v37 = vpack.c.bf16 %v974_v33, %v974_v33  ;;  %v943_v39 = vadd.f32 %v1707_v2, %v904_v35 }
 0x13a   : > { %1119 = vst.msk [vmem:[%s1717_s23 + $0x34] sm:$0xf] %vm1105_vm4, %v1371_v36  ;;  %v959_v40 = vmax.f32 %v927_v38, 0.0 }
 0x13b   : > { %1135 = vst.msk [vmem:[%s1717_s23 + $0x74] sm:$0xf] %vm1105_vm4, %v1387_v37  ;;  %v975_v41 = vmax.f32 %v943_v39, 0.0  ;;  %v889_v42 = vld [vmem:[#allocation2 + $0x78] sm:$0xff] }
 0x13c   : > { %v905_v43 = vld [vmem:[#allocation2 + $0xf8] sm:$0xff]  ;;  %v1372_v44 = vpack.c.bf16 %v959_v40, %v959_v40  ;;  %v928_v46 = vadd.f32 %v1707_v2, %v889_v42 }
 0x13d   : > { %v1388_v45 = vpack.c.bf16 %v975_v41, %v975_v41  ;;  %v944_v47 = vadd.f32 %v1707_v2, %v905_v43 }
 0x13e   : > { %1120 = vst.msk [vmem:[%s1717_s23 + $0x38] sm:$0xf] %vm1105_vm4, %v1372_v44  ;;  %v960_v48 = vmax.f32 %v928_v46, 0.0 }
 0x13f   : > { %1136 = vst.msk [vmem:[%s1717_s23 + $0x78] sm:$0xf] %vm1105_vm4, %v1388_v45  ;;  %v976_v49 = vmax.f32 %v944_v47, 0.0 }
 0x140   : > { %v1373_v50 = vpack.c.bf16 %v960_v48, %v960_v48 }
 0x141   : > { %v1389_v51 = vpack.c.bf16 %v976_v49, %v976_v49 }
 0x142   : > { %1121 = vst.msk [vmem:[%s1717_s23 + $0x3c] sm:$0xf] %vm1105_vm4, %v1373_v50 }
 0x143   : > { %1137 = vst.msk [vmem:[%s1717_s23 + $0x7c] sm:$0xf] %vm1105_vm4, %v1389_v51 }
 0x144 PF: > { %s13_s14 = sadd.s32 1, %s1517_s14   ;;  %s1852_s12 = smov %s1513_s13 }
 0x145   : > { %p10_p5 = scmp.ge.s32.totalorder %s13_s14, 6   ;;  %s1853_s13 = smov %s1855_s15 }
 0x147   :  { %12 = sbr.rel (!%p10_p5) target bundleno = 2 (0x2), region = 76 }

// kernel: siamese_forward.23
= control target key start
LH: loop header
LB: loop body
LE: loop exit
PB: predicated region body
PF: predicated region fallthrough
CT: control target
= control target key end

     0   :  { %vm19_vm0 = vcmask 523264   ;;  %vm1698_vm1 = vcmask 519168   ;;  %s3253_s1 = inlined_call_operand.vmem [shape: bf16[576,64], index: 1, kind: input, shape index: {}]   ;;  %s3254_s0 = inlined_call_operand.vmem [shape: bf16[256,576], index: 0, kind: input, shape index: {}]   ;;  %s3255_s2 = inlined_call_operand.vmem [shape: f32[1,64], index: 2, kind: input, shape index: {}]   ;;  %s3256_s3 = inlined_call_operand.vmem [shape: bf16[256,64], index: 3, kind: output, shape index: {}]  }
   0x1   :  { %v2233_v0 = vld [vmem:[%s3253_s1 + $0x78] sm:$0xff]   ;;  %v2235_v2 = vld [vmem:[%s3253_s1 + $0x70] sm:$0xff]   ;;  %v2237_v4 = vld [vmem:[%s3253_s1 + $0x68] sm:$0xff]  }
   0x2   :  { %v2234_v1 = vld [vmem:[%s3253_s1 + $0x38] sm:$0xff]   ;;  %1932 = vmatprep.subr.bf16.mxu0 %v2233_v0  ;;  %2216 = vmatprep.subr.bf16.mxu1 %v2233_v0  ;;  %v2236_v3 = vld [vmem:[%s3253_s1 + $0x30] sm:$0xff]   ;;  %v2238_v5 = vld [vmem:[%s3253_s1 + $0x28] sm:$0xff]  }
   0x3   :  { %1933 = vmatpush3.bf16.msra.mxu0 %v2234_v1  ;;  %2224 = vmatpush3.bf16.msra.mxu1 %v2234_v1  ;;  %v2239_v6 = vld [vmem:[%s3253_s1 + $0x60] sm:$0xff]   ;;  %v2241_v8 = vld [vmem:[%s3253_s1 + $0x58] sm:$0xff]   ;;  %v2243_v10 = vld [vmem:[%s3253_s1 + $0x50] sm:$0xff]  }
   0x4   :  { %1934 = vmatprep.subr.bf16.mxu0 %v2235_v2  ;;  %2217 = vmatprep.subr.bf16.mxu1 %v2235_v2  ;;  %v2240_v7 = vld [vmem:[%s3253_s1 + $0x20] sm:$0xff]   ;;  %v2242_v9 = vld [vmem:[%s3253_s1 + $0x18] sm:$0xff]   ;;  %v2244_v13 = vld [vmem:[%s3253_s1 + $0x10] sm:$0xff]  }
   0x5   :  { %v2251_v11 = vld [vmem:[%s3254_s0 + $0x4] ss:$20 sps:$4 sm:$0xff]   ;;  %v2245_v14 = vld [vmem:[%s3253_s1 + $0x48] sm:$0xff]   ;;  %v2249_v20 = vld [vmem:[%s3254_s0] ss:$20 sps:$4 sm:$0xff]  }
   0x6   :  { %v2254_v12 = vld [vmem:[%s3254_s0 + $0x1e4] ss:$20 sps:$4 sm:$0xff]   ;;  %949 = vmatprep.mubr.bf16.mxu0 %v2251_v11  ;;  %v2246_v15 = vld [vmem:[%s3253_s1 + $0x8] sm:$0xff]   ;;  %v2252_v21 = vld [vmem:[%s3254_s0 + $0x1e0] ss:$20 sps:$4 sm:$0xff]  }
   0x7   :  { %1935 = vmatpush3.bf16.msra.mxu0 %v2236_v3  ;;  %2225 = vmatpush3.bf16.msra.mxu1 %v2236_v3  ;;  %v2247_v16 = vld [vmem:[%s3253_s1 + $0x40] sm:$0xff]   ;;  %v2255_v18 = vld [vmem:[%s3253_s1 + $0xf8] sm:$0xff]   ;;  %v2257_v23 = vld [vmem:[%s3253_s1 + $0xf0] sm:$0xff]  }
   0x8   :  { %1936 = vmatprep.subr.bf16.mxu0 %v2237_v4  ;;  %2218 = vmatprep.subr.bf16.mxu1 %v2237_v4  ;;  %v2248_v17 = vld [vmem:[%s3253_s1] sm:$0xff]   ;;  %v2258_v19 = vld [vmem:[%s3253_s1 + $0x118] sm:$0xff]   ;;  %v2259_v26 = vld [vmem:[%s3253_s1 + $0xb0] sm:$0xff]  }
   0x9   :  { %1045 = vmatprep.mubr.bf16.mxu1 %v2254_v12  ;;  %v2256_v22 = vld [vmem:[%s3253_s1 + $0xb8] sm:$0xff]   ;;  %v2260_v24 = vld [vmem:[%s3254_s0 + $0x2c] ss:$20 sps:$4 sm:$0xff]   ;;  %v2270_v32 = vld [vmem:[%s3254_s0 + $0x54] ss:$20 sps:$4 sm:$0xff]  }
   0xa   :  { %v2262_v25 = vld [vmem:[%s3254_s0 + $0x20c] ss:$20 sps:$4 sm:$0xff]   ;;  %v2264_v27 = vld [vmem:[%s3254_s0 + $0x28] ss:$20 sps:$4 sm:$0xff]   ;;  %v2289_v35 = vld [vmem:[%s3253_s1 + $0x110] sm:$0xff]  }
   0xb   :  { %1937 = vmatpush3.bf16.msra.mxu0 %v2238_v5  ;;  %2226 = vmatpush3.bf16.msra.mxu1 %v2238_v5  ;;  %v2266_v28 = vld [vmem:[%s3253_s1 + $0xe8] sm:$0xff]   ;;  %v2268_v31 = vld [vmem:[%s3253_s1 + $0xe0] sm:$0xff]   ;;  %v2276_v37 = vld [vmem:[%s3253_s1 + $0xd8] sm:$0xff]  }
   0xc   :  { %1938 = vmatprep.subr.bf16.mxu0 %v2239_v6  ;;  %2219 = vmatprep.subr.bf16.mxu1 %v2239_v6  ;;  %v2265_v29 = vld [vmem:[%s3254_s0 + $0x208] ss:$20 sps:$4 sm:$0xff]   ;;  %v2269_v34 = vld [vmem:[%s3253_s1 + $0xa0] sm:$0xff]   ;;  %v2278_v40 = vld [vmem:[%s3253_s1 + $0xd0] sm:$0xff]  }
   0xd   :  { %v2267_v30 = vld [vmem:[%s3253_s1 + $0xa8] sm:$0xff]   ;;  %v2274_v36 = vld [vmem:[%s3254_s0 + $0x50] ss:$20 sps:$4 sm:$0xff]   ;;  %v2277_v39 = vld [vmem:[%s3253_s1 + $0x98] sm:$0xff]  }
   0xe   :  { %v2272_v33 = vld [vmem:[%s3254_s0 + $0x234] ss:$20 sps:$4 sm:$0xff]   ;;  %v2275_v38 = vld [vmem:[%s3254_s0 + $0x230] ss:$20 sps:$4 sm:$0xff]   ;;  %v2284_v44 = vld [vmem:[%s3254_s0 + $0x78] ss:$20 sps:$4 sm:$0xff]  }
   0xf   :  { %1939 = vmatpush3.bf16.msra.mxu0 %v2240_v7  ;;  %2227 = vmatpush3.bf16.msra.mxu1 %v2240_v7  ;;  %v2280_v41 = vld [vmem:[%s3254_s0 + $0x7c] ss:$20 sps:$4 sm:$0xff]   ;;  %v2285_v45 = vld [vmem:[%s3254_s0 + $0x258] ss:$20 sps:$4 sm:$0xff]   ;;  %v2288_v49 = vld [vmem:[%s3253_s1 + $0xc0] sm:$0xff]  }
  0x10   :  { %1940 = vmatprep.subr.bf16.mxu0 %v2241_v8  ;;  %2220 = vmatprep.subr.bf16.mxu1 %v2241_v8  ;;  %v2282_v42 = vld [vmem:[%s3254_s0 + $0x25c] ss:$20 sps:$4 sm:$0xff]   ;;  %v2286_v46 = vld [vmem:[%s3253_s1 + $0xc8] sm:$0xff]   ;;  %v2291_v50 = vld [vmem:[%s3254_s0 + $0xa4] ss:$20 sps:$4 sm:$0xff]  }
  0x11   :  { %v2279_v43 = vld [vmem:[%s3253_s1 + $0x90] sm:$0xff]   ;;  %v2309_v47 = vld [vmem:[%s3253_s1 + $0x108] sm:$0xff]   ;;  %v2290_v52 = vld [vmem:[%s3253_s1 + $0x80] sm:$0xff]  }
  0x12   :  { %v2287_v48 = vld [vmem:[%s3253_s1 + $0x88] sm:$0xff]   ;;  %v2296_v54 = vld [vmem:[%s3254_s0 + $0xa0] ss:$20 sps:$4 sm:$0xff]   ;;  %v2302_v59 = vld [vmem:[%s3254_s0 + $0x30] ss:$20 sps:$4 sm:$0xff]  }
  0x13   :  { %1941 = vmatpush3.bf16.msra.mxu0 %v2242_v9  ;;  %2228 = vmatpush3.bf16.msra.mxu1 %v2242_v9  ;;  %v2295_v51 = vld [vmem:[%s3254_s0 + $0xc] ss:$20 sps:$4 sm:$0xff]   ;;  %v2293_v53 = vld [vmem:[%s3254_s0 + $0x8] ss:$20 sps:$4 sm:$0xff]   ;;  %v2307_v62 = vld [vmem:[%s3254_s0 + $0xf0] ss:$20 sps:$4 sm:$0xff]  }
  0x14   :  { %1942 = vmatprep.subr.bf16.mxu0 %v2243_v10  ;;  %2221 = vmatprep.subr.bf16.mxu1 %v2243_v10  ;;  %v2297_v55 = vld [vmem:[%s3254_s0 + $0xcc] ss:$20 sps:$4 sm:$0xff]   ;;  %v2299_v57 = vld [vmem:[%s3254_s0 + $0x34] ss:$20 sps:$4 sm:$0xff]   ;;  %v2305_v61 = vld [vmem:[%s3254_s0 + $0x5c] ss:$20 sps:$4 sm:$0xff]  }
  0x15   :  { %v2328_v56 = vld [vmem:[%s3253_s1 + $0x100] sm:$0xff]   ;;  %v2301_v58 = vld [vmem:[%s3254_s0 + $0xc8] ss:$20 sps:$4 sm:$0xff]   ;;  %v2308_v63 = vld [vmem:[%s3254_s0 + $0x58] ss:$20 sps:$4 sm:$0xff]  }
  0x16   :  { %v2303_v60 = vld [vmem:[%s3254_s0 + $0xf4] ss:$20 sps:$4 sm:$0xff]   ;;  %v2310_v0 = vld [vmem:[%s3254_s0 + $0x11c] ss:$20 sps:$4 sm:$0xff]   ;;  %v2312_v1 = vld [vmem:[%s3254_s0 + $0x84] ss:$20 sps:$4 sm:$0xff]  }
  0x17   :  { %1943 = vmatpush3.bf16.msra.mxu0 %v2244_v13  ;;  %2229 = vmatpush3.bf16.msra.mxu1 %v2244_v13  ;;  %v2314_v2 = vld [vmem:[%s3254_s0 + $0x118] ss:$20 sps:$4 sm:$0xff]   ;;  %v2315_v3 = vld [vmem:[%s3254_s0 + $0x80] ss:$20 sps:$4 sm:$0xff]   ;;  %v2321_v7 = vld [vmem:[%s3254_s0 + $0xa8] ss:$20 sps:$4 sm:$0xff]  }
  0x18   :  { %1944 = vmatprep.subr.bf16.mxu0 %v2245_v14  ;;  %2222 = vmatprep.subr.bf16.mxu1 %v2245_v14  ;;  %v2316_v4 = vld [vmem:[%s3254_s0 + $0x144] ss:$20 sps:$4 sm:$0xff]   ;;  %v2318_v5 = vld [vmem:[%s3254_s0 + $0xac] ss:$20 sps:$4 sm:$0xff]   ;;  %v2324_v9 = vld [vmem:[%s3254_s0 + $0xd4] ss:$20 sps:$4 sm:$0xff]  }
  0x19   :  { %v2320_v6 = vld [vmem:[%s3254_s0 + $0x140] ss:$20 sps:$4 sm:$0xff]   ;;  %v2326_v10 = vld [vmem:[%s3254_s0 + $0x168] ss:$20 sps:$4 sm:$0xff]   ;;  %v2327_v11 = vld [vmem:[%s3254_s0 + $0xd0] ss:$20 sps:$4 sm:$0xff]  }
  0x1a   :  { %v2322_v8 = vld [vmem:[%s3254_s0 + $0x16c] ss:$20 sps:$4 sm:$0xff]   ;;  %v2329_v12 = vld [vmem:[%s3254_s0 + $0x194] ss:$20 sps:$4 sm:$0xff]   ;;  %v2331_v13 = vld [vmem:[%s3254_s0 + $0xfc] ss:$20 sps:$4 sm:$0xff]  }
  0x1b   :  { %1945 = vmatpush3.bf16.msra.mxu0 %v2246_v15  ;;  %2230 = vmatpush3.bf16.msra.mxu1 %v2246_v15  ;;  %v2333_v14 = vld [vmem:[%s3254_s0 + $0x190] ss:$20 sps:$4 sm:$0xff]   ;;  %v2334_v15 = vld [vmem:[%s3254_s0 + $0xf8] ss:$20 sps:$4 sm:$0xff]  }
  0x1c   :  { %1946 = vmatprep.subr.bf16.mxu0 %v2247_v16  ;;  %2223 = vmatprep.subr.bf16.mxu1 %v2247_v16  ;;  %v2335_v16 = vld [vmem:[%s3254_s0 + $0x1bc] ss:$20 sps:$4 sm:$0xff]  }
  0x1f   :  { %1947 = vmatpush3.bf16.msra.mxu0 %v2248_v17  ;;  %2231 = vmatpush3.bf16.msra.mxu1 %v2248_v17  ;;  %v2337_v17 = vld [vmem:[%s3254_s0 + $0x124] ss:$20 sps:$4 sm:$0xff]  }
  0x20   :  { %2044 = vmatprep.subr.bf16.mxu1 %v2255_v18  ;;  %2176 = vmatprep.subr.bf16.mxu0 %v2258_v19  ;;  %v2339_v18 = vld [vmem:[%s3254_s0 + $0x1b8] ss:$20 sps:$4 sm:$0xff]  }
  0x22   :  { %950 = vmatmul.mubr.bf16.vlgmr.msra.gmra.mxu0 %v2249_v20  ;;  %1046 = vmatmul.mubr.bf16.vlgmr.msra.gmra.mxu1 %v2252_v21  ;;  %v2341_v20 = vld [vmem:[%s3254_s0 + $0x14c] ss:$20 sps:$4 sm:$0xff]   ;;  %v2343_v21 = vld [vmem:[%s3254_s0 + $0x10] ss:$20 sps:$4 sm:$0xff]  }
  0x23   :  { %2045 = vmatpush3.bf16.msra.mxu1 %v2256_v22  ;;  %2177 = vmatpush3.bf16.msra.mxu0 %v2258_v19  ;;  %v2340_v19 = vld [vmem:[%s3254_s0 + $0x120] ss:$20 sps:$4 sm:$0xff]   ;;  %v2344_v22 = vld [vmem:[%s3254_s0 + $0x148] ss:$20 sps:$4 sm:$0xff]  }
  0x24   :  { %2046 = vmatprep.subr.bf16.mxu1 %v2257_v23  ;;  %957 = vmatprep.mubr.bf16.mxu0 %v2260_v24  ;;  %v2345_v23 = vld [vmem:[%s3254_s0 + $0x38] ss:$20 sps:$4 sm:$0xff]   ;;  %v2346_v24 = vld [vmem:[%s3254_s0 + $0x174] ss:$20 sps:$4 sm:$0xff]  }
  0x25   :  { %1053 = vmatprep.mubr.bf16.mxu1 %v2262_v25  ;;  %2178 = vmatprep.subr.bf16.mxu0 %v2289_v35  ;;  %v2348_v25 = vld [vmem:[%s3254_s0 + $0x60] ss:$20 sps:$4 sm:$0xff]  }
  0x27   :  { %2047 = vmatpush3.bf16.msra.mxu1 %v2259_v26  ;;  %2179 = vmatpush3.bf16.msra.mxu0 %v2289_v35  ;;  %v2349_v26 = vld [vmem:[%s3254_s0 + $0x170] ss:$20 sps:$4 sm:$0xff]   ;;  %v2360_v35 = vld [vmem:[%s3254_s0 + $0x128] ss:$20 sps:$4 sm:$0xff]  }
  0x28   :  { %2048 = vmatprep.subr.bf16.mxu1 %v2266_v28  ;;  %2180 = vmatprep.subr.bf16.mxu0 %v2309_v47  ;;  %v2351_v28 = vld [vmem:[%s3254_s0 + $0x19c] ss:$20 sps:$4 sm:$0xff]  }
  0x2a   :  { %958 = vmatmul.mubr.bf16.gmra.mxu0 %v2264_v27  ;;  %1054 = vmatmul.mubr.bf16.gmra.mxu1 %v2265_v29  ;;  %v2350_v27 = vld [vmem:[%s3254_s0 + $0x88] ss:$20 sps:$4 sm:$0xff]   ;;  %v2353_v29 = vld [vmem:[%s3254_s0 + $0xb0] ss:$20 sps:$4 sm:$0xff]  }
  0x2b   :  { %2049 = vmatpush3.bf16.msra.mxu1 %v2267_v30  ;;  %965 = vmatprep.mubr.bf16.mxu0 %v2270_v32  ;;  %v2354_v30 = vld [vmem:[%s3254_s0 + $0x198] ss:$20 sps:$4 sm:$0xff]  }
  0x2c   :  { %2050 = vmatprep.subr.bf16.mxu1 %v2268_v31  ;;  %1061 = vmatprep.mubr.bf16.mxu1 %v2272_v33  ;;  %v2355_v31 = vld [vmem:[%s3254_s0 + $0xd8] ss:$20 sps:$4 sm:$0xff]   ;;  %v2358_v33 = vld [vmem:[%s3254_s0 + $0x100] ss:$20 sps:$4 sm:$0xff]  }
  0x2d   :  { %2181 = vmatpush3.bf16.msra.mxu0 %v2309_v47  ;;  %v2356_v32 = vld [vmem:[%s3254_s0 + $0x1c4] ss:$20 sps:$4 sm:$0xff]  }
  0x2e   :  { %2182 = vmatprep.subr.bf16.mxu0 %v2328_v56  ;;  %v2375_v47 = vld [vmem:[%s3254_s0 + $0x218] ss:$20 sps:$4 sm:$0xff]  }
  0x2f   :  { %2051 = vmatpush3.bf16.msra.mxu1 %v2269_v34  ;;  %v2359_v34 = vld [vmem:[%s3254_s0 + $0x1c0] ss:$20 sps:$4 sm:$0xff]  }
  0x30   :  { %2052 = vmatprep.subr.bf16.mxu1 %v2276_v37  ;;  %v2363_v37 = vld [vmem:[%s3254_s0 + $0x150] ss:$20 sps:$4 sm:$0xff]  }
  0x31   :  { %2183 = vmatpush3.bf16.msra.mxu0 %v2328_v56 }
  0x32   :  { %966 = vmatmul.mubr.bf16.gmra.mxu0 %v2274_v36  ;;  %1062 = vmatmul.mubr.bf16.gmra.mxu1 %v2275_v38  ;;  %v2361_v36 = vld [vmem:[%s3254_s0 + $0x1ec] ss:$20 sps:$4 sm:$0xff]   ;;  %v2364_v38 = vld [vmem:[%s3254_s0 + $0x1e8] ss:$20 sps:$4 sm:$0xff]  }
  0x33   :  { %2053 = vmatpush3.bf16.msra.mxu1 %v2277_v39  ;;  %973 = vmatprep.mubr.bf16.mxu0 %v2280_v41  ;;  %v2365_v39 = vld [vmem:[%s3254_s0 + $0x178] ss:$20 sps:$4 sm:$0xff]   ;;  %v2368_v41 = vld [vmem:[%s3254_s0 + $0x1a0] ss:$20 sps:$4 sm:$0xff]  }
  0x34   :  { %2054 = vmatprep.subr.bf16.mxu1 %v2278_v40  ;;  %1069 = vmatprep.mubr.bf16.mxu1 %v2282_v42  ;;  %v2366_v40 = vld [vmem:[%s3254_s0 + $0x214] ss:$20 sps:$4 sm:$0xff]   ;;  %v2369_v42 = vld [vmem:[%s3254_s0 + $0x210] ss:$20 sps:$4 sm:$0xff]  }
  0x37   :  { %2055 = vmatpush3.bf16.msra.mxu1 %v2279_v43  ;;  %v2370_v43 = vld [vmem:[%s3254_s0 + $0x1c8] ss:$20 sps:$4 sm:$0xff]  }
  0x38   :  { %2056 = vmatprep.subr.bf16.mxu1 %v2286_v46  ;;  %v2374_v46 = vld [vmem:[%s3254_s0 + $0x238] ss:$20 sps:$4 sm:$0xff]  }
  0x3a   :  { %974 = vmatmul.mubr.bf16.gmra.mxu0 %v2284_v44  ;;  %1070 = vmatmul.mubr.bf16.gmra.mxu1 %v2285_v45  ;;  %v2371_v44 = vld [vmem:[%s3254_s0 + $0x23c] ss:$20 sps:$4 sm:$0xff]  }
  0x3b   :  { %2057 = vmatpush3.bf16.msra.mxu1 %v2287_v48  ;;  %981 = vmatprep.mubr.bf16.mxu0 %v2291_v50  ;;  %v2373_v45 = vld [vmem:[%s3254_s0 + $0x1f0] ss:$20 sps:$4 sm:$0xff]   ;;  %v2379_v50 = vld [vmem:[%s3254_s0 + $0x260] ss:$20 sps:$4 sm:$0xff]  }
  0x3c   :  { %2058 = vmatprep.subr.bf16.mxu1 %v2288_v49  ;;  %1110 = vmatprep.mubr.bf16.mxu1 %v2295_v51  ;;  %v2376_v48 = vld [vmem:[%s3254_s0 + $0x264] ss:$20 sps:$4 sm:$0xff]   ;;  %v2378_v49 = vld [vmem:[%s3254_s0 + $0x240] ss:$20 sps:$4 sm:$0xff]   ;;  %v2380_v51 = vld [vmem:[%s3254_s0 + $0x268] ss:$20 sps:$4 sm:$0xff]  }
  0x3f   :  { %2059 = vmatpush3.bf16.msra.mxu1 %v2290_v52  ;;  %v2381_v52 = vmov 0.0  }
  0x40   :  { %22 = vst.msk [vmem:[#allocation2 + $0x10] sm:$0xff] %vm19_vm0, %v2381_v52  ;;  %20 = vst.msk [vmem:[#allocation2] sm:$0xff] %vm19_vm0, %v2381_v52 }
  0x41   :  { %21 = vst.msk [vmem:[#allocation2 + $0x8] sm:$0xff] %vm19_vm0, %v2381_v52  ;;  %23 = vst.msk [vmem:[#allocation2 + $0x18] sm:$0xff] %vm19_vm0, %v2381_v52 }
  0x42   :  { %982 = vmatmul.mubr.bf16.gmra.mxu0 %v2296_v54  ;;  %1111 = vmatmul.mubr.bf16.vlgmr.msra.gmra.mxu1 %v2293_v53  ;;  %24 = vst.msk [vmem:[#allocation2 + $0x20] sm:$0xff] %vm19_vm0, %v2381_v52  ;;  %25 = vst.msk [vmem:[#allocation2 + $0x28] sm:$0xff] %vm19_vm0, %v2381_v52 }
  0x43   :  { %989 = vmatprep.mubr.bf16.mxu0 %v2297_v55  ;;  %1118 = vmatprep.mubr.bf16.mxu1 %v2299_v57  ;;  %26 = vst.msk [vmem:[#allocation2 + $0x30] sm:$0xff] %vm19_vm0, %v2381_v52  ;;  %27 = vst.msk [vmem:[#allocation2 + $0x38] sm:$0xff] %vm19_vm0, %v2381_v52 }
  0x44   :  { %28 = vst.msk [vmem:[#allocation2 + $0x40] sm:$0xff] %vm19_vm0, %v2381_v52  ;;  %29 = vst.msk [vmem:[#allocation2 + $0x48] sm:$0xff] %vm19_vm0, %v2381_v52 }
  0x45   :  { %30 = vst.msk [vmem:[#allocation2 + $0x50] sm:$0xff] %vm19_vm0, %v2381_v52  ;;  %31 = vst.msk [vmem:[#allocation2 + $0x58] sm:$0xff] %vm19_vm0, %v2381_v52 }
  0x46   :  { %32 = vst.msk [vmem:[#allocation2 + $0x60] sm:$0xff] %vm19_vm0, %v2381_v52  ;;  %33 = vst.msk [vmem:[#allocation2 + $0x68] sm:$0xff] %vm19_vm0, %v2381_v52 }
  0x47   :  { %34 = vst.msk [vmem:[#allocation2 + $0x70] sm:$0xff] %vm19_vm0, %v2381_v52  ;;  %35 = vst.msk [vmem:[#allocation2 + $0x78] sm:$0xff] %vm19_vm0, %v2381_v52 }
  0x48   :  { %36 = vst.msk [vmem:[#allocation2 + $0x80] sm:$0xff] %vm19_vm0, %v2381_v52  ;;  %37 = vst.msk [vmem:[#allocation2 + $0x88] sm:$0xff] %vm19_vm0, %v2381_v52 }
  0x49   :  { %38 = vst.msk [vmem:[#allocation2 + $0x90] sm:$0xff] %vm19_vm0, %v2381_v52  ;;  %39 = vst.msk [vmem:[#allocation2 + $0x98] sm:$0xff] %vm19_vm0, %v2381_v52 }
  0x4a   :  { %990 = vmatmul.mubr.bf16.gmra.mxu0 %v2301_v58  ;;  %1119 = vmatmul.mubr.bf16.gmra.mxu1 %v2302_v59  ;;  %40 = vst.msk [vmem:[#allocation2 + $0xa0] sm:$0xff] %vm19_vm0, %v2381_v52  ;;  %41 = vst.msk [vmem:[#allocation2 + $0xa8] sm:$0xff] %vm19_vm0, %v2381_v52 }
  0x4b   :  { %997 = vmatprep.mubr.bf16.mxu0 %v2303_v60  ;;  %1126 = vmatprep.mubr.bf16.mxu1 %v2305_v61  ;;  %42 = vst.msk [vmem:[#allocation2 + $0xb0] sm:$0xff] %vm19_vm0, %v2381_v52  ;;  %43 = vst.msk [vmem:[#allocation2 + $0xb8] sm:$0xff] %vm19_vm0, %v2381_v52 }
  0x4c   :  { %44 = vst.msk [vmem:[#allocation2 + $0xc0] sm:$0xff] %vm19_vm0, %v2381_v52  ;;  %45 = vst.msk [vmem:[#allocation2 + $0xc8] sm:$0xff] %vm19_vm0, %v2381_v52 }
  0x4d   :  { %46 = vst.msk [vmem:[#allocation2 + $0xd0] sm:$0xff] %vm19_vm0, %v2381_v52  ;;  %47 = vst.msk [vmem:[#allocation2 + $0xd8] sm:$0xff] %vm19_vm0, %v2381_v52 }
  0x4e   :  { %48 = vst.msk [vmem:[#allocation2 + $0xe0] sm:$0xff] %vm19_vm0, %v2381_v52  ;;  %49 = vst.msk [vmem:[#allocation2 + $0xe8] sm:$0xff] %vm19_vm0, %v2381_v52 }
  0x4f   :  { %50 = vst.msk [vmem:[#allocation2 + $0xf0] sm:$0xff] %vm19_vm0, %v2381_v52  ;;  %51 = vst.msk [vmem:[#allocation2 + $0xf8] sm:$0xff] %vm19_vm0, %v2381_v52 }
  0x52   :  { %998 = vmatmul.mubr.bf16.gmra.mxu0 %v2307_v62  ;;  %1127 = vmatmul.mubr.bf16.gmra.mxu1 %v2308_v63 }
  0x53   :  { %1005 = vmatprep.mubr.bf16.mxu0 %v2310_v0  ;;  %1134 = vmatprep.mubr.bf16.mxu1 %v2312_v1 }
  0x5a   :  { %1006 = vmatmul.mubr.bf16.gmra.mxu0 %v2314_v2  ;;  %1135 = vmatmul.mubr.bf16.gmra.mxu1 %v2315_v3 }
  0x5b   :  { %1013 = vmatprep.mubr.bf16.mxu0 %v2316_v4  ;;  %1142 = vmatprep.mubr.bf16.mxu1 %v2318_v5 }
  0x62   :  { %1014 = vmatmul.mubr.bf16.gmra.mxu0 %v2320_v6  ;;  %1143 = vmatmul.mubr.bf16.gmra.mxu1 %v2321_v7 }
  0x63   :  { %1021 = vmatprep.mubr.bf16.mxu0 %v2322_v8  ;;  %1150 = vmatprep.mubr.bf16.mxu1 %v2324_v9 }
  0x6a   :  { %1022 = vmatmul.mubr.bf16.gmra.mxu0 %v2326_v10  ;;  %1151 = vmatmul.mubr.bf16.gmra.mxu1 %v2327_v11 }
  0x6b   :  { %1029 = vmatprep.mubr.bf16.mxu0 %v2329_v12  ;;  %1158 = vmatprep.mubr.bf16.mxu1 %v2331_v13 }
  0x72   :  { %1030 = vmatmul.mubr.bf16.gmra.mxu0 %v2333_v14  ;;  %1159 = vmatmul.mubr.bf16.gmra.mxu1 %v2334_v15 }
  0x73   :  { %1037 = vmatprep.mubr.bf16.mxu0 %v2335_v16  ;;  %1166 = vmatprep.mubr.bf16.mxu1 %v2337_v17 }
  0x7a   :  { %1038 = vmatmul.mubr.bf16.gmra.mxu0 %v2339_v18  ;;  %1167 = vmatmul.mubr.bf16.gmra.mxu1 %v2340_v19 }
  0x7b   :  { %1174 = vmatprep.mubr.bf16.mxu1 %v2341_v20  ;;  %2184 = vmatprep.mubr.msk.bf16.mxu0 %vm19_vm0, %v2343_v21 }
  0x82   :  { %1175 = vmatmul.mubr.bf16.gmra.mxu1 %v2344_v22  ;;  %2185 = vmatmul.mubr.msk.bf16.vlgmr.msra.gmra.mxu0 %vm19_vm0, %v2345_v23 }
  0x83   :  { %1182 = vmatprep.mubr.bf16.mxu1 %v2346_v24  ;;  %2188 = vmatprep.mubr.msk.bf16.mxu0 %vm19_vm0, %v2348_v25 }
  0x8a   :  { %1183 = vmatmul.mubr.bf16.gmra.mxu1 %v2349_v26  ;;  %2189 = vmatmul.mubr.msk.bf16.gmra.mxu0 %vm19_vm0, %v2350_v27 }
  0x8b   :  { %1190 = vmatprep.mubr.bf16.mxu1 %v2351_v28  ;;  %2192 = vmatprep.mubr.msk.bf16.mxu0 %vm19_vm0, %v2353_v29 }
  0x92   :  { %1191 = vmatmul.mubr.bf16.gmra.mxu1 %v2354_v30  ;;  %2193 = vmatmul.mubr.msk.bf16.gmra.mxu0 %vm19_vm0, %v2355_v31 }
  0x93   :  { %1198 = vmatprep.mubr.bf16.mxu1 %v2356_v32  ;;  %2196 = vmatprep.mubr.msk.bf16.mxu0 %vm19_vm0, %v2358_v33 }
  0x9a   :  { %1199 = vmatmul.mubr.bf16.gmra.mxu1 %v2359_v34  ;;  %2197 = vmatmul.mubr.msk.bf16.gmra.mxu0 %vm19_vm0, %v2360_v35 }
  0x9b   :  { %1206 = vmatprep.mubr.bf16.mxu1 %v2361_v36  ;;  %2200 = vmatprep.mubr.msk.bf16.mxu0 %vm19_vm0, %v2363_v37 }
  0xa2   :  { %1207 = vmatmul.mubr.bf16.gmra.mxu1 %v2364_v38  ;;  %2201 = vmatmul.mubr.msk.bf16.gmra.mxu0 %vm19_vm0, %v2365_v39 }
  0xa3   :  { %1214 = vmatprep.mubr.bf16.mxu1 %v2366_v40  ;;  %2204 = vmatprep.mubr.msk.bf16.mxu0 %vm19_vm0, %v2368_v41 }
  0xaa   :  { %1215 = vmatmul.mubr.bf16.gmra.mxu1 %v2369_v42  ;;  %2205 = vmatmul.mubr.msk.bf16.gmra.mxu0 %vm19_vm0, %v2370_v43 }
  0xab   :  { %1222 = vmatprep.mubr.bf16.mxu1 %v2371_v44  ;;  %2208 = vmatprep.mubr.msk.bf16.mxu0 %vm19_vm0, %v2373_v45 }
  0xb2   :  { %1223 = vmatmul.mubr.bf16.gmra.mxu1 %v2374_v46  ;;  %2209 = vmatmul.mubr.msk.bf16.gmra.mxu0 %vm19_vm0, %v2375_v47 }
  0xb3   :  { %1230 = vmatprep.mubr.bf16.mxu1 %v2376_v48  ;;  %2212 = vmatprep.mubr.msk.bf16.mxu0 %vm19_vm0, %v2378_v49 }
  0xba   :  { %1231 = vmatmul.mubr.bf16.gmra.mxu1 %v2379_v50  ;;  %2213 = vmatmul.mubr.msk.bf16.gmra.mxu0 %vm19_vm0, %v2380_v51 }
  0xe2   :  { %v1948_v53 = vpop.f32.mrf.mxu0  ;;  %v2020_v54 = vpop.f32.mrf.mxu1 }
  0xe4   :  { %v1949_v55 = vpop.f32.mrf.mxu0  ;;  %v2021_v56 = vpop.f32.mrf.mxu1 }
  0xe5   :  { %v2798_v57 = vadd.f32 %v1949_v55, %v1948_v53  ;;  %v2800_v58 = vadd.f32 %v2021_v56, %v2020_v54 }
  0xe6   :  { %v1951_v59 = vpop.f32.mrf.mxu0  ;;  %v2023_v60 = vpop.f32.mrf.mxu1 }
  0xe7   :  { %3257 = vst [vmem:[#allocation3_spill] sm:$0xff] %v2800_v58 }
  0xe8   :  { %v1952_v61 = vpop.f32.mrf.mxu0  ;;  %v2024_v62 = vpop.f32.mrf.mxu1 }
  0xe9   :  { %v2802_v63 = vadd.f32 %v1952_v61, %v1951_v59  ;;  %v2804_v0 = vadd.f32 %v2024_v62, %v2023_v60 }
  0xea   :  { %v1954_v1 = vpop.f32.mrf.mxu0  ;;  %v2026_v2 = vpop.f32.mrf.mxu1 }
  0xeb   :  { %3258 = vst [vmem:[#allocation4_spill] sm:$0xff] %v2804_v0 }
  0xec   :  { %v1955_v3 = vpop.f32.mrf.mxu0  ;;  %v2027_v4 = vpop.f32.mrf.mxu1 }
  0xed   :  { %v2806_v5 = vadd.f32 %v1955_v3, %v1954_v1  ;;  %v2808_v6 = vadd.f32 %v2027_v4, %v2026_v2 }
  0xee   :  { %v1957_v7 = vpop.f32.mrf.mxu0  ;;  %v2029_v8 = vpop.f32.mrf.mxu1 }
  0xef   :  { %3259 = vst [vmem:[#allocation5_spill] sm:$0xff] %v2808_v6 }
  0xf0   :  { %v1958_v9 = vpop.f32.mrf.mxu0  ;;  %v2030_v10 = vpop.f32.mrf.mxu1 }
  0xf1   :  { %v2810_v11 = vadd.f32 %v1958_v9, %v1957_v7  ;;  %v2812_v12 = vadd.f32 %v2030_v10, %v2029_v8 }
  0xf2   :  { %v1960_v13 = vpop.f32.mrf.mxu0  ;;  %v2032_v14 = vpop.f32.mrf.mxu1 }
  0xf3   :  { %3260 = vst [vmem:[#allocation6_spill] sm:$0xff] %v2812_v12 }
  0xf4   :  { %v1961_v15 = vpop.f32.mrf.mxu0  ;;  %v2033_v16 = vpop.f32.mrf.mxu1 }
  0xf5   :  { %v2814_v17 = vadd.f32 %v1961_v15, %v1960_v13  ;;  %v2816_v18 = vadd.f32 %v2033_v16, %v2032_v14 }
  0xf6   :  { %v1963_v19 = vpop.f32.mrf.mxu0  ;;  %v2035_v20 = vpop.f32.mrf.mxu1 }
  0xf7   :  { %3261 = vst [vmem:[#allocation7_spill] sm:$0xff] %v2816_v18 }
  0xf8   :  { %v1964_v21 = vpop.f32.mrf.mxu0  ;;  %v2036_v22 = vpop.f32.mrf.mxu1 }
  0xf9   :  { %v2818_v23 = vadd.f32 %v1964_v21, %v1963_v19  ;;  %v2820_v24 = vadd.f32 %v2036_v22, %v2035_v20 }
  0xfa   :  { %v1966_v25 = vpop.f32.mrf.mxu0  ;;  %v2038_v26 = vpop.f32.mrf.mxu1 }
  0xfb   :  { %3262 = vst [vmem:[#allocation8_spill] sm:$0xff] %v2820_v24 }
  0xfc   :  { %v1967_v27 = vpop.f32.mrf.mxu0  ;;  %v2039_v28 = vpop.f32.mrf.mxu1 }
  0xfd   :  { %v2822_v29 = vadd.f32 %v1967_v27, %v1966_v25  ;;  %v2824_v30 = vadd.f32 %v2039_v28, %v2038_v26 }
  0xfe   :  { %v1969_v31 = vpop.f32.mrf.mxu0  ;;  %v2041_v32 = vpop.f32.mrf.mxu1 }
  0xff   :  { %3263 = vst [vmem:[#allocation9_spill] sm:$0xff] %v2824_v30 }
 0x100   :  { %v1970_v33 = vpop.f32.mrf.mxu0  ;;  %v2042_v34 = vpop.f32.mrf.mxu1 }
 0x101   :  { %v2826_v35 = vadd.f32 %v1970_v33, %v1969_v31  ;;  %v2828_v36 = vadd.f32 %v2042_v34, %v2041_v32 }
 0x102   :  { %v1972_v37 = vpop.f32.mrf.mxu0  ;;  %v2830_v38 = vpop.f32.mrf.mxu1 }
 0x103   :  { %3264 = vst [vmem:[#allocation10_spill] sm:$0xff] %v2828_v36 }
 0x104   :  { %v1973_v39 = vpop.f32.mrf.mxu0  ;;  %v2832_v40 = vpop.f32.mrf.mxu1 }
 0x105   :  { %v2834_v41 = vadd.f32 %v1973_v39, %v1972_v37 }
 0x106   :  { %v1975_v42 = vpop.f32.mrf.mxu0  ;;  %v2836_v43 = vpop.f32.mrf.mxu1 }
 0x108   :  { %v1976_v44 = vpop.f32.mrf.mxu0  ;;  %v2838_v45 = vpop.f32.mrf.mxu1 }
 0x109   :  { %v2840_v46 = vadd.f32 %v1976_v44, %v1975_v42 }
 0x10a   :  { %v1978_v47 = vpop.f32.mrf.mxu0  ;;  %v2066_v48 = vpop.f32.mrf.mxu1 }
 0x10c   :  { %v1979_v49 = vpop.f32.mrf.mxu0  ;;  %v2067_v50 = vpop.f32.mrf.mxu1 }
 0x10d   :  { %v2842_v51 = vadd.f32 %v1979_v49, %v1978_v47  ;;  %v2068_v58 = vadd.f32 %v2067_v50, %v2066_v48  ;;  %v2065_v48 = vadd.f32 %v2838_v45, %v2836_v43 }
 0x10e   :  { %v1981_v52 = vpop.f32.mrf.mxu0  ;;  %v2069_v53 = vpop.f32.mrf.mxu1 }
 0x10f   :  { %v1116_v43 = vadd.f32 %v2065_v48, %v2802_v63 }
 0x110   :  { %v1982_v54 = vpop.f32.mrf.mxu0  ;;  %v2070_v55 = vpop.f32.mrf.mxu1 }
 0x111   :  { %v2844_v56 = vadd.f32 %v1982_v54, %v1981_v52 }
 0x112   :  { %v1984_v59 = vpop.f32.mrf.mxu0  ;;  %v2846_v60 = vpop.f32.mrf.mxu1 }
 0x114   :  { %v1985_v61 = vpop.f32.mrf.mxu0  ;;  %v2848_v62 = vpop.f32.mrf.mxu1 }
 0x115   :  { %v2850_v1 = vadd.f32 %v1985_v61, %v1984_v59 }
 0x116   :  { %v1987_v2 = vpop.f32.mrf.mxu0  ;;  %v2852_v3 = vpop.f32.mrf.mxu1 }
 0x118   :  { %v1988_v4 = vpop.f32.mrf.mxu0  ;;  %v2854_v7 = vpop.f32.mrf.mxu1 }
 0x119   :  { %v2856_v8 = vadd.f32 %v1988_v4, %v1987_v2 }
 0x11a   :  { %v2858_v9 = vpop.f32.mrf.mxu0  ;;  %v2078_v10 = vpop.f32.mrf.mxu1 }
 0x11b   :  { %3265 = vst [vmem:[#allocation11_spill] sm:$0xff] %v2856_v8 }
 0x11c   :  { %v2860_v13 = vpop.f32.mrf.mxu0  ;;  %v2079_v14 = vpop.f32.mrf.mxu1 }
 0x11e   :  { %v2862_v15 = vpop.f32.mrf.mxu0  ;;  %v2864_v16 = vpop.f32.mrf.mxu1 }
 0x120   :  { %v2866_v19 = vpop.f32.mrf.mxu0  ;;  %v2082_v20 = vpop.f32.mrf.mxu1 }
 0x122   :  { %v2868_v21 = vpop.f32.mrf.mxu0  ;;  %v2870_v22 = vpop.f32.mrf.mxu1 }
 0x124   :  { %v2872_v25 = vpop.f32.mrf.mxu0  ;;  %v2874_v26 = vpop.f32.mrf.mxu1 }
 0x126   :  { %v2876_v27 = vpop.f32.mrf.mxu0  ;;  %v2878_v28 = vpop.f32.mrf.mxu1 }
 0x127   :  { %3266 = vst [vmem:[#allocation12_spill] sm:$0xff] %v2876_v27 }
 0x128   :  { %v2880_v31 = vpop.f32.mrf.mxu0  ;;  %v2882_v32 = vpop.f32.mrf.mxu1 }
 0x129   :  { %3267 = vst [vmem:[#allocation13_spill] sm:$0xff] %v2880_v31  ;;  %v2071_v31 = vadd.f32 %v2070_v55, %v2069_v53 }
 0x12a   :  { %v2884_v33 = vpop.f32.mrf.mxu0  ;;  %v2886_v34 = vpop.f32.mrf.mxu1 }
 0x12b   :  { %v1124_v53 = vadd.f32 %v2071_v31, %v2810_v11 }
 0x12c   :  { %v2888_v37 = vpop.f32.mrf.mxu0  ;;  %v2890_v39 = vpop.f32.mrf.mxu1 }
 0x12d   :  { %3268 = vst [vmem:[#allocation14_spill] sm:$0xff] %v2888_v37  ;;  %v2092_v48 = vadd.f32 %v2890_v39, %v2886_v34  ;;  %v2086_v34 = vadd.f32 %v2874_v26, %v2870_v22  ;;  %v2089_v22 = vadd.f32 %v2882_v32, %v2878_v28 }
 0x12e   :  { %v2892_v42 = vpop.f32.mrf.mxu0  ;;  %v2894_v44 = vpop.f32.mrf.mxu1 }
 0x12f   :  { %3269 = vst [vmem:[#allocation15_spill] sm:$0xff] %v2892_v42  ;;  %v1145_v32 = vadd.f32 %v2086_v34, %v2834_v41 }
 0x130   :  { %v2896_v47 = vpop.f32.mrf.mxu0  ;;  %v2898_v49 = vpop.f32.mrf.mxu1 }
 0x131   :  { %3270 = vst [vmem:[#allocation16_spill] sm:$0xff] %v2896_v47  ;;  %v2095_v39 = vadd.f32 %v2898_v49, %v2894_v44 }
 0x132   :  { %v2900_v52 = vpop.f32.mrf.mxu0  ;;  %v2902_v54 = vpop.f32.mrf.mxu1 }
 0x133   :  { %3271 = vst [vmem:[#allocation17_spill] sm:$0xff] %v2900_v52 }
 0x134   :  { %v2904_v59 = vpop.f32.mrf.mxu0  ;;  %v2906_v61 = vpop.f32.mrf.mxu1 }
 0x135   :  { %3272 = vst [vmem:[#allocation18_spill] sm:$0xff] %v2904_v59 }
 0x136   :  { %v2908_v2 = vpop.f32.mrf.mxu0  ;;  %v2910_v4 = vpop.f32.mrf.mxu1 }
 0x137   :  { %3273 = vst [vmem:[#allocation19_spill] sm:$0xff] %v2908_v2  ;;  %v2062_v2 = vadd.f32 %v2832_v40, %v2830_v38  ;;  %v52_v38 = vld [vmem:[#allocation2] sm:$0xff] }
 0x138   :  { %v2912_v36 = vpop.f32.mrf.mxu0  ;;  %v2914_v30 = vpop.f32.mrf.mxu1 }
 0x139   :  { %3274 = vst [vmem:[#allocation20_spill] sm:$0xff] %v2912_v36 }
 0x13a   :  { %v2916_v24 = vpop.f32.mrf.mxu0  ;;  %v2918_v18 = vpop.f32.mrf.mxu1 }
 0x13b   :  { %3275 = vst [vmem:[#allocation21_spill] sm:$0xff] %v2916_v24  ;;  %v1121_v24 = vadd.f32 %v2068_v58, %v2806_v5  ;;  %v55_v5 = vld [vmem:[#allocation2 + $0x18] sm:$0xff] }
 0x13c   :  { %v2920_v0 = vpop.f32.mrf.mxu0  ;;  %v2922_v12 = vpop.f32.mrf.mxu1 }
 0x13d   :  { %3276 = vst [vmem:[#allocation22_spill] sm:$0xff] %v2920_v0  ;;  %v54_v0 = vld [vmem:[#allocation2 + $0x10] sm:$0xff] }
 0x13e   :  { %v2924_v6 = vpop.f32.mrf.mxu0  ;;  %v2926_v59 = vpop.f32.mrf.mxu1 }
 0x13f   :  { %3277 = vst [vmem:[#allocation23_spill] sm:$0xff] %v2924_v6  ;;  %v1113_v6 = vadd.f32 %v2062_v2, %v2798_v57  ;;  %v2077_v2 = vadd.f32 %v2854_v7, %v2852_v3  ;;  %v59_v7 = vld [vmem:[#allocation2 + $0x38] sm:$0xff] }
 0x140   :  { %v2930_v52 = vpop.f32.mrf.mxu0  ;;  %v2932_v36 = vpop.f32.mrf.mxu1 }
 0x141   :  { %3278 = vst [vmem:[#allocation24_spill] sm:$0xff] %v2930_v52  ;;  %v2080_v52 = vadd.f32 %v2079_v14, %v2078_v10  ;;  %v53_v10 = vld [vmem:[#allocation2 + $0x8] sm:$0xff] }
 0x142   :  { %v2935_v27 = vpop.f32.mrf.mxu1  ;;  %v2186_v47 = vpop.f32.mrf.mxu0 }
 0x143   :  { %3279 = vst [vmem:[#allocation25_spill] sm:$0xff] %v2935_v27  ;;  %v1282_v50 = vadd.f32 %v2186_v47, %v1121_v24  ;;  %v2074_v27 = vadd.f32 %v2848_v62, %v2846_v60  ;;  %v1137_v31 = vadd.f32 %v2080_v52, %v2822_v29  ;;  %v58_v60 = vld [vmem:[#allocation2 + $0x30] sm:$0xff]  ;;  %v56_v29 = vld [vmem:[#allocation2 + $0x20] sm:$0xff] }
 0x144   :  { %v2940_v42 = vpop.f32.mrf.mxu1  ;;  %v1273_v40 = vpop.f32.mrf.mxu0 }
 0x145   :  { %v1402_v8 = vadd.f32 %v1282_v50, %v54_v0  ;;  %v1274_v37 = vadd.f32 %v1273_v40, %v1113_v6  ;;  %v2083_v6 = vadd.f32 %v2082_v20, %v2864_v16  ;;  %v2963_v16 = vld [vmem:[%s3255_s2] ss:$0 sm:$0xff] }
 0x146   :  { %v2943_v58 = vpop.f32.mrf.mxu1  ;;  %v2187_v55 = vpop.f32.mrf.mxu0 }
 0x147   :  { %1434 = vst.msk [vmem:[#allocation2 + $0x10] sm:$0xff] %vm19_vm0, %v1402_v8  ;;  %v1400_v24 = vadd.f32 %v1274_v37, %v52_v38  ;;  %v1285_v57 = vadd.f32 %v2187_v55, %v1124_v53  ;;  %v1129_v37 = vadd.f32 %v2074_v27, %v2814_v17  ;;  %v1140_v17 = vadd.f32 %v2083_v6, %v2826_v35 }
 0x148   :  { %v2949_v45 = vpop.f32.mrf.mxu1  ;;  %v1276_v0 = vpop.f32.mrf.mxu0  ;;  %v1132_v35 = vadd.f32 %v2077_v2, %v2818_v23 }
 0x149   :  { %1432 = vst.msk [vmem:[#allocation2] sm:$0xff] %vm19_vm0, %v1400_v24  ;;  %v1403_v11 = vadd.f32 %v1285_v57, %v55_v5  ;;  %v1277_v14 = vadd.f32 %v1276_v0, %v1116_v43 }
 0x14a   :  { %v2954_v47 = vpop.f32.mrf.mxu1  ;;  %v2190_v62 = vpop.f32.mrf.mxu0 }
 0x14b   :  { %1435 = vst.msk [vmem:[#allocation2 + $0x18] sm:$0xff] %vm19_vm0, %v1403_v11  ;;  %v1401_v8 = vadd.f32 %v1277_v14, %v53_v10  ;;  %v1298_v63 = vadd.f32 %v2190_v62, %v1137_v31  ;;  %v57_v11 = vld [vmem:[#allocation2 + $0x28] sm:$0xff]  ;;  %v1153_v14 = vadd.f32 %v2092_v48, %v2842_v51  ;;  %v62_v31 = vld [vmem:[#allocation2 + $0x50] sm:$0xff]  ;;  %v2104_v51 = vadd.f32 %v2922_v12, %v2918_v18  ;;  %v60_v12 = vld [vmem:[#allocation2 + $0x40] sm:$0xff] }
 0x14c   :  { %v2965_v20 = vpop.f32.mrf.mxu1  ;;  %v1289_v52 = vpop.f32.mrf.mxu0  ;;  %v1992_v18 = vadd.f32 %v2860_v13, %v2858_v9  ;;  %v2098_v13 = vadd.f32 %v2906_v61, %v2902_v54  ;;  %v61_v54 = vld [vmem:[#allocation2 + $0x48] sm:$0xff] }
 0x14d   :  { %1433 = vst.msk [vmem:[#allocation2 + $0x8] sm:$0xff] %vm19_vm0, %v1401_v8  ;;  %v1406_v50 = vadd.f32 %v1298_v63, %v58_v60  ;;  %v1290_v38 = vadd.f32 %v1289_v52, %v1129_v37  ;;  %v1156_v52 = vadd.f32 %v2095_v39, %v2844_v56  ;;  %v63_v56 = vld [vmem:[#allocation2 + $0x58] sm:$0xff]  ;;  %v2107_v39 = vadd.f32 %v2932_v36, %v2926_v59 }
 0x14e   :  { %v1469_v27 = vld [vmem:[#allocation2 + $0x10] sm:$0xff]  ;;  %v2971_v3 = vpop.f32.mrf.mxu1  ;;  %v2191_v40 = vpop.f32.mrf.mxu0  ;;  %v1995_v36 = vadd.f32 %v2866_v19, %v2862_v15  ;;  %v2101_v59 = vadd.f32 %v2914_v30, %v2910_v4  ;;  %v1998_v19 = vadd.f32 %v2872_v25, %v2868_v21  ;;  %v64_v21 = vld [vmem:[#allocation2 + $0x60] sm:$0xff]  ;;  %v3280_v25 = vld [vmem:[#allocation14_spill] sm:$0xff] }
 0x14f   :  { %v1508_v53 = vadd.f32 %v2963_v16, %v1469_v27  ;;  %1438 = vst.msk [vmem:[#allocation2 + $0x30] sm:$0xff] %vm19_vm0, %v1406_v50  ;;  %v1404_v5 = vadd.f32 %v1290_v38, %v56_v29  ;;  %v1301_v55 = vadd.f32 %v2191_v40, %v1140_v17 }
 0x150   :  { %v1467_v24 = vld [vmem:[#allocation2] sm:$0xff]  ;;  %v2979_v57 = vpop.f32.mrf.mxu1  ;;  %v1292_v43 = vpop.f32.mrf.mxu0 }
 0x151   :  { %v1540_v10 = vmax.f32 %v1508_v53, 0.0  ;;  %v1506_v0 = vadd.f32 %v2963_v16, %v1467_v24  ;;  %1436 = vst.msk [vmem:[#allocation2 + $0x20] sm:$0xff] %vm19_vm0, %v1404_v5  ;;  %v1407_v6 = vadd.f32 %v1301_v55, %v59_v7  ;;  %v1293_v44 = vadd.f32 %v1292_v43, %v1132_v35 }
 0x152   :  { %v1470_v26 = vld [vmem:[#allocation2 + $0x18] sm:$0xff]  ;;  %v2987_v49 = vpop.f32.mrf.mxu1  ;;  %v2194_v23 = vpop.f32.mrf.mxu0  ;;  %v1148_v53 = vadd.f32 %v2089_v22, %v2840_v46 }
 0x153   :  { %v1902_v60 = vpack.c.bf16 %v1540_v10, %v1540_v10  ;;  %v1538_v62 = vmax.f32 %v1506_v0, 0.0  ;;  %v1509_v8 = vadd.f32 %v2963_v16, %v1470_v26  ;;  %1439 = vst.msk [vmem:[#allocation2 + $0x38] sm:$0xff] %vm19_vm0, %v1407_v6  ;;  %v1314_v63 = vadd.f32 %v2194_v23, %v1153_v14 }
 0x154   :  { %v1468_v37 = vld [vmem:[#allocation2 + $0x8] sm:$0xff]  ;;  %v1405_v2 = vadd.f32 %v1293_v44, %v57_v11  ;;  %v2993_v28 = vpop.f32.mrf.mxu1  ;;  %v1305_v29 = vpop.f32.mrf.mxu0  ;;  %v1169_v10 = vadd.f32 %v2104_v51, %v1992_v18  ;;  %v66_v44 = vld [vmem:[#allocation2 + $0x70] sm:$0xff]  ;;  %v1172_v51 = vadd.f32 %v2107_v39, %v1995_v36 }
 0x155   :  { %1701 = vst.msk [vmem:[%s3256_s3 + $0x8] sm:$0xf] %vm1698_vm1, %v1902_v60  ;;  %v1900_v48 = vpack.c.bf16 %v1538_v62, %v1538_v62  ;;  %v1541_v50 = vmax.f32 %v1509_v8, 0.0  ;;  %v1507_v38 = vadd.f32 %v2963_v16, %v1468_v37  ;;  %v1410_v17 = vadd.f32 %v1314_v63, %v62_v31  ;;  %v65_v39 = vld [vmem:[#allocation2 + $0x68] sm:$0xff]  ;;  %v70_v36 = vld [vmem:[#allocation2 + $0x90] sm:$0xff] }
 0x156   :  { %v1473_v27 = vld [vmem:[#allocation2 + $0x30] sm:$0xff]  ;;  %1437 = vst.msk [vmem:[#allocation2 + $0x28] sm:$0xff] %vm19_vm0, %v1405_v2  ;;  %v1306_v41 = vadd.f32 %v1305_v29, %v1145_v32  ;;  %v3005_v7 = vpop.f32.mrf.mxu1  ;;  %v2195_v40 = vpop.f32.mrf.mxu0  ;;  %v1161_v8 = vadd.f32 %v2098_v13, %v2850_v1  ;;  %v2116_v37 = vadd.f32 %v2965_v20, %v2954_v47  ;;  %v67_v47 = vld [vmem:[#allocation2 + $0x78] sm:$0xff] }
 0x157   :  { %1699 = vst.msk [vmem:[%s3256_s3] sm:$0xf] %vm1698_vm1, %v1900_v48  ;;  %v1903_v5 = vpack.c.bf16 %v1541_v50, %v1541_v50  ;;  %v1539_v55 = vmax.f32 %v1507_v38, 0.0  ;;  %v1512_v34 = vadd.f32 %v2963_v16, %v1473_v27  ;;  %v1317_v9 = vadd.f32 %v2195_v40, %v1156_v52  ;;  %v3281_v50 = vld [vmem:[#allocation25_spill] sm:$0xff]  ;;  %v3283_v40 = vld [vmem:[#allocation15_spill] sm:$0xff] }
 0x158   :  { %1442 = vst.msk [vmem:[#allocation2 + $0x50] sm:$0xff] %vm19_vm0, %v1410_v17  ;;  %v1471_v24 = vld [vmem:[#allocation2 + $0x20] sm:$0xff]  ;;  %v1408_v46 = vadd.f32 %v1306_v41, %v60_v12  ;;  %v3018_v35 = vpop.f32.mrf.mxu1  ;;  %v1308_v43 = vpop.f32.mrf.mxu0  ;;  %v2004_v48 = vadd.f32 %v3280_v25, %v2884_v33  ;;  %v2110_v1 = vadd.f32 %v2940_v42, %v3281_v50 }
 0x159   :  { %1702 = vst.msk [vmem:[%s3256_s3 + $0xc] sm:$0xf] %vm1698_vm1, %v1903_v5  ;;  %v1901_v0 = vpack.c.bf16 %v1539_v55, %v1539_v55  ;;  %v1544_v6 = vmax.f32 %v1512_v34, 0.0  ;;  %v1510_v11 = vadd.f32 %v2963_v16, %v1471_v24  ;;  %v1411_v14 = vadd.f32 %v1317_v9, %v63_v56  ;;  %v3282_v41 = vld [vmem:[#allocation11_spill] sm:$0xff] }
 0x15a   :  { %v1474_v61 = vld [vmem:[#allocation2 + $0x38] sm:$0xff]  ;;  %1440 = vst.msk [vmem:[#allocation2 + $0x40] sm:$0xff] %vm19_vm0, %v1408_v46  ;;  %v1309_v22 = vadd.f32 %v1308_v43, %v1148_v53  ;;  %v3030_v26 = vpop.f32.mrf.mxu1  ;;  %v2198_v31 = vpop.f32.mrf.mxu0  ;;  %v1164_v56 = vadd.f32 %v2101_v59, %v3282_v41  ;;  %v3284_v53 = vld [vmem:[#allocation16_spill] sm:$0xff]  ;;  %v2119_v55 = vadd.f32 %v2979_v57, %v2971_v3 }
 0x15b   :  { %1700 = vst.msk [vmem:[%s3256_s3 + $0x4] sm:$0xf] %vm1698_vm1, %v1901_v0  ;;  %v1906_v23 = vpack.c.bf16 %v1544_v6, %v1544_v6  ;;  %v1542_v60 = vmax.f32 %v1510_v11, 0.0  ;;  %v1513_v15 = vadd.f32 %v2963_v16, %v1474_v61  ;;  %v1330_v30 = vadd.f32 %v2198_v31, %v1169_v10 }
 0x15c   :  { %1443 = vst.msk [vmem:[#allocation2 + $0x58] sm:$0xff] %vm19_vm0, %v1411_v14  ;;  %v1409_v4 = vadd.f32 %v1309_v22, %v61_v54  ;;  %v3040_v62 = vpop.f32.mrf.mxu1  ;;  %v1321_v63 = vpop.f32.mrf.mxu0  ;;  %v2007_v5 = vadd.f32 %v3284_v53, %v3283_v40  ;;  %v1185_v6 = vadd.f32 %v2116_v37, %v2004_v48  ;;  %v2113_v11 = vadd.f32 %v2949_v45, %v2943_v58  ;;  %v3286_v58 = vld [vmem:[#allocation13_spill] sm:$0xff] }
 0x15d   :  { %1705 = vst.msk [vmem:[%s3256_s3 + $0x18] sm:$0xf] %vm1698_vm1, %v1906_v23  ;;  %v1904_v2 = vpack.c.bf16 %v1542_v60, %v1542_v60  ;;  %v1545_v32 = vmax.f32 %v1513_v15, 0.0  ;;  %v1472_v29 = vld [vmem:[#allocation2 + $0x28] sm:$0xff]  ;;  %v1414_v52 = vadd.f32 %v1330_v30, %v66_v44  ;;  %v1322_v12 = vadd.f32 %v1321_v63, %v1161_v8 }
 0x15e   :  { %v1511_v38 = vadd.f32 %v2963_v16, %v1472_v29  ;;  %1441 = vst.msk [vmem:[#allocation2 + $0x48] sm:$0xff] %vm19_vm0, %v1409_v4  ;;  %v3055_v18 = vpop.f32.mrf.mxu1  ;;  %v2199_v20 = vpop.f32.mrf.mxu0  ;;  %v1177_v61 = vadd.f32 %v2110_v1, %v1998_v19  ;;  %v3285_v60 = vld [vmem:[#allocation12_spill] sm:$0xff]  ;;  %v68_v4 = vld [vmem:[#allocation2 + $0x80] sm:$0xff]  ;;  %v1188_v8 = vadd.f32 %v2119_v55, %v2007_v5  ;;  %v2128_v37 = vadd.f32 %v3040_v62, %v3030_v26  ;;  %v3287_v29 = vld [vmem:[#allocation21_spill] sm:$0xff] }
 0x15f   :  { %v1477_v17 = vld [vmem:[#allocation2 + $0x50] sm:$0xff]  ;;  %1703 = vst.msk [vmem:[%s3256_s3 + $0x10] sm:$0xf] %vm1698_vm1, %v1904_v2  ;;  %v1907_v27 = vpack.c.bf16 %v1545_v32, %v1545_v32  ;;  %v1333_v42 = vadd.f32 %v2199_v20, %v1172_v51  ;;  %v1412_v9 = vadd.f32 %v1322_v12, %v64_v21  ;;  %v2001_v45 = vadd.f32 %v3286_v58, %v3285_v60 }
 0x160   :  { %v1516_v33 = vadd.f32 %v2963_v16, %v1477_v17  ;;  %1446 = vst.msk [vmem:[#allocation2 + $0x70] sm:$0xff] %vm19_vm0, %v1414_v52  ;;  %v1543_v34 = vmax.f32 %v1511_v38, 0.0  ;;  %v2130_v13 = vpop.f32.mrf.mxu1  ;;  %v1324_v24 = vpop.f32.mrf.mxu0  ;;  %v3288_v52 = vld [vmem:[#allocation22_spill] sm:$0xff] }
 0x161   :  { %1706 = vst.msk [vmem:[%s3256_s3 + $0x1c] sm:$0xf] %vm1698_vm1, %v1907_v27  ;;  %v1475_v43 = vld [vmem:[#allocation2 + $0x40] sm:$0xff]  ;;  %v1415_v10 = vadd.f32 %v1333_v42, %v67_v47  ;;  %v1325_v0 = vadd.f32 %v1324_v24, %v1164_v56  ;;  %v2016_v21 = vadd.f32 %v3288_v52, %v3287_v29  ;;  %v71_v38 = vld [vmem:[#allocation2 + $0x98] sm:$0xff]  ;;  %v1180_v12 = vadd.f32 %v2113_v11, %v2001_v45  ;;  %v69_v56 = vld [vmem:[#allocation2 + $0x88] sm:$0xff] }
 0x162   :  { %v1548_v46 = vmax.f32 %v1516_v33, 0.0  ;;  %v1905_v14 = vpack.c.bf16 %v1543_v34, %v1543_v34  ;;  %v1514_v3 = vadd.f32 %v2963_v16, %v1475_v43  ;;  %1444 = vst.msk [vmem:[#allocation2 + $0x60] sm:$0xff] %vm19_vm0, %v1412_v9  ;;  %v3076_v54 = vpop.f32.mrf.mxu1  ;;  %v2202_v59 = vpop.f32.mrf.mxu0  ;;  %v2122_v27 = vadd.f32 %v2993_v28, %v2987_v49  ;;  %v3289_v34 = vld [vmem:[#allocation17_spill] sm:$0xff]  ;;  %v3290_v9 = vld [vmem:[#allocation18_spill] sm:$0xff] }
 0x163   :  { %v1478_v57 = vld [vmem:[#allocation2 + $0x58] sm:$0xff]  ;;  %1447 = vst.msk [vmem:[#allocation2 + $0x78] sm:$0xff] %vm19_vm0, %v1415_v10  ;;  %v1413_v31 = vadd.f32 %v1325_v0, %v65_v39  ;;  %v1346_v23 = vadd.f32 %v2202_v59, %v1185_v6  ;;  %v2131_v42 = vadd.f32 %v2130_v13, %v3055_v18  ;;  %v1201_v55 = vadd.f32 %v2128_v37, %v2016_v21  ;;  %v3291_v18 = vld [vmem:[#allocation23_spill] sm:$0xff]  ;;  %v3292_v13 = vld [vmem:[#allocation24_spill] sm:$0xff] }
 0x164   :  { %v1910_v22 = vpack.c.bf16 %v1548_v46, %v1548_v46  ;;  %v1517_v44 = vadd.f32 %v2963_v16, %v1478_v57  ;;  %1704 = vst.msk [vmem:[%s3256_s3 + $0x14] sm:$0xf] %vm1698_vm1, %v1905_v14  ;;  %v1546_v15 = vmax.f32 %v1514_v3, 0.0  ;;  %v3086_v30 = vpop.f32.mrf.mxu1  ;;  %v1337_v19 = vpop.f32.mrf.mxu0  ;;  %v2010_v39 = vadd.f32 %v3290_v9, %v3289_v34  ;;  %v74_v6 = vld [vmem:[#allocation2 + $0xb0] sm:$0xff] }
 0x165   :  { %v1476_v51 = vld [vmem:[#allocation2 + $0x48] sm:$0xff]  ;;  %1445 = vst.msk [vmem:[#allocation2 + $0x68] sm:$0xff] %vm19_vm0, %v1413_v31  ;;  %v1418_v2 = vadd.f32 %v1346_v23, %v70_v36  ;;  %v1338_v32 = vadd.f32 %v1337_v19, %v1177_v61  ;;  %v2019_v24 = vadd.f32 %v3292_v13, %v3291_v18  ;;  %v2125_v59 = vadd.f32 %v3018_v35, %v3005_v7 }
 0x166   :  { %1709 = vst.msk [vmem:[%s3256_s3 + $0x28] sm:$0xf] %vm1698_vm1, %v1910_v22  ;;  %v1549_v63 = vmax.f32 %v1517_v44, 0.0  ;;  %v1908_v25 = vpack.c.bf16 %v1546_v15, %v1546_v15  ;;  %v1515_v48 = vadd.f32 %v2963_v16, %v1476_v51  ;;  %v3098_v1 = vpop.f32.mrf.mxu1  ;;  %v2203_v17 = vpop.f32.mrf.mxu0  ;;  %v1193_v31 = vadd.f32 %v2122_v27, %v2010_v39  ;;  %v72_v15 = vld [vmem:[#allocation2 + $0xa0] sm:$0xff]  ;;  %v3294_v19 = vld [vmem:[#allocation20_spill] sm:$0xff] }
 0x167   :  { %v1481_v50 = vld [vmem:[#allocation2 + $0x70] sm:$0xff]  ;;  %1450 = vst.msk [vmem:[#allocation2 + $0x90] sm:$0xff] %vm19_vm0, %v1418_v2  ;;  %v1416_v26 = vadd.f32 %v1338_v32, %v68_v4  ;;  %v1349_v62 = vadd.f32 %v2203_v17, %v1188_v8  ;;  %v1204_v60 = vadd.f32 %v2131_v42, %v2019_v24  ;;  %v3293_v4 = vld [vmem:[#allocation19_spill] sm:$0xff]  ;;  %v75_v32 = vld [vmem:[#allocation2 + $0xb8] sm:$0xff] }
 0x168   :  { %v1911_v47 = vpack.c.bf16 %v1549_v63, %v1549_v63  ;;  %v1520_v20 = vadd.f32 %v2963_v16, %v1481_v50  ;;  %1707 = vst.msk [vmem:[%s3256_s3 + $0x20] sm:$0xf] %vm1698_vm1, %v1908_v25  ;;  %v1547_v33 = vmax.f32 %v1515_v48, 0.0  ;;  %v3109_v41 = vpop.f32.mrf.mxu1  ;;  %v1340_v40 = vpop.f32.mrf.mxu0  ;;  %v2013_v8 = vadd.f32 %v3294_v19, %v3293_v4 }
 0x169   :  { %v1479_v5 = vld [vmem:[#allocation2 + $0x60] sm:$0xff]  ;;  %1448 = vst.msk [vmem:[#allocation2 + $0x80] sm:$0xff] %vm19_vm0, %v1416_v26  ;;  %v1419_v49 = vadd.f32 %v1349_v62, %v71_v38  ;;  %v1341_v28 = vadd.f32 %v1340_v40, %v1180_v12  ;;  %v2134_v50 = vadd.f32 %v3086_v30, %v3076_v54  ;;  %v3295_v26 = vld [vmem:[#allocation5_spill] sm:$0xff]  ;;  %v73_v40 = vld [vmem:[#allocation2 + $0xa8] sm:$0xff]  ;;  %v2137_v18 = vadd.f32 %v3109_v41, %v3098_v1 }
 0x16a   :  { %1710 = vst.msk [vmem:[%s3256_s3 + $0x2c] sm:$0xf] %vm1698_vm1, %v1911_v47  ;;  %v1552_v53 = vmax.f32 %v1520_v20, 0.0  ;;  %v1909_v46 = vpack.c.bf16 %v1547_v33, %v1547_v33  ;;  %v1518_v43 = vadd.f32 %v2963_v16, %v1479_v5  ;;  %v1482_v10 = vld [vmem:[#allocation2 + $0x78] sm:$0xff]  ;;  %v2138_v0 = vpop.f32.mrf.mxu1  ;;  %v2206_v11 = vpop.f32.mrf.mxu0  ;;  %v1196_v47 = vadd.f32 %v2125_v59, %v2013_v8  ;;  %v76_v59 = vld [vmem:[#allocation2 + $0xc0] sm:$0xff] }
 0x16b   :  { %v1521_v3 = vadd.f32 %v2963_v16, %v1482_v10  ;;  %1451 = vst.msk [vmem:[#allocation2 + $0x98] sm:$0xff] %vm19_vm0, %v1419_v49  ;;  %v1417_v57 = vadd.f32 %v1341_v28, %v69_v56  ;;  %v1362_v36 = vadd.f32 %v2206_v11, %v1201_v55  ;;  %v78_v49 = vld [vmem:[#allocation2 + $0xd0] sm:$0xff] }
 0x16c   :  { %v1914_v14 = vpack.c.bf16 %v1552_v53, %v1552_v53  ;;  %1708 = vst.msk [vmem:[%s3256_s3 + $0x24] sm:$0xf] %vm1698_vm1, %v1909_v46  ;;  %v1550_v61 = vmax.f32 %v1518_v43, 0.0  ;;  %v1480_v22 = vld [vmem:[#allocation2 + $0x68] sm:$0xff]  ;;  %v2139_v44 = vpop.f32.mrf.mxu1  ;;  %v1353_v23 = vpop.f32.mrf.mxu0  ;;  %v3296_v43 = vld [vmem:[#allocation3_spill] sm:$0xff] }
 0x16d   :  { %v1553_v58 = vmax.f32 %v1521_v3, 0.0  ;;  %v1519_v45 = vadd.f32 %v2963_v16, %v1480_v22  ;;  %1449 = vst.msk [vmem:[#allocation2 + $0x88] sm:$0xff] %vm19_vm0, %v1417_v57  ;;  %v1422_v7 = vadd.f32 %v1362_v36, %v74_v6  ;;  %v2140_v35 = vadd.f32 %v2139_v44, %v2138_v0  ;;  %v3297_v6 = vld [vmem:[#allocation6_spill] sm:$0xff] }
 0x16e   :  { %1713 = vst.msk [vmem:[%s3256_s3 + $0x38] sm:$0xf] %vm1698_vm1, %v1914_v14  ;;  %v1912_v63 = vpack.c.bf16 %v1550_v61, %v1550_v61  ;;  %v1485_v51 = vld [vmem:[#allocation2 + $0x90] sm:$0xff]  ;;  %v1354_v37 = vadd.f32 %v1353_v23, %v1193_v31  ;;  %v2141_v2 = vpop.f32.mrf.mxu1  ;;  %v2207_v29 = vpop.f32.mrf.mxu0  ;;  %v1209_v10 = vadd.f32 %v2134_v50, %v3296_v43  ;;  %v79_v44 = vld [vmem:[#allocation2 + $0xd8] sm:$0xff] }
 0x16f   :  { %v1915_v52 = vpack.c.bf16 %v1553_v58, %v1553_v58  ;;  %v1551_v21 = vmax.f32 %v1519_v45, 0.0  ;;  %v1524_v25 = vadd.f32 %v2963_v16, %v1485_v51  ;;  %1454 = vst.msk [vmem:[#allocation2 + $0xb0] sm:$0xff] %vm19_vm0, %v1422_v7  ;;  %v1365_v48 = vadd.f32 %v2207_v29, %v1204_v60 }
 0x170   :  { %1711 = vst.msk [vmem:[%s3256_s3 + $0x30] sm:$0xf] %vm1698_vm1, %v1912_v63  ;;  %v1483_v38 = vld [vmem:[#allocation2 + $0x80] sm:$0xff]  ;;  %v1420_v17 = vadd.f32 %v1354_v37, %v72_v15  ;;  %v2142_v12 = vpop.f32.mrf.mxu1  ;;  %v1356_v20 = vpop.f32.mrf.mxu0  ;;  %v1217_v62 = vadd.f32 %v2140_v35, %v3295_v26  ;;  %v3298_v15 = vld [vmem:[#allocation4_spill] sm:$0xff] }
 0x171   :  { %1714 = vst.msk [vmem:[%s3256_s3 + $0x3c] sm:$0xf] %vm1698_vm1, %v1915_v52  ;;  %v1913_v27 = vpack.c.bf16 %v1551_v21, %v1551_v21  ;;  %v1556_v33 = vmax.f32 %v1524_v25, 0.0  ;;  %v1522_v42 = vadd.f32 %v2963_v16, %v1483_v38  ;;  %v1423_v56 = vadd.f32 %v1365_v48, %v75_v32 }
 0x172   :  { %v1486_v53 = vld [vmem:[#allocation2 + $0x98] sm:$0xff]  ;;  %1452 = vst.msk [vmem:[#allocation2 + $0xa0] sm:$0xff] %vm19_vm0, %v1420_v17  ;;  %v2143_v54 = vadd.f32 %v2142_v12, %v2141_v2  ;;  %v1357_v30 = vadd.f32 %v1356_v20, %v1196_v47  ;;  %v2144_v5 = vpop.f32.mrf.mxu1  ;;  %v2210_v28 = vpop.f32.mrf.mxu0  ;;  %v1212_v4 = vadd.f32 %v2137_v18, %v3298_v15  ;;  %v77_v2 = vld [vmem:[#allocation2 + $0xc8] sm:$0xff]  ;;  %v3299_v17 = vld [vmem:[#allocation7_spill] sm:$0xff] }
 0x173   :  { %1712 = vst.msk [vmem:[%s3256_s3 + $0x34] sm:$0xf] %vm1698_vm1, %v1913_v27  ;;  %v1918_v55 = vpack.c.bf16 %v1556_v33, %v1556_v33  ;;  %v1554_v34 = vmax.f32 %v1522_v42, 0.0  ;;  %v1525_v9 = vadd.f32 %v2963_v16, %v1486_v53  ;;  %v1378_v39 = vadd.f32 %v2210_v28, %v1217_v62  ;;  %v80_v62 = vld [vmem:[#allocation2 + $0xe0] sm:$0xff]  ;;  %v3300_v28 = vld [vmem:[#allocation8_spill] sm:$0xff] }
 0x174   :  { %1455 = vst.msk [vmem:[#allocation2 + $0xb8] sm:$0xff] %vm19_vm0, %v1423_v56  ;;  %v1484_v13 = vld [vmem:[#allocation2 + $0x88] sm:$0xff]  ;;  %v1421_v24 = vadd.f32 %v1357_v30, %v73_v40  ;;  %v2145_v46 = vpop.f32.mrf.mxu1  ;;  %v1369_v0 = vpop.f32.mrf.mxu0  ;;  %v1220_v11 = vadd.f32 %v2143_v54, %v3297_v6 }
 0x175   :  { %1717 = vst.msk [vmem:[%s3256_s3 + $0x48] sm:$0xf] %vm1698_vm1, %v1918_v55  ;;  %v1916_v14 = vpack.c.bf16 %v1554_v34, %v1554_v34  ;;  %v1557_v3 = vmax.f32 %v1525_v9, 0.0  ;;  %v1523_v57 = vadd.f32 %v2963_v16, %v1484_v13  ;;  %v1426_v36 = vadd.f32 %v1378_v39, %v78_v49  ;;  %v3301_v39 = vld [vmem:[#allocation9_spill] sm:$0xff] }
 0x176   :  { %v1489_v1 = vld [vmem:[#allocation2 + $0xb0] sm:$0xff]  ;;  %1453 = vst.msk [vmem:[#allocation2 + $0xa8] sm:$0xff] %vm19_vm0, %v1421_v24  ;;  %v2146_v41 = vadd.f32 %v2145_v46, %v2144_v5  ;;  %v1370_v61 = vadd.f32 %v1369_v0, %v1209_v10  ;;  %v2147_v22 = vpop.f32.mrf.mxu1  ;;  %v2211_v31 = vpop.f32.mrf.mxu0 }
 0x177   :  { %1715 = vst.msk [vmem:[%s3256_s3 + $0x40] sm:$0xf] %vm1698_vm1, %v1916_v14  ;;  %v1919_v23 = vpack.c.bf16 %v1557_v3, %v1557_v3  ;;  %v1555_v60 = vmax.f32 %v1523_v57, 0.0  ;;  %v1528_v58 = vadd.f32 %v2963_v16, %v1489_v1  ;;  %v1381_v45 = vadd.f32 %v2211_v31, %v1220_v11  ;;  %v82_v46 = vld [vmem:[#allocation2 + $0xf0] sm:$0xff]  ;;  %v81_v3 = vld [vmem:[#allocation2 + $0xe8] sm:$0xff] }
 0x178   :  { %1458 = vst.msk [vmem:[#allocation2 + $0xd0] sm:$0xff] %vm19_vm0, %v1426_v36  ;;  %v1424_v7 = vadd.f32 %v1370_v61, %v76_v59  ;;  %v2148_v35 = vpop.f32.mrf.mxu1  ;;  %v1372_v19 = vpop.f32.mrf.mxu0  ;;  %v1225_v12 = vadd.f32 %v2146_v41, %v3299_v17 }
 0x179   :  { %1718 = vst.msk [vmem:[%s3256_s3 + $0x4c] sm:$0xf] %vm1698_vm1, %v1919_v23  ;;  %v1917_v8 = vpack.c.bf16 %v1555_v60, %v1555_v60  ;;  %v1560_v63 = vmax.f32 %v1528_v58, 0.0  ;;  %v1487_v51 = vld [vmem:[#allocation2 + $0xa0] sm:$0xff]  ;;  %v1427_v37 = vadd.f32 %v1381_v45, %v79_v44  ;;  %v2149_v52 = vadd.f32 %v2148_v35, %v2147_v22  ;;  %v3302_v44 = vld [vmem:[#allocation10_spill] sm:$0xff] }
 0x17a   :  { %v1526_v32 = vadd.f32 %v2963_v16, %v1487_v51  ;;  %1456 = vst.msk [vmem:[#allocation2 + $0xc0] sm:$0xff] %vm19_vm0, %v1424_v7  ;;  %v1373_v21 = vadd.f32 %v1372_v19, %v1212_v4  ;;  %v2150_v25 = vpop.f32.mrf.mxu1  ;;  %v2214_v48 = vpop.f32.mrf.mxu0  ;;  %v83_v60 = vld [vmem:[#allocation2 + $0xf8] sm:$0xff] }
 0x17b   :  { %v1490_v29 = vld [vmem:[#allocation2 + $0xb8] sm:$0xff]  ;;  %1716 = vst.msk [vmem:[%s3256_s3 + $0x44] sm:$0xf] %vm1698_vm1, %v1917_v8  ;;  %v1922_v50 = vpack.c.bf16 %v1560_v63, %v1560_v63  ;;  %v1228_v55 = vadd.f32 %v2149_v52, %v3300_v28 }
 0x17c   :  { %v1529_v38 = vadd.f32 %v2963_v16, %v1490_v29  ;;  %1459 = vst.msk [vmem:[#allocation2 + $0xd8] sm:$0xff] %vm19_vm0, %v1427_v37  ;;  %v1558_v47 = vmax.f32 %v1526_v32, 0.0  ;;  %v1425_v20 = vadd.f32 %v1373_v21, %v77_v2  ;;  %v2151_v26 = vpop.f32.mrf.mxu1  ;;  %v1385_v27 = vpop.f32.mrf.mxu0 }
 0x17d   :  { %1721 = vst.msk [vmem:[%s3256_s3 + $0x58] sm:$0xf] %vm1698_vm1, %v1922_v50  ;;  %v1488_v42 = vld [vmem:[#allocation2 + $0xa8] sm:$0xff]  ;;  %v2152_v56 = vadd.f32 %v2151_v26, %v2150_v25  ;;  %v1386_v40 = vadd.f32 %v1385_v27, %v1225_v12 }
 0x17e   :  { %v1561_v33 = vmax.f32 %v1529_v38, 0.0  ;;  %v1920_v53 = vpack.c.bf16 %v1558_v47, %v1558_v47  ;;  %v1527_v54 = vadd.f32 %v2963_v16, %v1488_v42  ;;  %1457 = vst.msk [vmem:[#allocation2 + $0xc8] sm:$0xff] %vm19_vm0, %v1425_v20  ;;  %v2153_v5 = vpop.f32.mrf.mxu1  ;;  %v2215_v49 = vpop.f32.mrf.mxu0 }
 0x17f   :  { %v1493_v30 = vld [vmem:[#allocation2 + $0xd0] sm:$0xff]  ;;  %v1233_v18 = vadd.f32 %v2152_v56, %v3301_v39  ;;  %v1428_v13 = vadd.f32 %v1386_v40, %v80_v62 }
 0x180   :  { %v1923_v34 = vpack.c.bf16 %v1561_v33, %v1561_v33  ;;  %v1532_v9 = vadd.f32 %v2963_v16, %v1493_v30  ;;  %1719 = vst.msk [vmem:[%s3256_s3 + $0x50] sm:$0xf] %vm1698_vm1, %v1920_v53  ;;  %v1559_v24 = vmax.f32 %v1527_v54, 0.0  ;;  %v2154_v43 = vpop.f32.mrf.mxu1  ;;  %v1388_v10 = vpop.f32.mrf.mxu0 }
 0x181   :  { %v1491_v6 = vld [vmem:[#allocation2 + $0xc0] sm:$0xff]  ;;  %v1394_v11 = vadd.f32 %v2214_v48, %v1233_v18  ;;  %1460 = vst.msk [vmem:[#allocation2 + $0xe0] sm:$0xff] %vm19_vm0, %v1428_v13  ;;  %v2155_v14 = vadd.f32 %v2154_v43, %v2153_v5  ;;  %v1389_v57 = vadd.f32 %v1388_v10, %v1228_v55 }
 0x182   :  { %1722 = vst.msk [vmem:[%s3256_s3 + $0x5c] sm:$0xf] %vm1698_vm1, %v1923_v34  ;;  %v1564_v0 = vmax.f32 %v1532_v9, 0.0  ;;  %v1921_v36 = vpack.c.bf16 %v1559_v24, %v1559_v24  ;;  %v1530_v59 = vadd.f32 %v2963_v16, %v1491_v6 }
 0x183   :  { %v1494_v1 = vld [vmem:[#allocation2 + $0xd8] sm:$0xff]  ;;  %v1430_v22 = vadd.f32 %v1394_v11, %v82_v46  ;;  %v1236_v31 = vadd.f32 %v2155_v14, %v3302_v44  ;;  %v1429_v58 = vadd.f32 %v1389_v57, %v81_v3 }
 0x184   :  { %v1926_v41 = vpack.c.bf16 %v1564_v0, %v1564_v0  ;;  %v1533_v61 = vadd.f32 %v2963_v16, %v1494_v1  ;;  %1720 = vst.msk [vmem:[%s3256_s3 + $0x54] sm:$0xf] %vm1698_vm1, %v1921_v36  ;;  %v1562_v23 = vmax.f32 %v1530_v59, 0.0 }
 0x185   :  { %v1492_v7 = vld [vmem:[#allocation2 + $0xc8] sm:$0xff]  ;;  %1462 = vst.msk [vmem:[#allocation2 + $0xf0] sm:$0xff] %vm19_vm0, %v1430_v22  ;;  %v1397_v35 = vadd.f32 %v2215_v49, %v1236_v31  ;;  %1461 = vst.msk [vmem:[#allocation2 + $0xe8] sm:$0xff] %vm19_vm0, %v1429_v58 }
 0x186   :  { %1725 = vst.msk [vmem:[%s3256_s3 + $0x68] sm:$0xf] %vm1698_vm1, %v1926_v41  ;;  %v1565_v45 = vmax.f32 %v1533_v61, 0.0  ;;  %v1924_v15 = vpack.c.bf16 %v1562_v23, %v1562_v23  ;;  %v1531_v4 = vadd.f32 %v2963_v16, %v1492_v7 }
 0x187   :  { %v1431_v8 = vadd.f32 %v1397_v35, %v83_v60 }
 0x188   :  { %v1927_v19 = vpack.c.bf16 %v1565_v45, %v1565_v45  ;;  %1723 = vst.msk [vmem:[%s3256_s3 + $0x60] sm:$0xf] %vm1698_vm1, %v1924_v15  ;;  %v1563_v63 = vmax.f32 %v1531_v4, 0.0  ;;  %v1495_v51 = vld [vmem:[#allocation2 + $0xe0] sm:$0xff] }
 0x189   :  { %v1534_v37 = vadd.f32 %v2963_v16, %v1495_v51  ;;  %1463 = vst.msk [vmem:[#allocation2 + $0xf8] sm:$0xff] %vm19_vm0, %v1431_v8 }
 0x18a   :  { %1726 = vst.msk [vmem:[%s3256_s3 + $0x6c] sm:$0xf] %vm1698_vm1, %v1927_v19  ;;  %v1925_v2 = vpack.c.bf16 %v1563_v63, %v1563_v63 }
 0x18b   :  { %v1566_v32 = vmax.f32 %v1534_v37, 0.0 }
 0x18c   :  { %1724 = vst.msk [vmem:[%s3256_s3 + $0x64] sm:$0xf] %vm1698_vm1, %v1925_v2  ;;  %v1497_v29 = vld [vmem:[#allocation2 + $0xf0] sm:$0xff]  ;;  %v1496_v25 = vld [vmem:[#allocation2 + $0xe8] sm:$0xff] }
 0x18d   :  { %v1536_v52 = vadd.f32 %v2963_v16, %v1497_v29  ;;  %v1928_v21 = vpack.c.bf16 %v1566_v32, %v1566_v32  ;;  %v1535_v48 = vadd.f32 %v2963_v16, %v1496_v25 }
 0x18f   :  { %v1568_v50 = vmax.f32 %v1536_v52, 0.0  ;;  %1727 = vst.msk [vmem:[%s3256_s3 + $0x70] sm:$0xf] %vm1698_vm1, %v1928_v21  ;;  %v1567_v17 = vmax.f32 %v1535_v48, 0.0 }
 0x190   :  { %v1498_v38 = vld [vmem:[#allocation2 + $0xf8] sm:$0xff] }
 0x191   :  { %v1930_v12 = vpack.c.bf16 %v1568_v50, %v1568_v50  ;;  %v1537_v47 = vadd.f32 %v2963_v16, %v1498_v38  ;;  %v1929_v20 = vpack.c.bf16 %v1567_v17, %v1567_v17 }
 0x193   :  { %1729 = vst.msk [vmem:[%s3256_s3 + $0x78] sm:$0xf] %vm1698_vm1, %v1930_v12  ;;  %v1569_v26 = vmax.f32 %v1537_v47, 0.0  ;;  %1728 = vst.msk [vmem:[%s3256_s3 + $0x74] sm:$0xf] %vm1698_vm1, %v1929_v20 }
 0x195   :  { %v1931_v62 = vpack.c.bf16 %v1569_v26, %v1569_v26 }
 0x197   :  { %1730 = vst.msk [vmem:[%s3256_s3 + $0x7c] sm:$0xf] %vm1698_vm1, %v1931_v62 }

// kernel: siamese_forward.24
= control target key start
LH: loop header
LB: loop body
LE: loop exit
PB: predicated region body
PF: predicated region fallthrough
CT: control target
= control target key end

     0   :  { %vm22_vm0 = vcmask 523264   ;;  %vm1797_vm1 = vcmask 519168   ;;  %s3615_s1 = inlined_call_operand.vmem [shape: bf16[576,64], index: 1, kind: input, shape index: {}]   ;;  %s3616_s0 = inlined_call_operand.vmem [shape: bf16[256,576], index: 0, kind: input, shape index: {}]   ;;  %s3617_s3 = inlined_call_operand.vmem [shape: bf16[256,64], index: 3, kind: input, shape index: {}]   ;;  %s3618_s2 = inlined_call_operand.vmem [shape: f32[1,64], index: 2, kind: input, shape index: {}]   ;;  %s3619_s4 = inlined_call_operand.vmem [shape: bf16[256,64], index: 4, kind: output, shape index: {}]  }
   0x1   :  { %v2411_v0 = vld [vmem:[%s3615_s1 + $0x78] sm:$0xff]   ;;  %v2413_v2 = vld [vmem:[%s3615_s1 + $0x70] sm:$0xff]   ;;  %v2415_v4 = vld [vmem:[%s3615_s1 + $0x68] sm:$0xff]  }
   0x2   :  { %v2412_v1 = vld [vmem:[%s3615_s1 + $0x38] sm:$0xff]   ;;  %2110 = vmatprep.subr.bf16.mxu0 %v2411_v0  ;;  %2394 = vmatprep.subr.bf16.mxu1 %v2411_v0  ;;  %v2414_v3 = vld [vmem:[%s3615_s1 + $0x30] sm:$0xff]   ;;  %v2416_v5 = vld [vmem:[%s3615_s1 + $0x28] sm:$0xff]  }
   0x3   :  { %2111 = vmatpush3.bf16.msra.mxu0 %v2412_v1  ;;  %2402 = vmatpush3.bf16.msra.mxu1 %v2412_v1  ;;  %v2417_v6 = vld [vmem:[%s3615_s1 + $0x60] sm:$0xff]   ;;  %v2419_v8 = vld [vmem:[%s3615_s1 + $0x58] sm:$0xff]   ;;  %v2421_v10 = vld [vmem:[%s3615_s1 + $0x50] sm:$0xff]  }
   0x4   :  { %2112 = vmatprep.subr.bf16.mxu0 %v2413_v2  ;;  %2395 = vmatprep.subr.bf16.mxu1 %v2413_v2  ;;  %v2418_v7 = vld [vmem:[%s3615_s1 + $0x20] sm:$0xff]   ;;  %v2420_v9 = vld [vmem:[%s3615_s1 + $0x18] sm:$0xff]   ;;  %v2422_v13 = vld [vmem:[%s3615_s1 + $0x10] sm:$0xff]  }
   0x5   :  { %v2429_v11 = vld [vmem:[%s3616_s0 + $0x4] ss:$20 sps:$4 sm:$0xff]   ;;  %v2423_v14 = vld [vmem:[%s3615_s1 + $0x48] sm:$0xff]   ;;  %v2427_v20 = vld [vmem:[%s3616_s0] ss:$20 sps:$4 sm:$0xff]  }
   0x6   :  { %v2432_v12 = vld [vmem:[%s3616_s0 + $0x1e4] ss:$20 sps:$4 sm:$0xff]   ;;  %952 = vmatprep.mubr.bf16.mxu0 %v2429_v11  ;;  %v2424_v15 = vld [vmem:[%s3615_s1 + $0x8] sm:$0xff]   ;;  %v2430_v21 = vld [vmem:[%s3616_s0 + $0x1e0] ss:$20 sps:$4 sm:$0xff]  }
   0x7   :  { %2113 = vmatpush3.bf16.msra.mxu0 %v2414_v3  ;;  %2403 = vmatpush3.bf16.msra.mxu1 %v2414_v3  ;;  %v2425_v16 = vld [vmem:[%s3615_s1 + $0x40] sm:$0xff]   ;;  %v2433_v18 = vld [vmem:[%s3615_s1 + $0xf8] sm:$0xff]   ;;  %v2435_v23 = vld [vmem:[%s3615_s1 + $0xf0] sm:$0xff]  }
   0x8   :  { %2114 = vmatprep.subr.bf16.mxu0 %v2415_v4  ;;  %2396 = vmatprep.subr.bf16.mxu1 %v2415_v4  ;;  %v2426_v17 = vld [vmem:[%s3615_s1] sm:$0xff]   ;;  %v2436_v19 = vld [vmem:[%s3615_s1 + $0x118] sm:$0xff]   ;;  %v2437_v26 = vld [vmem:[%s3615_s1 + $0xb0] sm:$0xff]  }
   0x9   :  { %1048 = vmatprep.mubr.bf16.mxu1 %v2432_v12  ;;  %v2434_v22 = vld [vmem:[%s3615_s1 + $0xb8] sm:$0xff]   ;;  %v2438_v24 = vld [vmem:[%s3616_s0 + $0x2c] ss:$20 sps:$4 sm:$0xff]   ;;  %v2448_v32 = vld [vmem:[%s3616_s0 + $0x54] ss:$20 sps:$4 sm:$0xff]  }
   0xa   :  { %v2440_v25 = vld [vmem:[%s3616_s0 + $0x20c] ss:$20 sps:$4 sm:$0xff]   ;;  %v2442_v27 = vld [vmem:[%s3616_s0 + $0x28] ss:$20 sps:$4 sm:$0xff]   ;;  %v2467_v35 = vld [vmem:[%s3615_s1 + $0x110] sm:$0xff]  }
   0xb   :  { %2115 = vmatpush3.bf16.msra.mxu0 %v2416_v5  ;;  %2404 = vmatpush3.bf16.msra.mxu1 %v2416_v5  ;;  %v2444_v28 = vld [vmem:[%s3615_s1 + $0xe8] sm:$0xff]   ;;  %v2446_v31 = vld [vmem:[%s3615_s1 + $0xe0] sm:$0xff]   ;;  %v2454_v37 = vld [vmem:[%s3615_s1 + $0xd8] sm:$0xff]  }
   0xc   :  { %2116 = vmatprep.subr.bf16.mxu0 %v2417_v6  ;;  %2397 = vmatprep.subr.bf16.mxu1 %v2417_v6  ;;  %v2443_v29 = vld [vmem:[%s3616_s0 + $0x208] ss:$20 sps:$4 sm:$0xff]   ;;  %v2447_v34 = vld [vmem:[%s3615_s1 + $0xa0] sm:$0xff]   ;;  %v2456_v40 = vld [vmem:[%s3615_s1 + $0xd0] sm:$0xff]  }
   0xd   :  { %v2445_v30 = vld [vmem:[%s3615_s1 + $0xa8] sm:$0xff]   ;;  %v2452_v36 = vld [vmem:[%s3616_s0 + $0x50] ss:$20 sps:$4 sm:$0xff]   ;;  %v2455_v39 = vld [vmem:[%s3615_s1 + $0x98] sm:$0xff]  }
   0xe   :  { %v2450_v33 = vld [vmem:[%s3616_s0 + $0x234] ss:$20 sps:$4 sm:$0xff]   ;;  %v2453_v38 = vld [vmem:[%s3616_s0 + $0x230] ss:$20 sps:$4 sm:$0xff]   ;;  %v2462_v44 = vld [vmem:[%s3616_s0 + $0x78] ss:$20 sps:$4 sm:$0xff]  }
   0xf   :  { %2117 = vmatpush3.bf16.msra.mxu0 %v2418_v7  ;;  %2405 = vmatpush3.bf16.msra.mxu1 %v2418_v7  ;;  %v2458_v41 = vld [vmem:[%s3616_s0 + $0x7c] ss:$20 sps:$4 sm:$0xff]   ;;  %v2463_v45 = vld [vmem:[%s3616_s0 + $0x258] ss:$20 sps:$4 sm:$0xff]   ;;  %v2466_v49 = vld [vmem:[%s3615_s1 + $0xc0] sm:$0xff]  }
  0x10   :  { %2118 = vmatprep.subr.bf16.mxu0 %v2419_v8  ;;  %2398 = vmatprep.subr.bf16.mxu1 %v2419_v8  ;;  %v2460_v42 = vld [vmem:[%s3616_s0 + $0x25c] ss:$20 sps:$4 sm:$0xff]   ;;  %v2464_v46 = vld [vmem:[%s3615_s1 + $0xc8] sm:$0xff]   ;;  %v2469_v50 = vld [vmem:[%s3616_s0 + $0xa4] ss:$20 sps:$4 sm:$0xff]  }
  0x11   :  { %v2457_v43 = vld [vmem:[%s3615_s1 + $0x90] sm:$0xff]   ;;  %v2487_v47 = vld [vmem:[%s3615_s1 + $0x108] sm:$0xff]   ;;  %v2468_v52 = vld [vmem:[%s3615_s1 + $0x80] sm:$0xff]  }
  0x12   :  { %v2465_v48 = vld [vmem:[%s3615_s1 + $0x88] sm:$0xff]   ;;  %v2474_v54 = vld [vmem:[%s3616_s0 + $0xa0] ss:$20 sps:$4 sm:$0xff]   ;;  %v2480_v59 = vld [vmem:[%s3616_s0 + $0x30] ss:$20 sps:$4 sm:$0xff]  }
  0x13   :  { %2119 = vmatpush3.bf16.msra.mxu0 %v2420_v9  ;;  %2406 = vmatpush3.bf16.msra.mxu1 %v2420_v9  ;;  %v2473_v51 = vld [vmem:[%s3616_s0 + $0xc] ss:$20 sps:$4 sm:$0xff]   ;;  %v2471_v53 = vld [vmem:[%s3616_s0 + $0x8] ss:$20 sps:$4 sm:$0xff]   ;;  %v2485_v62 = vld [vmem:[%s3616_s0 + $0xf0] ss:$20 sps:$4 sm:$0xff]  }
  0x14   :  { %2120 = vmatprep.subr.bf16.mxu0 %v2421_v10  ;;  %2399 = vmatprep.subr.bf16.mxu1 %v2421_v10  ;;  %v2475_v55 = vld [vmem:[%s3616_s0 + $0xcc] ss:$20 sps:$4 sm:$0xff]   ;;  %v2477_v57 = vld [vmem:[%s3616_s0 + $0x34] ss:$20 sps:$4 sm:$0xff]   ;;  %v2483_v61 = vld [vmem:[%s3616_s0 + $0x5c] ss:$20 sps:$4 sm:$0xff]  }
  0x15   :  { %v2506_v56 = vld [vmem:[%s3615_s1 + $0x100] sm:$0xff]   ;;  %v2479_v58 = vld [vmem:[%s3616_s0 + $0xc8] ss:$20 sps:$4 sm:$0xff]   ;;  %v2486_v63 = vld [vmem:[%s3616_s0 + $0x58] ss:$20 sps:$4 sm:$0xff]  }
  0x16   :  { %v2481_v60 = vld [vmem:[%s3616_s0 + $0xf4] ss:$20 sps:$4 sm:$0xff]   ;;  %v2488_v0 = vld [vmem:[%s3616_s0 + $0x11c] ss:$20 sps:$4 sm:$0xff]   ;;  %v2490_v1 = vld [vmem:[%s3616_s0 + $0x84] ss:$20 sps:$4 sm:$0xff]  }
  0x17   :  { %2121 = vmatpush3.bf16.msra.mxu0 %v2422_v13  ;;  %2407 = vmatpush3.bf16.msra.mxu1 %v2422_v13  ;;  %v2492_v2 = vld [vmem:[%s3616_s0 + $0x118] ss:$20 sps:$4 sm:$0xff]   ;;  %v2493_v3 = vld [vmem:[%s3616_s0 + $0x80] ss:$20 sps:$4 sm:$0xff]   ;;  %v2499_v7 = vld [vmem:[%s3616_s0 + $0xa8] ss:$20 sps:$4 sm:$0xff]  }
  0x18   :  { %2122 = vmatprep.subr.bf16.mxu0 %v2423_v14  ;;  %2400 = vmatprep.subr.bf16.mxu1 %v2423_v14  ;;  %v2494_v4 = vld [vmem:[%s3616_s0 + $0x144] ss:$20 sps:$4 sm:$0xff]   ;;  %v2496_v5 = vld [vmem:[%s3616_s0 + $0xac] ss:$20 sps:$4 sm:$0xff]   ;;  %v2502_v9 = vld [vmem:[%s3616_s0 + $0xd4] ss:$20 sps:$4 sm:$0xff]  }
  0x19   :  { %v2498_v6 = vld [vmem:[%s3616_s0 + $0x140] ss:$20 sps:$4 sm:$0xff]   ;;  %v2504_v10 = vld [vmem:[%s3616_s0 + $0x168] ss:$20 sps:$4 sm:$0xff]   ;;  %v2505_v11 = vld [vmem:[%s3616_s0 + $0xd0] ss:$20 sps:$4 sm:$0xff]  }
  0x1a   :  { %v2500_v8 = vld [vmem:[%s3616_s0 + $0x16c] ss:$20 sps:$4 sm:$0xff]   ;;  %v2507_v12 = vld [vmem:[%s3616_s0 + $0x194] ss:$20 sps:$4 sm:$0xff]   ;;  %v2509_v13 = vld [vmem:[%s3616_s0 + $0xfc] ss:$20 sps:$4 sm:$0xff]  }
  0x1b   :  { %2123 = vmatpush3.bf16.msra.mxu0 %v2424_v15  ;;  %2408 = vmatpush3.bf16.msra.mxu1 %v2424_v15  ;;  %v2511_v14 = vld [vmem:[%s3616_s0 + $0x190] ss:$20 sps:$4 sm:$0xff]   ;;  %v2512_v15 = vld [vmem:[%s3616_s0 + $0xf8] ss:$20 sps:$4 sm:$0xff]  }
  0x1c   :  { %2124 = vmatprep.subr.bf16.mxu0 %v2425_v16  ;;  %2401 = vmatprep.subr.bf16.mxu1 %v2425_v16  ;;  %v2513_v16 = vld [vmem:[%s3616_s0 + $0x1bc] ss:$20 sps:$4 sm:$0xff]  }
  0x1f   :  { %2125 = vmatpush3.bf16.msra.mxu0 %v2426_v17  ;;  %2409 = vmatpush3.bf16.msra.mxu1 %v2426_v17  ;;  %v2515_v17 = vld [vmem:[%s3616_s0 + $0x124] ss:$20 sps:$4 sm:$0xff]  }
  0x20   :  { %2222 = vmatprep.subr.bf16.mxu1 %v2433_v18  ;;  %2354 = vmatprep.subr.bf16.mxu0 %v2436_v19  ;;  %v2517_v18 = vld [vmem:[%s3616_s0 + $0x1b8] ss:$20 sps:$4 sm:$0xff]  }
  0x22   :  { %953 = vmatmul.mubr.bf16.vlgmr.msra.gmra.mxu0 %v2427_v20  ;;  %1049 = vmatmul.mubr.bf16.vlgmr.msra.gmra.mxu1 %v2430_v21  ;;  %v2519_v20 = vld [vmem:[%s3616_s0 + $0x14c] ss:$20 sps:$4 sm:$0xff]   ;;  %v2521_v21 = vld [vmem:[%s3616_s0 + $0x10] ss:$20 sps:$4 sm:$0xff]  }
  0x23   :  { %2223 = vmatpush3.bf16.msra.mxu1 %v2434_v22  ;;  %2355 = vmatpush3.bf16.msra.mxu0 %v2436_v19  ;;  %v2518_v19 = vld [vmem:[%s3616_s0 + $0x120] ss:$20 sps:$4 sm:$0xff]   ;;  %v2522_v22 = vld [vmem:[%s3616_s0 + $0x148] ss:$20 sps:$4 sm:$0xff]  }
  0x24   :  { %2224 = vmatprep.subr.bf16.mxu1 %v2435_v23  ;;  %960 = vmatprep.mubr.bf16.mxu0 %v2438_v24  ;;  %v2523_v23 = vld [vmem:[%s3616_s0 + $0x38] ss:$20 sps:$4 sm:$0xff]   ;;  %v2524_v24 = vld [vmem:[%s3616_s0 + $0x174] ss:$20 sps:$4 sm:$0xff]  }
  0x25   :  { %1056 = vmatprep.mubr.bf16.mxu1 %v2440_v25  ;;  %2356 = vmatprep.subr.bf16.mxu0 %v2467_v35  ;;  %v2526_v25 = vld [vmem:[%s3616_s0 + $0x60] ss:$20 sps:$4 sm:$0xff]  }
  0x27   :  { %2225 = vmatpush3.bf16.msra.mxu1 %v2437_v26  ;;  %2357 = vmatpush3.bf16.msra.mxu0 %v2467_v35  ;;  %v2527_v26 = vld [vmem:[%s3616_s0 + $0x170] ss:$20 sps:$4 sm:$0xff]   ;;  %v2538_v35 = vld [vmem:[%s3616_s0 + $0x128] ss:$20 sps:$4 sm:$0xff]  }
  0x28   :  { %2226 = vmatprep.subr.bf16.mxu1 %v2444_v28  ;;  %2358 = vmatprep.subr.bf16.mxu0 %v2487_v47  ;;  %v2529_v28 = vld [vmem:[%s3616_s0 + $0x19c] ss:$20 sps:$4 sm:$0xff]  }
  0x2a   :  { %961 = vmatmul.mubr.bf16.gmra.mxu0 %v2442_v27  ;;  %1057 = vmatmul.mubr.bf16.gmra.mxu1 %v2443_v29  ;;  %v2528_v27 = vld [vmem:[%s3616_s0 + $0x88] ss:$20 sps:$4 sm:$0xff]   ;;  %v2531_v29 = vld [vmem:[%s3616_s0 + $0xb0] ss:$20 sps:$4 sm:$0xff]  }
  0x2b   :  { %2227 = vmatpush3.bf16.msra.mxu1 %v2445_v30  ;;  %968 = vmatprep.mubr.bf16.mxu0 %v2448_v32  ;;  %v2532_v30 = vld [vmem:[%s3616_s0 + $0x198] ss:$20 sps:$4 sm:$0xff]  }
  0x2c   :  { %2228 = vmatprep.subr.bf16.mxu1 %v2446_v31  ;;  %1064 = vmatprep.mubr.bf16.mxu1 %v2450_v33  ;;  %v2533_v31 = vld [vmem:[%s3616_s0 + $0xd8] ss:$20 sps:$4 sm:$0xff]   ;;  %v2536_v33 = vld [vmem:[%s3616_s0 + $0x100] ss:$20 sps:$4 sm:$0xff]  }
  0x2d   :  { %2359 = vmatpush3.bf16.msra.mxu0 %v2487_v47  ;;  %v2534_v32 = vld [vmem:[%s3616_s0 + $0x1c4] ss:$20 sps:$4 sm:$0xff]  }
  0x2e   :  { %2360 = vmatprep.subr.bf16.mxu0 %v2506_v56  ;;  %v2553_v47 = vld [vmem:[%s3616_s0 + $0x218] ss:$20 sps:$4 sm:$0xff]  }
  0x2f   :  { %2229 = vmatpush3.bf16.msra.mxu1 %v2447_v34  ;;  %v2537_v34 = vld [vmem:[%s3616_s0 + $0x1c0] ss:$20 sps:$4 sm:$0xff]  }
  0x30   :  { %2230 = vmatprep.subr.bf16.mxu1 %v2454_v37  ;;  %v2541_v37 = vld [vmem:[%s3616_s0 + $0x150] ss:$20 sps:$4 sm:$0xff]  }
  0x31   :  { %2361 = vmatpush3.bf16.msra.mxu0 %v2506_v56 }
  0x32   :  { %969 = vmatmul.mubr.bf16.gmra.mxu0 %v2452_v36  ;;  %1065 = vmatmul.mubr.bf16.gmra.mxu1 %v2453_v38  ;;  %v2539_v36 = vld [vmem:[%s3616_s0 + $0x1ec] ss:$20 sps:$4 sm:$0xff]   ;;  %v2542_v38 = vld [vmem:[%s3616_s0 + $0x1e8] ss:$20 sps:$4 sm:$0xff]  }
  0x33   :  { %2231 = vmatpush3.bf16.msra.mxu1 %v2455_v39  ;;  %976 = vmatprep.mubr.bf16.mxu0 %v2458_v41  ;;  %v2543_v39 = vld [vmem:[%s3616_s0 + $0x178] ss:$20 sps:$4 sm:$0xff]   ;;  %v2546_v41 = vld [vmem:[%s3616_s0 + $0x1a0] ss:$20 sps:$4 sm:$0xff]  }
  0x34   :  { %2232 = vmatprep.subr.bf16.mxu1 %v2456_v40  ;;  %1072 = vmatprep.mubr.bf16.mxu1 %v2460_v42  ;;  %v2544_v40 = vld [vmem:[%s3616_s0 + $0x214] ss:$20 sps:$4 sm:$0xff]   ;;  %v2547_v42 = vld [vmem:[%s3616_s0 + $0x210] ss:$20 sps:$4 sm:$0xff]  }
  0x37   :  { %2233 = vmatpush3.bf16.msra.mxu1 %v2457_v43  ;;  %v2548_v43 = vld [vmem:[%s3616_s0 + $0x1c8] ss:$20 sps:$4 sm:$0xff]  }
  0x38   :  { %2234 = vmatprep.subr.bf16.mxu1 %v2464_v46  ;;  %v2552_v46 = vld [vmem:[%s3616_s0 + $0x238] ss:$20 sps:$4 sm:$0xff]  }
  0x3a   :  { %977 = vmatmul.mubr.bf16.gmra.mxu0 %v2462_v44  ;;  %1073 = vmatmul.mubr.bf16.gmra.mxu1 %v2463_v45  ;;  %v2549_v44 = vld [vmem:[%s3616_s0 + $0x23c] ss:$20 sps:$4 sm:$0xff]  }
  0x3b   :  { %2235 = vmatpush3.bf16.msra.mxu1 %v2465_v48  ;;  %984 = vmatprep.mubr.bf16.mxu0 %v2469_v50  ;;  %v2551_v45 = vld [vmem:[%s3616_s0 + $0x1f0] ss:$20 sps:$4 sm:$0xff]   ;;  %v2557_v50 = vld [vmem:[%s3616_s0 + $0x260] ss:$20 sps:$4 sm:$0xff]  }
  0x3c   :  { %2236 = vmatprep.subr.bf16.mxu1 %v2466_v49  ;;  %1113 = vmatprep.mubr.bf16.mxu1 %v2473_v51  ;;  %v2554_v48 = vld [vmem:[%s3616_s0 + $0x264] ss:$20 sps:$4 sm:$0xff]   ;;  %v2556_v49 = vld [vmem:[%s3616_s0 + $0x240] ss:$20 sps:$4 sm:$0xff]   ;;  %v2558_v51 = vld [vmem:[%s3616_s0 + $0x268] ss:$20 sps:$4 sm:$0xff]  }
  0x3f   :  { %2237 = vmatpush3.bf16.msra.mxu1 %v2468_v52  ;;  %v2559_v52 = vmov 0.0  }
  0x40   :  { %25 = vst.msk [vmem:[#allocation2 + $0x10] sm:$0xff] %vm22_vm0, %v2559_v52  ;;  %23 = vst.msk [vmem:[#allocation2] sm:$0xff] %vm22_vm0, %v2559_v52 }
  0x41   :  { %24 = vst.msk [vmem:[#allocation2 + $0x8] sm:$0xff] %vm22_vm0, %v2559_v52  ;;  %26 = vst.msk [vmem:[#allocation2 + $0x18] sm:$0xff] %vm22_vm0, %v2559_v52 }
  0x42   :  { %985 = vmatmul.mubr.bf16.gmra.mxu0 %v2474_v54  ;;  %1114 = vmatmul.mubr.bf16.vlgmr.msra.gmra.mxu1 %v2471_v53  ;;  %27 = vst.msk [vmem:[#allocation2 + $0x20] sm:$0xff] %vm22_vm0, %v2559_v52  ;;  %28 = vst.msk [vmem:[#allocation2 + $0x28] sm:$0xff] %vm22_vm0, %v2559_v52 }
  0x43   :  { %992 = vmatprep.mubr.bf16.mxu0 %v2475_v55  ;;  %1121 = vmatprep.mubr.bf16.mxu1 %v2477_v57  ;;  %29 = vst.msk [vmem:[#allocation2 + $0x30] sm:$0xff] %vm22_vm0, %v2559_v52  ;;  %30 = vst.msk [vmem:[#allocation2 + $0x38] sm:$0xff] %vm22_vm0, %v2559_v52 }
  0x44   :  { %31 = vst.msk [vmem:[#allocation2 + $0x40] sm:$0xff] %vm22_vm0, %v2559_v52  ;;  %32 = vst.msk [vmem:[#allocation2 + $0x48] sm:$0xff] %vm22_vm0, %v2559_v52 }
  0x45   :  { %33 = vst.msk [vmem:[#allocation2 + $0x50] sm:$0xff] %vm22_vm0, %v2559_v52  ;;  %34 = vst.msk [vmem:[#allocation2 + $0x58] sm:$0xff] %vm22_vm0, %v2559_v52 }
  0x46   :  { %35 = vst.msk [vmem:[#allocation2 + $0x60] sm:$0xff] %vm22_vm0, %v2559_v52  ;;  %36 = vst.msk [vmem:[#allocation2 + $0x68] sm:$0xff] %vm22_vm0, %v2559_v52 }
  0x47   :  { %37 = vst.msk [vmem:[#allocation2 + $0x70] sm:$0xff] %vm22_vm0, %v2559_v52  ;;  %38 = vst.msk [vmem:[#allocation2 + $0x78] sm:$0xff] %vm22_vm0, %v2559_v52 }
  0x48   :  { %39 = vst.msk [vmem:[#allocation2 + $0x80] sm:$0xff] %vm22_vm0, %v2559_v52  ;;  %40 = vst.msk [vmem:[#allocation2 + $0x88] sm:$0xff] %vm22_vm0, %v2559_v52 }
  0x49   :  { %41 = vst.msk [vmem:[#allocation2 + $0x90] sm:$0xff] %vm22_vm0, %v2559_v52  ;;  %42 = vst.msk [vmem:[#allocation2 + $0x98] sm:$0xff] %vm22_vm0, %v2559_v52 }
  0x4a   :  { %993 = vmatmul.mubr.bf16.gmra.mxu0 %v2479_v58  ;;  %1122 = vmatmul.mubr.bf16.gmra.mxu1 %v2480_v59  ;;  %43 = vst.msk [vmem:[#allocation2 + $0xa0] sm:$0xff] %vm22_vm0, %v2559_v52  ;;  %44 = vst.msk [vmem:[#allocation2 + $0xa8] sm:$0xff] %vm22_vm0, %v2559_v52 }
  0x4b   :  { %1000 = vmatprep.mubr.bf16.mxu0 %v2481_v60  ;;  %1129 = vmatprep.mubr.bf16.mxu1 %v2483_v61  ;;  %45 = vst.msk [vmem:[#allocation2 + $0xb0] sm:$0xff] %vm22_vm0, %v2559_v52  ;;  %46 = vst.msk [vmem:[#allocation2 + $0xb8] sm:$0xff] %vm22_vm0, %v2559_v52 }
  0x4c   :  { %47 = vst.msk [vmem:[#allocation2 + $0xc0] sm:$0xff] %vm22_vm0, %v2559_v52  ;;  %48 = vst.msk [vmem:[#allocation2 + $0xc8] sm:$0xff] %vm22_vm0, %v2559_v52 }
  0x4d   :  { %49 = vst.msk [vmem:[#allocation2 + $0xd0] sm:$0xff] %vm22_vm0, %v2559_v52  ;;  %50 = vst.msk [vmem:[#allocation2 + $0xd8] sm:$0xff] %vm22_vm0, %v2559_v52 }
  0x4e   :  { %51 = vst.msk [vmem:[#allocation2 + $0xe0] sm:$0xff] %vm22_vm0, %v2559_v52  ;;  %52 = vst.msk [vmem:[#allocation2 + $0xe8] sm:$0xff] %vm22_vm0, %v2559_v52 }
  0x4f   :  { %53 = vst.msk [vmem:[#allocation2 + $0xf0] sm:$0xff] %vm22_vm0, %v2559_v52  ;;  %54 = vst.msk [vmem:[#allocation2 + $0xf8] sm:$0xff] %vm22_vm0, %v2559_v52 }
  0x52   :  { %1001 = vmatmul.mubr.bf16.gmra.mxu0 %v2485_v62  ;;  %1130 = vmatmul.mubr.bf16.gmra.mxu1 %v2486_v63 }
  0x53   :  { %1008 = vmatprep.mubr.bf16.mxu0 %v2488_v0  ;;  %1137 = vmatprep.mubr.bf16.mxu1 %v2490_v1 }
  0x5a   :  { %1009 = vmatmul.mubr.bf16.gmra.mxu0 %v2492_v2  ;;  %1138 = vmatmul.mubr.bf16.gmra.mxu1 %v2493_v3 }
  0x5b   :  { %1016 = vmatprep.mubr.bf16.mxu0 %v2494_v4  ;;  %1145 = vmatprep.mubr.bf16.mxu1 %v2496_v5 }
  0x62   :  { %1017 = vmatmul.mubr.bf16.gmra.mxu0 %v2498_v6  ;;  %1146 = vmatmul.mubr.bf16.gmra.mxu1 %v2499_v7 }
  0x63   :  { %1024 = vmatprep.mubr.bf16.mxu0 %v2500_v8  ;;  %1153 = vmatprep.mubr.bf16.mxu1 %v2502_v9 }
  0x6a   :  { %1025 = vmatmul.mubr.bf16.gmra.mxu0 %v2504_v10  ;;  %1154 = vmatmul.mubr.bf16.gmra.mxu1 %v2505_v11 }
  0x6b   :  { %1032 = vmatprep.mubr.bf16.mxu0 %v2507_v12  ;;  %1161 = vmatprep.mubr.bf16.mxu1 %v2509_v13 }
  0x72   :  { %1033 = vmatmul.mubr.bf16.gmra.mxu0 %v2511_v14  ;;  %1162 = vmatmul.mubr.bf16.gmra.mxu1 %v2512_v15 }
  0x73   :  { %1040 = vmatprep.mubr.bf16.mxu0 %v2513_v16  ;;  %1169 = vmatprep.mubr.bf16.mxu1 %v2515_v17 }
  0x7a   :  { %1041 = vmatmul.mubr.bf16.gmra.mxu0 %v2517_v18  ;;  %1170 = vmatmul.mubr.bf16.gmra.mxu1 %v2518_v19 }
  0x7b   :  { %1177 = vmatprep.mubr.bf16.mxu1 %v2519_v20  ;;  %2362 = vmatprep.mubr.msk.bf16.mxu0 %vm22_vm0, %v2521_v21 }
  0x82   :  { %1178 = vmatmul.mubr.bf16.gmra.mxu1 %v2522_v22  ;;  %2363 = vmatmul.mubr.msk.bf16.vlgmr.msra.gmra.mxu0 %vm22_vm0, %v2523_v23 }
  0x83   :  { %1185 = vmatprep.mubr.bf16.mxu1 %v2524_v24  ;;  %2366 = vmatprep.mubr.msk.bf16.mxu0 %vm22_vm0, %v2526_v25 }
  0x8a   :  { %1186 = vmatmul.mubr.bf16.gmra.mxu1 %v2527_v26  ;;  %2367 = vmatmul.mubr.msk.bf16.gmra.mxu0 %vm22_vm0, %v2528_v27 }
  0x8b   :  { %1193 = vmatprep.mubr.bf16.mxu1 %v2529_v28  ;;  %2370 = vmatprep.mubr.msk.bf16.mxu0 %vm22_vm0, %v2531_v29 }
  0x92   :  { %1194 = vmatmul.mubr.bf16.gmra.mxu1 %v2532_v30  ;;  %2371 = vmatmul.mubr.msk.bf16.gmra.mxu0 %vm22_vm0, %v2533_v31 }
  0x93   :  { %1201 = vmatprep.mubr.bf16.mxu1 %v2534_v32  ;;  %2374 = vmatprep.mubr.msk.bf16.mxu0 %vm22_vm0, %v2536_v33 }
  0x9a   :  { %1202 = vmatmul.mubr.bf16.gmra.mxu1 %v2537_v34  ;;  %2375 = vmatmul.mubr.msk.bf16.gmra.mxu0 %vm22_vm0, %v2538_v35 }
  0x9b   :  { %1209 = vmatprep.mubr.bf16.mxu1 %v2539_v36  ;;  %2378 = vmatprep.mubr.msk.bf16.mxu0 %vm22_vm0, %v2541_v37 }
  0xa2   :  { %1210 = vmatmul.mubr.bf16.gmra.mxu1 %v2542_v38  ;;  %2379 = vmatmul.mubr.msk.bf16.gmra.mxu0 %vm22_vm0, %v2543_v39 }
  0xa3   :  { %1217 = vmatprep.mubr.bf16.mxu1 %v2544_v40  ;;  %2382 = vmatprep.mubr.msk.bf16.mxu0 %vm22_vm0, %v2546_v41 }
  0xaa   :  { %1218 = vmatmul.mubr.bf16.gmra.mxu1 %v2547_v42  ;;  %2383 = vmatmul.mubr.msk.bf16.gmra.mxu0 %vm22_vm0, %v2548_v43 }
  0xab   :  { %1225 = vmatprep.mubr.bf16.mxu1 %v2549_v44  ;;  %2386 = vmatprep.mubr.msk.bf16.mxu0 %vm22_vm0, %v2551_v45 }
  0xb2   :  { %1226 = vmatmul.mubr.bf16.gmra.mxu1 %v2552_v46  ;;  %2387 = vmatmul.mubr.msk.bf16.gmra.mxu0 %vm22_vm0, %v2553_v47 }
  0xb3   :  { %1233 = vmatprep.mubr.bf16.mxu1 %v2554_v48  ;;  %2390 = vmatprep.mubr.msk.bf16.mxu0 %vm22_vm0, %v2556_v49 }
  0xba   :  { %1234 = vmatmul.mubr.bf16.gmra.mxu1 %v2557_v50  ;;  %2391 = vmatmul.mubr.msk.bf16.gmra.mxu0 %vm22_vm0, %v2558_v51 }
  0xe2   :  { %v2126_v53 = vpop.f32.mrf.mxu0  ;;  %v2198_v54 = vpop.f32.mrf.mxu1 }
  0xe4   :  { %v2127_v55 = vpop.f32.mrf.mxu0  ;;  %v2199_v56 = vpop.f32.mrf.mxu1 }
  0xe5   :  { %v2981_v57 = vadd.f32 %v2127_v55, %v2126_v53  ;;  %v2983_v58 = vadd.f32 %v2199_v56, %v2198_v54 }
  0xe6   :  { %v2129_v59 = vpop.f32.mrf.mxu0  ;;  %v2201_v60 = vpop.f32.mrf.mxu1 }
  0xe7   :  { %3622 = vst [vmem:[#allocation3_spill] sm:$0xff] %v2983_v58 }
  0xe8   :  { %v2130_v61 = vpop.f32.mrf.mxu0  ;;  %v2202_v62 = vpop.f32.mrf.mxu1 }
  0xe9   :  { %v2985_v63 = vadd.f32 %v2130_v61, %v2129_v59  ;;  %v2987_v0 = vadd.f32 %v2202_v62, %v2201_v60 }
  0xea   :  { %v2132_v1 = vpop.f32.mrf.mxu0  ;;  %v2204_v2 = vpop.f32.mrf.mxu1 }
  0xeb   :  { %3623 = vst [vmem:[#allocation4_spill] sm:$0xff] %v2987_v0 }
  0xec   :  { %v2133_v3 = vpop.f32.mrf.mxu0  ;;  %v2205_v4 = vpop.f32.mrf.mxu1 }
  0xed   :  { %v2989_v5 = vadd.f32 %v2133_v3, %v2132_v1  ;;  %v2991_v6 = vadd.f32 %v2205_v4, %v2204_v2 }
  0xee   :  { %v2135_v7 = vpop.f32.mrf.mxu0  ;;  %v2207_v8 = vpop.f32.mrf.mxu1 }
  0xef   :  { %3624 = vst [vmem:[#allocation5_spill] sm:$0xff] %v2991_v6 }
  0xf0   :  { %v2136_v9 = vpop.f32.mrf.mxu0  ;;  %v2208_v10 = vpop.f32.mrf.mxu1 }
  0xf1   :  { %v2993_v11 = vadd.f32 %v2136_v9, %v2135_v7  ;;  %v2995_v12 = vadd.f32 %v2208_v10, %v2207_v8 }
  0xf2   :  { %v2138_v13 = vpop.f32.mrf.mxu0  ;;  %v2210_v14 = vpop.f32.mrf.mxu1 }
  0xf3   :  { %3625 = vst [vmem:[#allocation6_spill] sm:$0xff] %v2995_v12 }
  0xf4   :  { %v2139_v15 = vpop.f32.mrf.mxu0  ;;  %v2211_v16 = vpop.f32.mrf.mxu1 }
  0xf5   :  { %v2997_v17 = vadd.f32 %v2139_v15, %v2138_v13  ;;  %v2999_v18 = vadd.f32 %v2211_v16, %v2210_v14 }
  0xf6   :  { %v2141_v19 = vpop.f32.mrf.mxu0  ;;  %v2213_v20 = vpop.f32.mrf.mxu1 }
  0xf7   :  { %3626 = vst [vmem:[#allocation7_spill] sm:$0xff] %v2999_v18 }
  0xf8   :  { %v2142_v21 = vpop.f32.mrf.mxu0  ;;  %v2214_v22 = vpop.f32.mrf.mxu1 }
  0xf9   :  { %v3001_v23 = vadd.f32 %v2142_v21, %v2141_v19  ;;  %v3003_v24 = vadd.f32 %v2214_v22, %v2213_v20 }
  0xfa   :  { %v2144_v25 = vpop.f32.mrf.mxu0  ;;  %v2216_v26 = vpop.f32.mrf.mxu1 }
  0xfb   :  { %3627 = vst [vmem:[#allocation8_spill] sm:$0xff] %v3003_v24 }
  0xfc   :  { %v2145_v27 = vpop.f32.mrf.mxu0  ;;  %v2217_v28 = vpop.f32.mrf.mxu1 }
  0xfd   :  { %v3005_v29 = vadd.f32 %v2145_v27, %v2144_v25  ;;  %v3007_v30 = vadd.f32 %v2217_v28, %v2216_v26 }
  0xfe   :  { %v2147_v31 = vpop.f32.mrf.mxu0  ;;  %v2219_v32 = vpop.f32.mrf.mxu1 }
  0xff   :  { %3628 = vst [vmem:[#allocation9_spill] sm:$0xff] %v3007_v30 }
 0x100   :  { %v2148_v33 = vpop.f32.mrf.mxu0  ;;  %v2220_v34 = vpop.f32.mrf.mxu1 }
 0x101   :  { %v3009_v35 = vadd.f32 %v2148_v33, %v2147_v31  ;;  %v3011_v36 = vadd.f32 %v2220_v34, %v2219_v32 }
 0x102   :  { %v2150_v37 = vpop.f32.mrf.mxu0  ;;  %v3013_v38 = vpop.f32.mrf.mxu1 }
 0x103   :  { %3629 = vst [vmem:[#allocation10_spill] sm:$0xff] %v3011_v36 }
 0x104   :  { %v2151_v39 = vpop.f32.mrf.mxu0  ;;  %v3015_v40 = vpop.f32.mrf.mxu1 }
 0x105   :  { %v3017_v41 = vadd.f32 %v2151_v39, %v2150_v37 }
 0x106   :  { %v2153_v42 = vpop.f32.mrf.mxu0  ;;  %v3019_v43 = vpop.f32.mrf.mxu1 }
 0x108   :  { %v2154_v44 = vpop.f32.mrf.mxu0  ;;  %v3021_v45 = vpop.f32.mrf.mxu1 }
 0x109   :  { %v3023_v46 = vadd.f32 %v2154_v44, %v2153_v42 }
 0x10a   :  { %v2156_v47 = vpop.f32.mrf.mxu0  ;;  %v2244_v48 = vpop.f32.mrf.mxu1 }
 0x10c   :  { %v2157_v49 = vpop.f32.mrf.mxu0  ;;  %v2245_v50 = vpop.f32.mrf.mxu1 }
 0x10d   :  { %v3025_v51 = vadd.f32 %v2157_v49, %v2156_v47  ;;  %v2246_v58 = vadd.f32 %v2245_v50, %v2244_v48  ;;  %v3130_v48 = vld [vmem:[%s3617_s3] sm:$0xff]   ;;  %v57_v50 = vld [vmem:[#allocation2 + $0x10] sm:$0xff] }
 0x10e   :  { %v2159_v52 = vpop.f32.mrf.mxu0  ;;  %v2247_v53 = vpop.f32.mrf.mxu1 }
 0x110   :  { %v2160_v54 = vpop.f32.mrf.mxu0  ;;  %v2248_v55 = vpop.f32.mrf.mxu1 }
 0x111   :  { %v3027_v56 = vadd.f32 %v2160_v54, %v2159_v52 }
 0x112   :  { %v2162_v59 = vpop.f32.mrf.mxu0  ;;  %v3029_v60 = vpop.f32.mrf.mxu1 }
 0x114   :  { %v2163_v61 = vpop.f32.mrf.mxu0  ;;  %v3031_v62 = vpop.f32.mrf.mxu1 }
 0x115   :  { %v3033_v1 = vadd.f32 %v2163_v61, %v2162_v59 }
 0x116   :  { %v2165_v2 = vpop.f32.mrf.mxu0  ;;  %v3035_v3 = vpop.f32.mrf.mxu1 }
 0x117   :  { %3630 = vst [vmem:[#allocation11_spill] sm:$0xff] %v3033_v1 }
 0x118   :  { %v2166_v4 = vpop.f32.mrf.mxu0  ;;  %v3037_v7 = vpop.f32.mrf.mxu1 }
 0x119   :  { %v3039_v8 = vadd.f32 %v2166_v4, %v2165_v2 }
 0x11a   :  { %v3041_v9 = vpop.f32.mrf.mxu0  ;;  %v3043_v10 = vpop.f32.mrf.mxu1 }
 0x11b   :  { %3631 = vst [vmem:[#allocation12_spill] sm:$0xff] %v3039_v8 }
 0x11c   :  { %v3045_v13 = vpop.f32.mrf.mxu0  ;;  %v2257_v14 = vpop.f32.mrf.mxu1 }
 0x11e   :  { %v3047_v15 = vpop.f32.mrf.mxu0  ;;  %v3049_v16 = vpop.f32.mrf.mxu1 }
 0x120   :  { %v3051_v19 = vpop.f32.mrf.mxu0  ;;  %v3053_v20 = vpop.f32.mrf.mxu1 }
 0x122   :  { %v3055_v21 = vpop.f32.mrf.mxu0  ;;  %v3057_v22 = vpop.f32.mrf.mxu1 }
 0x124   :  { %v3059_v25 = vpop.f32.mrf.mxu0  ;;  %v3061_v26 = vpop.f32.mrf.mxu1 }
 0x126   :  { %v3063_v27 = vpop.f32.mrf.mxu0  ;;  %v3065_v28 = vpop.f32.mrf.mxu1 }
 0x128   :  { %v3067_v31 = vpop.f32.mrf.mxu0  ;;  %v3069_v32 = vpop.f32.mrf.mxu1 }
 0x12a   :  { %v3071_v33 = vpop.f32.mrf.mxu0  ;;  %v3073_v34 = vpop.f32.mrf.mxu1 }
 0x12c   :  { %v3075_v37 = vpop.f32.mrf.mxu0  ;;  %v3077_v39 = vpop.f32.mrf.mxu1 }
 0x12e   :  { %v3079_v42 = vpop.f32.mrf.mxu0  ;;  %v3081_v44 = vpop.f32.mrf.mxu1 }
 0x130   :  { %v3083_v47 = vpop.f32.mrf.mxu0  ;;  %v3085_v49 = vpop.f32.mrf.mxu1 }
 0x132   :  { %v3087_v52 = vpop.f32.mrf.mxu0  ;;  %v3089_v54 = vpop.f32.mrf.mxu1 }
 0x134   :  { %v3091_v59 = vpop.f32.mrf.mxu0  ;;  %v3093_v61 = vpop.f32.mrf.mxu1 }
 0x136   :  { %v3095_v2 = vpop.f32.mrf.mxu0  ;;  %v3097_v4 = vpop.f32.mrf.mxu1 }
 0x137   :  { %3632 = vst [vmem:[#allocation13_spill] sm:$0xff] %v3095_v2  ;;  %3633 = vst [vmem:[#allocation14_spill] sm:$0xff] %v3097_v4  ;;  %v2240_v2 = vadd.f32 %v3015_v40, %v3013_v38  ;;  %v3135_v38 = vld [vmem:[%s3617_s3 + $0x18] sm:$0xff]  }
 0x138   :  { %v3099_v36 = vpop.f32.mrf.mxu0  ;;  %v3101_v24 = vpop.f32.mrf.mxu1 }
 0x139   :  { %3634 = vst [vmem:[#allocation15_spill] sm:$0xff] %v3099_v36  ;;  %3635 = vst [vmem:[#allocation16_spill] sm:$0xff] %v3101_v24  ;;  %v1124_v24 = vadd.f32 %v2246_v58, %v2989_v5  ;;  %v1116_v5 = vadd.f32 %v2240_v2, %v2981_v57  ;;  %v2258_v2 = vadd.f32 %v2257_v14, %v3043_v10  ;;  %v58_v57 = vld [vmem:[#allocation2 + $0x18] sm:$0xff] }
 0x13a   :  { %v3103_v30 = vpop.f32.mrf.mxu0  ;;  %v3105_v18 = vpop.f32.mrf.mxu1  ;;  %v2252_v14 = vadd.f32 %v3031_v62, %v3029_v60  ;;  %v61_v60 = vld [vmem:[#allocation2 + $0x30] sm:$0xff] }
 0x13b   :  { %3636 = vst [vmem:[#allocation17_spill] sm:$0xff] %v3103_v30  ;;  %v3124_v30 = vld [vmem:[%s3617_s3 + $0x8] sm:$0xff]  }
 0x13c   :  { %v3107_v0 = vpop.f32.mrf.mxu0  ;;  %v3109_v12 = vpop.f32.mrf.mxu1 }
 0x13d   :  { %3637 = vst [vmem:[#allocation18_spill] sm:$0xff] %v3107_v0  ;;  %3638 = vst [vmem:[#allocation19_spill] sm:$0xff] %v3109_v12  ;;  %v2249_v0 = vadd.f32 %v2248_v55, %v2247_v53  ;;  %v3146_v55 = vld [vmem:[%s3617_s3 + $0x10] sm:$0xff]  }
 0x13e   :  { %v3111_v6 = vpop.f32.mrf.mxu0  ;;  %v3113_v8 = vpop.f32.mrf.mxu1  ;;  %3644 = vst [vmem:[#allocation25_spill] sm:$0xff] %v3146_v55 }
 0x13f   :  { %3639 = vst [vmem:[#allocation20_spill] sm:$0xff] %v3111_v6  ;;  %3640 = vst [vmem:[#allocation21_spill] sm:$0xff] %v3113_v8  ;;  %v2243_v6 = vadd.f32 %v3021_v45, %v3019_v43  ;;  %v55_v8 = vld [vmem:[#allocation2] sm:$0xff]  ;;  %v1127_v12 = vadd.f32 %v2249_v0, %v2993_v11 }
 0x140   :  { %v3117_v4 = vpop.f32.mrf.mxu0  ;;  %v3119_v36 = vpop.f32.mrf.mxu1 }
 0x141   :  { %3641 = vst [vmem:[#allocation22_spill] sm:$0xff] %v3117_v4  ;;  %3642 = vst [vmem:[#allocation23_spill] sm:$0xff] %v3119_v36  ;;  %v3151_v36 = vld [vmem:[%s3617_s3 + $0x28] sm:$0xff]  }
 0x142   :  { %v3137_v40 = vpop.f32.mrf.mxu1  ;;  %v2364_v4 = vpop.f32.mrf.mxu0 }
 0x143   :  { %3643 = vst [vmem:[#allocation24_spill] sm:$0xff] %v3137_v40  ;;  %v1285_v53 = vadd.f32 %v2364_v4, %v1124_v24  ;;  %v3169_v24 = vld [vmem:[%s3617_s3 + $0x38] sm:$0xff]  }
 0x144   :  { %v3153_v40 = vpop.f32.mrf.mxu1  ;;  %v1276_v1 = vpop.f32.mrf.mxu0 }
 0x145   :  { %3645 = vst [vmem:[#allocation26_spill] sm:$0xff] %v3153_v40  ;;  %v1405_v4 = vadd.f32 %v1285_v53, %v57_v50  ;;  %v1277_v58 = vadd.f32 %v1276_v1, %v1116_v5  ;;  %v3164_v40 = vld [vmem:[%s3617_s3 + $0x20] sm:$0xff]   ;;  %v1119_v5 = vadd.f32 %v2243_v6, %v2985_v63  ;;  %v56_v1 = vld [vmem:[#allocation2 + $0x8] sm:$0xff]  ;;  %v2261_v6 = vadd.f32 %v3053_v20, %v3049_v16 }
 0x146   :  { %v3171_v43 = vpop.f32.mrf.mxu1  ;;  %v2365_v45 = vpop.f32.mrf.mxu0  ;;  %v2049_v11 = vunpack.c.l.bf16 %v3164_v40  ;;  %v3195_v63 = vld [vmem:[%s3617_s3 + $0x48] sm:$0xff]  }
 0x147   :  { %3646 = vst [vmem:[#allocation27_spill] sm:$0xff] %v3171_v43  ;;  %1437 = vst.msk [vmem:[#allocation2 + $0x10] sm:$0xff] %vm22_vm0, %v1405_v4  ;;  %v1403_v50 = vadd.f32 %v1277_v58, %v55_v8  ;;  %v1288_v53 = vadd.f32 %v2365_v45, %v1127_v12  ;;  %v3184_v43 = vld [vmem:[%s3617_s3 + $0x30] sm:$0xff]   ;;  %v1140_v58 = vadd.f32 %v2258_v2, %v3005_v29  ;;  %v3204_v45 = vld [vmem:[%s3617_s3 + $0x40] sm:$0xff]  }
 0x148   :  { %v3186_v10 = vpop.f32.mrf.mxu1  ;;  %v1279_v0 = vpop.f32.mrf.mxu0  ;;  %v2255_v4 = vadd.f32 %v3037_v7, %v3035_v3  ;;  %v2057_v16 = vunpack.c.l.bf16 %v3184_v43  ;;  %v3219_v3 = vld [vmem:[%s3617_s3 + $0x58] sm:$0xff]   ;;  %v2264_v7 = vadd.f32 %v3061_v26, %v3057_v22 }
 0x149   :  { %1435 = vst.msk [vmem:[#allocation2] sm:$0xff] %vm22_vm0, %v1403_v50  ;;  %v1406_v12 = vadd.f32 %v1288_v53, %v58_v57  ;;  %v1280_v8 = vadd.f32 %v1279_v0, %v1119_v5  ;;  %v1132_v0 = vadd.f32 %v2252_v14, %v2997_v17  ;;  %v3226_v53 = vld [vmem:[%s3618_s2] ss:$0 sm:$0xff]  ;;  %v3239_v50 = vadd.f32 %v3045_v13, %v3041_v9 }
 0x14a   :  { %v3208_v62 = vpop.f32.mrf.mxu1  ;;  %v2368_v55 = vpop.f32.mrf.mxu0  ;;  %v2267_v14 = vadd.f32 %v3069_v32, %v3065_v28  ;;  %v3255_v28 = vadd.f32 %v3059_v25, %v3055_v21  ;;  %v3259_v32 = vadd.f32 %v3067_v31, %v3063_v27  ;;  %v60_v25 = vld [vmem:[#allocation2 + $0x28] sm:$0xff]  ;;  %v3273_v31 = vadd.f32 %v3075_v37, %v3071_v33  ;;  %v65_v33 = vld [vmem:[#allocation2 + $0x50] sm:$0xff] }
 0x14b   :  { %1438 = vst.msk [vmem:[#allocation2 + $0x18] sm:$0xff] %vm22_vm0, %v1406_v12  ;;  %v1404_v29 = vadd.f32 %v1280_v8, %v56_v1  ;;  %v1301_v2 = vadd.f32 %v2368_v55, %v1140_v58  ;;  %v59_v55 = vld [vmem:[#allocation2 + $0x20] sm:$0xff]  ;;  %v2270_v8 = vadd.f32 %v3077_v39, %v3073_v34  ;;  %v1143_v58 = vadd.f32 %v2261_v6, %v3009_v35  ;;  %v62_v12 = vld [vmem:[#allocation2 + $0x38] sm:$0xff] }
 0x14c   :  { %v3228_v1 = vpop.f32.mrf.mxu1  ;;  %v1292_v17 = vpop.f32.mrf.mxu0  ;;  %v1135_v34 = vadd.f32 %v2255_v4, %v3001_v23  ;;  %v2077_v39 = vunpack.c.l.bf16 %v3219_v3  ;;  %v2273_v23 = vadd.f32 %v3085_v49, %v3081_v44  ;;  %v1148_v4 = vadd.f32 %v2264_v7, %v3017_v41 }
 0x14d   :  { %1436 = vst.msk [vmem:[#allocation2 + $0x8] sm:$0xff] %vm22_vm0, %v1404_v29  ;;  %v1409_v22 = vadd.f32 %v1301_v2, %v61_v60  ;;  %v1293_v26 = vadd.f32 %v1292_v17, %v1132_v0  ;;  %v3249_v60 = vadd.f32 %v3051_v19, %v3047_v15  ;;  %v1156_v27 = vadd.f32 %v2270_v8, %v3025_v51 }
 0x14e   :  { %v1472_v57 = vld [vmem:[#allocation2 + $0x10] sm:$0xff]  ;;  %v3243_v5 = vpop.f32.mrf.mxu1  ;;  %v2369_v20 = vpop.f32.mrf.mxu0  ;;  %v2276_v44 = vadd.f32 %v3093_v61, %v3089_v54  ;;  %v1151_v7 = vadd.f32 %v2267_v14, %v3023_v46  ;;  %v3648_v17 = vunpack.c.l.bf16 %v3130_v48  ;;  %v3286_v54 = vadd.f32 %v3083_v47, %v3079_v42  ;;  %v63_v42 = vld [vmem:[#allocation2 + $0x40] sm:$0xff] }
 0x14f   :  { %v1511_v35 = vadd.f32 %v3226_v53, %v1472_v57  ;;  %1441 = vst.msk [vmem:[#allocation2 + $0x30] sm:$0xff] %vm22_vm0, %v1409_v22  ;;  %v1407_v9 = vadd.f32 %v1293_v26, %v59_v55  ;;  %v1304_v13 = vadd.f32 %v2369_v20, %v1143_v58  ;;  %v3647_v57 = vunpack.c.l.bf16 %v3124_v30  ;;  %v3650_v47 = vld [vmem:[#allocation19_spill] sm:$0xff] }
 0x150   :  { %v1470_v6 = vld [vmem:[#allocation2] sm:$0xff]  ;;  %v3263_v15 = vpop.f32.mrf.mxu1  ;;  %v1295_v19 = vpop.f32.mrf.mxu0  ;;  %v3290_v61 = vadd.f32 %v3091_v59, %v3087_v52  ;;  %v1159_v26 = vadd.f32 %v2273_v23, %v3027_v56 }
 0x151   :  { %v1607_v20 = vadd.f32 %v3647_v57, %v1511_v35  ;;  %v1509_v29 = vadd.f32 %v3226_v53, %v1470_v6  ;;  %1439 = vst.msk [vmem:[#allocation2 + $0x20] sm:$0xff] %vm22_vm0, %v1407_v9  ;;  %v1410_v21 = vadd.f32 %v1304_v13, %v62_v12  ;;  %v1296_v41 = vadd.f32 %v1295_v19, %v1135_v34  ;;  %v3651_v56 = vld [vmem:[#allocation11_spill] sm:$0xff] }
 0x152   :  { %v1473_v49 = vld [vmem:[#allocation2 + $0x18] sm:$0xff]  ;;  %v3277_v2 = vpop.f32.mrf.mxu1  ;;  %v2372_v0 = vpop.f32.mrf.mxu0  ;;  %v3649_v35 = vunpack.c.h.bf16 %v3124_v30  ;;  %v2282_v6 = vadd.f32 %v3650_v47, %v3105_v18  ;;  %v1164_v23 = vadd.f32 %v2276_v44, %v3651_v56 }
 0x153   :  { %v1639_v55 = vmax.f32 %v1607_v20, 0.0  ;;  %v1605_v12 = vadd.f32 %v3648_v17, %v1509_v29  ;;  %v1512_v51 = vadd.f32 %v3226_v53, %v1473_v49  ;;  %1442 = vst.msk [vmem:[#allocation2 + $0x38] sm:$0xff] %vm22_vm0, %v1410_v21  ;;  %v1317_v37 = vadd.f32 %v2372_v0, %v1156_v27  ;;  %v66_v27 = vld [vmem:[#allocation2 + $0x58] sm:$0xff]  ;;  %v3655_v0 = vld [vmem:[#allocation21_spill] sm:$0xff] }
 0x154   :  { %v1471_v8 = vld [vmem:[#allocation2 + $0x8] sm:$0xff]  ;;  %v1408_v46 = vadd.f32 %v1296_v41, %v60_v25  ;;  %v3292_v14 = vpop.f32.mrf.mxu1  ;;  %v1308_v22 = vpop.f32.mrf.mxu0  ;;  %v3652_v21 = vunpack.c.h.bf16 %v3130_v48  ;;  %v3653_v49 = vld [vmem:[#allocation14_spill] sm:$0xff] }
 0x155   :  { %v2001_v58 = vpack.c.bf16 %v1639_v55, %v1639_v55  ;;  %v1637_v34 = vmax.f32 %v1605_v12, 0.0  ;;  %v1608_v9 = vadd.f32 %v3649_v35, %v1512_v51  ;;  %v1510_v13 = vadd.f32 %v3226_v53, %v1471_v8  ;;  %v3656_v55 = vld [vmem:[#allocation23_spill] sm:$0xff]  ;;  %v3658_v35 = vld [vmem:[#allocation13_spill] sm:$0xff] }
 0x156   :  { %v1476_v52 = vld [vmem:[#allocation2 + $0x30] sm:$0xff]  ;;  %1440 = vst.msk [vmem:[#allocation2 + $0x28] sm:$0xff] %vm22_vm0, %v1408_v46  ;;  %v1413_v59 = vadd.f32 %v1317_v37, %v65_v33  ;;  %v1309_v19 = vadd.f32 %v1308_v22, %v1148_v4  ;;  %v3301_v57 = vpop.f32.mrf.mxu1  ;;  %v2373_v20 = vpop.f32.mrf.mxu0  ;;  %v3654_v4 = vld [vmem:[#allocation16_spill] sm:$0xff]  ;;  %v2285_v17 = vadd.f32 %v3656_v55, %v3655_v0  ;;  %v3657_v46 = vunpack.c.l.bf16 %v3135_v38 }
 0x157   :  { %1800 = vst.msk [vmem:[%s3619_s4 + $0x8] sm:$0xf] %vm1797_vm1, %v2001_v58  ;;  %v1999_v30 = vpack.c.bf16 %v1637_v34, %v1637_v34  ;;  %v1640_v29 = vmax.f32 %v1608_v9, 0.0  ;;  %v1606_v18 = vadd.f32 %v3652_v21, %v1510_v13  ;;  %v1515_v25 = vadd.f32 %v3226_v53, %v1476_v52  ;;  %v64_v34 = vld [vmem:[#allocation2 + $0x48] sm:$0xff]  ;;  %v3659_v9 = vld [vmem:[#allocation15_spill] sm:$0xff] }
 0x158   :  { %v2279_v41 = vadd.f32 %v3654_v4, %v3653_v49  ;;  %v1474_v44 = vld [vmem:[#allocation2 + $0x20] sm:$0xff]  ;;  %1445 = vst.msk [vmem:[#allocation2 + $0x50] sm:$0xff] %vm22_vm0, %v1413_v59  ;;  %v1411_v12 = vadd.f32 %v1309_v19, %v63_v42  ;;  %v1320_v51 = vadd.f32 %v2373_v20, %v1159_v26  ;;  %v3316_v33 = vpop.f32.mrf.mxu1  ;;  %v1311_v37 = vpop.f32.mrf.mxu0  ;;  %v3327_v13 = vadd.f32 %v3659_v9, %v3658_v35  ;;  %v3662_v4 = vld [vmem:[#allocation12_spill] sm:$0xff]  ;;  %v70_v35 = vld [vmem:[#allocation2 + $0x78] sm:$0xff] }
 0x159   :  { %1798 = vst.msk [vmem:[%s3619_s4] sm:$0xf] %vm1797_vm1, %v1999_v30  ;;  %v2002_v48 = vpack.c.bf16 %v1640_v29, %v1640_v29  ;;  %v1638_v8 = vmax.f32 %v1606_v18, 0.0  ;;  %v1611_v22 = vadd.f32 %v3657_v46, %v1515_v25  ;;  %v1513_v58 = vadd.f32 %v3226_v53, %v1474_v44  ;;  %v3660_v30 = vld [vmem:[#allocation25_spill] sm:$0xff] }
 0x15a   :  { %v1477_v26 = vld [vmem:[#allocation2 + $0x38] sm:$0xff]  ;;  %1443 = vst.msk [vmem:[#allocation2 + $0x40] sm:$0xff] %vm22_vm0, %v1411_v12  ;;  %v1414_v42 = vadd.f32 %v1320_v51, %v66_v27  ;;  %v1312_v47 = vadd.f32 %v1311_v37, %v1151_v7  ;;  %v3330_v52 = vpop.f32.mrf.mxu1  ;;  %v1172_v59 = vadd.f32 %v2282_v6, %v3239_v50  ;;  %v2376_v19 = vpop.f32.mrf.mxu0  ;;  %v3661_v29 = vunpack.c.l.bf16 %v3660_v30  ;;  %v69_v25 = vld [vmem:[#allocation2 + $0x70] sm:$0xff] }
 0x15b   :  { %1801 = vst.msk [vmem:[%s3619_s4 + $0xc] sm:$0xf] %vm1797_vm1, %v2002_v48  ;;  %v2000_v20 = vpack.c.bf16 %v1638_v8, %v1638_v8  ;;  %v1643_v56 = vmax.f32 %v1611_v22, 0.0  ;;  %v1516_v18 = vadd.f32 %v3226_v53, %v1477_v26  ;;  %v2294_v7 = vadd.f32 %v3228_v1, %v3208_v62  ;;  %v67_v62 = vld [vmem:[#allocation2 + $0x60] sm:$0xff]  ;;  %v3664_v48 = vld [vmem:[#allocation17_spill] sm:$0xff]  ;;  %v3665_v8 = vld [vmem:[#allocation18_spill] sm:$0xff] }
 0x15c   :  { %v1609_v21 = vadd.f32 %v3661_v29, %v1513_v58  ;;  %1446 = vst.msk [vmem:[#allocation2 + $0x58] sm:$0xff] %vm22_vm0, %v1414_v42  ;;  %v1412_v50 = vadd.f32 %v1312_v47, %v64_v34  ;;  %v1333_v6 = vadd.f32 %v2376_v19, %v1172_v59  ;;  %v2305_v27 = vpop.f32.mrf.mxu1  ;;  %v1324_v49 = vpop.f32.mrf.mxu0  ;;  %v1167_v0 = vadd.f32 %v2279_v41, %v3662_v4  ;;  %v3667_v26 = vld [vmem:[#allocation26_spill] sm:$0xff] }
 0x15d   :  { %1799 = vst.msk [vmem:[%s3619_s4 + $0x4] sm:$0xf] %vm1797_vm1, %v2000_v20  ;;  %v2005_v55 = vpack.c.bf16 %v1643_v56, %v1643_v56  ;;  %v3663_v12 = vunpack.c.h.bf16 %v3135_v38  ;;  %v1475_v37 = vld [vmem:[#allocation2 + $0x28] sm:$0xff]  ;;  %v1175_v1 = vadd.f32 %v2285_v17, %v3249_v60  ;;  %v3353_v46 = vadd.f32 %v3665_v8, %v3664_v48 }
 0x15e   :  { %v1641_v44 = vmax.f32 %v1609_v21, 0.0  ;;  %v1514_v41 = vadd.f32 %v3226_v53, %v1475_v37  ;;  %1444 = vst.msk [vmem:[#allocation2 + $0x48] sm:$0xff] %vm22_vm0, %v1412_v50  ;;  %v1417_v22 = vadd.f32 %v1333_v6, %v69_v25  ;;  %v1325_v58 = vadd.f32 %v1324_v49, %v1164_v23  ;;  %v3357_v34 = vpop.f32.mrf.mxu1  ;;  %v2377_v9 = vpop.f32.mrf.mxu0  ;;  %v3666_v38 = vld [vmem:[#allocation24_spill] sm:$0xff] }
 0x15f   :  { %v1612_v51 = vadd.f32 %v3663_v12, %v1516_v18  ;;  %v2288_v42 = vadd.f32 %v3667_v26, %v3666_v38  ;;  %1804 = vst.msk [vmem:[%s3619_s4 + $0x18] sm:$0xf] %vm1797_vm1, %v2005_v55  ;;  %v1480_v47 = vld [vmem:[#allocation2 + $0x50] sm:$0xff]  ;;  %v1336_v59 = vadd.f32 %v2377_v9, %v1175_v1  ;;  %v3668_v19 = vunpack.c.h.bf16 %v3660_v30  ;;  %v68_v21 = vld [vmem:[#allocation2 + $0x68] sm:$0xff]  ;;  %v71_v26 = vld [vmem:[#allocation2 + $0x80] sm:$0xff] }
 0x160   :  { %v2003_v60 = vpack.c.bf16 %v1641_v44, %v1641_v44  ;;  %v1519_v23 = vadd.f32 %v3226_v53, %v1480_v47  ;;  %1449 = vst.msk [vmem:[#allocation2 + $0x70] sm:$0xff] %vm22_vm0, %v1417_v22  ;;  %v1415_v56 = vadd.f32 %v1325_v58, %v67_v62  ;;  %v2308_v29 = vpop.f32.mrf.mxu1  ;;  %v1327_v18 = vpop.f32.mrf.mxu0  ;;  %v1188_v25 = vadd.f32 %v2294_v7, %v3273_v31  ;;  %v3669_v55 = vld [vmem:[#allocation20_spill] sm:$0xff]  ;;  %v3670_v44 = vld [vmem:[#allocation22_spill] sm:$0xff]  ;;  %v73_v1 = vld [vmem:[#allocation2 + $0x90] sm:$0xff] }
 0x161   :  { %v1644_v17 = vmax.f32 %v1612_v51, 0.0  ;;  %v1610_v20 = vadd.f32 %v3668_v19, %v1514_v41  ;;  %v2297_v30 = vadd.f32 %v3263_v15, %v3243_v5  ;;  %v1478_v6 = vld [vmem:[#allocation2 + $0x40] sm:$0xff]  ;;  %v1418_v49 = vadd.f32 %v1336_v59, %v70_v35 }
 0x162   :  { %1802 = vst.msk [vmem:[%s3619_s4 + $0x10] sm:$0xf] %vm1797_vm1, %v2003_v60  ;;  %v1328_v4 = vadd.f32 %v1327_v18, %v1167_v0  ;;  %v3378_v12 = vadd.f32 %v3670_v44, %v3669_v55  ;;  %v3671_v37 = vunpack.c.l.bf16 %v3151_v36  ;;  %v1517_v7 = vadd.f32 %v3226_v53, %v1478_v6  ;;  %v3384_v62 = vpop.f32.mrf.mxu1  ;;  %v2380_v48 = vpop.f32.mrf.mxu0  ;;  %v3672_v5 = vld [vmem:[#allocation27_spill] sm:$0xff] }
 0x163   :  { %v2006_v50 = vpack.c.bf16 %v1644_v17, %v1644_v17  ;;  %v1642_v51 = vmax.f32 %v1610_v20, 0.0  ;;  %1447 = vst.msk [vmem:[#allocation2 + $0x60] sm:$0xff] %vm22_vm0, %v1415_v56  ;;  %v2291_v15 = vadd.f32 %v3186_v10, %v3672_v5  ;;  %v1481_v0 = vld [vmem:[#allocation2 + $0x58] sm:$0xff]  ;;  %1450 = vst.msk [vmem:[#allocation2 + $0x78] sm:$0xff] %vm22_vm0, %v1418_v49  ;;  %v1349_v41 = vadd.f32 %v2380_v48, %v1188_v25 }
 0x164   :  { %v1615_v31 = vadd.f32 %v3671_v37, %v1519_v23  ;;  %v1416_v8 = vadd.f32 %v1328_v4, %v68_v21  ;;  %v1180_v22 = vadd.f32 %v2288_v42, %v3255_v28  ;;  %v1613_v9 = vadd.f32 %v2049_v11, %v1517_v7  ;;  %v3397_v10 = vpop.f32.mrf.mxu1  ;;  %v1340_v60 = vpop.f32.mrf.mxu0 }
 0x165   :  { %1805 = vst.msk [vmem:[%s3619_s4 + $0x1c] sm:$0xf] %vm1797_vm1, %v2006_v50  ;;  %v2004_v58 = vpack.c.bf16 %v1642_v51, %v1642_v51  ;;  %v1520_v38 = vadd.f32 %v3226_v53, %v1481_v0  ;;  %v1479_v17 = vld [vmem:[#allocation2 + $0x48] sm:$0xff]  ;;  %v2306_v47 = vadd.f32 %v2305_v27, %v3330_v52  ;;  %v1421_v59 = vadd.f32 %v1349_v41, %v73_v1  ;;  %v74_v52 = vld [vmem:[#allocation2 + $0x98] sm:$0xff] }
 0x166   :  { %v1647_v35 = vmax.f32 %v1615_v31, 0.0  ;;  %1448 = vst.msk [vmem:[#allocation2 + $0x68] sm:$0xff] %vm22_vm0, %v1416_v8  ;;  %v1341_v19 = vadd.f32 %v1340_v60, %v1180_v22  ;;  %v1191_v28 = vadd.f32 %v2297_v30, %v3286_v54  ;;  %v1645_v42 = vmax.f32 %v1613_v9, 0.0  ;;  %v3409_v21 = vpop.f32.mrf.mxu1  ;;  %v2381_v27 = vpop.f32.mrf.mxu0 }
 0x167   :  { %1803 = vst.msk [vmem:[%s3619_s4 + $0x14] sm:$0xf] %vm1797_vm1, %v2004_v58  ;;  %v3673_v20 = vunpack.c.h.bf16 %v3151_v36  ;;  %v1518_v56 = vadd.f32 %v3226_v53, %v1479_v17  ;;  %v2300_v18 = vadd.f32 %v3292_v14, %v3277_v2  ;;  %v1484_v54 = vld [vmem:[#allocation2 + $0x70] sm:$0xff]  ;;  %v1183_v30 = vadd.f32 %v2291_v15, %v3259_v32  ;;  %v72_v14 = vld [vmem:[#allocation2 + $0x88] sm:$0xff] }
 0x168   :  { %v2009_v11 = vpack.c.bf16 %v1647_v35, %v1647_v35  ;;  %1453 = vst.msk [vmem:[#allocation2 + $0x90] sm:$0xff] %vm22_vm0, %v1421_v59  ;;  %v1419_v25 = vadd.f32 %v1341_v19, %v71_v26  ;;  %v1352_v50 = vadd.f32 %v2381_v27, %v1191_v28  ;;  %v2007_v36 = vpack.c.bf16 %v1645_v42, %v1645_v42  ;;  %v3422_v2 = vpop.f32.mrf.mxu1  ;;  %v1343_v44 = vpop.f32.mrf.mxu0 }
 0x169   :  { %v1616_v23 = vadd.f32 %v3673_v20, %v1520_v38  ;;  %v3674_v49 = vunpack.c.h.bf16 %v3164_v40  ;;  %v1523_v55 = vadd.f32 %v3226_v53, %v1484_v54  ;;  %v2309_v37 = vadd.f32 %v2308_v29, %v3357_v34  ;;  %v77_v29 = vld [vmem:[#allocation2 + $0xb0] sm:$0xff] }
 0x16a   :  { %1808 = vst.msk [vmem:[%s3619_s4 + $0x28] sm:$0xf] %vm1797_vm1, %v2009_v11  ;;  %v1482_v51 = vld [vmem:[#allocation2 + $0x60] sm:$0xff]  ;;  %v1422_v32 = vadd.f32 %v1352_v50, %v74_v52  ;;  %v1344_v31 = vadd.f32 %v1343_v44, %v1183_v30  ;;  %v1204_v7 = vadd.f32 %v2306_v47, %v3353_v46  ;;  %1806 = vst.msk [vmem:[%s3619_s4 + $0x20] sm:$0xf] %vm1797_vm1, %v2007_v36  ;;  %v3675_v48 = vunpack.c.l.bf16 %v3169_v24  ;;  %v1485_v0 = vld [vmem:[#allocation2 + $0x78] sm:$0xff]  ;;  %v2316_v34 = vpop.f32.mrf.mxu1  ;;  %v2384_v8 = vpop.f32.mrf.mxu0 }
 0x16b   :  { %v1648_v6 = vmax.f32 %v1616_v23, 0.0  ;;  %v1614_v4 = vadd.f32 %v3674_v49, %v1518_v56  ;;  %1451 = vst.msk [vmem:[#allocation2 + $0x80] sm:$0xff] %vm22_vm0, %v1419_v25  ;;  %v1521_v15 = vadd.f32 %v3226_v53, %v1482_v51  ;;  %v1524_v41 = vadd.f32 %v3226_v53, %v1485_v0  ;;  %v75_v11 = vld [vmem:[#allocation2 + $0xa0] sm:$0xff] }
 0x16c   :  { %v1619_v5 = vadd.f32 %v3675_v48, %v1523_v55  ;;  %1454 = vst.msk [vmem:[#allocation2 + $0x98] sm:$0xff] %vm22_vm0, %v1422_v32  ;;  %v1420_v46 = vadd.f32 %v1344_v31, %v72_v14  ;;  %v1365_v22 = vadd.f32 %v2384_v8, %v1204_v7  ;;  %v1196_v58 = vadd.f32 %v2300_v18, %v3290_v61  ;;  %v2317_v17 = vpop.f32.mrf.mxu1  ;;  %v1356_v47 = vpop.f32.mrf.mxu0  ;;  %v76_v32 = vld [vmem:[#allocation2 + $0xa8] sm:$0xff]  ;;  %v81_v8 = vld [vmem:[#allocation2 + $0xd0] sm:$0xff] }
 0x16d   :  { %v2010_v40 = vpack.c.bf16 %v1648_v6, %v1648_v6  ;;  %v1646_v1 = vmax.f32 %v1614_v4, 0.0  ;;  %v2303_v35 = vadd.f32 %v3316_v33, %v3301_v57  ;;  %v1617_v26 = vadd.f32 %v2057_v16, %v1521_v15  ;;  %v1483_v60 = vld [vmem:[#allocation2 + $0x68] sm:$0xff] }
 0x16e   :  { %v1651_v38 = vmax.f32 %v1619_v5, 0.0  ;;  %v3676_v59 = vunpack.c.h.bf16 %v3169_v24  ;;  %v1522_v61 = vadd.f32 %v3226_v53, %v1483_v60  ;;  %1452 = vst.msk [vmem:[#allocation2 + $0x88] sm:$0xff] %vm22_vm0, %v1420_v46  ;;  %v1425_v28 = vadd.f32 %v1365_v22, %v77_v29  ;;  %v2319_v24 = vpop.f32.mrf.mxu1  ;;  %v2385_v56 = vpop.f32.mrf.mxu0 }
 0x16f   :  { %1809 = vst.msk [vmem:[%s3619_s4 + $0x2c] sm:$0xf] %vm1797_vm1, %v2010_v40  ;;  %v2008_v9 = vpack.c.bf16 %v1646_v1, %v1646_v1  ;;  %v1207_v42 = vadd.f32 %v2309_v37, %v3378_v12  ;;  %v1649_v57 = vmax.f32 %v1617_v26, 0.0  ;;  %v1488_v33 = vld [vmem:[#allocation2 + $0x90] sm:$0xff]  ;;  %v2318_v20 = vadd.f32 %v2317_v17, %v2316_v34  ;;  %v78_v12 = vld [vmem:[#allocation2 + $0xb8] sm:$0xff] }
 0x170   :  { %v1620_v19 = vadd.f32 %v3676_v59, %v1524_v41  ;;  %v2013_v16 = vpack.c.bf16 %v1651_v38, %v1651_v38  ;;  %v1357_v23 = vadd.f32 %v1356_v47, %v1196_v58  ;;  %v3677_v27 = vunpack.c.h.bf16 %v3184_v43  ;;  %1457 = vst.msk [vmem:[#allocation2 + $0xb0] sm:$0xff] %vm22_vm0, %v1425_v28  ;;  %v2320_v49 = vpop.f32.mrf.mxu1  ;;  %v1359_v4 = vpop.f32.mrf.mxu0  ;;  %v3679_v40 = vld [vmem:[#allocation5_spill] sm:$0xff] }
 0x171   :  { %1807 = vst.msk [vmem:[%s3619_s4 + $0x24] sm:$0xf] %vm1797_vm1, %v2008_v9  ;;  %v1527_v54 = vadd.f32 %v3226_v53, %v1488_v33  ;;  %v1368_v25 = vadd.f32 %v2385_v56, %v1207_v42  ;;  %v2011_v50 = vpack.c.bf16 %v1649_v57, %v1649_v57  ;;  %v2312_v30 = vadd.f32 %v3397_v10, %v3384_v62  ;;  %v3681_v9 = vld [vmem:[#allocation3_spill] sm:$0xff]  ;;  %v3683_v57 = vld [vmem:[#allocation6_spill] sm:$0xff] }
 0x172   :  { %v1652_v52 = vmax.f32 %v1620_v19, 0.0  ;;  %v1618_v18 = vadd.f32 %v3677_v27, %v1522_v61  ;;  %1812 = vst.msk [vmem:[%s3619_s4 + $0x38] sm:$0xf] %vm1797_vm1, %v2013_v16  ;;  %v1486_v36 = vld [vmem:[#allocation2 + $0x80] sm:$0xff]  ;;  %v1423_v6 = vadd.f32 %v1357_v23, %v75_v11  ;;  %v1199_v43 = vadd.f32 %v2303_v35, %v3327_v13  ;;  %v2322_v7 = vpop.f32.mrf.mxu1  ;;  %v2388_v48 = vpop.f32.mrf.mxu0  ;;  %v82_v27 = vld [vmem:[#allocation2 + $0xd8] sm:$0xff] }
 0x173   :  { %v3678_v44 = vunpack.c.l.bf16 %v3195_v63  ;;  %v1525_v37 = vadd.f32 %v3226_v53, %v1486_v36  ;;  %1810 = vst.msk [vmem:[%s3619_s4 + $0x30] sm:$0xf] %vm1797_vm1, %v2011_v50  ;;  %v1489_v62 = vld [vmem:[#allocation2 + $0x98] sm:$0xff]  ;;  %v1426_v10 = vadd.f32 %v1368_v25, %v78_v12  ;;  %v2321_v31 = vadd.f32 %v2320_v49, %v2319_v24  ;;  %v79_v19 = vld [vmem:[#allocation2 + $0xc0] sm:$0xff]  ;;  %v3685_v50 = vld [vmem:[#allocation4_spill] sm:$0xff] }
 0x174   :  { %v2014_v55 = vpack.c.bf16 %v1652_v52, %v1652_v52  ;;  %v1650_v14 = vmax.f32 %v1618_v18, 0.0  ;;  %1455 = vst.msk [vmem:[#allocation2 + $0xa0] sm:$0xff] %vm22_vm0, %v1423_v6  ;;  %v1360_v13 = vadd.f32 %v1359_v4, %v1199_v43  ;;  %v1220_v1 = vadd.f32 %v2318_v20, %v3679_v40  ;;  %v2323_v35 = vpop.f32.mrf.mxu1  ;;  %v1372_v26 = vpop.f32.mrf.mxu0  ;;  %v80_v4 = vld [vmem:[#allocation2 + $0xc8] sm:$0xff] }
 0x175   :  { %v1623_v51 = vadd.f32 %v3678_v44, %v1527_v54  ;;  %v3680_v0 = vunpack.c.l.bf16 %v3204_v45  ;;  %v1528_v29 = vadd.f32 %v3226_v53, %v1489_v62  ;;  %v2315_v41 = vadd.f32 %v3422_v2, %v3409_v21  ;;  %v1487_v46 = vld [vmem:[#allocation2 + $0x88] sm:$0xff]  ;;  %1458 = vst.msk [vmem:[#allocation2 + $0xb8] sm:$0xff] %vm22_vm0, %v1426_v10  ;;  %v3495_v2 = vld [vmem:[%s3617_s3 + $0x50] sm:$0xff]  }
 0x176   :  { %1813 = vst.msk [vmem:[%s3619_s4 + $0x3c] sm:$0xf] %vm1797_vm1, %v2014_v55  ;;  %v2012_v5 = vpack.c.bf16 %v1650_v14, %v1650_v14  ;;  %v1424_v22 = vadd.f32 %v1360_v13, %v76_v32  ;;  %v1381_v58 = vadd.f32 %v2388_v48, %v1220_v1  ;;  %v1212_v38 = vadd.f32 %v2312_v30, %v3681_v9  ;;  %v2325_v16 = vpop.f32.mrf.mxu1  ;;  %v2389_v20 = vpop.f32.mrf.mxu0  ;;  %v3686_v13 = vld [vmem:[#allocation7_spill] sm:$0xff] }
 0x177   :  { %v1655_v15 = vmax.f32 %v1623_v51, 0.0  ;;  %v1621_v34 = vadd.f32 %v3680_v0, %v1525_v37  ;;  %v3682_v47 = vunpack.c.h.bf16 %v3195_v63  ;;  %v1526_v21 = vadd.f32 %v3226_v53, %v1487_v46  ;;  %v1492_v61 = vld [vmem:[#allocation2 + $0xb0] sm:$0xff] }
 0x178   :  { %1811 = vst.msk [vmem:[%s3619_s4 + $0x34] sm:$0xf] %vm1797_vm1, %v2012_v5  ;;  %v1429_v28 = vadd.f32 %v1381_v58, %v81_v8  ;;  %v2324_v11 = vadd.f32 %v2323_v35, %v2322_v7  ;;  %v1373_v42 = vadd.f32 %v1372_v26, %v1212_v38  ;;  %v1223_v33 = vadd.f32 %v2321_v31, %v3683_v57  ;;  %v2326_v25 = vpop.f32.mrf.mxu1  ;;  %v1375_v36 = vpop.f32.mrf.mxu0  ;;  %v3525_v31 = vld [vmem:[%s3617_s3 + $0x68] sm:$0xff]   ;;  %v3533_v5 = vld [vmem:[%s3617_s3 + $0x60] sm:$0xff]   ;;  %v85_v57 = vld [vmem:[#allocation2 + $0xf0] sm:$0xff] }
 0x179   :  { %v2017_v60 = vpack.c.bf16 %v1655_v15, %v1655_v15  ;;  %v1653_v17 = vmax.f32 %v1621_v34, 0.0  ;;  %v1624_v59 = vadd.f32 %v3682_v47, %v1528_v29  ;;  %1456 = vst.msk [vmem:[#allocation2 + $0xa8] sm:$0xff] %vm22_vm0, %v1424_v22  ;;  %v3684_v24 = vunpack.c.h.bf16 %v3204_v45  ;;  %v83_v34 = vld [vmem:[#allocation2 + $0xe0] sm:$0xff] }
 0x17a   :  { %v1531_v52 = vadd.f32 %v3226_v53, %v1492_v61  ;;  %v2073_v18 = vunpack.c.l.bf16 %v3495_v2  ;;  %1461 = vst.msk [vmem:[#allocation2 + $0xd0] sm:$0xff] %vm22_vm0, %v1429_v28  ;;  %v1427_v54 = vadd.f32 %v1373_v42, %v79_v19  ;;  %v1384_v12 = vadd.f32 %v2389_v20, %v1223_v33  ;;  %v2328_v37 = vpop.f32.mrf.mxu1  ;;  %v2392_v32 = vpop.f32.mrf.mxu0  ;;  %v3688_v19 = vld [vmem:[#allocation8_spill] sm:$0xff] }
 0x17b   :  { %1816 = vst.msk [vmem:[%s3619_s4 + $0x48] sm:$0xf] %vm1797_vm1, %v2017_v60  ;;  %v2015_v63 = vpack.c.bf16 %v1653_v17, %v1653_v17  ;;  %v1656_v23 = vmax.f32 %v1624_v59, 0.0  ;;  %v1622_v56 = vadd.f32 %v3684_v24, %v1526_v21  ;;  %v1215_v30 = vadd.f32 %v2315_v41, %v3685_v50  ;;  %v1490_v43 = vld [vmem:[#allocation2 + $0xa0] sm:$0xff]  ;;  %v3687_v59 = vld [vmem:[#allocation9_spill] sm:$0xff]  ;;  %v84_v20 = vld [vmem:[#allocation2 + $0xe8] sm:$0xff] }
 0x17c   :  { %v1627_v49 = vadd.f32 %v2077_v39, %v1531_v52  ;;  %v1529_v55 = vadd.f32 %v3226_v53, %v1490_v43  ;;  %v2078_v14 = vunpack.c.h.bf16 %v3219_v3  ;;  %1459 = vst.msk [vmem:[#allocation2 + $0xc0] sm:$0xff] %vm22_vm0, %v1427_v54  ;;  %v1430_v44 = vadd.f32 %v1384_v12, %v82_v27  ;;  %v1493_v39 = vld [vmem:[#allocation2 + $0xb8] sm:$0xff]  ;;  %v2329_v0 = vpop.f32.mrf.mxu1  ;;  %v1388_v29 = vpop.f32.mrf.mxu0 }
 0x17d   :  { %1814 = vst.msk [vmem:[%s3619_s4 + $0x40] sm:$0xf] %vm1797_vm1, %v2015_v63  ;;  %v2018_v45 = vpack.c.bf16 %v1656_v23, %v1656_v23  ;;  %v1654_v6 = vmax.f32 %v1622_v56, 0.0  ;;  %v1376_v51 = vadd.f32 %v1375_v36, %v1215_v30  ;;  %v2327_v3 = vadd.f32 %v2326_v25, %v2325_v16 }
 0x17e   :  { %v1659_v10 = vmax.f32 %v1627_v49, 0.0  ;;  %v1228_v7 = vadd.f32 %v2324_v11, %v3686_v13  ;;  %v1625_v40 = vadd.f32 %v2073_v18, %v1529_v55  ;;  %v1532_v1 = vadd.f32 %v3226_v53, %v1493_v39  ;;  %1462 = vst.msk [vmem:[#allocation2 + $0xd8] sm:$0xff] %vm22_vm0, %v1430_v44  ;;  %v2331_v26 = vpop.f32.mrf.mxu1  ;;  %v2393_v60 = vpop.f32.mrf.mxu0  ;;  %v2108_v44 = vld [vmem:[%s3617_s3 + $0x70] sm:$0xff]  }
 0x17f   :  { %1817 = vst.msk [vmem:[%s3619_s4 + $0x4c] sm:$0xf] %vm1797_vm1, %v2018_v45  ;;  %v2016_v62 = vpack.c.bf16 %v1654_v6, %v1654_v6  ;;  %v2074_v48 = vunpack.c.h.bf16 %v3495_v2  ;;  %v1428_v15 = vadd.f32 %v1376_v51, %v80_v4  ;;  %v2330_v46 = vadd.f32 %v2329_v0, %v2328_v37  ;;  %v3689_v45 = vld [vmem:[#allocation10_spill] sm:$0xff] }
 0x180   :  { %v2021_v8 = vpack.c.bf16 %v1659_v10, %v1659_v10  ;;  %v1491_v41 = vld [vmem:[#allocation2 + $0xa8] sm:$0xff]  ;;  %v1389_v22 = vadd.f32 %v1388_v29, %v1228_v7  ;;  %v1657_v58 = vmax.f32 %v1625_v40, 0.0  ;;  %v1628_v35 = vadd.f32 %v2078_v14, %v1532_v1  ;;  %v2332_v33 = vpop.f32.mrf.mxu1  ;;  %v1391_v63 = vpop.f32.mrf.mxu0  ;;  %v86_v51 = vld [vmem:[#allocation2 + $0xf8] sm:$0xff] }
 0x181   :  { %1815 = vst.msk [vmem:[%s3619_s4 + $0x44] sm:$0xf] %vm1797_vm1, %v2016_v62  ;;  %v1530_v9 = vadd.f32 %v3226_v53, %v1491_v41  ;;  %v2085_v38 = vunpack.c.l.bf16 %v3525_v31  ;;  %v1496_v17 = vld [vmem:[#allocation2 + $0xd0] sm:$0xff]  ;;  %v2081_v47 = vunpack.c.l.bf16 %v3533_v5  ;;  %v1236_v21 = vadd.f32 %v2330_v46, %v3687_v59 }
 0x182   :  { %1460 = vst.msk [vmem:[#allocation2 + $0xc8] sm:$0xff] %vm22_vm0, %v1428_v15  ;;  %v1431_v2 = vadd.f32 %v1389_v22, %v83_v34  ;;  %v1231_v61 = vadd.f32 %v2327_v3, %v3688_v19  ;;  %v2019_v28 = vpack.c.bf16 %v1657_v58, %v1657_v58  ;;  %v1660_v11 = vmax.f32 %v1628_v35, 0.0 }
 0x183   :  { %1820 = vst.msk [vmem:[%s3619_s4 + $0x58] sm:$0xf] %vm1797_vm1, %v2021_v8  ;;  %v1626_v42 = vadd.f32 %v2074_v48, %v1530_v9  ;;  %v1535_v16 = vadd.f32 %v3226_v53, %v1496_v17  ;;  %v1494_v23 = vld [vmem:[#allocation2 + $0xc0] sm:$0xff]  ;;  %v2086_v24 = vunpack.c.h.bf16 %v3525_v31  ;;  %v1397_v56 = vadd.f32 %v2392_v32, %v1236_v21  ;;  %v2109_v48 = vld [vmem:[%s3617_s3 + $0x78] sm:$0xff]  }
 0x184   :  { %1463 = vst.msk [vmem:[#allocation2 + $0xe0] sm:$0xff] %vm22_vm0, %v1431_v2  ;;  %v2333_v52 = vadd.f32 %v2332_v33, %v2331_v26  ;;  %v1392_v27 = vadd.f32 %v1391_v63, %v1231_v61  ;;  %v2022_v18 = vpack.c.bf16 %v1660_v11, %v1660_v11  ;;  %v1533_v25 = vadd.f32 %v3226_v53, %v1494_v23 }
 0x185   :  { %1818 = vst.msk [vmem:[%s3619_s4 + $0x50] sm:$0xf] %vm1797_vm1, %v2019_v28  ;;  %v1658_v54 = vmax.f32 %v1626_v42, 0.0  ;;  %v1631_v12 = vadd.f32 %v2085_v38, %v1535_v16  ;;  %v1497_v50 = vld [vmem:[#allocation2 + $0xd8] sm:$0xff]  ;;  %v2082_v30 = vunpack.c.h.bf16 %v3533_v5  ;;  %v1433_v36 = vadd.f32 %v1397_v56, %v85_v57 }
 0x186   :  { %v1239_v6 = vadd.f32 %v2333_v52, %v3689_v45  ;;  %v1432_v49 = vadd.f32 %v1392_v27, %v84_v20  ;;  %1821 = vst.msk [vmem:[%s3619_s4 + $0x5c] sm:$0xf] %vm1797_vm1, %v2022_v18  ;;  %v1629_v55 = vadd.f32 %v2081_v47, %v1533_v25  ;;  %v1536_v14 = vadd.f32 %v3226_v53, %v1497_v50 }
 0x187   :  { %v2020_v43 = vpack.c.bf16 %v1658_v54, %v1658_v54  ;;  %v1663_v4 = vmax.f32 %v1631_v12, 0.0  ;;  %1465 = vst.msk [vmem:[#allocation2 + $0xf0] sm:$0xff] %vm22_vm0, %v1433_v36  ;;  %v2089_v3 = vunpack.c.l.bf16 %v2108_v44  ;;  %v2093_v29 = vunpack.c.l.bf16 %v2109_v48 }
 0x188   :  { %v1400_v32 = vadd.f32 %v2393_v60, %v1239_v6  ;;  %1464 = vst.msk [vmem:[#allocation2 + $0xe8] sm:$0xff] %vm22_vm0, %v1432_v49  ;;  %v1661_v10 = vmax.f32 %v1629_v55, 0.0  ;;  %v1632_v39 = vadd.f32 %v2086_v24, %v1536_v14  ;;  %v2090_v41 = vunpack.c.h.bf16 %v2108_v44 }
 0x189   :  { %v1495_v37 = vld [vmem:[#allocation2 + $0xc8] sm:$0xff]  ;;  %1819 = vst.msk [vmem:[%s3619_s4 + $0x54] sm:$0xf] %vm1797_vm1, %v2020_v43  ;;  %v2025_v62 = vpack.c.bf16 %v1663_v4, %v1663_v4  ;;  %v2094_v17 = vunpack.c.h.bf16 %v2109_v48 }
 0x18a   :  { %v1534_v31 = vadd.f32 %v3226_v53, %v1495_v37  ;;  %v1434_v13 = vadd.f32 %v1400_v32, %v86_v51  ;;  %v2023_v7 = vpack.c.bf16 %v1661_v10, %v1661_v10  ;;  %v1664_v40 = vmax.f32 %v1632_v39, 0.0 }
 0x18b   :  { %1824 = vst.msk [vmem:[%s3619_s4 + $0x68] sm:$0xf] %vm1797_vm1, %v2025_v62  ;;  %v1498_v5 = vld [vmem:[#allocation2 + $0xe0] sm:$0xff] }
 0x18c   :  { %v1630_v1 = vadd.f32 %v2082_v30, %v1534_v31  ;;  %v1537_v15 = vadd.f32 %v3226_v53, %v1498_v5  ;;  %1466 = vst.msk [vmem:[#allocation2 + $0xf8] sm:$0xff] %vm22_vm0, %v1434_v13  ;;  %v2026_v0 = vpack.c.bf16 %v1664_v40, %v1664_v40 }
 0x18d   :  { %1822 = vst.msk [vmem:[%s3619_s4 + $0x60] sm:$0xf] %vm1797_vm1, %v2023_v7 }
 0x18e   :  { %v1662_v34 = vmax.f32 %v1630_v1, 0.0  ;;  %v1633_v8 = vadd.f32 %v2089_v3, %v1537_v15  ;;  %1825 = vst.msk [vmem:[%s3619_s4 + $0x6c] sm:$0xf] %vm1797_vm1, %v2026_v0  ;;  %v1500_v22 = vld [vmem:[#allocation2 + $0xf0] sm:$0xff] }
 0x18f   :  { %v1499_v58 = vld [vmem:[#allocation2 + $0xe8] sm:$0xff]  ;;  %v1539_v35 = vadd.f32 %v3226_v53, %v1500_v22 }
 0x190   :  { %v2024_v46 = vpack.c.bf16 %v1662_v34, %v1662_v34  ;;  %v1665_v9 = vmax.f32 %v1633_v8, 0.0  ;;  %v1538_v38 = vadd.f32 %v3226_v53, %v1499_v58 }
 0x191   :  { %v1635_v26 = vadd.f32 %v2093_v29, %v1539_v35 }
 0x192   :  { %1823 = vst.msk [vmem:[%s3619_s4 + $0x64] sm:$0xf] %vm1797_vm1, %v2024_v46  ;;  %v2027_v60 = vpack.c.bf16 %v1665_v9, %v1665_v9  ;;  %v1634_v47 = vadd.f32 %v2090_v41, %v1538_v38 }
 0x193   :  { %v1501_v59 = vld [vmem:[#allocation2 + $0xf8] sm:$0xff]  ;;  %v1667_v21 = vmax.f32 %v1635_v26, 0.0 }
 0x194   :  { %1826 = vst.msk [vmem:[%s3619_s4 + $0x70] sm:$0xf] %vm1797_vm1, %v2027_v60  ;;  %v1540_v2 = vadd.f32 %v3226_v53, %v1501_v59  ;;  %v1666_v19 = vmax.f32 %v1634_v47, 0.0 }
 0x195   :  { %v2029_v61 = vpack.c.bf16 %v1667_v21, %v1667_v21 }
 0x196   :  { %v1636_v28 = vadd.f32 %v2094_v17, %v1540_v2  ;;  %v2028_v11 = vpack.c.bf16 %v1666_v19, %v1666_v19 }
 0x197   :  { %1828 = vst.msk [vmem:[%s3619_s4 + $0x78] sm:$0xf] %vm1797_vm1, %v2029_v61 }
 0x198   :  { %v1668_v42 = vmax.f32 %v1636_v28, 0.0  ;;  %1827 = vst.msk [vmem:[%s3619_s4 + $0x74] sm:$0xf] %vm1797_vm1, %v2028_v11 }
 0x19a   :  { %v2030_v16 = vpack.c.bf16 %v1668_v42, %v1668_v42 }
 0x19c   :  { %1829 = vst.msk [vmem:[%s3619_s4 + $0x7c] sm:$0xf] %vm1797_vm1, %v2030_v16 }

// kernel: siamese_forward.28
= control target key start
LH: loop header
LB: loop body
LE: loop exit
PB: predicated region body
PF: predicated region fallthrough
CT: control target
= control target key end

     0   :  { %vm447_vm0 = vcmask 523264   ;;  %s1228_s1 = inlined_call_operand.vmem [shape: bf16[576,128], index: 1, kind: input, shape index: {}]   ;;  %s1229_s0 = inlined_call_operand.vmem [shape: bf16[64,576], index: 0, kind: input, shape index: {}]   ;;  %s1230_s2 = inlined_call_operand.vmem [shape: f32[1,128], index: 2, kind: input, shape index: {}]   ;;  %s1231_s3 = inlined_call_operand.vmem [shape: bf16[64,128], index: 3, kind: output, shape index: {}]  }
   0x1   :  { %v961_v0 = vld [vmem:[%s1228_s1 + $0x78] sm:$0xff]   ;;  %v965_v4 = vld [vmem:[%s1228_s1 + $0x70] sm:$0xff]   ;;  %v969_v8 = vld [vmem:[%s1228_s1 + $0x68] sm:$0xff]  }
   0x2   :  { %v962_v1 = vld [vmem:[%s1228_s1 + $0xf8] sm:$0xff]   ;;  %849 = vmatprep.subr.bf16.mxu0 %v961_v0  ;;  %v966_v5 = vld [vmem:[%s1228_s1 + $0xf0] sm:$0xff]   ;;  %v970_v9 = vld [vmem:[%s1228_s1 + $0xe8] sm:$0xff]  }
   0x3   :  { %v963_v2 = vld [vmem:[%s1228_s1 + $0x38] sm:$0xff]   ;;  %889 = vmatprep.subr.bf16.mxu1 %v962_v1  ;;  %v967_v6 = vld [vmem:[%s1228_s1 + $0x30] sm:$0xff]   ;;  %v971_v10 = vld [vmem:[%s1228_s1 + $0x28] sm:$0xff]  }
   0x4   :  { %v964_v3 = vld [vmem:[%s1228_s1 + $0xb8] sm:$0xff]   ;;  %850 = vmatpush3.bf16.msra.mxu0 %v963_v2  ;;  %v968_v7 = vld [vmem:[%s1228_s1 + $0xb0] sm:$0xff]   ;;  %v972_v11 = vld [vmem:[%s1228_s1 + $0xa8] sm:$0xff]  }
   0x5   :  { %890 = vmatpush3.bf16.msra.mxu1 %v964_v3  ;;  %851 = vmatprep.subr.bf16.mxu0 %v965_v4  ;;  %v973_v12 = vld [vmem:[%s1228_s1 + $0x60] sm:$0xff]   ;;  %v977_v16 = vld [vmem:[%s1228_s1 + $0x58] sm:$0xff]   ;;  %v981_v20 = vld [vmem:[%s1228_s1 + $0x50] sm:$0xff]  }
   0x6   :  { %891 = vmatprep.subr.bf16.mxu1 %v966_v5  ;;  %v974_v13 = vld [vmem:[%s1228_s1 + $0xe0] sm:$0xff]   ;;  %v978_v17 = vld [vmem:[%s1228_s1 + $0xd8] sm:$0xff]   ;;  %v982_v21 = vld [vmem:[%s1228_s1 + $0xd0] sm:$0xff]  }
   0x7   :  { %v975_v14 = vld [vmem:[%s1228_s1 + $0x20] sm:$0xff]   ;;  %v979_v18 = vld [vmem:[%s1228_s1 + $0x18] sm:$0xff]   ;;  %v983_v22 = vld [vmem:[%s1228_s1 + $0x10] sm:$0xff]  }
   0x8   :  { %852 = vmatpush3.bf16.msra.mxu0 %v967_v6  ;;  %v976_v15 = vld [vmem:[%s1228_s1 + $0xa0] sm:$0xff]   ;;  %v980_v19 = vld [vmem:[%s1228_s1 + $0x98] sm:$0xff]   ;;  %v984_v23 = vld [vmem:[%s1228_s1 + $0x90] sm:$0xff]  }
   0x9   :  { %892 = vmatpush3.bf16.msra.mxu1 %v968_v7  ;;  %853 = vmatprep.subr.bf16.mxu0 %v969_v8  ;;  %v985_v24 = vld [vmem:[%s1228_s1 + $0x48] sm:$0xff]   ;;  %v989_v28 = vld [vmem:[%s1228_s1 + $0x40] sm:$0xff]   ;;  %v999_v36 = vld [vmem:[%s1228_s1 + $0x118] sm:$0xff]  }
   0xa   :  { %893 = vmatprep.subr.bf16.mxu1 %v970_v9  ;;  %v986_v25 = vld [vmem:[%s1228_s1 + $0xc8] sm:$0xff]   ;;  %v990_v29 = vld [vmem:[%s1228_s1 + $0xc0] sm:$0xff]   ;;  %v1006_v39 = vld [vmem:[%s1228_s1 + $0x110] sm:$0xff]  }
   0xb   :  { %v987_v26 = vld [vmem:[%s1228_s1 + $0x8] sm:$0xff]   ;;  %v991_v30 = vld [vmem:[%s1228_s1] sm:$0xff]   ;;  %v1009_v43 = vld [vmem:[%s1229_s0 + $0x5c] ss:$20 sps:$4 sm:$0xff]  }
   0xc   :  { %854 = vmatpush3.bf16.msra.mxu0 %v971_v10  ;;  %v988_v27 = vld [vmem:[%s1228_s1 + $0x88] sm:$0xff]   ;;  %v992_v31 = vld [vmem:[%s1228_s1 + $0x80] sm:$0xff]   ;;  %v1014_v48 = vld [vmem:[%s1229_s0 + $0x7c] ss:$20 sps:$4 sm:$0xff]  }
   0xd   :  { %894 = vmatpush3.bf16.msra.mxu1 %v972_v11  ;;  %855 = vmatprep.subr.bf16.mxu0 %v973_v12  ;;  %v993_v32 = vld [vmem:[%s1229_s0] ss:$20 sps:$4 sm:$0xff]   ;;  %v995_v33 = vld [vmem:[%s1229_s0 + $0x4] ss:$20 sps:$4 sm:$0xff]   ;;  %v996_v34 = vld [vmem:[%s1229_s0 + $0x8] ss:$20 sps:$4 sm:$0xff]  }
   0xe   :  { %895 = vmatprep.subr.bf16.mxu1 %v974_v13  ;;  %v998_v35 = vld [vmem:[%s1229_s0 + $0xc] ss:$20 sps:$4 sm:$0xff]   ;;  %492 = vmatprep.mubr.bf16.mxu0 %v995_v33  ;;  %v1002_v38 = vld [vmem:[%s1229_s0 + $0x34] ss:$20 sps:$4 sm:$0xff]   ;;  %v1005_v41 = vld [vmem:[%s1229_s0 + $0x30] ss:$20 sps:$4 sm:$0xff]  }
   0xf   :  { %557 = vmatprep.mubr.bf16.mxu1 %v998_v35  ;;  %v1000_v37 = vld [vmem:[%s1229_s0 + $0x2c] ss:$20 sps:$4 sm:$0xff]   ;;  %v1004_v40 = vld [vmem:[%s1229_s0 + $0x28] ss:$20 sps:$4 sm:$0xff]   ;;  %v1011_v46 = vld [vmem:[%s1229_s0 + $0x50] ss:$20 sps:$4 sm:$0xff]  }
  0x10   :  { %856 = vmatpush3.bf16.msra.mxu0 %v975_v14  ;;  %v1007_v42 = vld [vmem:[%s1229_s0 + $0x54] ss:$20 sps:$4 sm:$0xff]   ;;  %v1020_v45 = vld [vmem:[%s1228_s1 + $0x100] sm:$0xff]   ;;  %v1012_v47 = vld [vmem:[%s1229_s0 + $0x58] ss:$20 sps:$4 sm:$0xff]  }
  0x11   :  { %896 = vmatpush3.bf16.msra.mxu1 %v976_v15  ;;  %857 = vmatprep.subr.bf16.mxu0 %v977_v16  ;;  %v1013_v44 = vld [vmem:[%s1228_s1 + $0x108] sm:$0xff]   ;;  %v1016_v49 = vld [vmem:[%s1229_s0 + $0x84] ss:$20 sps:$4 sm:$0xff]   ;;  %v1019_v51 = vld [vmem:[%s1229_s0 + $0x80] ss:$20 sps:$4 sm:$0xff]  }
  0x12   :  { %897 = vmatprep.subr.bf16.mxu1 %v978_v17  ;;  %v1018_v50 = vld [vmem:[%s1229_s0 + $0x78] ss:$20 sps:$4 sm:$0xff]   ;;  %v1021_v52 = vld [vmem:[%s1229_s0 + $0x10] ss:$20 sps:$4 sm:$0xff]   ;;  %v1022_v53 = vld [vmem:[%s1229_s0 + $0x60] ss:$20 sps:$4 sm:$0xff]  }
  0x13   :  { %v1023_v54 = vld [vmem:[%s1229_s0 + $0x38] ss:$20 sps:$4 sm:$0xff]   ;;  %v1024_v55 = vld [vmem:[%s1229_s0 + $0x88] ss:$20 sps:$4 sm:$0xff]  }
  0x14   :  { %858 = vmatpush3.bf16.msra.mxu0 %v979_v18 }
  0x15   :  { %898 = vmatpush3.bf16.msra.mxu1 %v980_v19  ;;  %859 = vmatprep.subr.bf16.mxu0 %v981_v20 }
  0x16   :  { %899 = vmatprep.subr.bf16.mxu1 %v982_v21 }
  0x18   :  { %860 = vmatpush3.bf16.msra.mxu0 %v983_v22 }
  0x19   :  { %900 = vmatpush3.bf16.msra.mxu1 %v984_v23  ;;  %861 = vmatprep.subr.bf16.mxu0 %v985_v24 }
  0x1a   :  { %901 = vmatprep.subr.bf16.mxu1 %v986_v25 }
  0x1c   :  { %862 = vmatpush3.bf16.msra.mxu0 %v987_v26 }
  0x1d   :  { %902 = vmatpush3.bf16.msra.mxu1 %v988_v27  ;;  %863 = vmatprep.subr.bf16.mxu0 %v989_v28 }
  0x1e   :  { %903 = vmatprep.subr.bf16.mxu1 %v990_v29 }
  0x20   :  { %864 = vmatpush3.bf16.msra.mxu0 %v991_v30 }
  0x21   :  { %904 = vmatpush3.bf16.msra.mxu1 %v992_v31  ;;  %937 = vmatprep.subr.bf16.mxu0 %v999_v36 }
  0x22   :  { %953 = vmatprep.subr.bf16.mxu1 %v999_v36 }
  0x23   :  { %493 = vmatmul.mubr.bf16.vlgmr.msra.gmra.mxu0 %v993_v32 }
  0x24   :  { %558 = vmatmul.mubr.bf16.vlgmr.msra.gmra.mxu1 %v996_v34  ;;  %938 = vmatpush3.bf16.msra.mxu0 %v999_v36 }
  0x25   :  { %957 = vmatpush3.bf16.msra.mxu1 %v999_v36  ;;  %500 = vmatprep.mubr.bf16.mxu0 %v1000_v37 }
  0x26   :  { %565 = vmatprep.mubr.bf16.mxu1 %v1002_v38  ;;  %939 = vmatprep.subr.bf16.mxu0 %v1006_v39 }
  0x27   :  { %954 = vmatprep.subr.bf16.mxu1 %v1006_v39 }
  0x28   :  { %940 = vmatpush3.bf16.msra.mxu0 %v1006_v39 }
  0x29   :  { %958 = vmatpush3.bf16.msra.mxu1 %v1006_v39  ;;  %941 = vmatprep.subr.bf16.mxu0 %v1013_v44 }
  0x2a   :  { %955 = vmatprep.subr.bf16.mxu1 %v1013_v44 }
  0x2b   :  { %501 = vmatmul.mubr.bf16.gmra.mxu0 %v1004_v40 }
  0x2c   :  { %566 = vmatmul.mubr.bf16.gmra.mxu1 %v1005_v41  ;;  %508 = vmatprep.mubr.bf16.mxu0 %v1007_v42 }
  0x2d   :  { %573 = vmatprep.mubr.bf16.mxu1 %v1009_v43  ;;  %942 = vmatpush3.bf16.msra.mxu0 %v1013_v44 }
  0x2e   :  { %959 = vmatpush3.bf16.msra.mxu1 %v1013_v44  ;;  %943 = vmatprep.subr.bf16.mxu0 %v1020_v45 }
  0x2f   :  { %956 = vmatprep.subr.bf16.mxu1 %v1020_v45 }
  0x31   :  { %944 = vmatpush3.bf16.msra.mxu0 %v1020_v45 }
  0x32   :  { %960 = vmatpush3.bf16.msra.mxu1 %v1020_v45 }
  0x33   :  { %509 = vmatmul.mubr.bf16.gmra.mxu0 %v1011_v46  ;;  %v809_v46 = vld [vmem:[%s1230_s2] ss:$0 sm:$0xff] }
  0x34   :  { %574 = vmatmul.mubr.bf16.gmra.mxu1 %v1012_v47  ;;  %516 = vmatprep.mubr.bf16.mxu0 %v1014_v48 }
  0x35   :  { %581 = vmatprep.mubr.bf16.mxu1 %v1016_v49 }
  0x3b   :  { %517 = vmatmul.mubr.bf16.gmra.mxu0 %v1018_v50 }
  0x3c   :  { %582 = vmatmul.mubr.bf16.gmra.mxu1 %v1019_v51  ;;  %945 = vmatprep.mubr.msk.bf16.mxu0 %vm447_vm0, %v1021_v52 }
  0x3d   :  { %949 = vmatprep.mubr.msk.bf16.mxu1 %vm447_vm0, %v1022_v53 }
  0x43   :  { %946 = vmatmul.mubr.msk.bf16.vlgmr.msra.gmra.mxu0 %vm447_vm0, %v1023_v54 }
  0x44   :  { %950 = vmatmul.mubr.msk.bf16.vlgmr.msra.gmra.mxu1 %vm447_vm0, %v1024_v55 }
  0xe3   :  { %v865_v56 = vpop.f32.mrf.mxu0 }
  0xe4   :  { %v905_v57 = vpop.f32.mrf.mxu1 }
  0xe5   :  { %v866_v58 = vpop.f32.mrf.mxu0 }
  0xe6   :  { %v906_v59 = vpop.f32.mrf.mxu1  ;;  %v867_v25 = vadd.f32 %v866_v58, %v865_v56 }
  0xe7   :  { %v868_v60 = vpop.f32.mrf.mxu0  ;;  %v907_v26 = vadd.f32 %v906_v59, %v905_v57 }
  0xe8   :  { %v908_v61 = vpop.f32.mrf.mxu1 }
  0xe9   :  { %v869_v62 = vpop.f32.mrf.mxu0  ;;  %v560_v43 = vadd.f32 %v907_v26, %v867_v25 }
  0xea   :  { %v909_v63 = vpop.f32.mrf.mxu1  ;;  %v870_v39 = vadd.f32 %v869_v62, %v868_v60 }
  0xeb   :  { %v871_v0 = vpop.f32.mrf.mxu0  ;;  %v910_v40 = vadd.f32 %v909_v63, %v908_v61 }
  0xec   :  { %v911_v1 = vpop.f32.mrf.mxu1 }
  0xed   :  { %v872_v2 = vpop.f32.mrf.mxu0  ;;  %v563_v59 = vadd.f32 %v910_v40, %v870_v39 }
  0xee   :  { %v912_v3 = vpop.f32.mrf.mxu1  ;;  %v873_v19 = vadd.f32 %v872_v2, %v871_v0 }
  0xef   :  { %v874_v4 = vpop.f32.mrf.mxu0  ;;  %v913_v20 = vadd.f32 %v912_v3, %v911_v1 }
  0xf0   :  { %v914_v5 = vpop.f32.mrf.mxu1 }
  0xf1   :  { %v875_v6 = vpop.f32.mrf.mxu0  ;;  %v568_v34 = vadd.f32 %v913_v20, %v873_v19 }
  0xf2   :  { %v915_v7 = vpop.f32.mrf.mxu1  ;;  %v876_v31 = vadd.f32 %v875_v6, %v874_v4 }
  0xf3   :  { %v877_v8 = vpop.f32.mrf.mxu0  ;;  %v916_v32 = vadd.f32 %v915_v7, %v914_v5 }
  0xf4   :  { %v917_v9 = vpop.f32.mrf.mxu1 }
  0xf5   :  { %v878_v10 = vpop.f32.mrf.mxu0  ;;  %v571_v52 = vadd.f32 %v916_v32, %v876_v31 }
  0xf6   :  { %v918_v11 = vpop.f32.mrf.mxu1  ;;  %v879_v28 = vadd.f32 %v878_v10, %v877_v8 }
  0xf7   :  { %v880_v12 = vpop.f32.mrf.mxu0  ;;  %v919_v29 = vadd.f32 %v918_v11, %v917_v9 }
  0xf8   :  { %v920_v13 = vpop.f32.mrf.mxu1 }
  0xf9   :  { %v881_v14 = vpop.f32.mrf.mxu0  ;;  %v576_v49 = vadd.f32 %v919_v29, %v879_v28 }
  0xfa   :  { %v921_v15 = vpop.f32.mrf.mxu1  ;;  %v882_v44 = vadd.f32 %v881_v14, %v880_v12 }
  0xfb   :  { %v883_v16 = vpop.f32.mrf.mxu0  ;;  %v922_v45 = vadd.f32 %v921_v15, %v920_v13 }
  0xfc   :  { %v923_v17 = vpop.f32.mrf.mxu1 }
  0xfd   :  { %v884_v18 = vpop.f32.mrf.mxu0  ;;  %v579_v63 = vadd.f32 %v922_v45, %v882_v44 }
  0xfe   :  { %v924_v21 = vpop.f32.mrf.mxu1  ;;  %v885_v22 = vadd.f32 %v884_v18, %v883_v16 }
  0xff   :  { %v925_v23 = vadd.f32 %v924_v21, %v923_v17  ;;  %v886_v24 = vpop.f32.mrf.mxu0 }
 0x100   :  { %v926_v27 = vpop.f32.mrf.mxu1 }
 0x101   :  { %v887_v30 = vpop.f32.mrf.mxu0  ;;  %v584_v38 = vadd.f32 %v925_v23, %v885_v22 }
 0x102   :  { %v927_v33 = vpop.f32.mrf.mxu1  ;;  %v888_v35 = vadd.f32 %v887_v30, %v886_v24 }
 0x103   :  { %v928_v36 = vadd.f32 %v927_v33, %v926_v27  ;;  %v947_v37 = vpop.f32.mrf.mxu0 }
 0x104   :  { %v633_v41 = vadd.f32 %v947_v37, %v568_v34  ;;  %v951_v42 = vpop.f32.mrf.mxu1 }
 0x105   :  { %v649_v47 = vadd.f32 %v951_v42, %v584_v38  ;;  %v624_v48 = vpop.f32.mrf.mxu0  ;;  %v587_v55 = vadd.f32 %v928_v36, %v888_v35 }
 0x106   :  { %v625_v50 = vadd.f32 %v624_v48, %v560_v43  ;;  %v640_v51 = vpop.f32.mrf.mxu1  ;;  %v691_v56 = vadd.f32 %v809_v46, %v633_v41 }
 0x107   :  { %v641_v53 = vadd.f32 %v640_v51, %v576_v49  ;;  %v948_v54 = vpop.f32.mrf.mxu0  ;;  %v695_v60 = vadd.f32 %v809_v46, %v649_v47 }
 0x108   :  { %v636_v57 = vadd.f32 %v948_v54, %v571_v52  ;;  %v952_v58 = vpop.f32.mrf.mxu1  ;;  %v689_v0 = vadd.f32 %v809_v46, %v625_v50  ;;  %v699_v7 = vmax.f32 %v691_v56, 0.0 }
 0x109   :  { %v652_v61 = vadd.f32 %v952_v58, %v587_v55  ;;  %v627_v62 = vpop.f32.mrf.mxu0  ;;  %v693_v4 = vadd.f32 %v809_v46, %v641_v53  ;;  %v703_v10 = vmax.f32 %v695_v60, 0.0 }
 0x10a   :  { %v692_v1 = vadd.f32 %v809_v46, %v636_v57  ;;  %v628_v2 = vadd.f32 %v627_v62, %v563_v59  ;;  %v643_v3 = vpop.f32.mrf.mxu1  ;;  %v697_v13 = vmax.f32 %v689_v0, 0.0 }
 0x10b   :  { %v696_v5 = vadd.f32 %v809_v46, %v652_v61  ;;  %v644_v6 = vadd.f32 %v643_v3, %v579_v63  ;;  %v701_v16 = vmax.f32 %v693_v4, 0.0 }
 0x10c   :  { %v700_v8 = vmax.f32 %v692_v1, 0.0  ;;  %v690_v9 = vadd.f32 %v809_v46, %v628_v2 }
 0x10d   :  { %v704_v11 = vmax.f32 %v696_v5, 0.0  ;;  %v694_v12 = vadd.f32 %v809_v46, %v644_v6 }
 0x10e   :  { %v834_v14 = vpack.c.bf16 %v700_v8, %v699_v7  ;;  %v698_v15 = vmax.f32 %v690_v9, 0.0 }
 0x10f   :  { %v844_v17 = vpack.c.bf16 %v704_v11, %v703_v10  ;;  %v702_v18 = vmax.f32 %v694_v12, 0.0 }
 0x110   :  { %846 = vst [vmem:[%s1231_s3 + $0x8] sm:$0xff] %v834_v14   ;;  %v829_v19 = vpack.c.bf16 %v698_v15, %v697_v13 }
 0x111   :  { %848 = vst [vmem:[%s1231_s3 + $0x18] sm:$0xff] %v844_v17   ;;  %v839_v20 = vpack.c.bf16 %v702_v18, %v701_v16 }
 0x112   :  { %830 = vst [vmem:[%s1231_s3] sm:$0xff] %v829_v19  }
 0x113   :  { %847 = vst [vmem:[%s1231_s3 + $0x10] sm:$0xff] %v839_v20  }

// kernel: siamese_forward.27
= control target key start
LH: loop header
LB: loop body
LE: loop exit
PB: predicated region body
PF: predicated region fallthrough
CT: control target
= control target key end

     0   :  { %vm95_vm0 = vcmask 523264   ;;  %s414_s1 = inlined_call_operand.vmem [shape: bf16[64,128], index: 1, kind: input, shape index: {}]   ;;  %s415_s0 = inlined_call_operand.vmem [shape: bf16[64,64], index: 0, kind: input, shape index: {}]   ;;  %s416_s2 = inlined_call_operand.vmem [shape: f32[1,128], index: 2, kind: input, shape index: {}]   ;;  %s417_s3 = inlined_call_operand.vmem [shape: bf16[64,128], index: 3, kind: output, shape index: {}]  }
   0x1   :  { %v343_v0 = vld [vmem:[%s414_s1 + $0x18] sm:$0xff]   ;;  %v344_v1 = vld [vmem:[%s414_s1 + $0x10] sm:$0xff]   ;;  %v345_v2 = vld [vmem:[%s414_s1 + $0x8] sm:$0xff]  }
   0x2   :  { %319 = vmatprep.subr.bf16.mxu0 %v343_v0  ;;  %335 = vmatprep.subr.bf16.mxu1 %v343_v0  ;;  %v347_v3 = vld [vmem:[%s415_s0] sm:$0xff]   ;;  %v348_v4 = vld [vmem:[%s415_s0 + $0x10] sm:$0xff]   ;;  %v349_v6 = vld [vmem:[%s415_s0 + $0x8] sm:$0xff]  }
   0x3   :  { %320 = vmatpush3.bf16.msra.mxu0 %v343_v0  ;;  %339 = vmatpush3.bf16.msra.mxu1 %v343_v0  ;;  %v346_v5 = vld [vmem:[%s414_s1] sm:$0xff]   ;;  %v350_v7 = vld [vmem:[%s415_s0 + $0x18] sm:$0xff]  }
   0x4   :  { %321 = vmatprep.subr.bf16.mxu0 %v344_v1  ;;  %336 = vmatprep.subr.bf16.mxu1 %v344_v1  ;;  %v271_v10 = vld [vmem:[%s416_s2] ss:$0 sm:$0xff] }
   0x5   :  { %327 = vmatprep.mubr.msk.bf16.mxu0 %vm95_vm0, %v347_v3  ;;  %331 = vmatprep.mubr.msk.bf16.mxu1 %vm95_vm0, %v348_v4 }
   0x7   :  { %322 = vmatpush3.bf16.msra.mxu0 %v344_v1  ;;  %340 = vmatpush3.bf16.msra.mxu1 %v344_v1 }
   0x8   :  { %323 = vmatprep.subr.bf16.mxu0 %v345_v2  ;;  %337 = vmatprep.subr.bf16.mxu1 %v345_v2 }
   0xb   :  { %324 = vmatpush3.bf16.msra.mxu0 %v345_v2  ;;  %341 = vmatpush3.bf16.msra.mxu1 %v345_v2 }
   0xc   :  { %325 = vmatprep.subr.bf16.mxu0 %v346_v5  ;;  %338 = vmatprep.subr.bf16.mxu1 %v346_v5 }
   0xf   :  { %326 = vmatpush3.bf16.msra.mxu0 %v346_v5  ;;  %342 = vmatpush3.bf16.msra.mxu1 %v346_v5 }
  0x12   :  { %328 = vmatmul.mubr.msk.bf16.vlgmr.msra.gmra.mxu0 %vm95_vm0, %v349_v6  ;;  %332 = vmatmul.mubr.msk.bf16.vlgmr.msra.gmra.mxu1 %vm95_vm0, %v350_v7 }
  0xd2   :  { %v329_v8 = vpop.f32.mrf.mxu0  ;;  %v333_v9 = vpop.f32.mrf.mxu1 }
  0xd3   :  { %v209_v15 = vadd.f32 %v329_v8, %v271_v10  ;;  %v213_v16 = vadd.f32 %v333_v9, %v271_v10 }
  0xd4   :  { %v142_v11 = vpop.f32.mrf.mxu0  ;;  %v158_v12 = vpop.f32.mrf.mxu1 }
  0xd5   :  { %v207_v19 = vadd.f32 %v271_v10, %v142_v11  ;;  %v211_v20 = vadd.f32 %v271_v10, %v158_v12 }
  0xd6   :  { %v330_v13 = vpop.f32.mrf.mxu0  ;;  %v334_v14 = vpop.f32.mrf.mxu1 }
  0xd7   :  { %v210_v17 = vadd.f32 %v330_v13, %v271_v10  ;;  %v214_v18 = vadd.f32 %v334_v14, %v271_v10 }
  0xd8   :  { %v145_v21 = vpop.f32.mrf.mxu0  ;;  %v161_v22 = vpop.f32.mrf.mxu1 }
  0xd9   :  { %v296_v23 = vpack.c.bf16 %v210_v17, %v209_v15  ;;  %v306_v24 = vpack.c.bf16 %v214_v18, %v213_v16  ;;  %v208_v25 = vadd.f32 %v271_v10, %v145_v21  ;;  %v212_v26 = vadd.f32 %v271_v10, %v161_v22 }
  0xdb   :  { %308 = vst [vmem:[%s417_s3 + $0x8] sm:$0xff] %v296_v23   ;;  %310 = vst [vmem:[%s417_s3 + $0x18] sm:$0xff] %v306_v24   ;;  %v291_v27 = vpack.c.bf16 %v208_v25, %v207_v19  ;;  %v301_v28 = vpack.c.bf16 %v212_v26, %v211_v20 }
  0xdd   :  { %292 = vst [vmem:[%s417_s3] sm:$0xff] %v291_v27   ;;  %309 = vst [vmem:[%s417_s3 + $0x10] sm:$0xff] %v301_v28  }

// kernel: siamese_forward.29
= control target key start
LH: loop header
LB: loop body
LE: loop exit
PB: predicated region body
PF: predicated region fallthrough
CT: control target
= control target key end

     0   :  { %s1395_s15 = smov 0   ;;  %s1397_s16 = smov 0   ;;  %s1547_s0 = inlined_call_operand.vmem [shape: bf16[64,1152], index: 0, kind: input, shape index: {}]   ;;  %s1548_s1 = inlined_call_operand.vmem [shape: bf16[1152,128], index: 1, kind: input, shape index: {}]   ;;  %s1549_s2 = inlined_call_operand.vmem [shape: f32[1,128], index: 2, kind: input, shape index: {}]   ;;  %s1550_s3 = inlined_call_operand.vmem [shape: bf16[64,128], index: 3, kind: input, shape index: {}]   ;;  %s1551_s4 = inlined_call_operand.vmem [shape: bf16[64,128], index: 4, kind: output, shape index: {}]  }
   0x1   :  { %s1399_s17 = smov 0   ;;  %s1401_s18 = smov 0  }
   0x2   :  { %s1403_s19 = smov 0  }
   0x3 LB: > { %s26_s20 = sadd.s32 1, %s1363_s18  ;;  %p49_p1 = scmp.ne.s32.totalorder %s1355_s16, %s1351_s15  ;;  %s1367_s19 = sphi %s1403_s19, %s14_s19   ;;  %s1363_s18 = sphi %s1401_s18, %s1555_s18   ;;  %s1359_s17 = sphi %s1399_s17, %s1554_s17   ;;  %s1355_s16 = sphi %s1397_s16, %s1553_s16   ;;  %s1351_s15 = sphi %s1395_s15, %s1552_s15  }
   0x4   : > { %p27_p0 = scmp.ge.s32.totalorder %s26_s20, 3  ;;  %p50_p2 = scmp.eq.s32.totalorder %s1367_s19, 0 }
   0x5   : > { %s42_s22 = sadd.s32 1, %s1355_s16  ;;  %p1048_p5 = scmp.ge.s32.totalorder %s1367_s19, 3 }
   0x6   : > { %s1557_s20 = smov (%p27_p0, %s26_s20), 0  ;;  %p51_p3 = por %p50_p2, %p49_p1 }
   0x7   : > { %s38_s21 = ssub.s32 %s1363_s18, %s1557_s20  ;;  %203 = sbr.rel (%p1048_p5) target bundleno = 26 (0x1a), region = 24 }
   0x8   : > { %p40_p4 = scmp.eq.s32.totalorder %s38_s21, 0 }
   0xa   : > { %s1430_s23 = scalar_select %p40_p4, %s1355_s16, %s42_s22  }
   0xc   : > { %206 = sbr.rel (!%p51_p3) target bundleno = 26 (0x1a), region = 28  ;;  %s208_s24 = sand.u32 (%p51_p3), 1, %s1355_s16  }
   0xd   : > { %s1119_s25 = smul.u32 (%p51_p3), 12, %s1363_s18 }
   0xe   : > { %s1246_s26 = smul.u32 (%p51_p3), 96, %s208_s24 }
   0xf   : > { %s1438_s29 = scalar_lea.vmem (%p51_p3), %s1547_s0, %s1119_s25 }
  0x10   : > { %v231_v0 = vld [vmem:[%s1438_s29] sm:$0xff] (%p51_p3)  ;;  %v235_v2 = vld [vmem:[%s1438_s29 + $0x48] sm:$0xff] (%p51_p3)  ;;  %s210_s30 = scalar_lea.vmem (%p51_p3), [#allocation3], %s1246_s26  ;;  %v239_v4 = vld [vmem:[%s1438_s29 + $0x90] sm:$0xff] (%p51_p3) }
  0x11   : > { %v233_v1 = vld [vmem:[%s1438_s29 + $0x24] sm:$0xff]  ;;  %232 = vst [vmem:[%s210_s30] sm:$0xff] %v231_v0  ;;  %236 = vst [vmem:[%s210_s30 + $0x18] sm:$0xff] %v235_v2  ;;  %v237_v3 = vld [vmem:[%s1438_s29 + $0x6c] sm:$0xff] }
  0x12   : > { %234 = vst [vmem:[%s210_s30 + $0xc] sm:$0xff] %v233_v1  ;;  %v241_v5 = vld [vmem:[%s1438_s29 + $0xb4] sm:$0xff]  ;;  %238 = vst [vmem:[%s210_s30 + $0x24] sm:$0xff] %v237_v3  ;;  %v245_v7 = vld [vmem:[%s1438_s29 + $0xfc] sm:$0xff] }
  0x13   : > { %240 = vst [vmem:[%s210_s30 + $0x30] sm:$0xff] %v239_v4  ;;  %242 = vst [vmem:[%s210_s30 + $0x3c] sm:$0xff] %v241_v5  ;;  %v243_v6 = vld [vmem:[%s1438_s29 + $0xd8] sm:$0xff]  ;;  %v1050_v8 = vld [vmem:[%s1438_s29 + $0x8] sm:$0xf] }
  0x14   : > { %244 = vst [vmem:[%s210_s30 + $0x48] sm:$0xff] %v243_v6  ;;  %246 = vst [vmem:[%s210_s30 + $0x54] sm:$0xff] %v245_v7  ;;  %v1052_v9 = vld [vmem:[%s1438_s29 + $0x2c] sm:$0xf]  ;;  %v1054_v10 = vld [vmem:[%s1438_s29 + $0x50] sm:$0xf] }
  0x15   : > { %1051 = vst [vmem:[%s210_s30 + $0x8] sm:$0xf] %v1050_v8  ;;  %v1056_v11 = vld [vmem:[%s1438_s29 + $0x74] sm:$0xf]  ;;  %1053 = vst [vmem:[%s210_s30 + $0x14] sm:$0xf] %v1052_v9 }
  0x16   : > { %1055 = vst [vmem:[%s210_s30 + $0x20] sm:$0xf] %v1054_v10  ;;  %1057 = vst [vmem:[%s210_s30 + $0x2c] sm:$0xf] %v1056_v11  ;;  %v1058_v12 = vld [vmem:[%s1438_s29 + $0x98] sm:$0xf] }
  0x17   : > { %v1060_v13 = vld [vmem:[%s1438_s29 + $0xbc] sm:$0xf]  ;;  %v1062_v14 = vld [vmem:[%s1438_s29 + $0xe0] sm:$0xf]  ;;  %1059 = vst [vmem:[%s210_s30 + $0x38] sm:$0xf] %v1058_v12 }
  0x18   : > { %1061 = vst [vmem:[%s210_s30 + $0x44] sm:$0xf] %v1060_v13  ;;  %1063 = vst [vmem:[%s210_s30 + $0x50] sm:$0xf] %v1062_v14  ;;  %v1064_v15 = vld [vmem:[%s1438_s29 + $0x104] sm:$0xf] }
  0x19   : > { %1065 = vst [vmem:[%s210_s30 + $0x5c] sm:$0xf] %v1064_v15 }
  0x1a PF: > { %p1066_p6 = scmp.ge.s32.totalorder %s1367_s19, 1  ;;  %p287_p7 = scmp.lt.s32.totalorder %s1367_s19, 4 }
  0x1c   : > { %p288_p8 = pnand %p1066_p6, %p287_p7 }
  0x1d   : > { %s294_s5 = sand.u32 (!%p288_p8), 1, %s1351_s15   ;;  %s343_s6 = smul.u32 (!%p288_p8), 48, %s1359_s17 }
  0x1e   : > { %291 = sbr.rel (%p288_p8) target bundleno = 325 (0x145), region = 58  ;;  %p1068_p10 = scmp.ne.s32.totalorder (!%p288_p8), %s1359_s17, 0 }
  0x1f   : > { %s1247_s7 = smul.u32 (!%p288_p8), 96, %s294_s5  ;;  %p344_p9 = scmp.lt.s32.totalorder (!%p288_p8), %s343_s6, 143 }
  0x21   : > { %s1465_s12 = scalar_lea.vmem (!%p288_p8), [#allocation3], %s1247_s7 }
  0x23   : > { %s1559_s6 = smov (!%p344_p9, %s343_s6), 143  ;;  %377 = sbr.rel (%p1068_p10) target bundleno = 45 (0x2d), region = 66 }
  0x24   : > { %s1067_s8 = sshll.u32 %s1559_s6, 2 }
  0x25   : > { %s1463_s11 = scalar_lea.vmem %s1548_s1, %s1067_s8 }
  0x28   : > { %v1369_v16 = vmov 0.0  }
  0x29   : > { %378 = vst [vmem:[#allocation2 + $0x30] sm:$0xff] %v1369_v16  ;;  %379 = vst [vmem:[#allocation2] sm:$0xff] %v1369_v16 }
  0x2a   : > { %380 = vst [vmem:[#allocation2 + $0x18] sm:$0xff] %v1369_v16  ;;  %381 = vst [vmem:[#allocation2 + $0x10] sm:$0xff] %v1369_v16 }
  0x2b   : > { %382 = vst [vmem:[#allocation2 + $0x8] sm:$0xff] %v1369_v16  ;;  %383 = vst [vmem:[#allocation2 + $0x20] sm:$0xff] %v1369_v16 }
  0x2c   : > { %384 = vst [vmem:[#allocation2 + $0x28] sm:$0xff] %v1369_v16  ;;  %385 = vst [vmem:[#allocation2 + $0x38] sm:$0xff] %v1369_v16 }
  0x2d PF: > { %v1289_v17 = vld [vmem:[%s1463_s11 + $0x78] sm:$0xff]   ;;  %v1292_v20 = vld [vmem:[%s1463_s11 + $0x70] sm:$0xff]   ;;  %v1295_v23 = vld [vmem:[%s1463_s11 + $0x68] sm:$0xff]   ;;  %p1105_p11 = scmp.ne.s32.totalorder %s1359_s17, 2 }
  0x2e   : > { %v1290_v18 = vld [vmem:[%s1463_s11 + $0x38] sm:$0xff]   ;;  %1170 = vmatprep.subr.bf16.mxu0 %v1289_v17  ;;  %v1293_v21 = vld [vmem:[%s1463_s11 + $0x30] sm:$0xff]   ;;  %v1296_v24 = vld [vmem:[%s1463_s11 + $0x28] sm:$0xff]  }
  0x2f   : > { %v1291_v19 = vld [vmem:[%s1463_s11 + $0xb8] sm:$0xff]   ;;  %1171 = vmatpush3.bf16.msra.mxu0 %v1290_v18  ;;  %v1294_v22 = vld [vmem:[%s1463_s11 + $0xb0] sm:$0xff]   ;;  %v1297_v25 = vld [vmem:[%s1463_s11 + $0xa8] sm:$0xff]  }
  0x30   : > { %1222 = vmatprep.subr.bf16.mxu1 %v1291_v19  ;;  %1172 = vmatprep.subr.bf16.mxu0 %v1292_v20  ;;  %v1298_v26 = vld [vmem:[%s1463_s11 + $0x60] sm:$0xff]   ;;  %v1301_v29 = vld [vmem:[%s1463_s11 + $0x58] sm:$0xff]   ;;  %v1304_v32 = vld [vmem:[%s1463_s11 + $0x50] sm:$0xff]  }
  0x31   : > { %1223 = vmatpush3.bf16.msra.mxu1 %v1291_v19  ;;  %v1299_v27 = vld [vmem:[%s1463_s11 + $0x20] sm:$0xff]   ;;  %v1303_v30 = vld [vmem:[%s1463_s11 + $0x98] sm:$0xff]   ;;  %v1306_v33 = vld [vmem:[%s1463_s11 + $0x90] sm:$0xff]  }
  0x32   : > { %1224 = vmatprep.subr.bf16.mxu1 %v1294_v22  ;;  %v1300_v28 = vld [vmem:[%s1463_s11 + $0xa0] sm:$0xff]   ;;  %v1302_v31 = vld [vmem:[%s1463_s11 + $0x18] sm:$0xff]   ;;  %v1305_v34 = vld [vmem:[%s1463_s11 + $0x10] sm:$0xff]  }
  0x33   : > { %1173 = vmatpush3.bf16.msra.mxu0 %v1293_v21  ;;  %v1307_v35 = vld [vmem:[%s1463_s11 + $0x48] sm:$0xff]   ;;  %v1310_v38 = vld [vmem:[%s1463_s11 + $0x40] sm:$0xff]   ;;  %v1325_v49 = vld [vmem:[%s1465_s12 + $0x50] ss:$12 sps:$4 sm:$0xff]  }
  0x34   : > { %1174 = vmatprep.subr.bf16.mxu0 %v1295_v23  ;;  %v1308_v36 = vld [vmem:[%s1463_s11 + $0x8] sm:$0xff]   ;;  %v1312_v39 = vld [vmem:[%s1463_s11 + $0x80] sm:$0xff]   ;;  %v1323_v50 = vld [vmem:[%s1465_s12 + $0x30] ss:$12 sps:$4 sm:$0xff]  }
  0x35   : > { %1225 = vmatpush3.bf16.msra.mxu1 %v1294_v22  ;;  %v1309_v37 = vld [vmem:[%s1463_s11 + $0x88] sm:$0xff]   ;;  %v1315_v40 = vld [vmem:[%s1465_s12 + $0x4] ss:$12 sps:$4 sm:$0xff]   ;;  %v1321_v48 = vld [vmem:[%s1465_s12 + $0x34] ss:$12 sps:$4 sm:$0xff]  }
  0x36   : > { %1226 = vmatprep.subr.bf16.mxu1 %v1297_v25  ;;  %v1316_v41 = vld [vmem:[%s1465_s12 + $0x8] ss:$12 sps:$4 sm:$0xff]   ;;  %v1311_v42 = vld [vmem:[%s1463_s11] sm:$0xff]   ;;  %698 = vmatprep.mubr.bf16.mxu0 %v1315_v40  ;;  %v1326_v51 = vld [vmem:[%s1465_s12 + $0x4c] ss:$12 sps:$4 sm:$0xff]  }
  0x37   : > { %1175 = vmatpush3.bf16.msra.mxu0 %v1296_v24  ;;  %1238 = vmatprep.mubr.bf16.mxu1 %v1316_v41  ;;  %v1313_v43 = vld [vmem:[%s1465_s12] ss:$12 sps:$4 sm:$0xff]   ;;  %v1318_v44 = vld [vmem:[%s1465_s12 + $0x1c] ss:$12 sps:$4 sm:$0xff]   ;;  %v1324_v46 = vld [vmem:[%s1465_s12 + $0x38] ss:$12 sps:$4 sm:$0xff]  }
  0x38   : > { %1176 = vmatprep.subr.bf16.mxu0 %v1298_v26  ;;  %v1317_v45 = vld [vmem:[%s1465_s12 + $0x20] ss:$12 sps:$4 sm:$0xff]   ;;  %v1320_v47 = vld [vmem:[%s1465_s12 + $0x18] ss:$12 sps:$4 sm:$0xff]   ;;  %v1328_v52 = vld [vmem:[%s1465_s12 + $0x48] ss:$12 sps:$4 sm:$0xff]  }
  0x39   : > { %1227 = vmatpush3.bf16.msra.mxu1 %v1297_v25  ;;  %v386_v58 = vld [vmem:[#allocation2 + $0x30] sm:$0xff]  ;;  %v387_v2 = vld [vmem:[#allocation2] sm:$0xff]  ;;  %v388_v9 = vld [vmem:[#allocation2 + $0x18] sm:$0xff] }
  0x3a   : > { %1228 = vmatprep.subr.bf16.mxu1 %v1300_v28  ;;  %v389_v16 = vld [vmem:[#allocation2 + $0x10] sm:$0xff]  ;;  %v390_v24 = vld [vmem:[#allocation2 + $0x8] sm:$0xff] }
  0x3b   : > { %1177 = vmatpush3.bf16.msra.mxu0 %v1299_v27 }
  0x3c   : > { %1178 = vmatprep.subr.bf16.mxu0 %v1301_v29 }
  0x3d   : > { %1229 = vmatpush3.bf16.msra.mxu1 %v1300_v28 }
  0x3e   : > { %1230 = vmatprep.subr.bf16.mxu1 %v1303_v30 }
  0x3f   : > { %1179 = vmatpush3.bf16.msra.mxu0 %v1302_v31  ;;  %v391_v31 = vld [vmem:[#allocation2 + $0x20] sm:$0xff] }
  0x40   : > { %1180 = vmatprep.subr.bf16.mxu0 %v1304_v32 }
  0x41   : > { %1231 = vmatpush3.bf16.msra.mxu1 %v1303_v30 }
  0x42   : > { %1232 = vmatprep.subr.bf16.mxu1 %v1306_v33 }
  0x43   : > { %1181 = vmatpush3.bf16.msra.mxu0 %v1305_v34 }
  0x44   : > { %1182 = vmatprep.subr.bf16.mxu0 %v1307_v35 }
  0x45   : > { %1233 = vmatpush3.bf16.msra.mxu1 %v1306_v33 }
  0x46   : > { %1234 = vmatprep.subr.bf16.mxu1 %v1309_v37 }
  0x47   : > { %1183 = vmatpush3.bf16.msra.mxu0 %v1308_v36  ;;  %v392_v36 = vld [vmem:[#allocation2 + $0x28] sm:$0xff] }
  0x48   : > { %1184 = vmatprep.subr.bf16.mxu0 %v1310_v38 }
  0x49   : > { %1235 = vmatpush3.bf16.msra.mxu1 %v1309_v37 }
  0x4a   : > { %1236 = vmatprep.subr.bf16.mxu1 %v1312_v39 }
  0x4b   : > { %1185 = vmatpush3.bf16.msra.mxu0 %v1311_v42  ;;  %v393_v42 = vld [vmem:[#allocation2 + $0x38] sm:$0xff] }
  0x4d   : > { %1237 = vmatpush3.bf16.msra.mxu1 %v1312_v39 }
  0x4e   : > { %699 = vmatmul.mubr.bf16.vlgmr.msra.gmra.mxu0 %v1313_v43 }
  0x4f   : > { %706 = vmatprep.mubr.bf16.mxu0 %v1318_v44 }
  0x50   : > { %1239 = vmatmul.mubr.bf16.vlgmr.msra.gmra.mxu1 %v1317_v45 }
  0x51   : > { %1242 = vmatprep.mubr.bf16.mxu1 %v1324_v46 }
  0x56   : > { %707 = vmatmul.mubr.bf16.gmra.mxu0 %v1320_v47 }
  0x57   : > { %714 = vmatprep.mubr.bf16.mxu0 %v1321_v48 }
  0x58   : > { %1243 = vmatmul.mubr.bf16.gmra.mxu1 %v1325_v49 }
  0x5e   : > { %715 = vmatmul.mubr.bf16.gmra.mxu0 %v1323_v50 }
  0x5f   : > { %722 = vmatprep.mubr.bf16.mxu0 %v1326_v51 }
  0x66   : > { %723 = vmatmul.mubr.bf16.gmra.mxu0 %v1328_v52 }
 0x10e   : > { %v1186_v53 = vpop.f32.mrf.mxu0 }
 0x110   : > { %v1187_v54 = vpop.f32.mrf.mxu0  ;;  %v1240_v55 = vpop.f32.mrf.mxu1 }
 0x111   : > { %v1188_v56 = vadd.f32 %v1187_v54, %v1186_v53 }
 0x112   : > { %v1189_v57 = vpop.f32.mrf.mxu0  ;;  %v765_v59 = vpop.f32.mrf.mxu1 }
 0x113   : > { %v766_v60 = vadd.f32 %v1188_v56, %v765_v59 }
 0x114   : > { %v1190_v61 = vpop.f32.mrf.mxu0  ;;  %v1241_v62 = vpop.f32.mrf.mxu1 }
 0x115   : > { %v796_v63 = vadd.f32 %v766_v60, %v386_v58  ;;  %v1191_v0 = vadd.f32 %v1190_v61, %v1189_v57 }
 0x116   : > { %v1192_v1 = vpop.f32.mrf.mxu0  ;;  %v768_v3 = vpop.f32.mrf.mxu1 }
 0x117   : > { %804 = vst [vmem:[#allocation2 + $0x30] sm:$0xff] %v796_v63  ;;  %v769_v4 = vadd.f32 %v1191_v0, %v768_v3 }
 0x118   : > { %v1193_v5 = vpop.f32.mrf.mxu0  ;;  %v1244_v6 = vpop.f32.mrf.mxu1 }
 0x119   : > { %v797_v7 = vadd.f32 %v769_v4, %v387_v2  ;;  %v1194_v8 = vadd.f32 %v1193_v5, %v1192_v1 }
 0x11a   : > { %v1195_v10 = vpop.f32.mrf.mxu0  ;;  %v781_v13 = vpop.f32.mrf.mxu1 }
 0x11b   : > { %805 = vst [vmem:[#allocation2] sm:$0xff] %v797_v7  ;;  %v774_v11 = vadd.f32 %v1240_v55, %v1194_v8 }
 0x11c   : > { %v1196_v12 = vpop.f32.mrf.mxu0  ;;  %v1245_v20 = vpop.f32.mrf.mxu1 }
 0x11d   : > { %v798_v14 = vadd.f32 %v774_v11, %v388_v9  ;;  %v1197_v15 = vadd.f32 %v1196_v12, %v1195_v10 }
 0x11e   : > { %v1198_v17 = vpop.f32.mrf.mxu0  ;;  %v784_v27 = vpop.f32.mrf.mxu1 }
 0x11f   : > { %806 = vst [vmem:[#allocation2 + $0x18] sm:$0xff] %v798_v14  ;;  %v777_v18 = vadd.f32 %v1241_v62, %v1197_v15 }
 0x120   : > { %v1199_v19 = vpop.f32.mrf.mxu0 }
 0x121   : > { %v799_v21 = vadd.f32 %v777_v18, %v389_v16  ;;  %v1200_v22 = vadd.f32 %v1199_v19, %v1198_v17 }
 0x122   : > { %v1201_v23 = vpop.f32.mrf.mxu0 }
 0x123   : > { %807 = vst [vmem:[#allocation2 + $0x10] sm:$0xff] %v799_v21  ;;  %v782_v25 = vadd.f32 %v1200_v22, %v781_v13 }
 0x124   : > { %v1202_v26 = vpop.f32.mrf.mxu0 }
 0x125   : > { %v800_v28 = vadd.f32 %v782_v25, %v390_v24  ;;  %v1203_v29 = vadd.f32 %v1202_v26, %v1201_v23 }
 0x126   : > { %v1204_v30 = vpop.f32.mrf.mxu0 }
 0x127   : > { %808 = vst [vmem:[#allocation2 + $0x8] sm:$0xff] %v800_v28  ;;  %v785_v32 = vadd.f32 %v1203_v29, %v784_v27 }
 0x128   : > { %v1205_v33 = vpop.f32.mrf.mxu0 }
 0x129   : > { %v801_v34 = vadd.f32 %v785_v32, %v391_v31  ;;  %v1206_v35 = vadd.f32 %v1205_v33, %v1204_v30 }
 0x12a   : > { %v1207_v37 = vpop.f32.mrf.mxu0 }
 0x12b   : > { %809 = vst [vmem:[#allocation2 + $0x20] sm:$0xff] %v801_v34  ;;  %v790_v38 = vadd.f32 %v1244_v6, %v1206_v35 }
 0x12c   : > { %v1208_v39 = vpop.f32.mrf.mxu0 }
 0x12d   : > { %v802_v40 = vadd.f32 %v790_v38, %v392_v36  ;;  %v1209_v41 = vadd.f32 %v1208_v39, %v1207_v37 }
 0x12f   : > { %810 = vst [vmem:[#allocation2 + $0x28] sm:$0xff] %v802_v40  ;;  %v793_v43 = vadd.f32 %v1245_v20, %v1209_v41  ;;  %815 = sbr.rel (%p1105_p11) target bundleno = 325 (0x145), region = 70 }
 0x131   : > { %v803_v44 = vadd.f32 %v793_v43, %v393_v42 }
 0x133   : > { %811 = vst [vmem:[#allocation2 + $0x38] sm:$0xff] %v803_v44 }
 0x134   : > { %v816_v45 = vld [vmem:[#allocation2 + $0x30] sm:$0xff]  ;;  %v817_v46 = vld [vmem:[#allocation2] sm:$0xff]  ;;  %v818_v51 = vld [vmem:[#allocation2 + $0x18] sm:$0xff] }
 0x135   : > { %v1106_v47 = vld [vmem:[%s1549_s2] ss:$0 sm:$0xff]  ;;  %v819_v52 = vld [vmem:[#allocation2 + $0x10] sm:$0xff]  ;;  %v1164_v57 = vld [vmem:[%s1550_s3 + $0x8] sm:$0xff]  }
 0x136   : > { %v831_v48 = vadd.f32 %v1106_v47, %v816_v45  ;;  %v832_v49 = vadd.f32 %v1106_v47, %v817_v46  ;;  %v1129_v50 = vld [vmem:[%s1550_s3] sm:$0xff]   ;;  %v833_v55 = vadd.f32 %v1106_v47, %v818_v51  ;;  %v834_v56 = vadd.f32 %v1106_v47, %v819_v52  ;;  %v820_v58 = vld [vmem:[#allocation2 + $0x8] sm:$0xff]  ;;  %v1165_v0 = vld [vmem:[%s1550_s3 + $0x10] sm:$0xff]  }
 0x137   : > { %v1130_v53 = vunpack.c.l.bf16 %v1129_v50  ;;  %v1131_v54 = vunpack.c.h.bf16 %v1129_v50  ;;  %v821_v59 = vld [vmem:[#allocation2 + $0x20] sm:$0xff]  ;;  %v1134_v60 = vunpack.c.l.bf16 %v1164_v57  ;;  %v1135_v61 = vunpack.c.h.bf16 %v1164_v57  ;;  %v822_v1 = vld [vmem:[#allocation2 + $0x28] sm:$0xff]  ;;  %v1166_v7 = vld [vmem:[%s1550_s3 + $0x18] sm:$0xff]  }
 0x138   : > { %v835_v62 = vadd.f32 %v1106_v47, %v820_v58  ;;  %v836_v63 = vadd.f32 %v1106_v47, %v821_v59  ;;  %v1138_v5 = vunpack.c.l.bf16 %v1165_v0  ;;  %v1139_v6 = vunpack.c.h.bf16 %v1165_v0 }
 0x139   : > { %v855_v3 = vadd.f32 %v1130_v53, %v831_v48  ;;  %v856_v4 = vadd.f32 %v1131_v54, %v832_v49  ;;  %v857_v8 = vadd.f32 %v1134_v60, %v833_v55  ;;  %v858_v9 = vadd.f32 %v1135_v61, %v834_v56 }
 0x13a   : > { %v823_v2 = vld [vmem:[#allocation2 + $0x38] sm:$0xff]  ;;  %v837_v10 = vadd.f32 %v1106_v47, %v822_v1  ;;  %v859_v14 = vadd.f32 %v1138_v5, %v835_v62  ;;  %v860_v15 = vadd.f32 %v1139_v6, %v836_v63  ;;  %v1142_v18 = vunpack.c.l.bf16 %v1166_v7 }
 0x13b   : > { %v838_v11 = vadd.f32 %v1106_v47, %v823_v2  ;;  %v863_v12 = vmax.f32 %v855_v3, 0.0  ;;  %v864_v13 = vmax.f32 %v856_v4, 0.0  ;;  %v865_v16 = vmax.f32 %v857_v8, 0.0 }
 0x13c   : > { %v866_v17 = vmax.f32 %v858_v9, 0.0  ;;  %v1143_v19 = vunpack.c.h.bf16 %v1166_v7  ;;  %v867_v21 = vmax.f32 %v859_v14, 0.0  ;;  %v868_v22 = vmax.f32 %v860_v15, 0.0 }
 0x13d   : > { %v1147_v20 = vpack.c.bf16 %v864_v13, %v863_v12  ;;  %v861_v24 = vadd.f32 %v1142_v18, %v837_v10 }
 0x13e   : > { %v1152_v23 = vpack.c.bf16 %v866_v17, %v865_v16  ;;  %v862_v25 = vadd.f32 %v1143_v19, %v838_v11  ;;  %v1157_v26 = vpack.c.bf16 %v868_v22, %v867_v21 }
 0x13f   : > { %1148 = vst [vmem:[%s1551_s4] sm:$0xff] %v1147_v20   ;;  %v869_v27 = vmax.f32 %v861_v24, 0.0 }
 0x140   : > { %1167 = vst [vmem:[%s1551_s4 + $0x8] sm:$0xff] %v1152_v23   ;;  %v870_v28 = vmax.f32 %v862_v25, 0.0  ;;  %1168 = vst [vmem:[%s1551_s4 + $0x10] sm:$0xff] %v1157_v26  }
 0x142   : > { %v1162_v29 = vpack.c.bf16 %v870_v28, %v869_v27 }
 0x144   : > { %1169 = vst [vmem:[%s1551_s4 + $0x18] sm:$0xff] %v1162_v29  }
 0x145 PF: > { %s14_s19 = sadd.s32 1, %s1367_s19   ;;  %s1552_s15 = smov %s1355_s16 }
 0x146   : > { %p11_p12 = scmp.ge.s32.totalorder %s14_s19, 5   ;;  %s1553_s16 = smov %s1430_s23 }
 0x147   : > { %s1554_s17 = smov %s1363_s18  ;;  %s1555_s18 = smov %s1557_s20 }
 0x148   :  { %13 = sbr.rel (!%p11_p12) target bundleno = 3 (0x3), region = 120 }

// kernel: siamese_forward.30
= control target key start
LH: loop header
LB: loop body
LE: loop exit
PB: predicated region body
PF: predicated region fallthrough
CT: control target
= control target key end

     0   :  { %s1268_s12 = smov 0   ;;  %s1270_s13 = smov 0   ;;  %s1408_s0 = inlined_call_operand.vmem [shape: bf16[64,1152], index: 0, kind: input, shape index: {}]   ;;  %s1409_s1 = inlined_call_operand.vmem [shape: bf16[1152,128], index: 1, kind: input, shape index: {}]   ;;  %s1410_s2 = inlined_call_operand.vmem [shape: f32[1,128], index: 2, kind: input, shape index: {}]   ;;  %s1411_s3 = inlined_call_operand.vmem [shape: bf16[64,128], index: 3, kind: output, shape index: {}]  }
   0x1   :  { %s1272_s14 = smov 0   ;;  %s1274_s15 = smov 0  }
   0x2   :  { %s1276_s16 = smov 0  }
   0x3 LB: > { %s25_s17 = sadd.s32 1, %s1241_s15  ;;  %p48_p1 = scmp.ne.s32.totalorder %s1233_s13, %s1229_s12  ;;  %s1245_s16 = sphi %s1276_s16, %s13_s16   ;;  %s1241_s15 = sphi %s1274_s15, %s1415_s15   ;;  %s1237_s14 = sphi %s1272_s14, %s1414_s14   ;;  %s1233_s13 = sphi %s1270_s13, %s1413_s13   ;;  %s1229_s12 = sphi %s1268_s12, %s1412_s12  }
   0x4   : > { %p26_p0 = scmp.ge.s32.totalorder %s25_s17, 3  ;;  %p49_p2 = scmp.eq.s32.totalorder %s1245_s16, 0 }
   0x5   : > { %s41_s19 = sadd.s32 1, %s1233_s13  ;;  %p945_p5 = scmp.ge.s32.totalorder %s1245_s16, 3 }
   0x6   : > { %s1417_s17 = smov (%p26_p0, %s25_s17), 0  ;;  %p50_p3 = por %p49_p2, %p48_p1 }
   0x7   : > { %s37_s18 = ssub.s32 %s1241_s15, %s1417_s17  ;;  %162 = sbr.rel (%p945_p5) target bundleno = 26 (0x1a), region = 20 }
   0x8   : > { %p39_p4 = scmp.eq.s32.totalorder %s37_s18, 0 }
   0xa   : > { %s1303_s20 = scalar_select %p39_p4, %s1233_s13, %s41_s19  }
   0xc   : > { %165 = sbr.rel (!%p50_p3) target bundleno = 26 (0x1a), region = 24  ;;  %s167_s21 = sand.u32 (%p50_p3), 1, %s1233_s13  }
   0xd   : > { %s1016_s22 = smul.u32 (%p50_p3), 12, %s1241_s15 }
   0xe   : > { %s1124_s23 = smul.u32 (%p50_p3), 96, %s167_s21 }
   0xf   : > { %s1311_s26 = scalar_lea.vmem (%p50_p3), %s1408_s0, %s1016_s22 }
  0x10   : > { %v190_v0 = vld [vmem:[%s1311_s26] sm:$0xff] (%p50_p3)  ;;  %v194_v2 = vld [vmem:[%s1311_s26 + $0x48] sm:$0xff] (%p50_p3)  ;;  %s169_s27 = scalar_lea.vmem (%p50_p3), [#allocation3], %s1124_s23  ;;  %v198_v4 = vld [vmem:[%s1311_s26 + $0x90] sm:$0xff] (%p50_p3) }
  0x11   : > { %v192_v1 = vld [vmem:[%s1311_s26 + $0x24] sm:$0xff]  ;;  %191 = vst [vmem:[%s169_s27] sm:$0xff] %v190_v0  ;;  %195 = vst [vmem:[%s169_s27 + $0x18] sm:$0xff] %v194_v2  ;;  %v196_v3 = vld [vmem:[%s1311_s26 + $0x6c] sm:$0xff] }
  0x12   : > { %193 = vst [vmem:[%s169_s27 + $0xc] sm:$0xff] %v192_v1  ;;  %v200_v5 = vld [vmem:[%s1311_s26 + $0xb4] sm:$0xff]  ;;  %197 = vst [vmem:[%s169_s27 + $0x24] sm:$0xff] %v196_v3  ;;  %v204_v7 = vld [vmem:[%s1311_s26 + $0xfc] sm:$0xff] }
  0x13   : > { %199 = vst [vmem:[%s169_s27 + $0x30] sm:$0xff] %v198_v4  ;;  %201 = vst [vmem:[%s169_s27 + $0x3c] sm:$0xff] %v200_v5  ;;  %v202_v6 = vld [vmem:[%s1311_s26 + $0xd8] sm:$0xff]  ;;  %v947_v8 = vld [vmem:[%s1311_s26 + $0x8] sm:$0xf] }
  0x14   : > { %203 = vst [vmem:[%s169_s27 + $0x48] sm:$0xff] %v202_v6  ;;  %205 = vst [vmem:[%s169_s27 + $0x54] sm:$0xff] %v204_v7  ;;  %v949_v9 = vld [vmem:[%s1311_s26 + $0x2c] sm:$0xf]  ;;  %v951_v10 = vld [vmem:[%s1311_s26 + $0x50] sm:$0xf] }
  0x15   : > { %948 = vst [vmem:[%s169_s27 + $0x8] sm:$0xf] %v947_v8  ;;  %v953_v11 = vld [vmem:[%s1311_s26 + $0x74] sm:$0xf]  ;;  %950 = vst [vmem:[%s169_s27 + $0x14] sm:$0xf] %v949_v9 }
  0x16   : > { %952 = vst [vmem:[%s169_s27 + $0x20] sm:$0xf] %v951_v10  ;;  %954 = vst [vmem:[%s169_s27 + $0x2c] sm:$0xf] %v953_v11  ;;  %v955_v12 = vld [vmem:[%s1311_s26 + $0x98] sm:$0xf] }
  0x17   : > { %v957_v13 = vld [vmem:[%s1311_s26 + $0xbc] sm:$0xf]  ;;  %v959_v14 = vld [vmem:[%s1311_s26 + $0xe0] sm:$0xf]  ;;  %956 = vst [vmem:[%s169_s27 + $0x38] sm:$0xf] %v955_v12 }
  0x18   : > { %958 = vst [vmem:[%s169_s27 + $0x44] sm:$0xf] %v957_v13  ;;  %960 = vst [vmem:[%s169_s27 + $0x50] sm:$0xf] %v959_v14  ;;  %v961_v15 = vld [vmem:[%s1311_s26 + $0x104] sm:$0xf] }
  0x19   : > { %962 = vst [vmem:[%s169_s27 + $0x5c] sm:$0xf] %v961_v15 }
  0x1a PF: > { %p963_p6 = scmp.ge.s32.totalorder %s1245_s16, 1  ;;  %p246_p7 = scmp.lt.s32.totalorder %s1245_s16, 4 }
  0x1c   : > { %p247_p8 = pnand %p963_p6, %p246_p7 }
  0x1d   : > { %s253_s28 = sand.u32 (!%p247_p8), 1, %s1229_s12   ;;  %s292_s29 = smul.u32 (!%p247_p8), 48, %s1237_s14 }
  0x1e   : > { %250 = sbr.rel (%p247_p8) target bundleno = 322 (0x142), region = 54  ;;  %p965_p10 = scmp.ne.s32.totalorder (!%p247_p8), %s1237_s14, 0 }
  0x1f   : > { %s1125_s30 = smul.u32 (!%p247_p8), 96, %s253_s28  ;;  %p293_p9 = scmp.lt.s32.totalorder (!%p247_p8), %s292_s29, 143 }
  0x21   : > { %s1338_s8 = scalar_lea.vmem (!%p247_p8), [#allocation3], %s1125_s30 }
  0x23   : > { %s1419_s29 = smov (!%p293_p9, %s292_s29), 143  ;;  %317 = sbr.rel (%p965_p10) target bundleno = 45 (0x2d), region = 62 }
  0x24   : > { %s964_s4 = sshll.u32 %s1419_s29, 2 }
  0x25   : > { %s1336_s7 = scalar_lea.vmem %s1409_s1, %s964_s4 }
  0x28   : > { %v1247_v16 = vmov 0.0  }
  0x29   : > { %318 = vst [vmem:[#allocation2 + $0x30] sm:$0xff] %v1247_v16  ;;  %319 = vst [vmem:[#allocation2] sm:$0xff] %v1247_v16 }
  0x2a   : > { %320 = vst [vmem:[#allocation2 + $0x18] sm:$0xff] %v1247_v16  ;;  %321 = vst [vmem:[#allocation2 + $0x10] sm:$0xff] %v1247_v16 }
  0x2b   : > { %322 = vst [vmem:[#allocation2 + $0x8] sm:$0xff] %v1247_v16  ;;  %323 = vst [vmem:[#allocation2 + $0x20] sm:$0xff] %v1247_v16 }
  0x2c   : > { %324 = vst [vmem:[#allocation2 + $0x28] sm:$0xff] %v1247_v16  ;;  %325 = vst [vmem:[#allocation2 + $0x38] sm:$0xff] %v1247_v16 }
  0x2d PF: > { %v1167_v17 = vld [vmem:[%s1336_s7 + $0x78] sm:$0xff]   ;;  %v1170_v20 = vld [vmem:[%s1336_s7 + $0x70] sm:$0xff]   ;;  %v1173_v23 = vld [vmem:[%s1336_s7 + $0x68] sm:$0xff]   ;;  %p1002_p11 = scmp.ne.s32.totalorder %s1237_s14, 2 }
  0x2e   : > { %v1168_v18 = vld [vmem:[%s1336_s7 + $0x38] sm:$0xff]   ;;  %1048 = vmatprep.subr.bf16.mxu0 %v1167_v17  ;;  %v1171_v21 = vld [vmem:[%s1336_s7 + $0x30] sm:$0xff]   ;;  %v1174_v24 = vld [vmem:[%s1336_s7 + $0x28] sm:$0xff]  }
  0x2f   : > { %v1169_v19 = vld [vmem:[%s1336_s7 + $0xb8] sm:$0xff]   ;;  %1049 = vmatpush3.bf16.msra.mxu0 %v1168_v18  ;;  %v1172_v22 = vld [vmem:[%s1336_s7 + $0xb0] sm:$0xff]   ;;  %v1175_v25 = vld [vmem:[%s1336_s7 + $0xa8] sm:$0xff]  }
  0x30   : > { %1100 = vmatprep.subr.bf16.mxu1 %v1169_v19  ;;  %1050 = vmatprep.subr.bf16.mxu0 %v1170_v20  ;;  %v1176_v26 = vld [vmem:[%s1336_s7 + $0x60] sm:$0xff]   ;;  %v1179_v29 = vld [vmem:[%s1336_s7 + $0x58] sm:$0xff]   ;;  %v1182_v32 = vld [vmem:[%s1336_s7 + $0x50] sm:$0xff]  }
  0x31   : > { %1101 = vmatpush3.bf16.msra.mxu1 %v1169_v19  ;;  %v1177_v27 = vld [vmem:[%s1336_s7 + $0x20] sm:$0xff]   ;;  %v1181_v30 = vld [vmem:[%s1336_s7 + $0x98] sm:$0xff]   ;;  %v1184_v33 = vld [vmem:[%s1336_s7 + $0x90] sm:$0xff]  }
  0x32   : > { %1102 = vmatprep.subr.bf16.mxu1 %v1172_v22  ;;  %v1178_v28 = vld [vmem:[%s1336_s7 + $0xa0] sm:$0xff]   ;;  %v1180_v31 = vld [vmem:[%s1336_s7 + $0x18] sm:$0xff]   ;;  %v1183_v34 = vld [vmem:[%s1336_s7 + $0x10] sm:$0xff]  }
  0x33   : > { %1051 = vmatpush3.bf16.msra.mxu0 %v1171_v21  ;;  %v1185_v35 = vld [vmem:[%s1336_s7 + $0x48] sm:$0xff]   ;;  %v1188_v38 = vld [vmem:[%s1336_s7 + $0x40] sm:$0xff]   ;;  %v1203_v49 = vld [vmem:[%s1338_s8 + $0x50] ss:$12 sps:$4 sm:$0xff]  }
  0x34   : > { %1052 = vmatprep.subr.bf16.mxu0 %v1173_v23  ;;  %v1186_v36 = vld [vmem:[%s1336_s7 + $0x8] sm:$0xff]   ;;  %v1190_v39 = vld [vmem:[%s1336_s7 + $0x80] sm:$0xff]   ;;  %v1201_v50 = vld [vmem:[%s1338_s8 + $0x30] ss:$12 sps:$4 sm:$0xff]  }
  0x35   : > { %1103 = vmatpush3.bf16.msra.mxu1 %v1172_v22  ;;  %v1187_v37 = vld [vmem:[%s1336_s7 + $0x88] sm:$0xff]   ;;  %v1193_v40 = vld [vmem:[%s1338_s8 + $0x4] ss:$12 sps:$4 sm:$0xff]   ;;  %v1199_v48 = vld [vmem:[%s1338_s8 + $0x34] ss:$12 sps:$4 sm:$0xff]  }
  0x36   : > { %1104 = vmatprep.subr.bf16.mxu1 %v1175_v25  ;;  %v1194_v41 = vld [vmem:[%s1338_s8 + $0x8] ss:$12 sps:$4 sm:$0xff]   ;;  %v1189_v42 = vld [vmem:[%s1336_s7] sm:$0xff]   ;;  %638 = vmatprep.mubr.bf16.mxu0 %v1193_v40  ;;  %v1204_v51 = vld [vmem:[%s1338_s8 + $0x4c] ss:$12 sps:$4 sm:$0xff]  }
  0x37   : > { %1053 = vmatpush3.bf16.msra.mxu0 %v1174_v24  ;;  %1116 = vmatprep.mubr.bf16.mxu1 %v1194_v41  ;;  %v1191_v43 = vld [vmem:[%s1338_s8] ss:$12 sps:$4 sm:$0xff]   ;;  %v1196_v44 = vld [vmem:[%s1338_s8 + $0x1c] ss:$12 sps:$4 sm:$0xff]   ;;  %v1202_v46 = vld [vmem:[%s1338_s8 + $0x38] ss:$12 sps:$4 sm:$0xff]  }
  0x38   : > { %1054 = vmatprep.subr.bf16.mxu0 %v1176_v26  ;;  %v1195_v45 = vld [vmem:[%s1338_s8 + $0x20] ss:$12 sps:$4 sm:$0xff]   ;;  %v1198_v47 = vld [vmem:[%s1338_s8 + $0x18] ss:$12 sps:$4 sm:$0xff]   ;;  %v1206_v52 = vld [vmem:[%s1338_s8 + $0x48] ss:$12 sps:$4 sm:$0xff]  }
  0x39   : > { %1105 = vmatpush3.bf16.msra.mxu1 %v1175_v25  ;;  %v326_v58 = vld [vmem:[#allocation2 + $0x30] sm:$0xff]  ;;  %v327_v2 = vld [vmem:[#allocation2] sm:$0xff]  ;;  %v328_v9 = vld [vmem:[#allocation2 + $0x18] sm:$0xff] }
  0x3a   : > { %1106 = vmatprep.subr.bf16.mxu1 %v1178_v28  ;;  %v329_v16 = vld [vmem:[#allocation2 + $0x10] sm:$0xff]  ;;  %v330_v24 = vld [vmem:[#allocation2 + $0x8] sm:$0xff] }
  0x3b   : > { %1055 = vmatpush3.bf16.msra.mxu0 %v1177_v27 }
  0x3c   : > { %1056 = vmatprep.subr.bf16.mxu0 %v1179_v29 }
  0x3d   : > { %1107 = vmatpush3.bf16.msra.mxu1 %v1178_v28 }
  0x3e   : > { %1108 = vmatprep.subr.bf16.mxu1 %v1181_v30 }
  0x3f   : > { %1057 = vmatpush3.bf16.msra.mxu0 %v1180_v31  ;;  %v331_v31 = vld [vmem:[#allocation2 + $0x20] sm:$0xff] }
  0x40   : > { %1058 = vmatprep.subr.bf16.mxu0 %v1182_v32 }
  0x41   : > { %1109 = vmatpush3.bf16.msra.mxu1 %v1181_v30 }
  0x42   : > { %1110 = vmatprep.subr.bf16.mxu1 %v1184_v33 }
  0x43   : > { %1059 = vmatpush3.bf16.msra.mxu0 %v1183_v34 }
  0x44   : > { %1060 = vmatprep.subr.bf16.mxu0 %v1185_v35 }
  0x45   : > { %1111 = vmatpush3.bf16.msra.mxu1 %v1184_v33 }
  0x46   : > { %1112 = vmatprep.subr.bf16.mxu1 %v1187_v37 }
  0x47   : > { %1061 = vmatpush3.bf16.msra.mxu0 %v1186_v36  ;;  %v332_v36 = vld [vmem:[#allocation2 + $0x28] sm:$0xff] }
  0x48   : > { %1062 = vmatprep.subr.bf16.mxu0 %v1188_v38 }
  0x49   : > { %1113 = vmatpush3.bf16.msra.mxu1 %v1187_v37 }
  0x4a   : > { %1114 = vmatprep.subr.bf16.mxu1 %v1190_v39 }
  0x4b   : > { %1063 = vmatpush3.bf16.msra.mxu0 %v1189_v42  ;;  %v333_v42 = vld [vmem:[#allocation2 + $0x38] sm:$0xff] }
  0x4d   : > { %1115 = vmatpush3.bf16.msra.mxu1 %v1190_v39 }
  0x4e   : > { %639 = vmatmul.mubr.bf16.vlgmr.msra.gmra.mxu0 %v1191_v43 }
  0x4f   : > { %646 = vmatprep.mubr.bf16.mxu0 %v1196_v44 }
  0x50   : > { %1117 = vmatmul.mubr.bf16.vlgmr.msra.gmra.mxu1 %v1195_v45 }
  0x51   : > { %1120 = vmatprep.mubr.bf16.mxu1 %v1202_v46 }
  0x56   : > { %647 = vmatmul.mubr.bf16.gmra.mxu0 %v1198_v47 }
  0x57   : > { %654 = vmatprep.mubr.bf16.mxu0 %v1199_v48 }
  0x58   : > { %1121 = vmatmul.mubr.bf16.gmra.mxu1 %v1203_v49 }
  0x5e   : > { %655 = vmatmul.mubr.bf16.gmra.mxu0 %v1201_v50 }
  0x5f   : > { %662 = vmatprep.mubr.bf16.mxu0 %v1204_v51 }
  0x66   : > { %663 = vmatmul.mubr.bf16.gmra.mxu0 %v1206_v52 }
 0x10e   : > { %v1064_v53 = vpop.f32.mrf.mxu0 }
 0x110   : > { %v1065_v54 = vpop.f32.mrf.mxu0  ;;  %v1118_v55 = vpop.f32.mrf.mxu1 }
 0x111   : > { %v1066_v56 = vadd.f32 %v1065_v54, %v1064_v53 }
 0x112   : > { %v1067_v57 = vpop.f32.mrf.mxu0  ;;  %v705_v59 = vpop.f32.mrf.mxu1 }
 0x113   : > { %v706_v60 = vadd.f32 %v1066_v56, %v705_v59 }
 0x114   : > { %v1068_v61 = vpop.f32.mrf.mxu0  ;;  %v1119_v62 = vpop.f32.mrf.mxu1 }
 0x115   : > { %v736_v63 = vadd.f32 %v706_v60, %v326_v58  ;;  %v1069_v0 = vadd.f32 %v1068_v61, %v1067_v57 }
 0x116   : > { %v1070_v1 = vpop.f32.mrf.mxu0  ;;  %v708_v3 = vpop.f32.mrf.mxu1 }
 0x117   : > { %744 = vst [vmem:[#allocation2 + $0x30] sm:$0xff] %v736_v63  ;;  %v709_v4 = vadd.f32 %v1069_v0, %v708_v3 }
 0x118   : > { %v1071_v5 = vpop.f32.mrf.mxu0  ;;  %v1122_v6 = vpop.f32.mrf.mxu1 }
 0x119   : > { %v737_v7 = vadd.f32 %v709_v4, %v327_v2  ;;  %v1072_v8 = vadd.f32 %v1071_v5, %v1070_v1 }
 0x11a   : > { %v1073_v10 = vpop.f32.mrf.mxu0  ;;  %v721_v13 = vpop.f32.mrf.mxu1 }
 0x11b   : > { %745 = vst [vmem:[#allocation2] sm:$0xff] %v737_v7  ;;  %v714_v11 = vadd.f32 %v1118_v55, %v1072_v8 }
 0x11c   : > { %v1074_v12 = vpop.f32.mrf.mxu0  ;;  %v1123_v20 = vpop.f32.mrf.mxu1 }
 0x11d   : > { %v738_v14 = vadd.f32 %v714_v11, %v328_v9  ;;  %v1075_v15 = vadd.f32 %v1074_v12, %v1073_v10 }
 0x11e   : > { %v1076_v17 = vpop.f32.mrf.mxu0  ;;  %v724_v27 = vpop.f32.mrf.mxu1 }
 0x11f   : > { %746 = vst [vmem:[#allocation2 + $0x18] sm:$0xff] %v738_v14  ;;  %v717_v18 = vadd.f32 %v1119_v62, %v1075_v15 }
 0x120   : > { %v1077_v19 = vpop.f32.mrf.mxu0 }
 0x121   : > { %v739_v21 = vadd.f32 %v717_v18, %v329_v16  ;;  %v1078_v22 = vadd.f32 %v1077_v19, %v1076_v17 }
 0x122   : > { %v1079_v23 = vpop.f32.mrf.mxu0 }
 0x123   : > { %747 = vst [vmem:[#allocation2 + $0x10] sm:$0xff] %v739_v21  ;;  %v722_v25 = vadd.f32 %v1078_v22, %v721_v13 }
 0x124   : > { %v1080_v26 = vpop.f32.mrf.mxu0 }
 0x125   : > { %v740_v28 = vadd.f32 %v722_v25, %v330_v24  ;;  %v1081_v29 = vadd.f32 %v1080_v26, %v1079_v23 }
 0x126   : > { %v1082_v30 = vpop.f32.mrf.mxu0 }
 0x127   : > { %748 = vst [vmem:[#allocation2 + $0x8] sm:$0xff] %v740_v28  ;;  %v725_v32 = vadd.f32 %v1081_v29, %v724_v27 }
 0x128   : > { %v1083_v33 = vpop.f32.mrf.mxu0 }
 0x129   : > { %v741_v34 = vadd.f32 %v725_v32, %v331_v31  ;;  %v1084_v35 = vadd.f32 %v1083_v33, %v1082_v30 }
 0x12a   : > { %v1085_v37 = vpop.f32.mrf.mxu0 }
 0x12b   : > { %749 = vst [vmem:[#allocation2 + $0x20] sm:$0xff] %v741_v34  ;;  %v730_v38 = vadd.f32 %v1122_v6, %v1084_v35 }
 0x12c   : > { %v1086_v39 = vpop.f32.mrf.mxu0 }
 0x12d   : > { %v742_v40 = vadd.f32 %v730_v38, %v332_v36  ;;  %v1087_v41 = vadd.f32 %v1086_v39, %v1085_v37 }
 0x12f   : > { %750 = vst [vmem:[#allocation2 + $0x28] sm:$0xff] %v742_v40  ;;  %v733_v43 = vadd.f32 %v1123_v20, %v1087_v41  ;;  %755 = sbr.rel (%p1002_p11) target bundleno = 322 (0x142), region = 66 }
 0x131   : > { %v743_v44 = vadd.f32 %v733_v43, %v333_v42 }
 0x133   : > { %751 = vst [vmem:[#allocation2 + $0x38] sm:$0xff] %v743_v44 }
 0x134   : > { %v756_v45 = vld [vmem:[#allocation2 + $0x30] sm:$0xff]  ;;  %v757_v46 = vld [vmem:[#allocation2] sm:$0xff]  ;;  %v758_v50 = vld [vmem:[#allocation2 + $0x18] sm:$0xff] }
 0x135   : > { %v1003_v47 = vld [vmem:[%s1410_s2] ss:$0 sm:$0xff]  ;;  %v759_v51 = vld [vmem:[#allocation2 + $0x10] sm:$0xff]  ;;  %v760_v52 = vld [vmem:[#allocation2 + $0x8] sm:$0xff] }
 0x136   : > { %v771_v48 = vadd.f32 %v1003_v47, %v756_v45  ;;  %v772_v49 = vadd.f32 %v1003_v47, %v757_v46  ;;  %v773_v53 = vadd.f32 %v1003_v47, %v758_v50  ;;  %v774_v54 = vadd.f32 %v1003_v47, %v759_v51  ;;  %v761_v55 = vld [vmem:[#allocation2 + $0x20] sm:$0xff]  ;;  %v762_v57 = vld [vmem:[#allocation2 + $0x28] sm:$0xff] }
 0x137   : > { %v775_v56 = vadd.f32 %v1003_v47, %v760_v52  ;;  %v776_v61 = vadd.f32 %v1003_v47, %v761_v55  ;;  %v777_v62 = vadd.f32 %v1003_v47, %v762_v57 }
 0x138   : > { %v779_v59 = vmax.f32 %v771_v48, 0.0  ;;  %v780_v60 = vmax.f32 %v772_v49, 0.0  ;;  %v781_v63 = vmax.f32 %v773_v53, 0.0  ;;  %v782_v0 = vmax.f32 %v774_v54, 0.0 }
 0x139   : > { %v783_v1 = vmax.f32 %v775_v56, 0.0  ;;  %v784_v4 = vmax.f32 %v776_v61, 0.0  ;;  %v785_v5 = vmax.f32 %v777_v62, 0.0 }
 0x13a   : > { %v763_v58 = vld [vmem:[#allocation2 + $0x38] sm:$0xff]  ;;  %v1028_v3 = vpack.c.bf16 %v780_v60, %v779_v59  ;;  %v1033_v6 = vpack.c.bf16 %v782_v0, %v781_v63 }
 0x13b   : > { %v778_v2 = vadd.f32 %v1003_v47, %v763_v58  ;;  %v1038_v8 = vpack.c.bf16 %v784_v4, %v783_v1 }
 0x13c   : > { %1029 = vst [vmem:[%s1411_s3] sm:$0xff] %v1028_v3   ;;  %1045 = vst [vmem:[%s1411_s3 + $0x8] sm:$0xff] %v1033_v6  }
 0x13d   : > { %v786_v7 = vmax.f32 %v778_v2, 0.0  ;;  %1046 = vst [vmem:[%s1411_s3 + $0x10] sm:$0xff] %v1038_v8  }
 0x13f   : > { %v1043_v9 = vpack.c.bf16 %v786_v7, %v785_v5 }
 0x141   : > { %1047 = vst [vmem:[%s1411_s3 + $0x18] sm:$0xff] %v1043_v9  }
 0x142 PF: > { %s13_s16 = sadd.s32 1, %s1245_s16   ;;  %s1412_s12 = smov %s1233_s13 }
 0x143   : > { %p10_p12 = scmp.ge.s32.totalorder %s13_s16, 5   ;;  %s1413_s13 = smov %s1303_s20 }
 0x144   : > { %s1414_s14 = smov %s1241_s15  ;;  %s1415_s15 = smov %s1417_s17 }
 0x145   :  { %12 = sbr.rel (!%p10_p12) target bundleno = 3 (0x3), region = 113 }

// kernel: siamese_forward.33
= control target key start
LH: loop header
LB: loop body
LE: loop exit
PB: predicated region body
PF: predicated region fallthrough
CT: control target
= control target key end

     0   :  { %s1148_s12 = smov 0   ;;  %s1150_s13 = smov 0   ;;  %s1279_s0 = inlined_call_operand.vmem [shape: bf16[16,1152], index: 0, kind: input, shape index: {}]   ;;  %s1280_s1 = inlined_call_operand.vmem [shape: bf16[1152,256], index: 1, kind: input, shape index: {}]   ;;  %s1281_s2 = inlined_call_operand.vmem [shape: f32[1,256], index: 2, kind: input, shape index: {}]   ;;  %s1282_s3 = inlined_call_operand.vmem [shape: bf16[16,256], index: 3, kind: output, shape index: {}]  }
   0x1   :  { %s1152_s14 = smov 0   ;;  %s1154_s15 = smov 0  }
   0x2   :  { %s1156_s16 = smov 0  }
   0x3 LB: > { %s25_s17 = sadd.s32 1, %s1120_s15  ;;  %p48_p1 = scmp.ne.s32.totalorder %s1112_s13, %s1108_s12  ;;  %s1124_s16 = sphi %s1156_s16, %s13_s16   ;;  %s1120_s15 = sphi %s1154_s15, %s1286_s15   ;;  %s1116_s14 = sphi %s1152_s14, %s1285_s14   ;;  %s1112_s13 = sphi %s1150_s13, %s1284_s13   ;;  %s1108_s12 = sphi %s1148_s12, %s1283_s12  }
   0x4   : > { %p26_p0 = scmp.ge.s32.totalorder %s25_s17, 3  ;;  %p49_p2 = scmp.eq.s32.totalorder %s1124_s16, 0 }
   0x5   : > { %s41_s19 = sadd.s32 1, %s1112_s13  ;;  %p894_p5 = scmp.ge.s32.totalorder %s1124_s16, 3 }
   0x6   : > { %s1288_s17 = smov (%p26_p0, %s25_s17), 0  ;;  %p50_p3 = por %p49_p2, %p48_p1 }
   0x7   : > { %s37_s18 = ssub.s32 %s1120_s15, %s1288_s17  ;;  %164 = sbr.rel (%p894_p5) target bundleno = 19 (0x13), region = 20 }
   0x8   : > { %p39_p4 = scmp.eq.s32.totalorder %s37_s18, 0 }
   0xa   : > { %s1183_s20 = scalar_select %p39_p4, %s1112_s13, %s41_s19  }
   0xc   : > { %167 = sbr.rel (!%p50_p3) target bundleno = 19 (0x13), region = 24  ;;  %s169_s21 = sand.u32 (%p50_p3), 1, %s1112_s13  }
   0xd   : > { %s962_s22 = smul.u32 (%p50_p3), 12, %s1120_s15 }
   0xe   : > { %s966_s23 = smul.u32 (%p50_p3), 24, %s169_s21 }
   0xf   : > { %s177_s26 = scalar_lea.vmem (%p50_p3), %s1279_s0, %s962_s22 }
  0x10   : > { %v192_v0 = vld [vmem:[%s177_s26] sm:$0xff] (%p50_p3)  ;;  %v896_v2 = vld [vmem:[%s177_s26 + $0x8] sm:$0xf] (%p50_p3)  ;;  %s171_s27 = scalar_lea.vmem (%p50_p3), [#allocation3], %s966_s23  ;;  %v898_v3 = vld [vmem:[%s177_s26 + $0x2c] sm:$0xf] (%p50_p3) }
  0x11   : > { %v194_v1 = vld [vmem:[%s177_s26 + $0x24] sm:$0xff]  ;;  %193 = vst [vmem:[%s171_s27] sm:$0xff] %v192_v0  ;;  %897 = vst [vmem:[%s171_s27 + $0x8] sm:$0xf] %v896_v2 }
  0x12   : > { %195 = vst [vmem:[%s171_s27 + $0xc] sm:$0xff] %v194_v1  ;;  %899 = vst [vmem:[%s171_s27 + $0x14] sm:$0xf] %v898_v3 }
  0x13 PF: > { %p900_p6 = scmp.ge.s32.totalorder %s1124_s16, 1  ;;  %p227_p7 = scmp.lt.s32.totalorder %s1124_s16, 4 }
  0x15   : > { %p228_p8 = pnand %p900_p6, %p227_p7 }
  0x16   : > { %s234_s28 = sand.u32 (!%p228_p8), 1, %s1108_s12   ;;  %s278_s29 = smul.u32 (!%p228_p8), 48, %s1116_s14 }
  0x17   : > { %231 = sbr.rel (%p228_p8) target bundleno = 320 (0x140), region = 54  ;;  %p903_p10 = scmp.ne.s32.totalorder (!%p228_p8), %s1116_s14, 0 }
  0x18   : > { %s967_s30 = smul.u32 (!%p228_p8), 24, %s234_s28  ;;  %p280_p9 = scmp.lt.s32.totalorder (!%p228_p8), %s278_s29, 143 }
  0x1a   : > { %s1200_s8 = scalar_lea.vmem (!%p228_p8), [#allocation3], %s967_s30 }
  0x1c   : > { %s1290_s29 = smov (!%p280_p9, %s278_s29), 143  ;;  %311 = sbr.rel (%p903_p10) target bundleno = 36 (0x24), region = 62 }
  0x1d   : > { %s963_s4 = sshll.u32 %s1290_s29, 3 }
  0x1e   : > { %s1198_s7 = scalar_lea.vmem %s1280_s1, %s963_s4 }
  0x21   : > { %v1126_v4 = vmov 0.0  }
  0x22   : > { %312 = vst [vmem:[#allocation2 + $0x10] sm:$0xff] %v1126_v4  ;;  %313 = vst [vmem:[#allocation2] sm:$0xff] %v1126_v4 }
  0x23   : > { %314 = vst [vmem:[#allocation2 + $0x18] sm:$0xff] %v1126_v4  ;;  %315 = vst [vmem:[#allocation2 + $0x8] sm:$0xff] %v1126_v4 }
  0x24 PF: > { %v1010_v5 = vld [vmem:[%s1198_s7 + $0x74] ss:$8 sps:$4 sm:$0xff]   ;;  %v1012_v6 = vld [vmem:[%s1198_s7 + $0x70] ss:$8 sps:$4 sm:$0xff]   ;;  %v1127_v7 = vmov 0   ;;  %p955_p11 = scmp.ne.s32.totalorder %s1116_s14, 2 }
  0x25   : > { %703 = vmatprep.mubr.bf16.mxu1 %v1127_v7  ;;  %628 = vmatprep.subr.bf16.mxu0 %v1010_v5  ;;  %v1013_v8 = vld [vmem:[%s1198_s7 + $0x64] ss:$8 sps:$4 sm:$0xff]   ;;  %v1015_v9 = vld [vmem:[%s1198_s7 + $0x60] ss:$8 sps:$4 sm:$0xff]   ;;  %v1016_v10 = vld [vmem:[%s1198_s7 + $0x54] ss:$8 sps:$4 sm:$0xff]  }
  0x26   : > { %629 = vmatpush1.bf16.msra.mxu0 %v1012_v6  ;;  %v1018_v11 = vld [vmem:[%s1198_s7 + $0x50] ss:$8 sps:$4 sm:$0xff]   ;;  %v1019_v12 = vld [vmem:[%s1198_s7 + $0x44] ss:$8 sps:$4 sm:$0xff]   ;;  %v1031_v13 = vld [vmem:[%s1198_s7 + $0x174] ss:$8 sps:$4 sm:$0xff]  }
  0x27   : > { %630 = vmatprep.subr.bf16.mxu0 %v1013_v8  ;;  %v1033_v14 = vld [vmem:[%s1198_s7 + $0x170] ss:$8 sps:$4 sm:$0xff]   ;;  %v1021_v15 = vld [vmem:[%s1198_s7 + $0x40] ss:$8 sps:$4 sm:$0xff]   ;;  %v1022_v16 = vld [vmem:[%s1198_s7 + $0x34] ss:$8 sps:$4 sm:$0xff]   ;;  %671 = vmatprep.subr.bf16.mxu1 %v1031_v13 }
  0x28   : > { %v1037_v17 = vld [vmem:[%s1198_s7 + $0x164] ss:$8 sps:$4 sm:$0xff]   ;;  %672 = vmatpush1.bf16.msra.mxu1 %v1033_v14  ;;  %v1039_v18 = vld [vmem:[%s1198_s7 + $0x160] ss:$8 sps:$4 sm:$0xff]   ;;  %v1024_v19 = vld [vmem:[%s1198_s7 + $0x30] ss:$8 sps:$4 sm:$0xff]  }
  0x29   : > { %673 = vmatprep.subr.bf16.mxu1 %v1037_v17  ;;  %v1043_v20 = vld [vmem:[%s1198_s7 + $0x154] ss:$8 sps:$4 sm:$0xff]   ;;  %v1025_v21 = vld [vmem:[%s1198_s7 + $0x24] ss:$8 sps:$4 sm:$0xff]   ;;  %v1045_v22 = vld [vmem:[%s1198_s7 + $0x150] ss:$8 sps:$4 sm:$0xff]  }
  0x2a   : > { %631 = vmatpush1.bf16.msra.mxu0 %v1015_v9  ;;  %v1049_v23 = vld [vmem:[%s1198_s7 + $0x144] ss:$8 sps:$4 sm:$0xff]   ;;  %v1027_v24 = vld [vmem:[%s1198_s7 + $0x20] ss:$8 sps:$4 sm:$0xff]   ;;  %v1028_v25 = vld [vmem:[%s1198_s7 + $0x14] ss:$8 sps:$4 sm:$0xff]  }
  0x2b   : > { %632 = vmatprep.subr.bf16.mxu0 %v1016_v10  ;;  %v1051_v26 = vld [vmem:[%s1198_s7 + $0x140] ss:$8 sps:$4 sm:$0xff]   ;;  %v1055_v27 = vld [vmem:[%s1198_s7 + $0x134] ss:$8 sps:$4 sm:$0xff]   ;;  %v1030_v28 = vld [vmem:[%s1198_s7 + $0x10] ss:$8 sps:$4 sm:$0xff]  }
  0x2c   : > { %674 = vmatpush1.bf16.msra.mxu1 %v1039_v18  ;;  %v1034_v29 = vld [vmem:[%s1198_s7 + $0x4] ss:$8 sps:$4 sm:$0xff]   ;;  %v1057_v30 = vld [vmem:[%s1198_s7 + $0x130] ss:$8 sps:$4 sm:$0xff]   ;;  %v1036_v32 = vld [vmem:[%s1198_s7] ss:$8 sps:$4 sm:$0xff]  }
  0x2d   : > { %675 = vmatprep.subr.bf16.mxu1 %v1043_v20  ;;  %v1061_v31 = vld [vmem:[%s1198_s7 + $0x124] ss:$8 sps:$4 sm:$0xff]   ;;  %v1040_v33 = vld [vmem:[%s1198_s7 + $0xf4] ss:$8 sps:$4 sm:$0xff]   ;;  %v1063_v34 = vld [vmem:[%s1198_s7 + $0x120] ss:$8 sps:$4 sm:$0xff]  }
  0x2e   : > { %633 = vmatpush1.bf16.msra.mxu0 %v1018_v11  ;;  %v1067_v35 = vld [vmem:[%s1198_s7 + $0x114] ss:$8 sps:$4 sm:$0xff]   ;;  %v1042_v36 = vld [vmem:[%s1198_s7 + $0xf0] ss:$8 sps:$4 sm:$0xff]   ;;  %v1046_v37 = vld [vmem:[%s1198_s7 + $0xe4] ss:$8 sps:$4 sm:$0xff]  }
  0x2f   : > { %634 = vmatprep.subr.bf16.mxu0 %v1019_v12  ;;  %v1069_v38 = vld [vmem:[%s1198_s7 + $0x110] ss:$8 sps:$4 sm:$0xff]   ;;  %v1073_v39 = vld [vmem:[%s1198_s7 + $0x104] ss:$8 sps:$4 sm:$0xff]   ;;  %v1048_v41 = vld [vmem:[%s1198_s7 + $0xe0] ss:$8 sps:$4 sm:$0xff]  }
  0x30   : > { %676 = vmatpush1.bf16.msra.mxu1 %v1045_v22  ;;  %v1085_v40 = vld [vmem:[%s1200_s8 + $0x4] ss:$12 sps:$4 sm:$0xff]   ;;  %v1079_v46 = vld [vmem:[%s1200_s8 + $0x8] ss:$12 sps:$4 sm:$0xff]   ;;  %v1083_v56 = vld [vmem:[%s1200_s8] ss:$12 sps:$4 sm:$0xff]  }
  0x31   : > { %677 = vmatprep.subr.bf16.mxu1 %v1049_v23  ;;  %v1052_v42 = vld [vmem:[%s1198_s7 + $0xd4] ss:$8 sps:$4 sm:$0xff]   ;;  %660 = vmatprep.mubr.bf16.mxu0 %v1085_v40  ;;  %v1075_v43 = vld [vmem:[%s1198_s7 + $0x100] ss:$8 sps:$4 sm:$0xff]   ;;  %v1054_v44 = vld [vmem:[%s1198_s7 + $0xd0] ss:$8 sps:$4 sm:$0xff]  }
  0x32   : > { %635 = vmatpush1.bf16.msra.mxu0 %v1021_v15  ;;  %v1058_v45 = vld [vmem:[%s1198_s7 + $0xc4] ss:$8 sps:$4 sm:$0xff]   ;;  %v1060_v47 = vld [vmem:[%s1198_s7 + $0xc0] ss:$8 sps:$4 sm:$0xff]   ;;  %v1064_v48 = vld [vmem:[%s1198_s7 + $0xb4] ss:$8 sps:$4 sm:$0xff]  }
  0x33   : > { %636 = vmatprep.subr.bf16.mxu0 %v1022_v16  ;;  %v1066_v49 = vld [vmem:[%s1198_s7 + $0xb0] ss:$8 sps:$4 sm:$0xff]   ;;  %v1070_v50 = vld [vmem:[%s1198_s7 + $0xa4] ss:$8 sps:$4 sm:$0xff]   ;;  %v1072_v51 = vld [vmem:[%s1198_s7 + $0xa0] ss:$8 sps:$4 sm:$0xff]  }
  0x34   : > { %678 = vmatpush1.bf16.msra.mxu1 %v1051_v26  ;;  %v1076_v52 = vld [vmem:[%s1198_s7 + $0x94] ss:$8 sps:$4 sm:$0xff]   ;;  %v1078_v53 = vld [vmem:[%s1198_s7 + $0x90] ss:$8 sps:$4 sm:$0xff]   ;;  %v1080_v54 = vld [vmem:[%s1198_s7 + $0x84] ss:$8 sps:$4 sm:$0xff]  }
  0x35   : > { %679 = vmatprep.subr.bf16.mxu1 %v1055_v27  ;;  %v1082_v55 = vld [vmem:[%s1198_s7 + $0x80] ss:$8 sps:$4 sm:$0xff]   ;;  %v316_v59 = vld [vmem:[#allocation2 + $0x10] sm:$0xff]  ;;  %v318_v3 = vld [vmem:[#allocation2 + $0x18] sm:$0xff] }
  0x36   : > { %637 = vmatpush1.bf16.msra.mxu0 %v1024_v19  ;;  %v317_v63 = vld [vmem:[#allocation2] sm:$0xff]  ;;  %v319_v8 = vld [vmem:[#allocation2 + $0x8] sm:$0xff] }
  0x37   : > { %638 = vmatprep.subr.bf16.mxu0 %v1025_v21 }
  0x38   : > { %680 = vmatpush1.bf16.msra.mxu1 %v1057_v30 }
  0x39   : > { %681 = vmatprep.subr.bf16.mxu1 %v1061_v31 }
  0x3a   : > { %639 = vmatpush1.bf16.msra.mxu0 %v1027_v24 }
  0x3b   : > { %640 = vmatprep.subr.bf16.mxu0 %v1028_v25 }
  0x3c   : > { %682 = vmatpush1.bf16.msra.mxu1 %v1063_v34 }
  0x3d   : > { %683 = vmatprep.subr.bf16.mxu1 %v1067_v35 }
  0x3e   : > { %641 = vmatpush1.bf16.msra.mxu0 %v1030_v28 }
  0x3f   : > { %642 = vmatprep.subr.bf16.mxu0 %v1034_v29 }
  0x40   : > { %684 = vmatpush1.bf16.msra.mxu1 %v1069_v38 }
  0x41   : > { %685 = vmatprep.subr.bf16.mxu1 %v1073_v39 }
  0x42   : > { %643 = vmatpush1.bf16.msra.mxu0 %v1036_v32 }
  0x43   : > { %644 = vmatprep.subr.bf16.mxu0 %v1040_v33 }
  0x44   : > { %686 = vmatpush1.bf16.msra.mxu1 %v1075_v43 }
  0x46   : > { %645 = vmatpush2.bf16.msra.mxu0 %v1042_v36 }
  0x47   : > { %646 = vmatprep.subr.bf16.mxu0 %v1046_v37  ;;  %704 = vmatmul.mubr.bf16.vlgmr.msra.gmra.mxu1 %v1079_v46 }
  0x4a   : > { %647 = vmatpush2.bf16.msra.mxu0 %v1048_v41 }
  0x4b   : > { %648 = vmatprep.subr.bf16.mxu0 %v1052_v42 }
  0x4e   : > { %649 = vmatpush2.bf16.msra.mxu0 %v1054_v44 }
  0x4f   : > { %650 = vmatprep.subr.bf16.mxu0 %v1058_v45 }
  0x52   : > { %651 = vmatpush2.bf16.msra.mxu0 %v1060_v47 }
  0x53   : > { %652 = vmatprep.subr.bf16.mxu0 %v1064_v48 }
  0x56   : > { %653 = vmatpush2.bf16.msra.mxu0 %v1066_v49 }
  0x57   : > { %654 = vmatprep.subr.bf16.mxu0 %v1070_v50 }
  0x5a   : > { %655 = vmatpush2.bf16.msra.mxu0 %v1072_v51 }
  0x5b   : > { %656 = vmatprep.subr.bf16.mxu0 %v1076_v52 }
  0x5e   : > { %657 = vmatpush2.bf16.msra.mxu0 %v1078_v53 }
  0x5f   : > { %658 = vmatprep.subr.bf16.mxu0 %v1080_v54 }
  0x62   : > { %659 = vmatpush2.bf16.msra.mxu0 %v1082_v55 }
  0x65   : > { %661 = vmatmul.mubr.bf16.vlgmr.msra.gmra.mxu0 %v1083_v56 }
 0x107   : > { %v705_v57 = vpop.f32.mrf.mxu1 }
 0x109   : > { %v707_v58 = vpop.f32.mrf.mxu1 }
 0x10b   : > { %v709_v62 = vpop.f32.mrf.mxu1 }
 0x10d   : > { %v711_v7 = vpop.f32.mrf.mxu1 }
 0x125   : > { %v662_v60 = vpop.f32.mrf.mxu0 }
 0x126   : > { %v706_v61 = vadd.f32 %v705_v57, %v662_v60 }
 0x127   : > { %v664_v0 = vpop.f32.mrf.mxu0 }
 0x128   : > { %v714_v1 = vadd.f32 %v706_v61, %v316_v59  ;;  %v708_v2 = vadd.f32 %v707_v58, %v664_v0 }
 0x129   : > { %v666_v4 = vpop.f32.mrf.mxu0 }
 0x12a   : > { %718 = vst [vmem:[#allocation2 + $0x10] sm:$0xff] %v714_v1  ;;  %v715_v5 = vadd.f32 %v708_v2, %v317_v63  ;;  %v710_v6 = vadd.f32 %v709_v62, %v666_v4 }
 0x12b   : > { %v668_v9 = vpop.f32.mrf.mxu0 }
 0x12c   : > { %719 = vst [vmem:[#allocation2] sm:$0xff] %v715_v5  ;;  %v716_v10 = vadd.f32 %v710_v6, %v318_v3  ;;  %v712_v11 = vadd.f32 %v711_v7, %v668_v9  ;;  %725 = sbr.rel (%p955_p11) target bundleno = 320 (0x140), region = 66 }
 0x12e   : > { %720 = vst [vmem:[#allocation2 + $0x18] sm:$0xff] %v716_v10  ;;  %v717_v12 = vadd.f32 %v712_v11, %v319_v8 }
 0x130   : > { %721 = vst [vmem:[#allocation2 + $0x8] sm:$0xff] %v717_v12 }
 0x131   : > { %v732_v13 = vlaneseq  ;;  %v730_v15 = vld [vmem:[%s1281_s2] sm:$0x3]  ;;  %v726_v16 = vld [vmem:[#allocation2 + $0x10] sm:$0xff] }
 0x133   : > { %v733_v14 = vshrl.u32 %v732_v13, 7  ;;  %v727_v19 = vld [vmem:[#allocation2] sm:$0xff] }
 0x135   : > { %v734_v17 = vsub.s32 0, %v733_v14  ;;  %v738_v18 = vsub.s32 1, %v733_v14  ;;  %v728_v20 = vld [vmem:[#allocation2 + $0x18] sm:$0xff] }
 0x137   : > { %v729_v21 = vld [vmem:[#allocation2 + $0x8] sm:$0xff]  ;;  %v735_v22 = vrot.slane %v730_v15, %v734_v17  ;;  %v739_v23 = vrot.slane %v730_v15, %v738_v18 }
 0x139   : > { %v742_v24 = vadd.f32 %v735_v22, %v726_v16  ;;  %v743_v25 = vadd.f32 %v739_v23, %v727_v19  ;;  %v744_v26 = vadd.f32 %v735_v22, %v728_v20  ;;  %v745_v27 = vadd.f32 %v739_v23, %v729_v21 }
 0x13b   : > { %v746_v28 = vmax.f32 %v742_v24, 0.0  ;;  %v747_v29 = vmax.f32 %v743_v25, 0.0  ;;  %v748_v30 = vmax.f32 %v744_v26, 0.0  ;;  %v749_v31 = vmax.f32 %v745_v27, 0.0 }
 0x13d   : > { %v964_v32 = vpack.c.bf16 %v747_v29, %v746_v28  ;;  %v965_v33 = vpack.c.bf16 %v749_v31, %v748_v30 }
 0x13f   : > { %762 = vst [vmem:[%s1282_s3] sm:$0xff] %v964_v32  ;;  %763 = vst [vmem:[%s1282_s3 + $0x8] sm:$0xff] %v965_v33 }
 0x140 PF: > { %s13_s16 = sadd.s32 1, %s1124_s16   ;;  %s1283_s12 = smov %s1112_s13 }
 0x141   : > { %p10_p12 = scmp.ge.s32.totalorder %s13_s16, 5   ;;  %s1284_s13 = smov %s1183_s20 }
 0x142   : > { %s1285_s14 = smov %s1120_s15  ;;  %s1286_s15 = smov %s1288_s17 }
 0x143   :  { %12 = sbr.rel (!%p10_p12) target bundleno = 3 (0x3), region = 113 }

// kernel: siamese_forward.32
= control target key start
LH: loop header
LB: loop body
LE: loop exit
PB: predicated region body
PF: predicated region fallthrough
CT: control target
= control target key end

     0   :  { %v270_v1 = vmov 0   ;;  %v191_v18 = vlaneseq  ;;  %s351_s1 = inlined_call_operand.vmem [shape: bf16[128,256], index: 1, kind: input, shape index: {}]   ;;  %s352_s0 = inlined_call_operand.vmem [shape: bf16[16,128], index: 0, kind: input, shape index: {}]   ;;  %s353_s2 = inlined_call_operand.vmem [shape: f32[1,256], index: 2, kind: input, shape index: {}]   ;;  %s354_s3 = inlined_call_operand.vmem [shape: bf16[16,256], index: 3, kind: output, shape index: {}]  }
   0x1   :  { %v245_v0 = vld [vmem:[%s351_s1 + $0x74] ss:$8 sps:$4 sm:$0xff]   ;;  %163 = vmatprep.mubr.bf16.mxu0 %v270_v1  ;;  %v247_v2 = vld [vmem:[%s351_s1 + $0x70] ss:$8 sps:$4 sm:$0xff]   ;;  %v248_v3 = vld [vmem:[%s351_s1 + $0x64] ss:$8 sps:$4 sm:$0xff]  }
   0x2   :  { %131 = vmatprep.subr.bf16.mxu0 %v245_v0  ;;  %v250_v4 = vld [vmem:[%s351_s1 + $0x60] ss:$8 sps:$4 sm:$0xff]   ;;  %v251_v5 = vld [vmem:[%s351_s1 + $0x54] ss:$8 sps:$4 sm:$0xff]   ;;  %v253_v6 = vld [vmem:[%s351_s1 + $0x50] ss:$8 sps:$4 sm:$0xff]  }
   0x3   :  { %132 = vmatpush1.bf16.msra.mxu0 %v247_v2  ;;  %v254_v7 = vld [vmem:[%s351_s1 + $0x44] ss:$8 sps:$4 sm:$0xff]   ;;  %v256_v8 = vld [vmem:[%s351_s1 + $0x40] ss:$8 sps:$4 sm:$0xff]   ;;  %v257_v9 = vld [vmem:[%s351_s1 + $0x34] ss:$8 sps:$4 sm:$0xff]  }
   0x4   :  { %133 = vmatprep.subr.bf16.mxu0 %v248_v3  ;;  %v259_v10 = vld [vmem:[%s351_s1 + $0x30] ss:$8 sps:$4 sm:$0xff]   ;;  %v260_v11 = vld [vmem:[%s351_s1 + $0x24] ss:$8 sps:$4 sm:$0xff]   ;;  %v262_v12 = vld [vmem:[%s351_s1 + $0x20] ss:$8 sps:$4 sm:$0xff]  }
   0x5   :  { %v263_v13 = vld [vmem:[%s351_s1 + $0x14] ss:$8 sps:$4 sm:$0xff]   ;;  %v265_v14 = vld [vmem:[%s351_s1 + $0x10] ss:$8 sps:$4 sm:$0xff]   ;;  %v266_v15 = vld [vmem:[%s351_s1 + $0x4] ss:$8 sps:$4 sm:$0xff]  }
   0x6   :  { %v268_v16 = vld [vmem:[%s351_s1] ss:$8 sps:$4 sm:$0xff]   ;;  %v192_v19 = vshrl.u32 %v191_v18, 7 }
   0x7   :  { %134 = vmatpush1.bf16.msra.mxu0 %v250_v4  ;;  %v269_v17 = vld [vmem:[%s352_s0] sm:$0xff]  }
   0x8   :  { %135 = vmatprep.subr.bf16.mxu0 %v251_v5  ;;  %v193_v20 = vsub.s32 0, %v192_v19  ;;  %v197_v21 = vsub.s32 1, %v192_v19  ;;  %v189_v22 = vld [vmem:[%s353_s2] sm:$0x3] }
   0xa   :  { %v194_v23 = vrot.slane %v189_v22, %v193_v20  ;;  %v198_v24 = vrot.slane %v189_v22, %v197_v21 }
   0xb   :  { %136 = vmatpush1.bf16.msra.mxu0 %v253_v6 }
   0xc   :  { %137 = vmatprep.subr.bf16.mxu0 %v254_v7 }
   0xf   :  { %138 = vmatpush1.bf16.msra.mxu0 %v256_v8 }
  0x10   :  { %139 = vmatprep.subr.bf16.mxu0 %v257_v9 }
  0x13   :  { %140 = vmatpush1.bf16.msra.mxu0 %v259_v10 }
  0x14   :  { %141 = vmatprep.subr.bf16.mxu0 %v260_v11 }
  0x17   :  { %142 = vmatpush1.bf16.msra.mxu0 %v262_v12 }
  0x18   :  { %143 = vmatprep.subr.bf16.mxu0 %v263_v13 }
  0x1b   :  { %144 = vmatpush1.bf16.msra.mxu0 %v265_v14 }
  0x1c   :  { %145 = vmatprep.subr.bf16.mxu0 %v266_v15 }
  0x1f   :  { %146 = vmatpush1.bf16.msra.mxu0 %v268_v16 }
  0x22   :  { %164 = vmatmul.mubr.bf16.vlgmr.msra.gmra.mxu0 %v269_v17 }
  0xe2   :  { %v165_v25 = vpop.f32.mrf.mxu0 }
  0xe3   :  { %v201_v27 = vadd.f32 %v194_v23, %v165_v25 }
  0xe4   :  { %v167_v26 = vpop.f32.mrf.mxu0 }
  0xe5   :  { %v202_v28 = vadd.f32 %v198_v24, %v167_v26 }
  0xe6   :  { %v169_v29 = vpop.f32.mrf.mxu0 }
  0xe7   :  { %v242_v30 = vpack.c.bf16 %v202_v28, %v201_v27  ;;  %v203_v32 = vadd.f32 %v194_v23, %v169_v29 }
  0xe8   :  { %v171_v31 = vpop.f32.mrf.mxu0 }
  0xe9   :  { %217 = vst [vmem:[%s354_s3] sm:$0xff] %v242_v30  ;;  %v204_v33 = vadd.f32 %v198_v24, %v171_v31 }
  0xeb   :  { %v243_v34 = vpack.c.bf16 %v204_v33, %v203_v32 }
  0xed   :  { %218 = vst [vmem:[%s354_s3 + $0x8] sm:$0xff] %v243_v34 }

// kernel: siamese_forward.34
= control target key start
LH: loop header
LB: loop body
LE: loop exit
PB: predicated region body
PF: predicated region fallthrough
CT: control target
= control target key end

     0   :  { %s1253_s15 = smov 0   ;;  %s1255_s16 = smov 0   ;;  %s1390_s0 = inlined_call_operand.vmem [shape: bf16[16,2304], index: 0, kind: input, shape index: {}]   ;;  %s1391_s1 = inlined_call_operand.vmem [shape: bf16[2304,256], index: 1, kind: input, shape index: {}]   ;;  %s1392_s2 = inlined_call_operand.vmem [shape: f32[1,256], index: 2, kind: input, shape index: {}]   ;;  %s1393_s3 = inlined_call_operand.vmem [shape: bf16[16,256], index: 3, kind: input, shape index: {}]   ;;  %s1394_s4 = inlined_call_operand.vmem [shape: bf16[16,256], index: 4, kind: output, shape index: {}]  }
   0x1   :  { %s1257_s17 = smov 0   ;;  %s1259_s18 = smov 0  }
   0x2   :  { %s1261_s19 = smov 0  }
   0x3 LB: > { %s26_s20 = sadd.s32 1, %s1220_s18  ;;  %p49_p1 = scmp.ne.s32.totalorder %s1212_s16, %s1208_s15  ;;  %s1224_s19 = sphi %s1261_s19, %s14_s19   ;;  %s1220_s18 = sphi %s1259_s18, %s1398_s18   ;;  %s1216_s17 = sphi %s1257_s17, %s1397_s17   ;;  %s1212_s16 = sphi %s1255_s16, %s1396_s16   ;;  %s1208_s15 = sphi %s1253_s15, %s1395_s15  }
   0x4   : > { %p27_p0 = scmp.ge.s32.totalorder %s26_s20, 6  ;;  %p50_p2 = scmp.eq.s32.totalorder %s1224_s19, 0 }
   0x5   : > { %s42_s22 = sadd.s32 1, %s1212_s16  ;;  %p994_p5 = scmp.ge.s32.totalorder %s1224_s19, 6 }
   0x6   : > { %s1400_s20 = smov (%p27_p0, %s26_s20), 0  ;;  %p51_p3 = por %p50_p2, %p49_p1 }
   0x7   : > { %s38_s21 = ssub.s32 %s1220_s18, %s1400_s20  ;;  %208 = sbr.rel (%p994_p5) target bundleno = 19 (0x13), region = 24 }
   0x8   : > { %p40_p4 = scmp.eq.s32.totalorder %s38_s21, 0 }
   0xa   : > { %s1288_s23 = scalar_select %p40_p4, %s1212_s16, %s42_s22  }
   0xc   : > { %211 = sbr.rel (!%p51_p3) target bundleno = 19 (0x13), region = 28  ;;  %s213_s24 = sand.u32 (%p51_p3), 1, %s1212_s16  }
   0xd   : > { %s1062_s25 = smul.u32 (%p51_p3), 12, %s1220_s18 }
   0xe   : > { %s1066_s26 = smul.u32 (%p51_p3), 24, %s213_s24 }
   0xf   : > { %s221_s29 = scalar_lea.vmem (%p51_p3), %s1390_s0, %s1062_s25 }
  0x10   : > { %v236_v0 = vld [vmem:[%s221_s29] sm:$0xff] (%p51_p3)  ;;  %v238_v1 = vld [vmem:[%s221_s29 + $0x48] sm:$0xff] (%p51_p3)  ;;  %s215_s30 = scalar_lea.vmem (%p51_p3), [#allocation3], %s1066_s26  ;;  %v998_v3 = vld [vmem:[%s221_s29 + $0x50] sm:$0xf] (%p51_p3) }
  0x11   : > { %v996_v2 = vld [vmem:[%s221_s29 + $0x8] sm:$0xf]  ;;  %237 = vst [vmem:[%s215_s30] sm:$0xff] %v236_v0  ;;  %239 = vst [vmem:[%s215_s30 + $0xc] sm:$0xff] %v238_v1 }
  0x12   : > { %997 = vst [vmem:[%s215_s30 + $0x8] sm:$0xf] %v996_v2  ;;  %999 = vst [vmem:[%s215_s30 + $0x14] sm:$0xf] %v998_v3 }
  0x13 PF: > { %p1000_p6 = scmp.ge.s32.totalorder %s1224_s19, 1  ;;  %p271_p7 = scmp.lt.s32.totalorder %s1224_s19, 7 }
  0x15   : > { %p272_p8 = pnand %p1000_p6, %p271_p7 }
  0x16   : > { %s278_s5 = sand.u32 (!%p272_p8), 1, %s1208_s15   ;;  %s334_s6 = smul.u32 (!%p272_p8), 48, %s1216_s17 }
  0x17   : > { %275 = sbr.rel (%p272_p8) target bundleno = 322 (0x142), region = 58  ;;  %p1003_p10 = scmp.ne.s32.totalorder (!%p272_p8), %s1216_s17, 0 }
  0x18   : > { %s1067_s7 = smul.u32 (!%p272_p8), 24, %s278_s5  ;;  %p336_p9 = scmp.lt.s32.totalorder (!%p272_p8), %s334_s6, 287 }
  0x1a   : > { %s1305_s12 = scalar_lea.vmem (!%p272_p8), [#allocation3], %s1067_s7 }
  0x1c   : > { %s1402_s6 = smov (!%p336_p9, %s334_s6), 287  ;;  %379 = sbr.rel (%p1003_p10) target bundleno = 36 (0x24), region = 66 }
  0x1d   : > { %s1063_s8 = sshll.u32 %s1402_s6, 3 }
  0x1e   : > { %s1303_s11 = scalar_lea.vmem %s1391_s1, %s1063_s8 }
  0x21   : > { %v1226_v4 = vmov 0.0  }
  0x22   : > { %380 = vst [vmem:[#allocation2 + $0x10] sm:$0xff] %v1226_v4  ;;  %381 = vst [vmem:[#allocation2] sm:$0xff] %v1226_v4 }
  0x23   : > { %382 = vst [vmem:[#allocation2 + $0x18] sm:$0xff] %v1226_v4  ;;  %383 = vst [vmem:[#allocation2 + $0x8] sm:$0xff] %v1226_v4 }
  0x24 PF: > { %v1110_v5 = vld [vmem:[%s1303_s11 + $0x74] ss:$8 sps:$4 sm:$0xff]   ;;  %v1112_v6 = vld [vmem:[%s1303_s11 + $0x70] ss:$8 sps:$4 sm:$0xff]   ;;  %v1227_v7 = vmov 0   ;;  %p1055_p11 = scmp.ne.s32.totalorder %s1216_s17, 5 }
  0x25   : > { %771 = vmatprep.mubr.bf16.mxu1 %v1227_v7  ;;  %696 = vmatprep.subr.bf16.mxu0 %v1110_v5  ;;  %v1113_v8 = vld [vmem:[%s1303_s11 + $0x64] ss:$8 sps:$4 sm:$0xff]   ;;  %v1115_v9 = vld [vmem:[%s1303_s11 + $0x60] ss:$8 sps:$4 sm:$0xff]   ;;  %v1116_v10 = vld [vmem:[%s1303_s11 + $0x54] ss:$8 sps:$4 sm:$0xff]  }
  0x26   : > { %697 = vmatpush1.bf16.msra.mxu0 %v1112_v6  ;;  %v1118_v11 = vld [vmem:[%s1303_s11 + $0x50] ss:$8 sps:$4 sm:$0xff]   ;;  %v1119_v12 = vld [vmem:[%s1303_s11 + $0x44] ss:$8 sps:$4 sm:$0xff]   ;;  %v1131_v13 = vld [vmem:[%s1303_s11 + $0x174] ss:$8 sps:$4 sm:$0xff]  }
  0x27   : > { %698 = vmatprep.subr.bf16.mxu0 %v1113_v8  ;;  %v1133_v14 = vld [vmem:[%s1303_s11 + $0x170] ss:$8 sps:$4 sm:$0xff]   ;;  %v1121_v15 = vld [vmem:[%s1303_s11 + $0x40] ss:$8 sps:$4 sm:$0xff]   ;;  %v1122_v16 = vld [vmem:[%s1303_s11 + $0x34] ss:$8 sps:$4 sm:$0xff]   ;;  %739 = vmatprep.subr.bf16.mxu1 %v1131_v13 }
  0x28   : > { %v1137_v17 = vld [vmem:[%s1303_s11 + $0x164] ss:$8 sps:$4 sm:$0xff]   ;;  %740 = vmatpush1.bf16.msra.mxu1 %v1133_v14  ;;  %v1139_v18 = vld [vmem:[%s1303_s11 + $0x160] ss:$8 sps:$4 sm:$0xff]   ;;  %v1124_v19 = vld [vmem:[%s1303_s11 + $0x30] ss:$8 sps:$4 sm:$0xff]  }
  0x29   : > { %741 = vmatprep.subr.bf16.mxu1 %v1137_v17  ;;  %v1143_v20 = vld [vmem:[%s1303_s11 + $0x154] ss:$8 sps:$4 sm:$0xff]   ;;  %v1125_v21 = vld [vmem:[%s1303_s11 + $0x24] ss:$8 sps:$4 sm:$0xff]   ;;  %v1145_v22 = vld [vmem:[%s1303_s11 + $0x150] ss:$8 sps:$4 sm:$0xff]  }
  0x2a   : > { %699 = vmatpush1.bf16.msra.mxu0 %v1115_v9  ;;  %v1149_v23 = vld [vmem:[%s1303_s11 + $0x144] ss:$8 sps:$4 sm:$0xff]   ;;  %v1127_v24 = vld [vmem:[%s1303_s11 + $0x20] ss:$8 sps:$4 sm:$0xff]   ;;  %v1128_v25 = vld [vmem:[%s1303_s11 + $0x14] ss:$8 sps:$4 sm:$0xff]  }
  0x2b   : > { %700 = vmatprep.subr.bf16.mxu0 %v1116_v10  ;;  %v1151_v26 = vld [vmem:[%s1303_s11 + $0x140] ss:$8 sps:$4 sm:$0xff]   ;;  %v1155_v27 = vld [vmem:[%s1303_s11 + $0x134] ss:$8 sps:$4 sm:$0xff]   ;;  %v1130_v28 = vld [vmem:[%s1303_s11 + $0x10] ss:$8 sps:$4 sm:$0xff]  }
  0x2c   : > { %742 = vmatpush1.bf16.msra.mxu1 %v1139_v18  ;;  %v1134_v29 = vld [vmem:[%s1303_s11 + $0x4] ss:$8 sps:$4 sm:$0xff]   ;;  %v1157_v30 = vld [vmem:[%s1303_s11 + $0x130] ss:$8 sps:$4 sm:$0xff]   ;;  %v1136_v32 = vld [vmem:[%s1303_s11] ss:$8 sps:$4 sm:$0xff]  }
  0x2d   : > { %743 = vmatprep.subr.bf16.mxu1 %v1143_v20  ;;  %v1161_v31 = vld [vmem:[%s1303_s11 + $0x124] ss:$8 sps:$4 sm:$0xff]   ;;  %v1140_v33 = vld [vmem:[%s1303_s11 + $0xf4] ss:$8 sps:$4 sm:$0xff]   ;;  %v1163_v34 = vld [vmem:[%s1303_s11 + $0x120] ss:$8 sps:$4 sm:$0xff]  }
  0x2e   : > { %701 = vmatpush1.bf16.msra.mxu0 %v1118_v11  ;;  %v1167_v35 = vld [vmem:[%s1303_s11 + $0x114] ss:$8 sps:$4 sm:$0xff]   ;;  %v1142_v36 = vld [vmem:[%s1303_s11 + $0xf0] ss:$8 sps:$4 sm:$0xff]   ;;  %v1146_v37 = vld [vmem:[%s1303_s11 + $0xe4] ss:$8 sps:$4 sm:$0xff]  }
  0x2f   : > { %702 = vmatprep.subr.bf16.mxu0 %v1119_v12  ;;  %v1169_v38 = vld [vmem:[%s1303_s11 + $0x110] ss:$8 sps:$4 sm:$0xff]   ;;  %v1173_v39 = vld [vmem:[%s1303_s11 + $0x104] ss:$8 sps:$4 sm:$0xff]   ;;  %v1148_v41 = vld [vmem:[%s1303_s11 + $0xe0] ss:$8 sps:$4 sm:$0xff]  }
  0x30   : > { %744 = vmatpush1.bf16.msra.mxu1 %v1145_v22  ;;  %v1185_v40 = vld [vmem:[%s1305_s12 + $0x4] ss:$12 sps:$4 sm:$0xff]   ;;  %v1179_v46 = vld [vmem:[%s1305_s12 + $0x8] ss:$12 sps:$4 sm:$0xff]   ;;  %v1183_v56 = vld [vmem:[%s1305_s12] ss:$12 sps:$4 sm:$0xff]  }
  0x31   : > { %745 = vmatprep.subr.bf16.mxu1 %v1149_v23  ;;  %v1152_v42 = vld [vmem:[%s1303_s11 + $0xd4] ss:$8 sps:$4 sm:$0xff]   ;;  %728 = vmatprep.mubr.bf16.mxu0 %v1185_v40  ;;  %v1175_v43 = vld [vmem:[%s1303_s11 + $0x100] ss:$8 sps:$4 sm:$0xff]   ;;  %v1154_v44 = vld [vmem:[%s1303_s11 + $0xd0] ss:$8 sps:$4 sm:$0xff]  }
  0x32   : > { %703 = vmatpush1.bf16.msra.mxu0 %v1121_v15  ;;  %v1158_v45 = vld [vmem:[%s1303_s11 + $0xc4] ss:$8 sps:$4 sm:$0xff]   ;;  %v1160_v47 = vld [vmem:[%s1303_s11 + $0xc0] ss:$8 sps:$4 sm:$0xff]   ;;  %v1164_v48 = vld [vmem:[%s1303_s11 + $0xb4] ss:$8 sps:$4 sm:$0xff]  }
  0x33   : > { %704 = vmatprep.subr.bf16.mxu0 %v1122_v16  ;;  %v1166_v49 = vld [vmem:[%s1303_s11 + $0xb0] ss:$8 sps:$4 sm:$0xff]   ;;  %v1170_v50 = vld [vmem:[%s1303_s11 + $0xa4] ss:$8 sps:$4 sm:$0xff]   ;;  %v1172_v51 = vld [vmem:[%s1303_s11 + $0xa0] ss:$8 sps:$4 sm:$0xff]  }
  0x34   : > { %746 = vmatpush1.bf16.msra.mxu1 %v1151_v26  ;;  %v1176_v52 = vld [vmem:[%s1303_s11 + $0x94] ss:$8 sps:$4 sm:$0xff]   ;;  %v1178_v53 = vld [vmem:[%s1303_s11 + $0x90] ss:$8 sps:$4 sm:$0xff]   ;;  %v1180_v54 = vld [vmem:[%s1303_s11 + $0x84] ss:$8 sps:$4 sm:$0xff]  }
  0x35   : > { %747 = vmatprep.subr.bf16.mxu1 %v1155_v27  ;;  %v1182_v55 = vld [vmem:[%s1303_s11 + $0x80] ss:$8 sps:$4 sm:$0xff]   ;;  %v384_v59 = vld [vmem:[#allocation2 + $0x10] sm:$0xff]  ;;  %v386_v3 = vld [vmem:[#allocation2 + $0x18] sm:$0xff] }
  0x36   : > { %705 = vmatpush1.bf16.msra.mxu0 %v1124_v19  ;;  %v385_v63 = vld [vmem:[#allocation2] sm:$0xff]  ;;  %v387_v8 = vld [vmem:[#allocation2 + $0x8] sm:$0xff] }
  0x37   : > { %706 = vmatprep.subr.bf16.mxu0 %v1125_v21 }
  0x38   : > { %748 = vmatpush1.bf16.msra.mxu1 %v1157_v30 }
  0x39   : > { %749 = vmatprep.subr.bf16.mxu1 %v1161_v31 }
  0x3a   : > { %707 = vmatpush1.bf16.msra.mxu0 %v1127_v24 }
  0x3b   : > { %708 = vmatprep.subr.bf16.mxu0 %v1128_v25 }
  0x3c   : > { %750 = vmatpush1.bf16.msra.mxu1 %v1163_v34 }
  0x3d   : > { %751 = vmatprep.subr.bf16.mxu1 %v1167_v35 }
  0x3e   : > { %709 = vmatpush1.bf16.msra.mxu0 %v1130_v28 }
  0x3f   : > { %710 = vmatprep.subr.bf16.mxu0 %v1134_v29 }
  0x40   : > { %752 = vmatpush1.bf16.msra.mxu1 %v1169_v38 }
  0x41   : > { %753 = vmatprep.subr.bf16.mxu1 %v1173_v39 }
  0x42   : > { %711 = vmatpush1.bf16.msra.mxu0 %v1136_v32 }
  0x43   : > { %712 = vmatprep.subr.bf16.mxu0 %v1140_v33 }
  0x44   : > { %754 = vmatpush1.bf16.msra.mxu1 %v1175_v43 }
  0x46   : > { %713 = vmatpush2.bf16.msra.mxu0 %v1142_v36 }
  0x47   : > { %714 = vmatprep.subr.bf16.mxu0 %v1146_v37  ;;  %772 = vmatmul.mubr.bf16.vlgmr.msra.gmra.mxu1 %v1179_v46 }
  0x4a   : > { %715 = vmatpush2.bf16.msra.mxu0 %v1148_v41 }
  0x4b   : > { %716 = vmatprep.subr.bf16.mxu0 %v1152_v42 }
  0x4e   : > { %717 = vmatpush2.bf16.msra.mxu0 %v1154_v44 }
  0x4f   : > { %718 = vmatprep.subr.bf16.mxu0 %v1158_v45 }
  0x52   : > { %719 = vmatpush2.bf16.msra.mxu0 %v1160_v47 }
  0x53   : > { %720 = vmatprep.subr.bf16.mxu0 %v1164_v48 }
  0x56   : > { %721 = vmatpush2.bf16.msra.mxu0 %v1166_v49 }
  0x57   : > { %722 = vmatprep.subr.bf16.mxu0 %v1170_v50 }
  0x5a   : > { %723 = vmatpush2.bf16.msra.mxu0 %v1172_v51 }
  0x5b   : > { %724 = vmatprep.subr.bf16.mxu0 %v1176_v52 }
  0x5e   : > { %725 = vmatpush2.bf16.msra.mxu0 %v1178_v53 }
  0x5f   : > { %726 = vmatprep.subr.bf16.mxu0 %v1180_v54 }
  0x62   : > { %727 = vmatpush2.bf16.msra.mxu0 %v1182_v55 }
  0x65   : > { %729 = vmatmul.mubr.bf16.vlgmr.msra.gmra.mxu0 %v1183_v56 }
 0x107   : > { %v773_v57 = vpop.f32.mrf.mxu1 }
 0x109   : > { %v775_v58 = vpop.f32.mrf.mxu1 }
 0x10b   : > { %v777_v62 = vpop.f32.mrf.mxu1 }
 0x10d   : > { %v779_v7 = vpop.f32.mrf.mxu1 }
 0x125   : > { %v730_v60 = vpop.f32.mrf.mxu0 }
 0x126   : > { %v774_v61 = vadd.f32 %v773_v57, %v730_v60 }
 0x127   : > { %v732_v0 = vpop.f32.mrf.mxu0 }
 0x128   : > { %v782_v1 = vadd.f32 %v774_v61, %v384_v59  ;;  %v776_v2 = vadd.f32 %v775_v58, %v732_v0 }
 0x129   : > { %v734_v4 = vpop.f32.mrf.mxu0 }
 0x12a   : > { %786 = vst [vmem:[#allocation2 + $0x10] sm:$0xff] %v782_v1  ;;  %v783_v5 = vadd.f32 %v776_v2, %v385_v63  ;;  %v778_v6 = vadd.f32 %v777_v62, %v734_v4 }
 0x12b   : > { %v736_v9 = vpop.f32.mrf.mxu0 }
 0x12c   : > { %787 = vst [vmem:[#allocation2] sm:$0xff] %v783_v5  ;;  %v784_v10 = vadd.f32 %v778_v6, %v386_v3  ;;  %v780_v11 = vadd.f32 %v779_v7, %v736_v9  ;;  %793 = sbr.rel (%p1055_p11) target bundleno = 322 (0x142), region = 70 }
 0x12e   : > { %788 = vst [vmem:[#allocation2 + $0x18] sm:$0xff] %v784_v10  ;;  %v785_v12 = vadd.f32 %v780_v11, %v387_v8 }
 0x130   : > { %789 = vst [vmem:[#allocation2 + $0x8] sm:$0xff] %v785_v12 }
 0x131   : > { %v800_v13 = vlaneseq  ;;  %v814_v15 = vld [vmem:[%s1393_s3] sm:$0xff]  ;;  %v815_v17 = vld [vmem:[%s1393_s3 + $0x8] sm:$0xff]  ;;  %v794_v18 = vld [vmem:[#allocation2 + $0x10] sm:$0xff] }
 0x132   : > { %v798_v16 = vld [vmem:[%s1392_s2] sm:$0x3]  ;;  %v816_v22 = vunpack.c.l.bf16 %v814_v15  ;;  %v817_v23 = vunpack.c.h.bf16 %v814_v15  ;;  %v818_v28 = vunpack.c.l.bf16 %v815_v17  ;;  %v819_v29 = vunpack.c.h.bf16 %v815_v17 }
 0x133   : > { %v801_v14 = vshrl.u32 %v800_v13, 7  ;;  %v795_v21 = vld [vmem:[#allocation2] sm:$0xff] }
 0x135   : > { %v802_v19 = vsub.s32 0, %v801_v14  ;;  %v806_v20 = vsub.s32 1, %v801_v14  ;;  %v796_v24 = vld [vmem:[#allocation2 + $0x18] sm:$0xff] }
 0x137   : > { %v797_v25 = vld [vmem:[#allocation2 + $0x8] sm:$0xff]  ;;  %v803_v26 = vrot.slane %v798_v16, %v802_v19  ;;  %v807_v27 = vrot.slane %v798_v16, %v806_v20 }
 0x139   : > { %v810_v30 = vadd.f32 %v803_v26, %v794_v18  ;;  %v811_v31 = vadd.f32 %v807_v27, %v795_v21  ;;  %v812_v32 = vadd.f32 %v803_v26, %v796_v24  ;;  %v813_v33 = vadd.f32 %v807_v27, %v797_v25 }
 0x13b   : > { %v820_v34 = vadd.f32 %v816_v22, %v810_v30  ;;  %v821_v35 = vadd.f32 %v817_v23, %v811_v31  ;;  %v822_v36 = vadd.f32 %v818_v28, %v812_v32  ;;  %v823_v37 = vadd.f32 %v819_v29, %v813_v33 }
 0x13d   : > { %v824_v38 = vmax.f32 %v820_v34, 0.0  ;;  %v825_v39 = vmax.f32 %v821_v35, 0.0  ;;  %v826_v40 = vmax.f32 %v822_v36, 0.0  ;;  %v827_v41 = vmax.f32 %v823_v37, 0.0 }
 0x13f   : > { %v1064_v42 = vpack.c.bf16 %v825_v39, %v824_v38  ;;  %v1065_v43 = vpack.c.bf16 %v827_v41, %v826_v40 }
 0x141   : > { %840 = vst [vmem:[%s1394_s4] sm:$0xff] %v1064_v42  ;;  %841 = vst [vmem:[%s1394_s4 + $0x8] sm:$0xff] %v1065_v43 }
 0x142 PF: > { %s14_s19 = sadd.s32 1, %s1224_s19   ;;  %s1395_s15 = smov %s1212_s16 }
 0x143   : > { %p11_p12 = scmp.ge.s32.totalorder %s14_s19, 8   ;;  %s1396_s16 = smov %s1288_s23 }
 0x144   : > { %s1397_s17 = smov %s1220_s18  ;;  %s1398_s18 = smov %s1400_s20 }
 0x145   :  { %13 = sbr.rel (!%p11_p12) target bundleno = 3 (0x3), region = 120 }

// kernel: siamese_forward.35
= control target key start
LH: loop header
LB: loop body
LE: loop exit
PB: predicated region body
PF: predicated region fallthrough
CT: control target
= control target key end

     0   :  { %s1148_s12 = smov 0   ;;  %s1150_s13 = smov 0   ;;  %s1279_s0 = inlined_call_operand.vmem [shape: bf16[16,2304], index: 0, kind: input, shape index: {}]   ;;  %s1280_s1 = inlined_call_operand.vmem [shape: bf16[2304,256], index: 1, kind: input, shape index: {}]   ;;  %s1281_s2 = inlined_call_operand.vmem [shape: f32[1,256], index: 2, kind: input, shape index: {}]   ;;  %s1282_s3 = inlined_call_operand.vmem [shape: bf16[16,256], index: 3, kind: output, shape index: {}]  }
   0x1   :  { %s1152_s14 = smov 0   ;;  %s1154_s15 = smov 0  }
   0x2   :  { %s1156_s16 = smov 0  }
   0x3 LB: > { %s25_s17 = sadd.s32 1, %s1120_s15  ;;  %p48_p1 = scmp.ne.s32.totalorder %s1112_s13, %s1108_s12  ;;  %s1124_s16 = sphi %s1156_s16, %s13_s16   ;;  %s1120_s15 = sphi %s1154_s15, %s1286_s15   ;;  %s1116_s14 = sphi %s1152_s14, %s1285_s14   ;;  %s1112_s13 = sphi %s1150_s13, %s1284_s13   ;;  %s1108_s12 = sphi %s1148_s12, %s1283_s12  }
   0x4   : > { %p26_p0 = scmp.ge.s32.totalorder %s25_s17, 6  ;;  %p49_p2 = scmp.eq.s32.totalorder %s1124_s16, 0 }
   0x5   : > { %s41_s19 = sadd.s32 1, %s1112_s13  ;;  %p894_p5 = scmp.ge.s32.totalorder %s1124_s16, 6 }
   0x6   : > { %s1288_s17 = smov (%p26_p0, %s25_s17), 0  ;;  %p50_p3 = por %p49_p2, %p48_p1 }
   0x7   : > { %s37_s18 = ssub.s32 %s1120_s15, %s1288_s17  ;;  %164 = sbr.rel (%p894_p5) target bundleno = 19 (0x13), region = 20 }
   0x8   : > { %p39_p4 = scmp.eq.s32.totalorder %s37_s18, 0 }
   0xa   : > { %s1183_s20 = scalar_select %p39_p4, %s1112_s13, %s41_s19  }
   0xc   : > { %167 = sbr.rel (!%p50_p3) target bundleno = 19 (0x13), region = 24  ;;  %s169_s21 = sand.u32 (%p50_p3), 1, %s1112_s13  }
   0xd   : > { %s962_s22 = smul.u32 (%p50_p3), 12, %s1120_s15 }
   0xe   : > { %s966_s23 = smul.u32 (%p50_p3), 24, %s169_s21 }
   0xf   : > { %s177_s26 = scalar_lea.vmem (%p50_p3), %s1279_s0, %s962_s22 }
  0x10   : > { %v192_v0 = vld [vmem:[%s177_s26] sm:$0xff] (%p50_p3)  ;;  %v194_v1 = vld [vmem:[%s177_s26 + $0x48] sm:$0xff] (%p50_p3)  ;;  %s171_s27 = scalar_lea.vmem (%p50_p3), [#allocation3], %s966_s23  ;;  %v898_v3 = vld [vmem:[%s177_s26 + $0x50] sm:$0xf] (%p50_p3) }
  0x11   : > { %v896_v2 = vld [vmem:[%s177_s26 + $0x8] sm:$0xf]  ;;  %193 = vst [vmem:[%s171_s27] sm:$0xff] %v192_v0  ;;  %195 = vst [vmem:[%s171_s27 + $0xc] sm:$0xff] %v194_v1 }
  0x12   : > { %897 = vst [vmem:[%s171_s27 + $0x8] sm:$0xf] %v896_v2  ;;  %899 = vst [vmem:[%s171_s27 + $0x14] sm:$0xf] %v898_v3 }
  0x13 PF: > { %p900_p6 = scmp.ge.s32.totalorder %s1124_s16, 1  ;;  %p227_p7 = scmp.lt.s32.totalorder %s1124_s16, 7 }
  0x15   : > { %p228_p8 = pnand %p900_p6, %p227_p7 }
  0x16   : > { %s234_s28 = sand.u32 (!%p228_p8), 1, %s1108_s12   ;;  %s278_s29 = smul.u32 (!%p228_p8), 48, %s1116_s14 }
  0x17   : > { %231 = sbr.rel (%p228_p8) target bundleno = 320 (0x140), region = 54  ;;  %p903_p10 = scmp.ne.s32.totalorder (!%p228_p8), %s1116_s14, 0 }
  0x18   : > { %s967_s30 = smul.u32 (!%p228_p8), 24, %s234_s28  ;;  %p280_p9 = scmp.lt.s32.totalorder (!%p228_p8), %s278_s29, 287 }
  0x1a   : > { %s1200_s8 = scalar_lea.vmem (!%p228_p8), [#allocation3], %s967_s30 }
  0x1c   : > { %s1290_s29 = smov (!%p280_p9, %s278_s29), 287  ;;  %311 = sbr.rel (%p903_p10) target bundleno = 36 (0x24), region = 62 }
  0x1d   : > { %s963_s4 = sshll.u32 %s1290_s29, 3 }
  0x1e   : > { %s1198_s7 = scalar_lea.vmem %s1280_s1, %s963_s4 }
  0x21   : > { %v1126_v4 = vmov 0.0  }
  0x22   : > { %312 = vst [vmem:[#allocation2 + $0x10] sm:$0xff] %v1126_v4  ;;  %313 = vst [vmem:[#allocation2] sm:$0xff] %v1126_v4 }
  0x23   : > { %314 = vst [vmem:[#allocation2 + $0x18] sm:$0xff] %v1126_v4  ;;  %315 = vst [vmem:[#allocation2 + $0x8] sm:$0xff] %v1126_v4 }
  0x24 PF: > { %v1010_v5 = vld [vmem:[%s1198_s7 + $0x74] ss:$8 sps:$4 sm:$0xff]   ;;  %v1012_v6 = vld [vmem:[%s1198_s7 + $0x70] ss:$8 sps:$4 sm:$0xff]   ;;  %v1127_v7 = vmov 0   ;;  %p955_p11 = scmp.ne.s32.totalorder %s1116_s14, 5 }
  0x25   : > { %703 = vmatprep.mubr.bf16.mxu1 %v1127_v7  ;;  %628 = vmatprep.subr.bf16.mxu0 %v1010_v5  ;;  %v1013_v8 = vld [vmem:[%s1198_s7 + $0x64] ss:$8 sps:$4 sm:$0xff]   ;;  %v1015_v9 = vld [vmem:[%s1198_s7 + $0x60] ss:$8 sps:$4 sm:$0xff]   ;;  %v1016_v10 = vld [vmem:[%s1198_s7 + $0x54] ss:$8 sps:$4 sm:$0xff]  }
  0x26   : > { %629 = vmatpush1.bf16.msra.mxu0 %v1012_v6  ;;  %v1018_v11 = vld [vmem:[%s1198_s7 + $0x50] ss:$8 sps:$4 sm:$0xff]   ;;  %v1019_v12 = vld [vmem:[%s1198_s7 + $0x44] ss:$8 sps:$4 sm:$0xff]   ;;  %v1031_v13 = vld [vmem:[%s1198_s7 + $0x174] ss:$8 sps:$4 sm:$0xff]  }
  0x27   : > { %630 = vmatprep.subr.bf16.mxu0 %v1013_v8  ;;  %v1033_v14 = vld [vmem:[%s1198_s7 + $0x170] ss:$8 sps:$4 sm:$0xff]   ;;  %v1021_v15 = vld [vmem:[%s1198_s7 + $0x40] ss:$8 sps:$4 sm:$0xff]   ;;  %v1022_v16 = vld [vmem:[%s1198_s7 + $0x34] ss:$8 sps:$4 sm:$0xff]   ;;  %671 = vmatprep.subr.bf16.mxu1 %v1031_v13 }
  0x28   : > { %v1037_v17 = vld [vmem:[%s1198_s7 + $0x164] ss:$8 sps:$4 sm:$0xff]   ;;  %672 = vmatpush1.bf16.msra.mxu1 %v1033_v14  ;;  %v1039_v18 = vld [vmem:[%s1198_s7 + $0x160] ss:$8 sps:$4 sm:$0xff]   ;;  %v1024_v19 = vld [vmem:[%s1198_s7 + $0x30] ss:$8 sps:$4 sm:$0xff]  }
  0x29   : > { %673 = vmatprep.subr.bf16.mxu1 %v1037_v17  ;;  %v1043_v20 = vld [vmem:[%s1198_s7 + $0x154] ss:$8 sps:$4 sm:$0xff]   ;;  %v1025_v21 = vld [vmem:[%s1198_s7 + $0x24] ss:$8 sps:$4 sm:$0xff]   ;;  %v1045_v22 = vld [vmem:[%s1198_s7 + $0x150] ss:$8 sps:$4 sm:$0xff]  }
  0x2a   : > { %631 = vmatpush1.bf16.msra.mxu0 %v1015_v9  ;;  %v1049_v23 = vld [vmem:[%s1198_s7 + $0x144] ss:$8 sps:$4 sm:$0xff]   ;;  %v1027_v24 = vld [vmem:[%s1198_s7 + $0x20] ss:$8 sps:$4 sm:$0xff]   ;;  %v1028_v25 = vld [vmem:[%s1198_s7 + $0x14] ss:$8 sps:$4 sm:$0xff]  }
  0x2b   : > { %632 = vmatprep.subr.bf16.mxu0 %v1016_v10  ;;  %v1051_v26 = vld [vmem:[%s1198_s7 + $0x140] ss:$8 sps:$4 sm:$0xff]   ;;  %v1055_v27 = vld [vmem:[%s1198_s7 + $0x134] ss:$8 sps:$4 sm:$0xff]   ;;  %v1030_v28 = vld [vmem:[%s1198_s7 + $0x10] ss:$8 sps:$4 sm:$0xff]  }
  0x2c   : > { %674 = vmatpush1.bf16.msra.mxu1 %v1039_v18  ;;  %v1034_v29 = vld [vmem:[%s1198_s7 + $0x4] ss:$8 sps:$4 sm:$0xff]   ;;  %v1057_v30 = vld [vmem:[%s1198_s7 + $0x130] ss:$8 sps:$4 sm:$0xff]   ;;  %v1036_v32 = vld [vmem:[%s1198_s7] ss:$8 sps:$4 sm:$0xff]  }
  0x2d   : > { %675 = vmatprep.subr.bf16.mxu1 %v1043_v20  ;;  %v1061_v31 = vld [vmem:[%s1198_s7 + $0x124] ss:$8 sps:$4 sm:$0xff]   ;;  %v1040_v33 = vld [vmem:[%s1198_s7 + $0xf4] ss:$8 sps:$4 sm:$0xff]   ;;  %v1063_v34 = vld [vmem:[%s1198_s7 + $0x120] ss:$8 sps:$4 sm:$0xff]  }
  0x2e   : > { %633 = vmatpush1.bf16.msra.mxu0 %v1018_v11  ;;  %v1067_v35 = vld [vmem:[%s1198_s7 + $0x114] ss:$8 sps:$4 sm:$0xff]   ;;  %v1042_v36 = vld [vmem:[%s1198_s7 + $0xf0] ss:$8 sps:$4 sm:$0xff]   ;;  %v1046_v37 = vld [vmem:[%s1198_s7 + $0xe4] ss:$8 sps:$4 sm:$0xff]  }
  0x2f   : > { %634 = vmatprep.subr.bf16.mxu0 %v1019_v12  ;;  %v1069_v38 = vld [vmem:[%s1198_s7 + $0x110] ss:$8 sps:$4 sm:$0xff]   ;;  %v1073_v39 = vld [vmem:[%s1198_s7 + $0x104] ss:$8 sps:$4 sm:$0xff]   ;;  %v1048_v41 = vld [vmem:[%s1198_s7 + $0xe0] ss:$8 sps:$4 sm:$0xff]  }
  0x30   : > { %676 = vmatpush1.bf16.msra.mxu1 %v1045_v22  ;;  %v1085_v40 = vld [vmem:[%s1200_s8 + $0x4] ss:$12 sps:$4 sm:$0xff]   ;;  %v1079_v46 = vld [vmem:[%s1200_s8 + $0x8] ss:$12 sps:$4 sm:$0xff]   ;;  %v1083_v56 = vld [vmem:[%s1200_s8] ss:$12 sps:$4 sm:$0xff]  }
  0x31   : > { %677 = vmatprep.subr.bf16.mxu1 %v1049_v23  ;;  %v1052_v42 = vld [vmem:[%s1198_s7 + $0xd4] ss:$8 sps:$4 sm:$0xff]   ;;  %660 = vmatprep.mubr.bf16.mxu0 %v1085_v40  ;;  %v1075_v43 = vld [vmem:[%s1198_s7 + $0x100] ss:$8 sps:$4 sm:$0xff]   ;;  %v1054_v44 = vld [vmem:[%s1198_s7 + $0xd0] ss:$8 sps:$4 sm:$0xff]  }
  0x32   : > { %635 = vmatpush1.bf16.msra.mxu0 %v1021_v15  ;;  %v1058_v45 = vld [vmem:[%s1198_s7 + $0xc4] ss:$8 sps:$4 sm:$0xff]   ;;  %v1060_v47 = vld [vmem:[%s1198_s7 + $0xc0] ss:$8 sps:$4 sm:$0xff]   ;;  %v1064_v48 = vld [vmem:[%s1198_s7 + $0xb4] ss:$8 sps:$4 sm:$0xff]  }
  0x33   : > { %636 = vmatprep.subr.bf16.mxu0 %v1022_v16  ;;  %v1066_v49 = vld [vmem:[%s1198_s7 + $0xb0] ss:$8 sps:$4 sm:$0xff]   ;;  %v1070_v50 = vld [vmem:[%s1198_s7 + $0xa4] ss:$8 sps:$4 sm:$0xff]   ;;  %v1072_v51 = vld [vmem:[%s1198_s7 + $0xa0] ss:$8 sps:$4 sm:$0xff]  }
  0x34   : > { %678 = vmatpush1.bf16.msra.mxu1 %v1051_v26  ;;  %v1076_v52 = vld [vmem:[%s1198_s7 + $0x94] ss:$8 sps:$4 sm:$0xff]   ;;  %v1078_v53 = vld [vmem:[%s1198_s7 + $0x90] ss:$8 sps:$4 sm:$0xff]   ;;  %v1080_v54 = vld [vmem:[%s1198_s7 + $0x84] ss:$8 sps:$4 sm:$0xff]  }
  0x35   : > { %679 = vmatprep.subr.bf16.mxu1 %v1055_v27  ;;  %v1082_v55 = vld [vmem:[%s1198_s7 + $0x80] ss:$8 sps:$4 sm:$0xff]   ;;  %v316_v59 = vld [vmem:[#allocation2 + $0x10] sm:$0xff]  ;;  %v318_v3 = vld [vmem:[#allocation2 + $0x18] sm:$0xff] }
  0x36   : > { %637 = vmatpush1.bf16.msra.mxu0 %v1024_v19  ;;  %v317_v63 = vld [vmem:[#allocation2] sm:$0xff]  ;;  %v319_v8 = vld [vmem:[#allocation2 + $0x8] sm:$0xff] }
  0x37   : > { %638 = vmatprep.subr.bf16.mxu0 %v1025_v21 }
  0x38   : > { %680 = vmatpush1.bf16.msra.mxu1 %v1057_v30 }
  0x39   : > { %681 = vmatprep.subr.bf16.mxu1 %v1061_v31 }
  0x3a   : > { %639 = vmatpush1.bf16.msra.mxu0 %v1027_v24 }
  0x3b   : > { %640 = vmatprep.subr.bf16.mxu0 %v1028_v25 }
  0x3c   : > { %682 = vmatpush1.bf16.msra.mxu1 %v1063_v34 }
  0x3d   : > { %683 = vmatprep.subr.bf16.mxu1 %v1067_v35 }
  0x3e   : > { %641 = vmatpush1.bf16.msra.mxu0 %v1030_v28 }
  0x3f   : > { %642 = vmatprep.subr.bf16.mxu0 %v1034_v29 }
  0x40   : > { %684 = vmatpush1.bf16.msra.mxu1 %v1069_v38 }
  0x41   : > { %685 = vmatprep.subr.bf16.mxu1 %v1073_v39 }
  0x42   : > { %643 = vmatpush1.bf16.msra.mxu0 %v1036_v32 }
  0x43   : > { %644 = vmatprep.subr.bf16.mxu0 %v1040_v33 }
  0x44   : > { %686 = vmatpush1.bf16.msra.mxu1 %v1075_v43 }
  0x46   : > { %645 = vmatpush2.bf16.msra.mxu0 %v1042_v36 }
  0x47   : > { %646 = vmatprep.subr.bf16.mxu0 %v1046_v37  ;;  %704 = vmatmul.mubr.bf16.vlgmr.msra.gmra.mxu1 %v1079_v46 }
  0x4a   : > { %647 = vmatpush2.bf16.msra.mxu0 %v1048_v41 }
  0x4b   : > { %648 = vmatprep.subr.bf16.mxu0 %v1052_v42 }
  0x4e   : > { %649 = vmatpush2.bf16.msra.mxu0 %v1054_v44 }
  0x4f   : > { %650 = vmatprep.subr.bf16.mxu0 %v1058_v45 }
  0x52   : > { %651 = vmatpush2.bf16.msra.mxu0 %v1060_v47 }
  0x53   : > { %652 = vmatprep.subr.bf16.mxu0 %v1064_v48 }
  0x56   : > { %653 = vmatpush2.bf16.msra.mxu0 %v1066_v49 }
  0x57   : > { %654 = vmatprep.subr.bf16.mxu0 %v1070_v50 }
  0x5a   : > { %655 = vmatpush2.bf16.msra.mxu0 %v1072_v51 }
  0x5b   : > { %656 = vmatprep.subr.bf16.mxu0 %v1076_v52 }
  0x5e   : > { %657 = vmatpush2.bf16.msra.mxu0 %v1078_v53 }
  0x5f   : > { %658 = vmatprep.subr.bf16.mxu0 %v1080_v54 }
  0x62   : > { %659 = vmatpush2.bf16.msra.mxu0 %v1082_v55 }
  0x65   : > { %661 = vmatmul.mubr.bf16.vlgmr.msra.gmra.mxu0 %v1083_v56 }
 0x107   : > { %v705_v57 = vpop.f32.mrf.mxu1 }
 0x109   : > { %v707_v58 = vpop.f32.mrf.mxu1 }
 0x10b   : > { %v709_v62 = vpop.f32.mrf.mxu1 }
 0x10d   : > { %v711_v7 = vpop.f32.mrf.mxu1 }
 0x125   : > { %v662_v60 = vpop.f32.mrf.mxu0 }
 0x126   : > { %v706_v61 = vadd.f32 %v705_v57, %v662_v60 }
 0x127   : > { %v664_v0 = vpop.f32.mrf.mxu0 }
 0x128   : > { %v714_v1 = vadd.f32 %v706_v61, %v316_v59  ;;  %v708_v2 = vadd.f32 %v707_v58, %v664_v0 }
 0x129   : > { %v666_v4 = vpop.f32.mrf.mxu0 }
 0x12a   : > { %718 = vst [vmem:[#allocation2 + $0x10] sm:$0xff] %v714_v1  ;;  %v715_v5 = vadd.f32 %v708_v2, %v317_v63  ;;  %v710_v6 = vadd.f32 %v709_v62, %v666_v4 }
 0x12b   : > { %v668_v9 = vpop.f32.mrf.mxu0 }
 0x12c   : > { %719 = vst [vmem:[#allocation2] sm:$0xff] %v715_v5  ;;  %v716_v10 = vadd.f32 %v710_v6, %v318_v3  ;;  %v712_v11 = vadd.f32 %v711_v7, %v668_v9  ;;  %725 = sbr.rel (%p955_p11) target bundleno = 320 (0x140), region = 66 }
 0x12e   : > { %720 = vst [vmem:[#allocation2 + $0x18] sm:$0xff] %v716_v10  ;;  %v717_v12 = vadd.f32 %v712_v11, %v319_v8 }
 0x130   : > { %721 = vst [vmem:[#allocation2 + $0x8] sm:$0xff] %v717_v12 }
 0x131   : > { %v732_v13 = vlaneseq  ;;  %v730_v15 = vld [vmem:[%s1281_s2] sm:$0x3]  ;;  %v726_v16 = vld [vmem:[#allocation2 + $0x10] sm:$0xff] }
 0x133   : > { %v733_v14 = vshrl.u32 %v732_v13, 7  ;;  %v727_v19 = vld [vmem:[#allocation2] sm:$0xff] }
 0x135   : > { %v734_v17 = vsub.s32 0, %v733_v14  ;;  %v738_v18 = vsub.s32 1, %v733_v14  ;;  %v728_v20 = vld [vmem:[#allocation2 + $0x18] sm:$0xff] }
 0x137   : > { %v729_v21 = vld [vmem:[#allocation2 + $0x8] sm:$0xff]  ;;  %v735_v22 = vrot.slane %v730_v15, %v734_v17  ;;  %v739_v23 = vrot.slane %v730_v15, %v738_v18 }
 0x139   : > { %v742_v24 = vadd.f32 %v735_v22, %v726_v16  ;;  %v743_v25 = vadd.f32 %v739_v23, %v727_v19  ;;  %v744_v26 = vadd.f32 %v735_v22, %v728_v20  ;;  %v745_v27 = vadd.f32 %v739_v23, %v729_v21 }
 0x13b   : > { %v746_v28 = vmax.f32 %v742_v24, 0.0  ;;  %v747_v29 = vmax.f32 %v743_v25, 0.0  ;;  %v748_v30 = vmax.f32 %v744_v26, 0.0  ;;  %v749_v31 = vmax.f32 %v745_v27, 0.0 }
 0x13d   : > { %v964_v32 = vpack.c.bf16 %v747_v29, %v746_v28  ;;  %v965_v33 = vpack.c.bf16 %v749_v31, %v748_v30 }
 0x13f   : > { %762 = vst [vmem:[%s1282_s3] sm:$0xff] %v964_v32  ;;  %763 = vst [vmem:[%s1282_s3 + $0x8] sm:$0xff] %v965_v33 }
 0x140 PF: > { %s13_s16 = sadd.s32 1, %s1124_s16   ;;  %s1283_s12 = smov %s1112_s13 }
 0x141   : > { %p10_p12 = scmp.ge.s32.totalorder %s13_s16, 8   ;;  %s1284_s13 = smov %s1183_s20 }
 0x142   : > { %s1285_s14 = smov %s1120_s15  ;;  %s1286_s15 = smov %s1288_s17 }
 0x143   :  { %12 = sbr.rel (!%p10_p12) target bundleno = 3 (0x3), region = 113 }

// kernel: siamese_forward.38
= control target key start
LH: loop header
LB: loop body
LE: loop exit
PB: predicated region body
PF: predicated region fallthrough
CT: control target
= control target key end

     0   :  { %s1330_s12 = smov 0   ;;  %s1332_s13 = smov 0   ;;  %s1597_s0 = inlined_call_operand.vmem [shape: bf16[4,2304], index: 0, kind: input, shape index: {}]   ;;  %s1598_s1 = inlined_call_operand.vmem [shape: bf16[2304,512], index: 1, kind: input, shape index: {}]   ;;  %s1599_s2 = inlined_call_operand.vmem [shape: f32[1,512], index: 2, kind: input, shape index: {}]   ;;  %s1600_s3 = inlined_call_operand.vmem [shape: bf16[4,512], index: 3, kind: output, shape index: {}]  }
   0x1   :  { %s1334_s14 = smov 0   ;;  %s1336_s15 = smov 0  }
   0x2   :  { %s1338_s16 = smov 0   ;;  %s1340_s17 = smov 0  }
   0x3   :  { %s1342_s18 = smov 0  }
   0x4 LB: > { %s25_s19 = sadd.s32 1, %s1297_s16  ;;  %s28_s20 = sadd.s32 1, %s1301_s17  ;;  %s1305_s18 = sphi %s1342_s18, %s13_s18   ;;  %s1301_s17 = sphi %s1340_s17, %s1606_s17   ;;  %s1297_s16 = sphi %s1338_s16, %s1605_s16   ;;  %s1293_s15 = sphi %s1336_s15, %s1604_s15   ;;  %s1289_s14 = sphi %s1334_s14, %s1603_s14   ;;  %s1285_s13 = sphi %s1332_s13, %s1602_s13   ;;  %s1281_s12 = sphi %s1330_s12, %s1601_s12  }
   0x5   : > { %p26_p0 = scmp.ge.s32.totalorder %s25_s19, 6  ;;  %p76_p1 = scmp.ne.s32.totalorder %s1285_s13, %s1281_s12 }
   0x6   : > { %p77_p2 = scmp.eq.s32.totalorder %s1305_s18, 0  ;;  %s69_s24 = sadd.s32 1, %s1285_s13 }
   0x7   : > { %s1608_s19 = smov (%p26_p0, %s25_s19), 0  ;;  %s1610_s20 = smov (!%p26_p0, %s28_s20), %s1301_s17 }
   0x8   : > { %p78_p3 = por %p77_p2, %p76_p1  ;;  %p30_p4 = scmp.ge.s32.totalorder %s1610_s20, 2 }
   0x9   : > { %s64_s21 = ssub.s32 %s1297_s16, %s1608_s19  ;;  %p1053_p6 = scmp.ge.s32.totalorder %s1305_s18, 12 }
   0xa   : > { %s1612_s20 = smov (%p30_p4, %s1610_s20), 0 }
   0xb   : > { %s65_s22 = ssub.s32 %s1301_s17, %s1612_s20  ;;  %156 = sbr.rel (%p1053_p6) target bundleno = 48 (0x30), region = 16 }
   0xc   : > { %s66_s23 = sor.u32 %s65_s22, %s64_s21 }
   0xd   : > { %p67_p5 = scmp.eq.s32.totalorder %s66_s23, 0 }
   0xf   : > { %s1381_s25 = scalar_select %p67_p5, %s1285_s13, %s69_s24  }
  0x10   : > { %172 = sbr.rel (!%p78_p3) target bundleno = 48 (0x30), region = 24  ;;  %s174_s26 = sand.u32 (%p78_p3), 1, %s1285_s13  }
  0x11   : > { %s1117_s27 = smul.u32 (%p78_p3), 384, %s174_s26  ;;  %s1054_s28 = sshll.u32 (%p78_p3), %s1301_s17, 1 }
  0x12   : > { %s1116_s29 = smul.u32 (%p78_p3), 192, %s1297_s16 }
  0x13   : > { %s1395_s8 = scalar_lea.vmem (%p78_p3), [#allocation3], %s1117_s27 }
  0x14   : > { %s180_s30 = sadd.s32 (%p78_p3), %s1116_s29, %s1054_s28 }
  0x15   : > { %s1056_s4 = sshll.u32 %s180_s30, 2 }
  0x16   : > { %s1390_s7 = scalar_lea.vmem %s1598_s1, %s1056_s4 }
  0x17   : > { %v305_v0 = vld [vmem:[%s1390_s7] sm:$0xff]  ;;  %v307_v1 = vld [vmem:[%s1390_s7 + $0x10] sm:$0xff] }
  0x18   : > { %v309_v2 = vld [vmem:[%s1390_s7 + $0x20] sm:$0xff]  ;;  %306 = vst [vmem:[%s1395_s8] sm:$0xff] %v305_v0  ;;  %308 = vst [vmem:[%s1395_s8 + $0x8] sm:$0xff] %v307_v1  ;;  %v311_v3 = vld [vmem:[%s1390_s7 + $0x30] sm:$0xff] }
  0x19   : > { %310 = vst [vmem:[%s1395_s8 + $0x10] sm:$0xff] %v309_v2  ;;  %v313_v4 = vld [vmem:[%s1390_s7 + $0x40] sm:$0xff]  ;;  %v315_v5 = vld [vmem:[%s1390_s7 + $0x50] sm:$0xff]  ;;  %312 = vst [vmem:[%s1395_s8 + $0x18] sm:$0xff] %v311_v3 }
  0x1a   : > { %314 = vst [vmem:[%s1395_s8 + $0x20] sm:$0xff] %v313_v4  ;;  %316 = vst [vmem:[%s1395_s8 + $0x28] sm:$0xff] %v315_v5  ;;  %v317_v6 = vld [vmem:[%s1390_s7 + $0x60] sm:$0xff]  ;;  %v319_v7 = vld [vmem:[%s1390_s7 + $0x70] sm:$0xff] }
  0x1b   : > { %v321_v8 = vld [vmem:[%s1390_s7 + $0x80] sm:$0xff]  ;;  %318 = vst [vmem:[%s1395_s8 + $0x30] sm:$0xff] %v317_v6  ;;  %320 = vst [vmem:[%s1395_s8 + $0x38] sm:$0xff] %v319_v7  ;;  %v323_v9 = vld [vmem:[%s1390_s7 + $0x90] sm:$0xff] }
  0x1c   : > { %322 = vst [vmem:[%s1395_s8 + $0x40] sm:$0xff] %v321_v8  ;;  %v325_v10 = vld [vmem:[%s1390_s7 + $0xa0] sm:$0xff]  ;;  %v327_v11 = vld [vmem:[%s1390_s7 + $0xb0] sm:$0xff]  ;;  %324 = vst [vmem:[%s1395_s8 + $0x48] sm:$0xff] %v323_v9 }
  0x1d   : > { %326 = vst [vmem:[%s1395_s8 + $0x50] sm:$0xff] %v325_v10  ;;  %328 = vst [vmem:[%s1395_s8 + $0x58] sm:$0xff] %v327_v11  ;;  %v329_v12 = vld [vmem:[%s1390_s7 + $0xc0] sm:$0xff]  ;;  %v331_v13 = vld [vmem:[%s1390_s7 + $0xd0] sm:$0xff] }
  0x1e   : > { %v333_v14 = vld [vmem:[%s1390_s7 + $0xe0] sm:$0xff]  ;;  %330 = vst [vmem:[%s1395_s8 + $0x60] sm:$0xff] %v329_v12  ;;  %332 = vst [vmem:[%s1395_s8 + $0x68] sm:$0xff] %v331_v13  ;;  %v335_v15 = vld [vmem:[%s1390_s7 + $0xf0] sm:$0xff] }
  0x1f   : > { %334 = vst [vmem:[%s1395_s8 + $0x70] sm:$0xff] %v333_v14  ;;  %v337_v16 = vld [vmem:[%s1390_s7 + $0x100] sm:$0xff]  ;;  %v339_v17 = vld [vmem:[%s1390_s7 + $0x110] sm:$0xff]  ;;  %336 = vst [vmem:[%s1395_s8 + $0x78] sm:$0xff] %v335_v15 }
  0x20   : > { %338 = vst [vmem:[%s1395_s8 + $0x80] sm:$0xff] %v337_v16  ;;  %340 = vst [vmem:[%s1395_s8 + $0x88] sm:$0xff] %v339_v17  ;;  %v341_v18 = vld [vmem:[%s1390_s7 + $0x120] sm:$0xff]  ;;  %v343_v19 = vld [vmem:[%s1390_s7 + $0x130] sm:$0xff] }
  0x21   : > { %v345_v20 = vld [vmem:[%s1390_s7 + $0x140] sm:$0xff]  ;;  %342 = vst [vmem:[%s1395_s8 + $0x90] sm:$0xff] %v341_v18  ;;  %344 = vst [vmem:[%s1395_s8 + $0x98] sm:$0xff] %v343_v19  ;;  %v347_v21 = vld [vmem:[%s1390_s7 + $0x150] sm:$0xff] }
  0x22   : > { %346 = vst [vmem:[%s1395_s8 + $0xa0] sm:$0xff] %v345_v20  ;;  %v349_v22 = vld [vmem:[%s1390_s7 + $0x160] sm:$0xff]  ;;  %v351_v23 = vld [vmem:[%s1390_s7 + $0x170] sm:$0xff]  ;;  %348 = vst [vmem:[%s1395_s8 + $0xa8] sm:$0xff] %v347_v21 }
  0x23   : > { %350 = vst [vmem:[%s1395_s8 + $0xb0] sm:$0xff] %v349_v22  ;;  %352 = vst [vmem:[%s1395_s8 + $0xb8] sm:$0xff] %v351_v23  ;;  %v353_v24 = vld [vmem:[%s1390_s7 + $0x180] sm:$0xff]  ;;  %v355_v25 = vld [vmem:[%s1390_s7 + $0x190] sm:$0xff] }
  0x24   : > { %v357_v26 = vld [vmem:[%s1390_s7 + $0x1a0] sm:$0xff]  ;;  %354 = vst [vmem:[%s1395_s8 + $0xc0] sm:$0xff] %v353_v24  ;;  %356 = vst [vmem:[%s1395_s8 + $0xc8] sm:$0xff] %v355_v25  ;;  %v359_v27 = vld [vmem:[%s1390_s7 + $0x1b0] sm:$0xff] }
  0x25   : > { %358 = vst [vmem:[%s1395_s8 + $0xd0] sm:$0xff] %v357_v26  ;;  %v361_v28 = vld [vmem:[%s1390_s7 + $0x1c0] sm:$0xff]  ;;  %v363_v29 = vld [vmem:[%s1390_s7 + $0x1d0] sm:$0xff]  ;;  %360 = vst [vmem:[%s1395_s8 + $0xd8] sm:$0xff] %v359_v27 }
  0x26   : > { %362 = vst [vmem:[%s1395_s8 + $0xe0] sm:$0xff] %v361_v28  ;;  %364 = vst [vmem:[%s1395_s8 + $0xe8] sm:$0xff] %v363_v29  ;;  %v365_v30 = vld [vmem:[%s1390_s7 + $0x1e0] sm:$0xff]  ;;  %v367_v31 = vld [vmem:[%s1390_s7 + $0x1f0] sm:$0xff] }
  0x27   : > { %v369_v32 = vld [vmem:[%s1390_s7 + $0x200] sm:$0xff]  ;;  %366 = vst [vmem:[%s1395_s8 + $0xf0] sm:$0xff] %v365_v30  ;;  %368 = vst [vmem:[%s1395_s8 + $0xf8] sm:$0xff] %v367_v31  ;;  %v371_v33 = vld [vmem:[%s1390_s7 + $0x210] sm:$0xff] }
  0x28   : > { %370 = vst [vmem:[%s1395_s8 + $0x100] sm:$0xff] %v369_v32  ;;  %v373_v34 = vld [vmem:[%s1390_s7 + $0x220] sm:$0xff]  ;;  %v375_v35 = vld [vmem:[%s1390_s7 + $0x230] sm:$0xff]  ;;  %372 = vst [vmem:[%s1395_s8 + $0x108] sm:$0xff] %v371_v33 }
  0x29   : > { %374 = vst [vmem:[%s1395_s8 + $0x110] sm:$0xff] %v373_v34  ;;  %376 = vst [vmem:[%s1395_s8 + $0x118] sm:$0xff] %v375_v35  ;;  %v377_v36 = vld [vmem:[%s1390_s7 + $0x240] sm:$0xff]  ;;  %v379_v37 = vld [vmem:[%s1390_s7 + $0x250] sm:$0xff] }
  0x2a   : > { %v381_v38 = vld [vmem:[%s1390_s7 + $0x260] sm:$0xff]  ;;  %378 = vst [vmem:[%s1395_s8 + $0x120] sm:$0xff] %v377_v36  ;;  %380 = vst [vmem:[%s1395_s8 + $0x128] sm:$0xff] %v379_v37  ;;  %v383_v39 = vld [vmem:[%s1390_s7 + $0x270] sm:$0xff] }
  0x2b   : > { %382 = vst [vmem:[%s1395_s8 + $0x130] sm:$0xff] %v381_v38  ;;  %v385_v40 = vld [vmem:[%s1390_s7 + $0x280] sm:$0xff]  ;;  %v387_v41 = vld [vmem:[%s1390_s7 + $0x290] sm:$0xff]  ;;  %384 = vst [vmem:[%s1395_s8 + $0x138] sm:$0xff] %v383_v39 }
  0x2c   : > { %386 = vst [vmem:[%s1395_s8 + $0x140] sm:$0xff] %v385_v40  ;;  %388 = vst [vmem:[%s1395_s8 + $0x148] sm:$0xff] %v387_v41  ;;  %v389_v42 = vld [vmem:[%s1390_s7 + $0x2a0] sm:$0xff]  ;;  %v391_v43 = vld [vmem:[%s1390_s7 + $0x2b0] sm:$0xff] }
  0x2d   : > { %v393_v44 = vld [vmem:[%s1390_s7 + $0x2c0] sm:$0xff]  ;;  %390 = vst [vmem:[%s1395_s8 + $0x150] sm:$0xff] %v389_v42  ;;  %392 = vst [vmem:[%s1395_s8 + $0x158] sm:$0xff] %v391_v43  ;;  %v395_v45 = vld [vmem:[%s1390_s7 + $0x2d0] sm:$0xff] }
  0x2e   : > { %394 = vst [vmem:[%s1395_s8 + $0x160] sm:$0xff] %v393_v44  ;;  %v397_v46 = vld [vmem:[%s1390_s7 + $0x2e0] sm:$0xff]  ;;  %v399_v47 = vld [vmem:[%s1390_s7 + $0x2f0] sm:$0xff]  ;;  %396 = vst [vmem:[%s1395_s8 + $0x168] sm:$0xff] %v395_v45 }
  0x2f   : > { %398 = vst [vmem:[%s1395_s8 + $0x170] sm:$0xff] %v397_v46  ;;  %400 = vst [vmem:[%s1395_s8 + $0x178] sm:$0xff] %v399_v47 }
  0x30 PF: > { %p1057_p7 = scmp.ge.s32.totalorder %s1305_s18, 1  ;;  %p413_p8 = scmp.lt.s32.totalorder %s1305_s18, 13 }
  0x32   : > { %p414_p9 = pnand %p1057_p7, %p413_p8 }
  0x33   : > { %s420_s9 = sand.u32 (!%p414_p9), 1, %s1281_s12   ;;  %s460_s10 = smul.u32 (!%p414_p9), 3, %s1289_s14 }
  0x34   : > { %417 = sbr.rel (%p414_p9) target bundleno = 350 (0x15e), region = 66  ;;  %s1059_s21 = sshll.u32 (!%p414_p9), %s1293_s15, 1 }
  0x35   : > { %s1118_s11 = smul.u32 (!%p414_p9), 384, %s420_s9  ;;  %p463_p10 = scmp.lt.s32.totalorder (!%p414_p9), %s460_s10, 17 }
  0x36   : > { %p473_p11 = scmp.lt.s32.totalorder (!%p414_p9), %s1059_s21, 3  ;;  %p1062_p12 = scmp.ne.s32.totalorder (!%p414_p9), %s1289_s14, 0 }
  0x37   : > { %s1512_s5 = scalar_lea.vmem (!%p414_p9), [#allocation3], %s1118_s11 }
  0x39   : > { %s1614_s10 = smov (!%p463_p10, %s460_s10), 17  ;;  %s1616_s21 = smov (!%p473_p11, %s1059_s21), 3 }
  0x3a   : > { %s1058_s22 = sshll.u32 %s1614_s10, 1  ;;  %s475_s12 = scalar_lea.vmem %s1599_s2, %s1616_s21 }
  0x3b   : > { %s1500_s26 = scalar_lea.vmem %s1597_s0, %s1058_s22  ;;  %s1061_s29 = sshll.u32 %s1616_s21, 1 }
  0x3c   : > { %s1510_s4 = scalar_lea.vmem %s1600_s3, %s1061_s29  ;;  %491 = sbr.rel (%p1062_p12) target bundleno = 67 (0x43), region = 74 }
  0x41   : > { %v1307_v48 = vmov 0.0  }
  0x42   : > { %492 = vst [vmem:[#allocation2] sm:$0xff] %v1307_v48 }
  0x43 PF: > { %v1178_v49 = vld [vmem:[%s1512_s5 + $0x74] ss:$8 sps:$4 sm:$0xff]   ;;  %v1180_v50 = vld [vmem:[%s1512_s5 + $0x70] ss:$8 sps:$4 sm:$0xff]   ;;  %v1308_v51 = vmov 0   ;;  %v548_v9 = vlaneseq  ;;  %p1111_p13 = scmp.ne.s32.totalorder %s1289_s14, 5 }
  0x44   : > { %876 = vmatprep.mubr.bf16.mxu1 %v1308_v51  ;;  %803 = vmatprep.subr.bf16.mxu0 %v1178_v49  ;;  %v1181_v52 = vld [vmem:[%s1512_s5 + $0x64] ss:$8 sps:$4 sm:$0xff]   ;;  %v1183_v53 = vld [vmem:[%s1512_s5 + $0x60] ss:$8 sps:$4 sm:$0xff]   ;;  %v1184_v54 = vld [vmem:[%s1512_s5 + $0x54] ss:$8 sps:$4 sm:$0xff]  }
  0x45   : > { %804 = vmatpush1.bf16.msra.mxu0 %v1180_v50  ;;  %v1186_v55 = vld [vmem:[%s1512_s5 + $0x50] ss:$8 sps:$4 sm:$0xff]   ;;  %v1187_v56 = vld [vmem:[%s1512_s5 + $0x44] ss:$8 sps:$4 sm:$0xff]   ;;  %v1199_v57 = vld [vmem:[%s1512_s5 + $0x174] ss:$8 sps:$4 sm:$0xff]  }
  0x46   : > { %805 = vmatprep.subr.bf16.mxu0 %v1181_v52  ;;  %v1201_v58 = vld [vmem:[%s1512_s5 + $0x170] ss:$8 sps:$4 sm:$0xff]   ;;  %v1189_v59 = vld [vmem:[%s1512_s5 + $0x40] ss:$8 sps:$4 sm:$0xff]   ;;  %v1190_v60 = vld [vmem:[%s1512_s5 + $0x34] ss:$8 sps:$4 sm:$0xff]   ;;  %844 = vmatprep.subr.bf16.mxu1 %v1199_v57 }
  0x47   : > { %v1205_v61 = vld [vmem:[%s1512_s5 + $0x164] ss:$8 sps:$4 sm:$0xff]   ;;  %845 = vmatpush1.bf16.msra.mxu1 %v1201_v58  ;;  %v1207_v62 = vld [vmem:[%s1512_s5 + $0x160] ss:$8 sps:$4 sm:$0xff]   ;;  %v1192_v63 = vld [vmem:[%s1512_s5 + $0x30] ss:$8 sps:$4 sm:$0xff]  }
  0x48   : > { %846 = vmatprep.subr.bf16.mxu1 %v1205_v61  ;;  %v1211_v0 = vld [vmem:[%s1512_s5 + $0x154] ss:$8 sps:$4 sm:$0xff]   ;;  %v1193_v1 = vld [vmem:[%s1512_s5 + $0x24] ss:$8 sps:$4 sm:$0xff]   ;;  %v1213_v2 = vld [vmem:[%s1512_s5 + $0x150] ss:$8 sps:$4 sm:$0xff]  }
  0x49   : > { %806 = vmatpush1.bf16.msra.mxu0 %v1183_v53  ;;  %v1217_v3 = vld [vmem:[%s1512_s5 + $0x144] ss:$8 sps:$4 sm:$0xff]   ;;  %v1195_v4 = vld [vmem:[%s1512_s5 + $0x20] ss:$8 sps:$4 sm:$0xff]   ;;  %v1196_v5 = vld [vmem:[%s1512_s5 + $0x14] ss:$8 sps:$4 sm:$0xff]  }
  0x4a   : > { %807 = vmatprep.subr.bf16.mxu0 %v1184_v54  ;;  %v1219_v6 = vld [vmem:[%s1512_s5 + $0x140] ss:$8 sps:$4 sm:$0xff]   ;;  %v1309_v7 = vmov 1983009808   ;;  %v1223_v10 = vld [vmem:[%s1512_s5 + $0x134] ss:$8 sps:$4 sm:$0xff]  }
  0x4b   : > { %847 = vmatpush1.bf16.msra.mxu1 %v1207_v62  ;;  %v546_v8 = vunpack.c.l.s4 %v1309_v7  ;;  %v1198_v11 = vld [vmem:[%s1512_s5 + $0x10] ss:$8 sps:$4 sm:$0xff]   ;;  %v1202_v12 = vld [vmem:[%s1512_s5 + $0x4] ss:$8 sps:$4 sm:$0xff]   ;;  %v1540_v15 = vshrl.u32 %v548_v9, 7 }
  0x4c   : > { %848 = vmatprep.subr.bf16.mxu1 %v1211_v0  ;;  %v1225_v13 = vld [vmem:[%s1512_s5 + $0x130] ss:$8 sps:$4 sm:$0xff]   ;;  %v1229_v16 = vld [vmem:[%s1512_s5 + $0x124] ss:$8 sps:$4 sm:$0xff]   ;;  %v1204_v17 = vld [vmem:[%s1512_s5] ss:$8 sps:$4 sm:$0xff]  }
  0x4d   : > { %808 = vmatpush1.bf16.msra.mxu0 %v1186_v55  ;;  %v547_v14 = vunpack.c.0.s8 %v546_v8  ;;  %v1208_v18 = vld [vmem:[%s1512_s5 + $0xf4] ss:$8 sps:$4 sm:$0xff]   ;;  %v1231_v19 = vld [vmem:[%s1512_s5 + $0x120] ss:$8 sps:$4 sm:$0xff]   ;;  %v1210_v23 = vld [vmem:[%s1512_s5 + $0xf0] ss:$8 sps:$4 sm:$0xff]  }
  0x4e   : > { %809 = vmatprep.subr.bf16.mxu0 %v1187_v56  ;;  %v1235_v21 = vld [vmem:[%s1512_s5 + $0x114] ss:$8 sps:$4 sm:$0xff]   ;;  %v1214_v25 = vld [vmem:[%s1512_s5 + $0xe4] ss:$8 sps:$4 sm:$0xff]   ;;  %v1237_v26 = vld [vmem:[%s1512_s5 + $0x110] ss:$8 sps:$4 sm:$0xff]  }
  0x4f   : > { %849 = vmatpush1.bf16.msra.mxu1 %v1213_v2  ;;  %v550_v20 = vsub.s32 %v547_v14, %v1540_v15  ;;  %v494_v22 = vld [vmem:[%s1500_s26] sm:$0x3f]  ;;  %v1241_v28 = vld [vmem:[%s1512_s5 + $0x104] ss:$8 sps:$4 sm:$0xff]   ;;  %v1216_v29 = vld [vmem:[%s1512_s5 + $0xe0] ss:$8 sps:$4 sm:$0xff]  }
  0x50   : > { %850 = vmatprep.subr.bf16.mxu1 %v1217_v3  ;;  %v1220_v30 = vld [vmem:[%s1512_s5 + $0xd4] ss:$8 sps:$4 sm:$0xff]   ;;  %v544_v31 = vcombine.high %v494_v22, %v494_v22  ;;  %v1243_v32 = vld [vmem:[%s1512_s5 + $0x100] ss:$8 sps:$4 sm:$0xff]   ;;  %v1222_v33 = vld [vmem:[%s1512_s5 + $0xd0] ss:$8 sps:$4 sm:$0xff]  }
  0x51   : > { %810 = vmatpush1.bf16.msra.mxu0 %v1189_v59  ;;  %v551_v24 = vrot.slane %v494_v22, %v550_v20  ;;  %v1226_v34 = vld [vmem:[%s1512_s5 + $0xc4] ss:$8 sps:$4 sm:$0xff]   ;;  %v1228_v36 = vld [vmem:[%s1512_s5 + $0xc0] ss:$8 sps:$4 sm:$0xff]   ;;  %v1232_v37 = vld [vmem:[%s1512_s5 + $0xb4] ss:$8 sps:$4 sm:$0xff]  }
  0x52   : > { %811 = vmatprep.subr.bf16.mxu0 %v1190_v60  ;;  %v558_v35 = vrot.slane %v544_v31, %v550_v20  ;;  %v1234_v38 = vld [vmem:[%s1512_s5 + $0xb0] ss:$8 sps:$4 sm:$0xff]   ;;  %v1238_v39 = vld [vmem:[%s1512_s5 + $0xa4] ss:$8 sps:$4 sm:$0xff]   ;;  %v1240_v40 = vld [vmem:[%s1512_s5 + $0xa0] ss:$8 sps:$4 sm:$0xff]  }
  0x53   : > { %851 = vmatpush1.bf16.msra.mxu1 %v1219_v6  ;;  %v559_v27 = vcombine.high %v551_v24, %v551_v24  ;;  %v1244_v41 = vld [vmem:[%s1512_s5 + $0x94] ss:$8 sps:$4 sm:$0xff]   ;;  %v1246_v42 = vld [vmem:[%s1512_s5 + $0x90] ss:$8 sps:$4 sm:$0xff]   ;;  %v1248_v43 = vld [vmem:[%s1512_s5 + $0x84] ss:$8 sps:$4 sm:$0xff]  }
  0x54   : > { %852 = vmatprep.subr.bf16.mxu1 %v1223_v10  ;;  %v1250_v44 = vld [vmem:[%s1512_s5 + $0x80] ss:$8 sps:$4 sm:$0xff]   ;;  %v493_v53 = vld [vmem:[#allocation2] sm:$0xff] }
  0x55   : > { %812 = vmatpush1.bf16.msra.mxu0 %v1192_v63  ;;  %835 = vmatprep.mubr.bf16.mxu0 %v559_v27 }
  0x56   : > { %813 = vmatprep.subr.bf16.mxu0 %v1193_v1 }
  0x57   : > { %853 = vmatpush1.bf16.msra.mxu1 %v1225_v13 }
  0x58   : > { %854 = vmatprep.subr.bf16.mxu1 %v1229_v16 }
  0x59   : > { %814 = vmatpush1.bf16.msra.mxu0 %v1195_v4 }
  0x5a   : > { %815 = vmatprep.subr.bf16.mxu0 %v1196_v5 }
  0x5b   : > { %855 = vmatpush1.bf16.msra.mxu1 %v1231_v19 }
  0x5c   : > { %856 = vmatprep.subr.bf16.mxu1 %v1235_v21 }
  0x5d   : > { %816 = vmatpush1.bf16.msra.mxu0 %v1198_v11 }
  0x5e   : > { %817 = vmatprep.subr.bf16.mxu0 %v1202_v12 }
  0x5f   : > { %857 = vmatpush1.bf16.msra.mxu1 %v1237_v26 }
  0x60   : > { %858 = vmatprep.subr.bf16.mxu1 %v1241_v28 }
  0x61   : > { %818 = vmatpush1.bf16.msra.mxu0 %v1204_v17 }
  0x62   : > { %819 = vmatprep.subr.bf16.mxu0 %v1208_v18 }
  0x63   : > { %859 = vmatpush1.bf16.msra.mxu1 %v1243_v32 }
  0x65   : > { %820 = vmatpush2.bf16.msra.mxu0 %v1210_v23 }
  0x66   : > { %821 = vmatprep.subr.bf16.mxu0 %v1214_v25  ;;  %877 = vmatmul.mubr.bf16.vlgmr.msra.gmra.mxu1 %v558_v35 }
  0x69   : > { %822 = vmatpush2.bf16.msra.mxu0 %v1216_v29 }
  0x6a   : > { %823 = vmatprep.subr.bf16.mxu0 %v1220_v30 }
  0x6d   : > { %824 = vmatpush2.bf16.msra.mxu0 %v1222_v33 }
  0x6e   : > { %825 = vmatprep.subr.bf16.mxu0 %v1226_v34 }
  0x71   : > { %826 = vmatpush2.bf16.msra.mxu0 %v1228_v36 }
  0x72   : > { %827 = vmatprep.subr.bf16.mxu0 %v1232_v37 }
  0x75   : > { %828 = vmatpush2.bf16.msra.mxu0 %v1234_v38 }
  0x76   : > { %829 = vmatprep.subr.bf16.mxu0 %v1238_v39 }
  0x79   : > { %830 = vmatpush2.bf16.msra.mxu0 %v1240_v40 }
  0x7a   : > { %831 = vmatprep.subr.bf16.mxu0 %v1244_v41 }
  0x7d   : > { %832 = vmatpush2.bf16.msra.mxu0 %v1246_v42 }
  0x7e   : > { %833 = vmatprep.subr.bf16.mxu0 %v1248_v43 }
  0x81   : > { %834 = vmatpush2.bf16.msra.mxu0 %v1250_v44 }
  0x84   : > { %836 = vmatmul.mubr.bf16.vlgmr.msra.gmra.mxu0 %v551_v24 }
 0x126   : > { %v878_v45 = vpop.f32.mrf.mxu1 }
 0x128   : > { %v880_v46 = vpop.f32.mrf.mxu1 }
 0x12a   : > { %v882_v47 = vpop.f32.mrf.mxu1 }
 0x12c   : > { %v883_v48 = vpop.f32.mrf.mxu1 }
 0x144   : > { %v837_v49 = vpop.f32.mrf.mxu0 }
 0x145   : > { %v879_v51 = vadd.f32 %v878_v45, %v837_v49 }
 0x146   : > { %v839_v50 = vpop.f32.mrf.mxu0 }
 0x147   : > { %v881_v52 = vadd.f32 %v880_v46, %v839_v50 }
 0x148   : > { %v841_v54 = vpop.f32.mrf.mxu0 }
 0x149   : > { %v887_v55 = vcombine.low %v879_v51, %v881_v52  ;;  %894 = sbr.rel (%p1111_p13) target bundleno = 350 (0x15e), region = 78 }
 0x14a   : > { %v842_v56 = vpop.f32.mrf.mxu0 }
 0x14b   : > { %v889_v57 = vadd.f32 %v887_v55, %v493_v53 }
 0x14d   : > { %890 = vst [vmem:[#allocation2] sm:$0xff] %v889_v57 }
 0x14e   : > { %v896_v58 = vld [vmem:[%s475_s12] sm:$0x3]  ;;  %v900_v59 = vsub.s32 0, %v1540_v15  ;;  %v904_v60 = vsub.s32 1, %v1540_v15 }
 0x150   : > { %v901_v61 = vrot.slane %v896_v58, %v900_v59  ;;  %v905_v62 = vrot.slane %v896_v58, %v904_v60 }
 0x152   : > { %v906_v0 = vcombine.low %v901_v61, %v905_v62 }
 0x154   : > { %v895_v63 = vld [vmem:[#allocation2] sm:$0xff] }
 0x155   : > { %v908_v1 = vadd.f32 %v906_v0, %v895_v63 }
 0x157   : > { %v909_v2 = vmax.f32 %v908_v1, 0.0 }
 0x159   : > { %v911_v3 = vcombine.high %v909_v2, %v909_v2 }
 0x15b   : > { %v1112_v4 = vpack.c.bf16 %v911_v3, %v909_v2 }
 0x15d   : > { %1113 = vst.sshfl [vmem:[%s1510_s4] sm:$0x33 pattern:$0x76325410] %v1112_v4 }
 0x15e PF: > { %s13_s18 = sadd.s32 1, %s1305_s18   ;;  %s1601_s12 = smov %s1285_s13 }
 0x15f   : > { %p10_p0 = scmp.ge.s32.totalorder %s13_s18, 14   ;;  %s1602_s13 = smov %s1381_s25 }
 0x160   : > { %s1603_s14 = smov %s1297_s16  ;;  %s1604_s15 = smov %s1301_s17 }
 0x161   : > { %s1605_s16 = smov %s1608_s19  ;;  %s1606_s17 = smov %s1612_s20 }
 0x162   :  { %12 = sbr.rel (!%p10_p0) target bundleno = 4 (0x4), region = 119 }

// kernel: siamese_forward.37
= control target key start
LH: loop header
LB: loop body
LE: loop exit
PB: predicated region body
PF: predicated region fallthrough
CT: control target
= control target key end

     0   :  { %s1036_s12 = smov 0   ;;  %s1038_s13 = smov 0   ;;  %s1214_s0 = inlined_call_operand.vmem [shape: bf16[4,256], index: 0, kind: input, shape index: {}]   ;;  %s1215_s1 = inlined_call_operand.vmem [shape: bf16[256,512], index: 1, kind: input, shape index: {}]   ;;  %s1216_s2 = inlined_call_operand.vmem [shape: f32[1,512], index: 2, kind: input, shape index: {}]   ;;  %s1217_s3 = inlined_call_operand.vmem [shape: bf16[4,512], index: 3, kind: output, shape index: {}]  }
   0x1   :  { %s1040_s14 = smov 0   ;;  %s1042_s15 = smov 0  }
   0x2   :  { %s1044_s16 = smov 0  }
   0x3 LB: > { %s28_s17 = sadd.s32 1, %s1010_s15  ;;  %p76_p1 = scmp.ne.s32.totalorder %s1002_s13, %s998_s12  ;;  %s1014_s16 = sphi %s1044_s16, %s13_s16   ;;  %s1010_s15 = sphi %s1042_s15, %s1221_s15   ;;  %s1006_s14 = sphi %s1040_s14, %s1220_s14   ;;  %s1002_s13 = sphi %s1038_s13, %s1219_s13   ;;  %s998_s12 = sphi %s1036_s12, %s1218_s12  }
   0x4   : > { %p30_p0 = scmp.ge.s32.totalorder %s28_s17, 2  ;;  %p77_p2 = scmp.eq.s32.totalorder %s1014_s16, 0 }
   0x5   : > { %s69_s19 = sadd.s32 1, %s1002_s13  ;;  %p841_p5 = scmp.ge.s32.totalorder %s1014_s16, 2 }
   0x6   : > { %s1223_s17 = smov (%p30_p0, %s28_s17), 0  ;;  %p78_p3 = por %p77_p2, %p76_p1 }
   0x7   : > { %s65_s18 = ssub.s32 %s1010_s15, %s1223_s17  ;;  %169 = sbr.rel (%p841_p5) target bundleno = 32 (0x20), region = 20 }
   0x8   : > { %p67_p4 = scmp.eq.s32.totalorder %s65_s18, 0 }
   0xa   : > { %s1071_s20 = scalar_select %p67_p4, %s1002_s13, %s69_s19  }
   0xc   : > { %172 = sbr.rel (!%p78_p3) target bundleno = 32 (0x20), region = 24  ;;  %s174_s21 = sand.u32 (%p78_p3), 1, %s1002_s13  }
   0xd   : > { %s887_s22 = sshll.u32 (%p78_p3), %s1010_s15, 3  ;;  %s842_s23 = sshll.u32 (%p78_p3), %s174_s21, 8 }
   0xe   : > { %s1079_s26 = scalar_lea.vmem (%p78_p3), %s1215_s1, %s887_s22  ;;  %s1084_s27 = scalar_lea.vmem (%p78_p3), [#allocation3], %s842_s23 }
   0xf   : > { %v273_v0 = vld [vmem:[%s1079_s26] sm:$0xff] (%p78_p3)  ;;  %v275_v1 = vld [vmem:[%s1079_s26 + $0x10] sm:$0xff] (%p78_p3) }
  0x10   : > { %v277_v2 = vld [vmem:[%s1079_s26 + $0x20] sm:$0xff] (%p78_p3)  ;;  %274 = vst [vmem:[%s1084_s27] sm:$0xff] (%p78_p3), %v273_v0  ;;  %276 = vst [vmem:[%s1084_s27 + $0x8] sm:$0xff] (%p78_p3), %v275_v1  ;;  %v279_v3 = vld [vmem:[%s1079_s26 + $0x30] sm:$0xff] (%p78_p3) }
  0x11   : > { %278 = vst [vmem:[%s1084_s27 + $0x10] sm:$0xff] %v277_v2  ;;  %v281_v4 = vld [vmem:[%s1079_s26 + $0x40] sm:$0xff]  ;;  %v283_v5 = vld [vmem:[%s1079_s26 + $0x50] sm:$0xff]  ;;  %280 = vst [vmem:[%s1084_s27 + $0x18] sm:$0xff] %v279_v3 }
  0x12   : > { %282 = vst [vmem:[%s1084_s27 + $0x20] sm:$0xff] %v281_v4  ;;  %284 = vst [vmem:[%s1084_s27 + $0x28] sm:$0xff] %v283_v5  ;;  %v285_v6 = vld [vmem:[%s1079_s26 + $0x60] sm:$0xff]  ;;  %v287_v7 = vld [vmem:[%s1079_s26 + $0x70] sm:$0xff] }
  0x13   : > { %v289_v8 = vld [vmem:[%s1079_s26 + $0x80] sm:$0xff]  ;;  %286 = vst [vmem:[%s1084_s27 + $0x30] sm:$0xff] %v285_v6  ;;  %288 = vst [vmem:[%s1084_s27 + $0x38] sm:$0xff] %v287_v7  ;;  %v291_v9 = vld [vmem:[%s1079_s26 + $0x90] sm:$0xff] }
  0x14   : > { %290 = vst [vmem:[%s1084_s27 + $0x40] sm:$0xff] %v289_v8  ;;  %v293_v10 = vld [vmem:[%s1079_s26 + $0xa0] sm:$0xff]  ;;  %v295_v11 = vld [vmem:[%s1079_s26 + $0xb0] sm:$0xff]  ;;  %292 = vst [vmem:[%s1084_s27 + $0x48] sm:$0xff] %v291_v9 }
  0x15   : > { %294 = vst [vmem:[%s1084_s27 + $0x50] sm:$0xff] %v293_v10  ;;  %296 = vst [vmem:[%s1084_s27 + $0x58] sm:$0xff] %v295_v11  ;;  %v297_v12 = vld [vmem:[%s1079_s26 + $0xc0] sm:$0xff]  ;;  %v299_v13 = vld [vmem:[%s1079_s26 + $0xd0] sm:$0xff] }
  0x16   : > { %v301_v14 = vld [vmem:[%s1079_s26 + $0xe0] sm:$0xff]  ;;  %298 = vst [vmem:[%s1084_s27 + $0x60] sm:$0xff] %v297_v12  ;;  %300 = vst [vmem:[%s1084_s27 + $0x68] sm:$0xff] %v299_v13  ;;  %v303_v15 = vld [vmem:[%s1079_s26 + $0xf0] sm:$0xff] }
  0x17   : > { %302 = vst [vmem:[%s1084_s27 + $0x70] sm:$0xff] %v301_v14  ;;  %v305_v16 = vld [vmem:[%s1079_s26 + $0x100] sm:$0xff]  ;;  %v307_v17 = vld [vmem:[%s1079_s26 + $0x110] sm:$0xff]  ;;  %304 = vst [vmem:[%s1084_s27 + $0x78] sm:$0xff] %v303_v15 }
  0x18   : > { %306 = vst [vmem:[%s1084_s27 + $0x80] sm:$0xff] %v305_v16  ;;  %308 = vst [vmem:[%s1084_s27 + $0x88] sm:$0xff] %v307_v17  ;;  %v309_v18 = vld [vmem:[%s1079_s26 + $0x120] sm:$0xff]  ;;  %v311_v19 = vld [vmem:[%s1079_s26 + $0x130] sm:$0xff] }
  0x19   : > { %v313_v20 = vld [vmem:[%s1079_s26 + $0x140] sm:$0xff]  ;;  %310 = vst [vmem:[%s1084_s27 + $0x90] sm:$0xff] %v309_v18  ;;  %312 = vst [vmem:[%s1084_s27 + $0x98] sm:$0xff] %v311_v19  ;;  %v315_v21 = vld [vmem:[%s1079_s26 + $0x150] sm:$0xff] }
  0x1a   : > { %314 = vst [vmem:[%s1084_s27 + $0xa0] sm:$0xff] %v313_v20  ;;  %v317_v22 = vld [vmem:[%s1079_s26 + $0x160] sm:$0xff]  ;;  %v319_v23 = vld [vmem:[%s1079_s26 + $0x170] sm:$0xff]  ;;  %316 = vst [vmem:[%s1084_s27 + $0xa8] sm:$0xff] %v315_v21 }
  0x1b   : > { %318 = vst [vmem:[%s1084_s27 + $0xb0] sm:$0xff] %v317_v22  ;;  %320 = vst [vmem:[%s1084_s27 + $0xb8] sm:$0xff] %v319_v23  ;;  %v321_v24 = vld [vmem:[%s1079_s26 + $0x180] sm:$0xff]  ;;  %v323_v25 = vld [vmem:[%s1079_s26 + $0x190] sm:$0xff] }
  0x1c   : > { %v325_v26 = vld [vmem:[%s1079_s26 + $0x1a0] sm:$0xff]  ;;  %322 = vst [vmem:[%s1084_s27 + $0xc0] sm:$0xff] %v321_v24  ;;  %324 = vst [vmem:[%s1084_s27 + $0xc8] sm:$0xff] %v323_v25  ;;  %v327_v27 = vld [vmem:[%s1079_s26 + $0x1b0] sm:$0xff] }
  0x1d   : > { %326 = vst [vmem:[%s1084_s27 + $0xd0] sm:$0xff] %v325_v26  ;;  %v329_v28 = vld [vmem:[%s1079_s26 + $0x1c0] sm:$0xff]  ;;  %v331_v29 = vld [vmem:[%s1079_s26 + $0x1d0] sm:$0xff]  ;;  %328 = vst [vmem:[%s1084_s27 + $0xd8] sm:$0xff] %v327_v27 }
  0x1e   : > { %330 = vst [vmem:[%s1084_s27 + $0xe0] sm:$0xff] %v329_v28  ;;  %332 = vst [vmem:[%s1084_s27 + $0xe8] sm:$0xff] %v331_v29  ;;  %v333_v30 = vld [vmem:[%s1079_s26 + $0x1e0] sm:$0xff]  ;;  %v335_v31 = vld [vmem:[%s1079_s26 + $0x1f0] sm:$0xff] }
  0x1f   : > { %334 = vst [vmem:[%s1084_s27 + $0xf0] sm:$0xff] %v333_v30  ;;  %336 = vst [vmem:[%s1084_s27 + $0xf8] sm:$0xff] %v335_v31 }
  0x20 PF: > { %p845_p6 = scmp.ge.s32.totalorder %s1014_s16, 1  ;;  %p349_p7 = scmp.lt.s32.totalorder %s1014_s16, 3 }
  0x22   : > { %p350_p8 = pnand %p845_p6, %p349_p7 }
  0x23   : > { %s356_s28 = sand.u32 (!%p350_p8), 1, %s998_s12   ;;  %s847_s6 = sshll.u32 (!%p350_p8), %s1006_s14, 1 }
  0x24   : > { %353 = sbr.rel (%p350_p8) target bundleno = 310 (0x136), region = 66  ;;  %s846_s4 = sshll.u32 (!%p350_p8), %s356_s28, 8 }
  0x25   : > { %s1157_s5 = scalar_lea.vmem (!%p350_p8), [#allocation3], %s846_s4  ;;  %p409_p9 = scmp.lt.s32.totalorder (!%p350_p8), %s847_s6, 3 }
  0x29   : > { %v1153_v32 = vld.sshfl [vmem:[%s1214_s0] sm:$0x33 pattern:$0x76325410]  ;;  %v928_v34 = vld [vmem:[%s1157_s5 + $0x74] ss:$8 sps:$4 sm:$0xff]   ;;  %v686_v2 = vlaneseq }
  0x2a   : > { %v470_v33 = vcombine.high %v1153_v32, %v1153_v32  ;;  %v930_v35 = vld [vmem:[%s1157_s5 + $0x70] ss:$8 sps:$4 sm:$0xff]   ;;  %633 = vmatprep.subr.bf16.mxu0 %v928_v34  ;;  %v931_v36 = vld [vmem:[%s1157_s5 + $0x64] ss:$8 sps:$4 sm:$0xff]   ;;  %v933_v37 = vld [vmem:[%s1157_s5 + $0x60] ss:$8 sps:$4 sm:$0xff]  }
  0x2b   : > { %634 = vmatpush1.bf16.msra.mxu0 %v930_v35  ;;  %v934_v38 = vld [vmem:[%s1157_s5 + $0x54] ss:$8 sps:$4 sm:$0xff]   ;;  %v936_v39 = vld [vmem:[%s1157_s5 + $0x50] ss:$8 sps:$4 sm:$0xff]   ;;  %v937_v40 = vld [vmem:[%s1157_s5 + $0x44] ss:$8 sps:$4 sm:$0xff]  }
  0x2c   : > { %665 = vmatprep.mubr.bf16.mxu0 %v470_v33  ;;  %635 = vmatprep.subr.bf16.mxu0 %v931_v36  ;;  %v939_v41 = vld [vmem:[%s1157_s5 + $0x40] ss:$8 sps:$4 sm:$0xff]   ;;  %v940_v42 = vld [vmem:[%s1157_s5 + $0x34] ss:$8 sps:$4 sm:$0xff]   ;;  %v942_v43 = vld [vmem:[%s1157_s5 + $0x30] ss:$8 sps:$4 sm:$0xff]  }
  0x2d   : > { %v943_v44 = vld [vmem:[%s1157_s5 + $0x24] ss:$8 sps:$4 sm:$0xff]   ;;  %v945_v45 = vld [vmem:[%s1157_s5 + $0x20] ss:$8 sps:$4 sm:$0xff]   ;;  %v946_v46 = vld [vmem:[%s1157_s5 + $0x14] ss:$8 sps:$4 sm:$0xff]  }
  0x2e   : > { %v948_v47 = vld [vmem:[%s1157_s5 + $0x10] ss:$8 sps:$4 sm:$0xff]   ;;  %v949_v48 = vld [vmem:[%s1157_s5 + $0x4] ss:$8 sps:$4 sm:$0xff]   ;;  %v951_v49 = vld [vmem:[%s1157_s5] ss:$8 sps:$4 sm:$0xff]  }
  0x2f   : > { %636 = vmatpush1.bf16.msra.mxu0 %v933_v37  ;;  %v952_v50 = vld [vmem:[%s1157_s5 + $0xf4] ss:$8 sps:$4 sm:$0xff]   ;;  %v954_v51 = vld [vmem:[%s1157_s5 + $0xf0] ss:$8 sps:$4 sm:$0xff]   ;;  %v955_v52 = vld [vmem:[%s1157_s5 + $0xe4] ss:$8 sps:$4 sm:$0xff]  }
  0x30   : > { %637 = vmatprep.subr.bf16.mxu0 %v934_v38  ;;  %v957_v53 = vld [vmem:[%s1157_s5 + $0xe0] ss:$8 sps:$4 sm:$0xff]   ;;  %v958_v54 = vld [vmem:[%s1157_s5 + $0xd4] ss:$8 sps:$4 sm:$0xff]   ;;  %v960_v55 = vld [vmem:[%s1157_s5 + $0xd0] ss:$8 sps:$4 sm:$0xff]  }
  0x31   : > { %v961_v56 = vld [vmem:[%s1157_s5 + $0xc4] ss:$8 sps:$4 sm:$0xff]   ;;  %v963_v57 = vld [vmem:[%s1157_s5 + $0xc0] ss:$8 sps:$4 sm:$0xff]   ;;  %v964_v58 = vld [vmem:[%s1157_s5 + $0xb4] ss:$8 sps:$4 sm:$0xff]  }
  0x32   : > { %v966_v59 = vld [vmem:[%s1157_s5 + $0xb0] ss:$8 sps:$4 sm:$0xff]   ;;  %v967_v60 = vld [vmem:[%s1157_s5 + $0xa4] ss:$8 sps:$4 sm:$0xff]   ;;  %v969_v61 = vld [vmem:[%s1157_s5 + $0xa0] ss:$8 sps:$4 sm:$0xff]  }
  0x33   : > { %638 = vmatpush1.bf16.msra.mxu0 %v936_v39  ;;  %v970_v62 = vld [vmem:[%s1157_s5 + $0x94] ss:$8 sps:$4 sm:$0xff]   ;;  %v972_v63 = vld [vmem:[%s1157_s5 + $0x90] ss:$8 sps:$4 sm:$0xff]   ;;  %v973_v0 = vld [vmem:[%s1157_s5 + $0x84] ss:$8 sps:$4 sm:$0xff]  }
  0x34   : > { %639 = vmatprep.subr.bf16.mxu0 %v937_v40  ;;  %v975_v1 = vld [vmem:[%s1157_s5 + $0x80] ss:$8 sps:$4 sm:$0xff]   ;;  %s1225_s6 = smov (!%p409_p9, %s847_s6), 3  ;;  %v687_v3 = vshrl.u32 %v686_v2, 7 }
  0x35   : > { %s411_s9 = scalar_lea.vmem %s1216_s2, %s1225_s6  ;;  %s849_s10 = sshll.u32 %s1225_s6, 1 }
  0x36   : > { %v688_v4 = vsub.s32 0, %v687_v3  ;;  %v692_v5 = vsub.s32 1, %v687_v3  ;;  %v684_v6 = vld [vmem:[%s411_s9] sm:$0x3]  ;;  %s421_s14 = scalar_lea.vmem %s1217_s3, %s849_s10 }
  0x37   : > { %640 = vmatpush1.bf16.msra.mxu0 %v939_v41 }
  0x38   : > { %641 = vmatprep.subr.bf16.mxu0 %v940_v42  ;;  %v689_v7 = vrot.slane %v684_v6, %v688_v4  ;;  %v693_v8 = vrot.slane %v684_v6, %v692_v5 }
  0x3a   : > { %v694_v10 = vcombine.low %v689_v7, %v693_v8 }
  0x3b   : > { %642 = vmatpush1.bf16.msra.mxu0 %v942_v43 }
  0x3c   : > { %643 = vmatprep.subr.bf16.mxu0 %v943_v44 }
  0x3f   : > { %644 = vmatpush1.bf16.msra.mxu0 %v945_v45 }
  0x40   : > { %645 = vmatprep.subr.bf16.mxu0 %v946_v46 }
  0x43   : > { %646 = vmatpush1.bf16.msra.mxu0 %v948_v47 }
  0x44   : > { %647 = vmatprep.subr.bf16.mxu0 %v949_v48 }
  0x47   : > { %648 = vmatpush1.bf16.msra.mxu0 %v951_v49 }
  0x48   : > { %649 = vmatprep.subr.bf16.mxu0 %v952_v50 }
  0x4b   : > { %650 = vmatpush2.bf16.msra.mxu0 %v954_v51 }
  0x4c   : > { %651 = vmatprep.subr.bf16.mxu0 %v955_v52 }
  0x4f   : > { %652 = vmatpush2.bf16.msra.mxu0 %v957_v53 }
  0x50   : > { %653 = vmatprep.subr.bf16.mxu0 %v958_v54 }
  0x53   : > { %654 = vmatpush2.bf16.msra.mxu0 %v960_v55 }
  0x54   : > { %655 = vmatprep.subr.bf16.mxu0 %v961_v56 }
  0x57   : > { %656 = vmatpush2.bf16.msra.mxu0 %v963_v57 }
  0x58   : > { %657 = vmatprep.subr.bf16.mxu0 %v964_v58 }
  0x5b   : > { %658 = vmatpush2.bf16.msra.mxu0 %v966_v59 }
  0x5c   : > { %659 = vmatprep.subr.bf16.mxu0 %v967_v60 }
  0x5f   : > { %660 = vmatpush2.bf16.msra.mxu0 %v969_v61 }
  0x60   : > { %661 = vmatprep.subr.bf16.mxu0 %v970_v62 }
  0x63   : > { %662 = vmatpush2.bf16.msra.mxu0 %v972_v63 }
  0x64   : > { %663 = vmatprep.subr.bf16.mxu0 %v973_v0 }
  0x67   : > { %664 = vmatpush2.bf16.msra.mxu0 %v975_v1 }
  0x6a   : > { %666 = vmatmul.mubr.bf16.vlgmr.msra.gmra.mxu0 %v1153_v32 }
 0x12a   : > { %v667_v9 = vpop.f32.mrf.mxu0 }
 0x12c   : > { %v669_v11 = vpop.f32.mrf.mxu0 }
 0x12d   : > { %v676_v12 = vcombine.low %v667_v9, %v669_v11 }
 0x12e   : > { %v671_v13 = vpop.f32.mrf.mxu0 }
 0x12f   : > { %v696_v14 = vadd.f32 %v694_v10, %v676_v12 }
 0x130   : > { %v672_v15 = vpop.f32.mrf.mxu0 }
 0x131   : > { %v698_v16 = vcombine.high %v696_v14, %v696_v14 }
 0x133   : > { %v883_v17 = vpack.c.bf16 %v698_v16, %v696_v14 }
 0x135   : > { %884 = vst.sshfl [vmem:[%s421_s14] sm:$0x33 pattern:$0x76325410] %v883_v17 }
 0x136 PF: > { %s13_s16 = sadd.s32 1, %s1014_s16   ;;  %s1218_s12 = smov %s1002_s13 }
 0x137   : > { %p10_p10 = scmp.ge.s32.totalorder %s13_s16, 4   ;;  %s1219_s13 = smov %s1071_s20 }
 0x138   : > { %s1220_s14 = smov %s1010_s15  ;;  %s1221_s15 = smov %s1223_s17 }
 0x139   :  { %12 = sbr.rel (!%p10_p10) target bundleno = 3 (0x3), region = 119 }

// kernel: siamese_forward.39
= control target key start
LH: loop header
LB: loop body
LE: loop exit
PB: predicated region body
PF: predicated region fallthrough
CT: control target
= control target key end

     0   :  { %s1622_s15 = smov 0   ;;  %s1624_s16 = smov 0   ;;  %s1943_s0 = inlined_call_operand.vmem [shape: bf16[4,4608], index: 0, kind: input, shape index: {}]   ;;  %s1944_s1 = inlined_call_operand.vmem [shape: bf16[4608,512], index: 1, kind: input, shape index: {}]   ;;  %s1945_s2 = inlined_call_operand.vmem [shape: f32[1,512], index: 2, kind: input, shape index: {}]   ;;  %s1946_s3 = inlined_call_operand.vmem [shape: bf16[4,512], index: 3, kind: input, shape index: {}]   ;;  %s1947_s4 = inlined_call_operand.vmem [shape: bf16[4,512], index: 4, kind: output, shape index: {}]  }
   0x1   :  { %s1626_s17 = smov 0   ;;  %s1628_s18 = smov 0  }
   0x2   :  { %s1630_s19 = smov 0   ;;  %s1632_s20 = smov 0  }
   0x3   :  { %s1634_s21 = smov 0  }
   0x4 LB: > { %s26_s22 = sadd.s32 1, %s1585_s19  ;;  %s29_s23 = sadd.s32 1, %s1589_s20  ;;  %s1593_s21 = sphi %s1634_s21, %s14_s21   ;;  %s1589_s20 = sphi %s1632_s20, %s1953_s20   ;;  %s1585_s19 = sphi %s1630_s19, %s1952_s19   ;;  %s1581_s18 = sphi %s1628_s18, %s1951_s18   ;;  %s1577_s17 = sphi %s1626_s17, %s1950_s17   ;;  %s1573_s16 = sphi %s1624_s16, %s1949_s16   ;;  %s1569_s15 = sphi %s1622_s15, %s1948_s15  }
   0x5   : > { %p27_p0 = scmp.ge.s32.totalorder %s26_s22, 9  ;;  %p77_p1 = scmp.ne.s32.totalorder %s1573_s16, %s1569_s15 }
   0x6   : > { %p78_p2 = scmp.eq.s32.totalorder %s1593_s21, 0  ;;  %s70_s27 = sadd.s32 1, %s1573_s16 }
   0x7   : > { %s1955_s22 = smov (%p27_p0, %s26_s22), 0  ;;  %s1957_s23 = smov (!%p27_p0, %s29_s23), %s1589_s20 }
   0x8   : > { %p79_p3 = por %p78_p2, %p77_p1  ;;  %p31_p4 = scmp.ge.s32.totalorder %s1957_s23, 2 }
   0x9   : > { %s65_s24 = ssub.s32 %s1585_s19, %s1955_s22  ;;  %p1298_p6 = scmp.ge.s32.totalorder %s1593_s21, 18 }
   0xa   : > { %s1959_s23 = smov (%p31_p4, %s1957_s23), 0 }
   0xb   : > { %s66_s25 = ssub.s32 %s1589_s20, %s1959_s23  ;;  %185 = sbr.rel (%p1298_p6) target bundleno = 55 (0x37), region = 16 }
   0xc   : > { %s67_s26 = sor.u32 %s66_s25, %s65_s24 }
   0xd   : > { %p68_p5 = scmp.eq.s32.totalorder %s67_s26, 0 }
   0xf   : > { %s1673_s28 = scalar_select %p68_p5, %s1573_s16, %s70_s27  }
  0x10   : > { %201 = sbr.rel (!%p79_p3) target bundleno = 55 (0x37), region = 24  ;;  %s203_s29 = sand.u32 (%p79_p3), 1, %s1573_s16  }
  0x11   : > { %s1301_s30 = sshll.u32 (%p79_p3), %s1589_s20, 1  ;;  %s1299_s5 = sshll.u32 (%p79_p3), %s203_s29, 9 }
  0x12   : > { %s1383_s6 = sshll.u32 (%p79_p3), %s1585_s19, 8  ;;  %s1687_s12 = scalar_lea.vmem (%p79_p3), [#allocation3], %s1299_s5 }
  0x13   : > { %s209_s7 = sadd.s32 (%p79_p3), %s1383_s6, %s1301_s30 }
  0x14   : > { %s1303_s8 = sshll.u32 (%p79_p3), %s209_s7, 2 }
  0x15   : > { %s1682_s11 = scalar_lea.vmem %s1944_s1, %s1303_s8 }
  0x16   : > { %v366_v0 = vld [vmem:[%s1682_s11] sm:$0xff]  ;;  %v368_v1 = vld [vmem:[%s1682_s11 + $0x10] sm:$0xff] }
  0x17   : > { %v370_v2 = vld [vmem:[%s1682_s11 + $0x20] sm:$0xff]  ;;  %367 = vst [vmem:[%s1687_s12] sm:$0xff] %v366_v0  ;;  %369 = vst [vmem:[%s1687_s12 + $0x8] sm:$0xff] %v368_v1  ;;  %v372_v3 = vld [vmem:[%s1682_s11 + $0x30] sm:$0xff] }
  0x18   : > { %371 = vst [vmem:[%s1687_s12 + $0x10] sm:$0xff] %v370_v2  ;;  %v374_v4 = vld [vmem:[%s1682_s11 + $0x40] sm:$0xff]  ;;  %v376_v5 = vld [vmem:[%s1682_s11 + $0x50] sm:$0xff]  ;;  %373 = vst [vmem:[%s1687_s12 + $0x18] sm:$0xff] %v372_v3 }
  0x19   : > { %375 = vst [vmem:[%s1687_s12 + $0x20] sm:$0xff] %v374_v4  ;;  %377 = vst [vmem:[%s1687_s12 + $0x28] sm:$0xff] %v376_v5  ;;  %v378_v6 = vld [vmem:[%s1682_s11 + $0x60] sm:$0xff]  ;;  %v380_v7 = vld [vmem:[%s1682_s11 + $0x70] sm:$0xff] }
  0x1a   : > { %v382_v8 = vld [vmem:[%s1682_s11 + $0x80] sm:$0xff]  ;;  %379 = vst [vmem:[%s1687_s12 + $0x30] sm:$0xff] %v378_v6  ;;  %381 = vst [vmem:[%s1687_s12 + $0x38] sm:$0xff] %v380_v7  ;;  %v384_v9 = vld [vmem:[%s1682_s11 + $0x90] sm:$0xff] }
  0x1b   : > { %383 = vst [vmem:[%s1687_s12 + $0x40] sm:$0xff] %v382_v8  ;;  %v386_v10 = vld [vmem:[%s1682_s11 + $0xa0] sm:$0xff]  ;;  %v388_v11 = vld [vmem:[%s1682_s11 + $0xb0] sm:$0xff]  ;;  %385 = vst [vmem:[%s1687_s12 + $0x48] sm:$0xff] %v384_v9 }
  0x1c   : > { %387 = vst [vmem:[%s1687_s12 + $0x50] sm:$0xff] %v386_v10  ;;  %389 = vst [vmem:[%s1687_s12 + $0x58] sm:$0xff] %v388_v11  ;;  %v390_v12 = vld [vmem:[%s1682_s11 + $0xc0] sm:$0xff]  ;;  %v392_v13 = vld [vmem:[%s1682_s11 + $0xd0] sm:$0xff] }
  0x1d   : > { %v394_v14 = vld [vmem:[%s1682_s11 + $0xe0] sm:$0xff]  ;;  %391 = vst [vmem:[%s1687_s12 + $0x60] sm:$0xff] %v390_v12  ;;  %393 = vst [vmem:[%s1687_s12 + $0x68] sm:$0xff] %v392_v13  ;;  %v396_v15 = vld [vmem:[%s1682_s11 + $0xf0] sm:$0xff] }
  0x1e   : > { %395 = vst [vmem:[%s1687_s12 + $0x70] sm:$0xff] %v394_v14  ;;  %v398_v16 = vld [vmem:[%s1682_s11 + $0x100] sm:$0xff]  ;;  %v400_v17 = vld [vmem:[%s1682_s11 + $0x110] sm:$0xff]  ;;  %397 = vst [vmem:[%s1687_s12 + $0x78] sm:$0xff] %v396_v15 }
  0x1f   : > { %399 = vst [vmem:[%s1687_s12 + $0x80] sm:$0xff] %v398_v16  ;;  %401 = vst [vmem:[%s1687_s12 + $0x88] sm:$0xff] %v400_v17  ;;  %v402_v18 = vld [vmem:[%s1682_s11 + $0x120] sm:$0xff]  ;;  %v404_v19 = vld [vmem:[%s1682_s11 + $0x130] sm:$0xff] }
  0x20   : > { %v406_v20 = vld [vmem:[%s1682_s11 + $0x140] sm:$0xff]  ;;  %403 = vst [vmem:[%s1687_s12 + $0x90] sm:$0xff] %v402_v18  ;;  %405 = vst [vmem:[%s1687_s12 + $0x98] sm:$0xff] %v404_v19  ;;  %v408_v21 = vld [vmem:[%s1682_s11 + $0x150] sm:$0xff] }
  0x21   : > { %407 = vst [vmem:[%s1687_s12 + $0xa0] sm:$0xff] %v406_v20  ;;  %v410_v22 = vld [vmem:[%s1682_s11 + $0x160] sm:$0xff]  ;;  %v412_v23 = vld [vmem:[%s1682_s11 + $0x170] sm:$0xff]  ;;  %409 = vst [vmem:[%s1687_s12 + $0xa8] sm:$0xff] %v408_v21 }
  0x22   : > { %411 = vst [vmem:[%s1687_s12 + $0xb0] sm:$0xff] %v410_v22  ;;  %413 = vst [vmem:[%s1687_s12 + $0xb8] sm:$0xff] %v412_v23  ;;  %v414_v24 = vld [vmem:[%s1682_s11 + $0x180] sm:$0xff]  ;;  %v416_v25 = vld [vmem:[%s1682_s11 + $0x190] sm:$0xff] }
  0x23   : > { %v418_v26 = vld [vmem:[%s1682_s11 + $0x1a0] sm:$0xff]  ;;  %415 = vst [vmem:[%s1687_s12 + $0xc0] sm:$0xff] %v414_v24  ;;  %417 = vst [vmem:[%s1687_s12 + $0xc8] sm:$0xff] %v416_v25  ;;  %v420_v27 = vld [vmem:[%s1682_s11 + $0x1b0] sm:$0xff] }
  0x24   : > { %419 = vst [vmem:[%s1687_s12 + $0xd0] sm:$0xff] %v418_v26  ;;  %v422_v28 = vld [vmem:[%s1682_s11 + $0x1c0] sm:$0xff]  ;;  %v424_v29 = vld [vmem:[%s1682_s11 + $0x1d0] sm:$0xff]  ;;  %421 = vst [vmem:[%s1687_s12 + $0xd8] sm:$0xff] %v420_v27 }
  0x25   : > { %423 = vst [vmem:[%s1687_s12 + $0xe0] sm:$0xff] %v422_v28  ;;  %425 = vst [vmem:[%s1687_s12 + $0xe8] sm:$0xff] %v424_v29  ;;  %v426_v30 = vld [vmem:[%s1682_s11 + $0x1e0] sm:$0xff]  ;;  %v428_v31 = vld [vmem:[%s1682_s11 + $0x1f0] sm:$0xff] }
  0x26   : > { %v430_v32 = vld [vmem:[%s1682_s11 + $0x200] sm:$0xff]  ;;  %427 = vst [vmem:[%s1687_s12 + $0xf0] sm:$0xff] %v426_v30  ;;  %429 = vst [vmem:[%s1687_s12 + $0xf8] sm:$0xff] %v428_v31  ;;  %v432_v33 = vld [vmem:[%s1682_s11 + $0x210] sm:$0xff] }
  0x27   : > { %431 = vst [vmem:[%s1687_s12 + $0x100] sm:$0xff] %v430_v32  ;;  %v434_v34 = vld [vmem:[%s1682_s11 + $0x220] sm:$0xff]  ;;  %v436_v35 = vld [vmem:[%s1682_s11 + $0x230] sm:$0xff]  ;;  %433 = vst [vmem:[%s1687_s12 + $0x108] sm:$0xff] %v432_v33 }
  0x28   : > { %435 = vst [vmem:[%s1687_s12 + $0x110] sm:$0xff] %v434_v34  ;;  %437 = vst [vmem:[%s1687_s12 + $0x118] sm:$0xff] %v436_v35  ;;  %v438_v36 = vld [vmem:[%s1682_s11 + $0x240] sm:$0xff]  ;;  %v440_v37 = vld [vmem:[%s1682_s11 + $0x250] sm:$0xff] }
  0x29   : > { %v442_v38 = vld [vmem:[%s1682_s11 + $0x260] sm:$0xff]  ;;  %439 = vst [vmem:[%s1687_s12 + $0x120] sm:$0xff] %v438_v36  ;;  %441 = vst [vmem:[%s1687_s12 + $0x128] sm:$0xff] %v440_v37  ;;  %v444_v39 = vld [vmem:[%s1682_s11 + $0x270] sm:$0xff] }
  0x2a   : > { %443 = vst [vmem:[%s1687_s12 + $0x130] sm:$0xff] %v442_v38  ;;  %v446_v40 = vld [vmem:[%s1682_s11 + $0x280] sm:$0xff]  ;;  %v448_v41 = vld [vmem:[%s1682_s11 + $0x290] sm:$0xff]  ;;  %445 = vst [vmem:[%s1687_s12 + $0x138] sm:$0xff] %v444_v39 }
  0x2b   : > { %447 = vst [vmem:[%s1687_s12 + $0x140] sm:$0xff] %v446_v40  ;;  %449 = vst [vmem:[%s1687_s12 + $0x148] sm:$0xff] %v448_v41  ;;  %v450_v42 = vld [vmem:[%s1682_s11 + $0x2a0] sm:$0xff]  ;;  %v452_v43 = vld [vmem:[%s1682_s11 + $0x2b0] sm:$0xff] }
  0x2c   : > { %v454_v44 = vld [vmem:[%s1682_s11 + $0x2c0] sm:$0xff]  ;;  %451 = vst [vmem:[%s1687_s12 + $0x150] sm:$0xff] %v450_v42  ;;  %453 = vst [vmem:[%s1687_s12 + $0x158] sm:$0xff] %v452_v43  ;;  %v456_v45 = vld [vmem:[%s1682_s11 + $0x2d0] sm:$0xff] }
  0x2d   : > { %455 = vst [vmem:[%s1687_s12 + $0x160] sm:$0xff] %v454_v44  ;;  %v458_v46 = vld [vmem:[%s1682_s11 + $0x2e0] sm:$0xff]  ;;  %v460_v47 = vld [vmem:[%s1682_s11 + $0x2f0] sm:$0xff]  ;;  %457 = vst [vmem:[%s1687_s12 + $0x168] sm:$0xff] %v456_v45 }
  0x2e   : > { %459 = vst [vmem:[%s1687_s12 + $0x170] sm:$0xff] %v458_v46  ;;  %461 = vst [vmem:[%s1687_s12 + $0x178] sm:$0xff] %v460_v47  ;;  %v462_v48 = vld [vmem:[%s1682_s11 + $0x300] sm:$0xff]  ;;  %v464_v49 = vld [vmem:[%s1682_s11 + $0x310] sm:$0xff] }
  0x2f   : > { %v466_v50 = vld [vmem:[%s1682_s11 + $0x320] sm:$0xff]  ;;  %463 = vst [vmem:[%s1687_s12 + $0x180] sm:$0xff] %v462_v48  ;;  %465 = vst [vmem:[%s1687_s12 + $0x188] sm:$0xff] %v464_v49  ;;  %v468_v51 = vld [vmem:[%s1682_s11 + $0x330] sm:$0xff] }
  0x30   : > { %467 = vst [vmem:[%s1687_s12 + $0x190] sm:$0xff] %v466_v50  ;;  %v470_v52 = vld [vmem:[%s1682_s11 + $0x340] sm:$0xff]  ;;  %v472_v53 = vld [vmem:[%s1682_s11 + $0x350] sm:$0xff]  ;;  %469 = vst [vmem:[%s1687_s12 + $0x198] sm:$0xff] %v468_v51 }
  0x31   : > { %471 = vst [vmem:[%s1687_s12 + $0x1a0] sm:$0xff] %v470_v52  ;;  %473 = vst [vmem:[%s1687_s12 + $0x1a8] sm:$0xff] %v472_v53  ;;  %v474_v54 = vld [vmem:[%s1682_s11 + $0x360] sm:$0xff]  ;;  %v476_v55 = vld [vmem:[%s1682_s11 + $0x370] sm:$0xff] }
  0x32   : > { %v478_v56 = vld [vmem:[%s1682_s11 + $0x380] sm:$0xff]  ;;  %475 = vst [vmem:[%s1687_s12 + $0x1b0] sm:$0xff] %v474_v54  ;;  %477 = vst [vmem:[%s1687_s12 + $0x1b8] sm:$0xff] %v476_v55  ;;  %v480_v57 = vld [vmem:[%s1682_s11 + $0x390] sm:$0xff] }
  0x33   : > { %479 = vst [vmem:[%s1687_s12 + $0x1c0] sm:$0xff] %v478_v56  ;;  %v482_v58 = vld [vmem:[%s1682_s11 + $0x3a0] sm:$0xff]  ;;  %v484_v59 = vld [vmem:[%s1682_s11 + $0x3b0] sm:$0xff]  ;;  %481 = vst [vmem:[%s1687_s12 + $0x1c8] sm:$0xff] %v480_v57 }
  0x34   : > { %483 = vst [vmem:[%s1687_s12 + $0x1d0] sm:$0xff] %v482_v58  ;;  %485 = vst [vmem:[%s1687_s12 + $0x1d8] sm:$0xff] %v484_v59  ;;  %v486_v60 = vld [vmem:[%s1682_s11 + $0x3c0] sm:$0xff]  ;;  %v488_v61 = vld [vmem:[%s1682_s11 + $0x3d0] sm:$0xff] }
  0x35   : > { %v490_v62 = vld [vmem:[%s1682_s11 + $0x3e0] sm:$0xff]  ;;  %487 = vst [vmem:[%s1687_s12 + $0x1e0] sm:$0xff] %v486_v60  ;;  %489 = vst [vmem:[%s1687_s12 + $0x1e8] sm:$0xff] %v488_v61  ;;  %v492_v63 = vld [vmem:[%s1682_s11 + $0x3f0] sm:$0xff] }
  0x36   : > { %491 = vst [vmem:[%s1687_s12 + $0x1f0] sm:$0xff] %v490_v62  ;;  %493 = vst [vmem:[%s1687_s12 + $0x1f8] sm:$0xff] %v492_v63 }
  0x37 PF: > { %p1304_p7 = scmp.ge.s32.totalorder %s1593_s21, 1  ;;  %p519_p8 = scmp.lt.s32.totalorder %s1593_s21, 19 }
  0x39   : > { %p520_p9 = pnand %p1304_p7, %p519_p8 }
  0x3a   : > { %s526_s13 = sand.u32 (!%p520_p9), 1, %s1569_s15   ;;  %s1306_s14 = sshll.u32 (!%p520_p9), %s1577_s17, 2 }
  0x3b   : > { %523 = sbr.rel (%p520_p9) target bundleno = 361 (0x169), region = 70  ;;  %s1305_s24 = sshll.u32 (!%p520_p9), %s526_s13, 9 }
  0x3c   : > { %p580_p10 = scmp.lt.s32.totalorder (!%p520_p9), %s1306_s14, 35  ;;  %s1308_s25 = sshll.u32 (!%p520_p9), %s1581_s18, 1 }
  0x3d   : > { %p590_p11 = scmp.lt.s32.totalorder (!%p520_p9), %s1308_s25, 3  ;;  %s1841_s13 = scalar_lea.vmem (!%p520_p9), [#allocation3], %s1305_s24 }
  0x3e   : > { %p1313_p12 = scmp.ne.s32.totalorder (!%p520_p9), %s1577_s17, 0 }
  0x40   : > { %s1961_s14 = smov (!%p580_p10, %s1306_s14), 35  ;;  %s1963_s25 = smov (!%p590_p11, %s1308_s25), 3 }
  0x41   : > { %s1307_s26 = sshll.u32 %s1961_s14, 1  ;;  %s592_s15 = scalar_lea.vmem %s1945_s2, %s1963_s25 }
  0x42   : > { %s1822_s30 = scalar_lea.vmem %s1943_s0, %s1307_s26  ;;  %s1310_s7 = sshll.u32 %s1963_s25, 1 }
  0x43   : > { %s1834_s18 = scalar_lea.vmem %s1946_s3, %s1310_s7  ;;  %s1839_s12 = scalar_lea.vmem %s1947_s4, %s1310_s7 }
  0x44   : > { %617 = sbr.rel (%p1313_p12) target bundleno = 75 (0x4b), region = 78 }
  0x49   : > { %v1595_v0 = vmov 0.0  }
  0x4a   : > { %618 = vst [vmem:[#allocation2] sm:$0xff] %v1595_v0 }
  0x4b PF: > { %v1442_v1 = vld [vmem:[%s1841_s13 + $0x74] ss:$8 sps:$4 sm:$0xff]   ;;  %v1446_v3 = vld [vmem:[%s1841_s13 + $0x70] ss:$8 sps:$4 sm:$0xff]   ;;  %v1448_v5 = vld [vmem:[%s1841_s13 + $0x64] ss:$8 sps:$4 sm:$0xff]   ;;  %v690_v39 = vlaneseq }
  0x4c   : > { %v1444_v2 = vld [vmem:[%s1841_s13 + $0x174] ss:$8 sps:$4 sm:$0xff]   ;;  %1027 = vmatprep.subr.bf16.mxu0 %v1442_v1  ;;  %v1447_v4 = vld [vmem:[%s1841_s13 + $0x170] ss:$8 sps:$4 sm:$0xff]   ;;  %v1450_v6 = vld [vmem:[%s1841_s13 + $0x164] ss:$8 sps:$4 sm:$0xff]  }
  0x4d   : > { %1068 = vmatprep.subr.bf16.mxu1 %v1444_v2  ;;  %1028 = vmatpush1.bf16.msra.mxu0 %v1446_v3  ;;  %v1452_v7 = vld [vmem:[%s1841_s13 + $0x60] ss:$8 sps:$4 sm:$0xff]   ;;  %v1454_v9 = vld [vmem:[%s1841_s13 + $0x54] ss:$8 sps:$4 sm:$0xff]   ;;  %v1458_v11 = vld [vmem:[%s1841_s13 + $0x50] ss:$8 sps:$4 sm:$0xff]  }
  0x4e   : > { %1069 = vmatpush1.bf16.msra.mxu1 %v1447_v4  ;;  %1029 = vmatprep.subr.bf16.mxu0 %v1448_v5  ;;  %v1453_v8 = vld [vmem:[%s1841_s13 + $0x160] ss:$8 sps:$4 sm:$0xff]   ;;  %v1456_v10 = vld [vmem:[%s1841_s13 + $0x154] ss:$8 sps:$4 sm:$0xff]   ;;  %v1459_v12 = vld [vmem:[%s1841_s13 + $0x150] ss:$8 sps:$4 sm:$0xff]  }
  0x4f   : > { %1070 = vmatprep.subr.bf16.mxu1 %v1450_v6  ;;  %v1460_v13 = vld [vmem:[%s1841_s13 + $0x44] ss:$8 sps:$4 sm:$0xff]   ;;  %v1464_v15 = vld [vmem:[%s1841_s13 + $0x40] ss:$8 sps:$4 sm:$0xff]   ;;  %v1466_v17 = vld [vmem:[%s1841_s13 + $0x34] ss:$8 sps:$4 sm:$0xff]  }
  0x50   : > { %v1462_v14 = vld [vmem:[%s1841_s13 + $0x144] ss:$8 sps:$4 sm:$0xff]   ;;  %v1465_v16 = vld [vmem:[%s1841_s13 + $0x140] ss:$8 sps:$4 sm:$0xff]   ;;  %v1468_v18 = vld [vmem:[%s1841_s13 + $0x134] ss:$8 sps:$4 sm:$0xff]  }
  0x51   : > { %1030 = vmatpush1.bf16.msra.mxu0 %v1452_v7  ;;  %v1470_v19 = vld [vmem:[%s1841_s13 + $0x30] ss:$8 sps:$4 sm:$0xff]   ;;  %v1472_v21 = vld [vmem:[%s1841_s13 + $0x24] ss:$8 sps:$4 sm:$0xff]   ;;  %v1476_v23 = vld [vmem:[%s1841_s13 + $0x20] ss:$8 sps:$4 sm:$0xff]  }
  0x52   : > { %1071 = vmatpush1.bf16.msra.mxu1 %v1453_v8  ;;  %1031 = vmatprep.subr.bf16.mxu0 %v1454_v9  ;;  %v1471_v20 = vld [vmem:[%s1841_s13 + $0x130] ss:$8 sps:$4 sm:$0xff]   ;;  %v1474_v22 = vld [vmem:[%s1841_s13 + $0x124] ss:$8 sps:$4 sm:$0xff]   ;;  %v1477_v24 = vld [vmem:[%s1841_s13 + $0x120] ss:$8 sps:$4 sm:$0xff]  }
  0x53   : > { %1072 = vmatprep.subr.bf16.mxu1 %v1456_v10  ;;  %v1478_v25 = vld [vmem:[%s1841_s13 + $0x14] ss:$8 sps:$4 sm:$0xff]   ;;  %v1482_v27 = vld [vmem:[%s1841_s13 + $0x10] ss:$8 sps:$4 sm:$0xff]   ;;  %v1484_v29 = vld [vmem:[%s1841_s13 + $0x4] ss:$8 sps:$4 sm:$0xff]  }
  0x54   : > { %v1480_v26 = vld [vmem:[%s1841_s13 + $0x114] ss:$8 sps:$4 sm:$0xff]   ;;  %v1483_v28 = vld [vmem:[%s1841_s13 + $0x110] ss:$8 sps:$4 sm:$0xff]   ;;  %v1486_v30 = vld [vmem:[%s1841_s13 + $0x104] ss:$8 sps:$4 sm:$0xff]  }
  0x55   : > { %1032 = vmatpush1.bf16.msra.mxu0 %v1458_v11  ;;  %v1488_v31 = vld [vmem:[%s1841_s13] ss:$8 sps:$4 sm:$0xff]   ;;  %v1490_v33 = vld [vmem:[%s1841_s13 + $0xf4] ss:$8 sps:$4 sm:$0xff]   ;;  %v1494_v35 = vld [vmem:[%s1841_s13 + $0xf0] ss:$8 sps:$4 sm:$0xff]  }
  0x56   : > { %1073 = vmatpush1.bf16.msra.mxu1 %v1459_v12  ;;  %1033 = vmatprep.subr.bf16.mxu0 %v1460_v13  ;;  %v1489_v32 = vld [vmem:[%s1841_s13 + $0x100] ss:$8 sps:$4 sm:$0xff]   ;;  %v1492_v34 = vld [vmem:[%s1841_s13 + $0x1f4] ss:$8 sps:$4 sm:$0xff]   ;;  %v1495_v36 = vld [vmem:[%s1841_s13 + $0x1f0] ss:$8 sps:$4 sm:$0xff]  }
  0x57   : > { %1074 = vmatprep.subr.bf16.mxu1 %v1462_v14  ;;  %v1596_v37 = vmov 1983009808   ;;  %v1496_v40 = vld [vmem:[%s1841_s13 + $0xe4] ss:$8 sps:$4 sm:$0xff]   ;;  %v1500_v42 = vld [vmem:[%s1841_s13 + $0xe0] ss:$8 sps:$4 sm:$0xff]  }
  0x58   : > { %v688_v38 = vunpack.c.l.s4 %v1596_v37  ;;  %v1498_v41 = vld [vmem:[%s1841_s13 + $0x1e4] ss:$8 sps:$4 sm:$0xff]   ;;  %v1883_v44 = vshrl.u32 %v690_v39, 7  ;;  %v1501_v45 = vld [vmem:[%s1841_s13 + $0x1e0] ss:$8 sps:$4 sm:$0xff]   ;;  %v620_v53 = vld [vmem:[%s1822_s30] sm:$0xff] }
  0x59   : > { %1034 = vmatpush1.bf16.msra.mxu0 %v1464_v15  ;;  %v1502_v46 = vld [vmem:[%s1841_s13 + $0xd4] ss:$8 sps:$4 sm:$0xff]   ;;  %v1506_v48 = vld [vmem:[%s1841_s13 + $0xd0] ss:$8 sps:$4 sm:$0xff]   ;;  %v1508_v51 = vld [vmem:[%s1841_s13 + $0xc4] ss:$8 sps:$4 sm:$0xff]   ;;  %v686_v55 = vcombine.high %v620_v53, %v620_v53 }
  0x5a   : > { %1075 = vmatpush1.bf16.msra.mxu1 %v1465_v16  ;;  %1035 = vmatprep.subr.bf16.mxu0 %v1466_v17  ;;  %v689_v43 = vunpack.c.0.s8 %v688_v38  ;;  %v1504_v47 = vld [vmem:[%s1841_s13 + $0x1d4] ss:$8 sps:$4 sm:$0xff]   ;;  %v1507_v49 = vld [vmem:[%s1841_s13 + $0x1d0] ss:$8 sps:$4 sm:$0xff]   ;;  %v1510_v52 = vld [vmem:[%s1841_s13 + $0x1c4] ss:$8 sps:$4 sm:$0xff]  }
  0x5b   : > { %1076 = vmatprep.subr.bf16.mxu1 %v1468_v18  ;;  %v1512_v56 = vld [vmem:[%s1841_s13 + $0xc0] ss:$8 sps:$4 sm:$0xff]   ;;  %v1514_v58 = vld [vmem:[%s1841_s13 + $0xb4] ss:$8 sps:$4 sm:$0xff]   ;;  %v1518_v63 = vld [vmem:[%s1841_s13 + $0xb0] ss:$8 sps:$4 sm:$0xff]  }
  0x5c   : > { %v692_v50 = vsub.s32 %v689_v43, %v1883_v44  ;;  %v1513_v57 = vld [vmem:[%s1841_s13 + $0x1c0] ss:$8 sps:$4 sm:$0xff]   ;;  %v1516_v59 = vld [vmem:[%s1841_s13 + $0x1b4] ss:$8 sps:$4 sm:$0xff]   ;;  %v1519_v0 = vld [vmem:[%s1841_s13 + $0x1b0] ss:$8 sps:$4 sm:$0xff]  }
  0x5d   : > { %1036 = vmatpush1.bf16.msra.mxu0 %v1470_v19  ;;  %v1520_v1 = vld [vmem:[%s1841_s13 + $0xa4] ss:$8 sps:$4 sm:$0xff]   ;;  %v1524_v3 = vld [vmem:[%s1841_s13 + $0xa0] ss:$8 sps:$4 sm:$0xff]   ;;  %v1526_v5 = vld [vmem:[%s1841_s13 + $0x94] ss:$8 sps:$4 sm:$0xff]  }
  0x5e   : > { %1077 = vmatpush1.bf16.msra.mxu1 %v1471_v20  ;;  %1037 = vmatprep.subr.bf16.mxu0 %v1472_v21  ;;  %v693_v54 = vrot.slane %v620_v53, %v692_v50  ;;  %v700_v61 = vrot.slane %v686_v55, %v692_v50  ;;  %v1522_v2 = vld [vmem:[%s1841_s13 + $0x1a4] ss:$8 sps:$4 sm:$0xff]   ;;  %v1525_v4 = vld [vmem:[%s1841_s13 + $0x1a0] ss:$8 sps:$4 sm:$0xff]   ;;  %v1528_v6 = vld [vmem:[%s1841_s13 + $0x194] ss:$8 sps:$4 sm:$0xff]  }
  0x5f   : > { %1078 = vmatprep.subr.bf16.mxu1 %v1474_v22  ;;  %v1530_v7 = vld [vmem:[%s1841_s13 + $0x90] ss:$8 sps:$4 sm:$0xff]   ;;  %v1532_v9 = vld [vmem:[%s1841_s13 + $0x84] ss:$8 sps:$4 sm:$0xff]   ;;  %v1536_v11 = vld [vmem:[%s1841_s13 + $0x80] ss:$8 sps:$4 sm:$0xff]  }
  0x60   : > { %v701_v60 = vcombine.high %v693_v54, %v693_v54  ;;  %v702_v62 = vcombine.high %v700_v61, %v700_v61  ;;  %v1531_v8 = vld [vmem:[%s1841_s13 + $0x190] ss:$8 sps:$4 sm:$0xff]   ;;  %v1534_v10 = vld [vmem:[%s1841_s13 + $0x184] ss:$8 sps:$4 sm:$0xff]   ;;  %v1537_v12 = vld [vmem:[%s1841_s13 + $0x180] ss:$8 sps:$4 sm:$0xff]  }
  0x61   : > { %1038 = vmatpush1.bf16.msra.mxu0 %v1476_v23  ;;  %v619_v19 = vld [vmem:[#allocation2] sm:$0xff]  ;;  %p1378_p13 = scmp.ne.s32.totalorder %s1577_s17, 8 }
  0x62   : > { %1079 = vmatpush1.bf16.msra.mxu1 %v1477_v24  ;;  %1039 = vmatprep.subr.bf16.mxu0 %v1478_v25 }
  0x63   : > { %1080 = vmatprep.subr.bf16.mxu1 %v1480_v26  ;;  %1059 = vmatprep.mubr.bf16.mxu0 %v701_v60 }
  0x64   : > { %1100 = vmatprep.mubr.bf16.mxu1 %v702_v62 }
  0x65   : > { %1040 = vmatpush1.bf16.msra.mxu0 %v1482_v27 }
  0x66   : > { %1081 = vmatpush1.bf16.msra.mxu1 %v1483_v28  ;;  %1041 = vmatprep.subr.bf16.mxu0 %v1484_v29 }
  0x67   : > { %1082 = vmatprep.subr.bf16.mxu1 %v1486_v30 }
  0x69   : > { %1042 = vmatpush1.bf16.msra.mxu0 %v1488_v31 }
  0x6a   : > { %1083 = vmatpush1.bf16.msra.mxu1 %v1489_v32  ;;  %1043 = vmatprep.subr.bf16.mxu0 %v1490_v33 }
  0x6b   : > { %1084 = vmatprep.subr.bf16.mxu1 %v1492_v34 }
  0x6d   : > { %1044 = vmatpush2.bf16.msra.mxu0 %v1494_v35 }
  0x6e   : > { %1085 = vmatpush2.bf16.msra.mxu1 %v1495_v36  ;;  %1045 = vmatprep.subr.bf16.mxu0 %v1496_v40 }
  0x6f   : > { %1086 = vmatprep.subr.bf16.mxu1 %v1498_v41 }
  0x71   : > { %1046 = vmatpush2.bf16.msra.mxu0 %v1500_v42 }
  0x72   : > { %1087 = vmatpush2.bf16.msra.mxu1 %v1501_v45  ;;  %1047 = vmatprep.subr.bf16.mxu0 %v1502_v46 }
  0x73   : > { %1088 = vmatprep.subr.bf16.mxu1 %v1504_v47 }
  0x75   : > { %1048 = vmatpush2.bf16.msra.mxu0 %v1506_v48 }
  0x76   : > { %1089 = vmatpush2.bf16.msra.mxu1 %v1507_v49  ;;  %1049 = vmatprep.subr.bf16.mxu0 %v1508_v51 }
  0x77   : > { %1090 = vmatprep.subr.bf16.mxu1 %v1510_v52 }
  0x79   : > { %1050 = vmatpush2.bf16.msra.mxu0 %v1512_v56 }
  0x7a   : > { %1091 = vmatpush2.bf16.msra.mxu1 %v1513_v57  ;;  %1051 = vmatprep.subr.bf16.mxu0 %v1514_v58 }
  0x7b   : > { %1092 = vmatprep.subr.bf16.mxu1 %v1516_v59 }
  0x7d   : > { %1052 = vmatpush2.bf16.msra.mxu0 %v1518_v63 }
  0x7e   : > { %1093 = vmatpush2.bf16.msra.mxu1 %v1519_v0  ;;  %1053 = vmatprep.subr.bf16.mxu0 %v1520_v1 }
  0x7f   : > { %1094 = vmatprep.subr.bf16.mxu1 %v1522_v2 }
  0x81   : > { %1054 = vmatpush2.bf16.msra.mxu0 %v1524_v3 }
  0x82   : > { %1095 = vmatpush2.bf16.msra.mxu1 %v1525_v4  ;;  %1055 = vmatprep.subr.bf16.mxu0 %v1526_v5 }
  0x83   : > { %1096 = vmatprep.subr.bf16.mxu1 %v1528_v6 }
  0x85   : > { %1056 = vmatpush2.bf16.msra.mxu0 %v1530_v7 }
  0x86   : > { %1097 = vmatpush2.bf16.msra.mxu1 %v1531_v8  ;;  %1057 = vmatprep.subr.bf16.mxu0 %v1532_v9 }
  0x87   : > { %1098 = vmatprep.subr.bf16.mxu1 %v1534_v10 }
  0x89   : > { %1058 = vmatpush2.bf16.msra.mxu0 %v1536_v11 }
  0x8a   : > { %1099 = vmatpush2.bf16.msra.mxu1 %v1537_v12 }
  0x8c   : > { %1060 = vmatmul.mubr.bf16.vlgmr.msra.gmra.mxu0 %v693_v54 }
  0x8d   : > { %1101 = vmatmul.mubr.bf16.vlgmr.msra.gmra.mxu1 %v700_v61 }
 0x14c   : > { %v1061_v13 = vpop.f32.mrf.mxu0 }
 0x14d   : > { %v1102_v14 = vpop.f32.mrf.mxu1 }
 0x14e   : > { %v1063_v15 = vpop.f32.mrf.mxu0  ;;  %v1103_v17 = vadd.f32 %v1102_v14, %v1061_v13 }
 0x14f   : > { %v1104_v16 = vpop.f32.mrf.mxu1 }
 0x150   : > { %v1105_v18 = vadd.f32 %v1104_v16, %v1063_v15  ;;  %v1065_v20 = vpop.f32.mrf.mxu0 }
 0x151   : > { %v1106_v21 = vpop.f32.mrf.mxu1 }
 0x152   : > { %v1111_v22 = vcombine.low %v1103_v17, %v1105_v18  ;;  %v1066_v23 = vpop.f32.mrf.mxu0  ;;  %1118 = sbr.rel (%p1378_p13) target bundleno = 361 (0x169), region = 82 }
 0x153   : > { %v1107_v24 = vpop.f32.mrf.mxu1 }
 0x154   : > { %v1113_v25 = vadd.f32 %v1111_v22, %v619_v19 }
 0x156   : > { %1114 = vst [vmem:[#allocation2] sm:$0xff] %v1113_v25 }
 0x157   : > { %v1120_v26 = vld [vmem:[%s592_s15] sm:$0x3]  ;;  %v1124_v27 = vsub.s32 0, %v1883_v44  ;;  %v1128_v28 = vsub.s32 1, %v1883_v44 }
 0x158   : > { %v1133_v29 = vld [vmem:[%s1834_s18] sm:$0xf] }
 0x159   : > { %v1125_v30 = vrot.slane %v1120_v26, %v1124_v27  ;;  %v1129_v31 = vrot.slane %v1120_v26, %v1128_v28  ;;  %v1134_v34 = vunpack.c.l.bf16 %v1133_v29 }
 0x15b   : > { %v1130_v33 = vcombine.low %v1125_v30, %v1129_v31 }
 0x15d   : > { %v1119_v32 = vld [vmem:[#allocation2] sm:$0xff] }
 0x15e   : > { %v1132_v35 = vadd.f32 %v1130_v33, %v1119_v32 }
 0x160   : > { %v1135_v36 = vadd.f32 %v1134_v34, %v1132_v35 }
 0x162   : > { %v1136_v37 = vmax.f32 %v1135_v36, 0.0 }
 0x164   : > { %v1138_v38 = vcombine.high %v1136_v37, %v1136_v37 }
 0x166   : > { %v1379_v39 = vpack.c.bf16 %v1138_v38, %v1136_v37 }
 0x168   : > { %1380 = vst.sshfl [vmem:[%s1839_s12] sm:$0x33 pattern:$0x76325410] %v1379_v39 }
 0x169 PF: > { %s14_s21 = sadd.s32 1, %s1593_s21   ;;  %s1948_s15 = smov %s1573_s16 }
 0x16a   : > { %p11_p0 = scmp.ge.s32.totalorder %s14_s21, 20   ;;  %s1949_s16 = smov %s1673_s28 }
 0x16b   : > { %s1950_s17 = smov %s1585_s19  ;;  %s1951_s18 = smov %s1589_s20 }
 0x16c   : > { %s1952_s19 = smov %s1955_s22  ;;  %s1953_s20 = smov %s1959_s23 }
 0x16d   :  { %13 = sbr.rel (!%p11_p0) target bundleno = 4 (0x4), region = 126 }

// kernel: siamese_forward.40
= control target key start
LH: loop header
LB: loop body
LE: loop exit
PB: predicated region body
PF: predicated region fallthrough
CT: control target
= control target key end

     0   :  { %s1531_s12 = smov 0   ;;  %s1533_s13 = smov 0   ;;  %s1846_s0 = inlined_call_operand.vmem [shape: bf16[4,4608], index: 0, kind: input, shape index: {}]   ;;  %s1847_s1 = inlined_call_operand.vmem [shape: bf16[4608,512], index: 1, kind: input, shape index: {}]   ;;  %s1848_s2 = inlined_call_operand.vmem [shape: f32[1,512], index: 2, kind: input, shape index: {}]   ;;  %s1849_s3 = inlined_call_operand.vmem [shape: bf16[4,512], index: 3, kind: output, shape index: {}]  }
   0x1   :  { %s1535_s14 = smov 0   ;;  %s1537_s15 = smov 0  }
   0x2   :  { %s1539_s16 = smov 0   ;;  %s1541_s17 = smov 0  }
   0x3   :  { %s1543_s18 = smov 0  }
   0x4 LB: > { %s25_s19 = sadd.s32 1, %s1499_s16  ;;  %s28_s20 = sadd.s32 1, %s1503_s17  ;;  %s1507_s18 = sphi %s1543_s18, %s13_s18   ;;  %s1503_s17 = sphi %s1541_s17, %s1855_s17   ;;  %s1499_s16 = sphi %s1539_s16, %s1854_s16   ;;  %s1495_s15 = sphi %s1537_s15, %s1853_s15   ;;  %s1491_s14 = sphi %s1535_s14, %s1852_s14   ;;  %s1487_s13 = sphi %s1533_s13, %s1851_s13   ;;  %s1483_s12 = sphi %s1531_s12, %s1850_s12  }
   0x5   : > { %p26_p0 = scmp.ge.s32.totalorder %s25_s19, 9  ;;  %p76_p1 = scmp.ne.s32.totalorder %s1487_s13, %s1483_s12 }
   0x6   : > { %p77_p2 = scmp.eq.s32.totalorder %s1507_s18, 0  ;;  %s69_s24 = sadd.s32 1, %s1487_s13 }
   0x7   : > { %s1857_s19 = smov (%p26_p0, %s25_s19), 0  ;;  %s1859_s20 = smov (!%p26_p0, %s28_s20), %s1503_s17 }
   0x8   : > { %p78_p3 = por %p77_p2, %p76_p1  ;;  %p30_p4 = scmp.ge.s32.totalorder %s1859_s20, 2 }
   0x9   : > { %s64_s21 = ssub.s32 %s1499_s16, %s1857_s19  ;;  %p1214_p6 = scmp.ge.s32.totalorder %s1507_s18, 18 }
   0xa   : > { %s1861_s20 = smov (%p30_p4, %s1859_s20), 0 }
   0xb   : > { %s65_s22 = ssub.s32 %s1503_s17, %s1861_s20  ;;  %156 = sbr.rel (%p1214_p6) target bundleno = 55 (0x37), region = 16 }
   0xc   : > { %s66_s23 = sor.u32 %s65_s22, %s64_s21 }
   0xd   : > { %p67_p5 = scmp.eq.s32.totalorder %s66_s23, 0 }
   0xf   : > { %s1582_s25 = scalar_select %p67_p5, %s1487_s13, %s69_s24  }
  0x10   : > { %172 = sbr.rel (!%p78_p3) target bundleno = 55 (0x37), region = 24  ;;  %s174_s26 = sand.u32 (%p78_p3), 1, %s1487_s13  }
  0x11   : > { %s1217_s27 = sshll.u32 (%p78_p3), %s1503_s17, 1  ;;  %s1215_s28 = sshll.u32 (%p78_p3), %s174_s26, 9 }
  0x12   : > { %s1297_s29 = sshll.u32 (%p78_p3), %s1499_s16, 8  ;;  %s1596_s8 = scalar_lea.vmem (%p78_p3), [#allocation3], %s1215_s28 }
  0x13   : > { %s180_s30 = sadd.s32 (%p78_p3), %s1297_s29, %s1217_s27 }
  0x14   : > { %s1219_s4 = sshll.u32 (%p78_p3), %s180_s30, 2 }
  0x15   : > { %s1591_s7 = scalar_lea.vmem %s1847_s1, %s1219_s4 }
  0x16   : > { %v337_v0 = vld [vmem:[%s1591_s7] sm:$0xff]  ;;  %v339_v1 = vld [vmem:[%s1591_s7 + $0x10] sm:$0xff] }
  0x17   : > { %v341_v2 = vld [vmem:[%s1591_s7 + $0x20] sm:$0xff]  ;;  %338 = vst [vmem:[%s1596_s8] sm:$0xff] %v337_v0  ;;  %340 = vst [vmem:[%s1596_s8 + $0x8] sm:$0xff] %v339_v1  ;;  %v343_v3 = vld [vmem:[%s1591_s7 + $0x30] sm:$0xff] }
  0x18   : > { %342 = vst [vmem:[%s1596_s8 + $0x10] sm:$0xff] %v341_v2  ;;  %v345_v4 = vld [vmem:[%s1591_s7 + $0x40] sm:$0xff]  ;;  %v347_v5 = vld [vmem:[%s1591_s7 + $0x50] sm:$0xff]  ;;  %344 = vst [vmem:[%s1596_s8 + $0x18] sm:$0xff] %v343_v3 }
  0x19   : > { %346 = vst [vmem:[%s1596_s8 + $0x20] sm:$0xff] %v345_v4  ;;  %348 = vst [vmem:[%s1596_s8 + $0x28] sm:$0xff] %v347_v5  ;;  %v349_v6 = vld [vmem:[%s1591_s7 + $0x60] sm:$0xff]  ;;  %v351_v7 = vld [vmem:[%s1591_s7 + $0x70] sm:$0xff] }
  0x1a   : > { %v353_v8 = vld [vmem:[%s1591_s7 + $0x80] sm:$0xff]  ;;  %350 = vst [vmem:[%s1596_s8 + $0x30] sm:$0xff] %v349_v6  ;;  %352 = vst [vmem:[%s1596_s8 + $0x38] sm:$0xff] %v351_v7  ;;  %v355_v9 = vld [vmem:[%s1591_s7 + $0x90] sm:$0xff] }
  0x1b   : > { %354 = vst [vmem:[%s1596_s8 + $0x40] sm:$0xff] %v353_v8  ;;  %v357_v10 = vld [vmem:[%s1591_s7 + $0xa0] sm:$0xff]  ;;  %v359_v11 = vld [vmem:[%s1591_s7 + $0xb0] sm:$0xff]  ;;  %356 = vst [vmem:[%s1596_s8 + $0x48] sm:$0xff] %v355_v9 }
  0x1c   : > { %358 = vst [vmem:[%s1596_s8 + $0x50] sm:$0xff] %v357_v10  ;;  %360 = vst [vmem:[%s1596_s8 + $0x58] sm:$0xff] %v359_v11  ;;  %v361_v12 = vld [vmem:[%s1591_s7 + $0xc0] sm:$0xff]  ;;  %v363_v13 = vld [vmem:[%s1591_s7 + $0xd0] sm:$0xff] }
  0x1d   : > { %v365_v14 = vld [vmem:[%s1591_s7 + $0xe0] sm:$0xff]  ;;  %362 = vst [vmem:[%s1596_s8 + $0x60] sm:$0xff] %v361_v12  ;;  %364 = vst [vmem:[%s1596_s8 + $0x68] sm:$0xff] %v363_v13  ;;  %v367_v15 = vld [vmem:[%s1591_s7 + $0xf0] sm:$0xff] }
  0x1e   : > { %366 = vst [vmem:[%s1596_s8 + $0x70] sm:$0xff] %v365_v14  ;;  %v369_v16 = vld [vmem:[%s1591_s7 + $0x100] sm:$0xff]  ;;  %v371_v17 = vld [vmem:[%s1591_s7 + $0x110] sm:$0xff]  ;;  %368 = vst [vmem:[%s1596_s8 + $0x78] sm:$0xff] %v367_v15 }
  0x1f   : > { %370 = vst [vmem:[%s1596_s8 + $0x80] sm:$0xff] %v369_v16  ;;  %372 = vst [vmem:[%s1596_s8 + $0x88] sm:$0xff] %v371_v17  ;;  %v373_v18 = vld [vmem:[%s1591_s7 + $0x120] sm:$0xff]  ;;  %v375_v19 = vld [vmem:[%s1591_s7 + $0x130] sm:$0xff] }
  0x20   : > { %v377_v20 = vld [vmem:[%s1591_s7 + $0x140] sm:$0xff]  ;;  %374 = vst [vmem:[%s1596_s8 + $0x90] sm:$0xff] %v373_v18  ;;  %376 = vst [vmem:[%s1596_s8 + $0x98] sm:$0xff] %v375_v19  ;;  %v379_v21 = vld [vmem:[%s1591_s7 + $0x150] sm:$0xff] }
  0x21   : > { %378 = vst [vmem:[%s1596_s8 + $0xa0] sm:$0xff] %v377_v20  ;;  %v381_v22 = vld [vmem:[%s1591_s7 + $0x160] sm:$0xff]  ;;  %v383_v23 = vld [vmem:[%s1591_s7 + $0x170] sm:$0xff]  ;;  %380 = vst [vmem:[%s1596_s8 + $0xa8] sm:$0xff] %v379_v21 }
  0x22   : > { %382 = vst [vmem:[%s1596_s8 + $0xb0] sm:$0xff] %v381_v22  ;;  %384 = vst [vmem:[%s1596_s8 + $0xb8] sm:$0xff] %v383_v23  ;;  %v385_v24 = vld [vmem:[%s1591_s7 + $0x180] sm:$0xff]  ;;  %v387_v25 = vld [vmem:[%s1591_s7 + $0x190] sm:$0xff] }
  0x23   : > { %v389_v26 = vld [vmem:[%s1591_s7 + $0x1a0] sm:$0xff]  ;;  %386 = vst [vmem:[%s1596_s8 + $0xc0] sm:$0xff] %v385_v24  ;;  %388 = vst [vmem:[%s1596_s8 + $0xc8] sm:$0xff] %v387_v25  ;;  %v391_v27 = vld [vmem:[%s1591_s7 + $0x1b0] sm:$0xff] }
  0x24   : > { %390 = vst [vmem:[%s1596_s8 + $0xd0] sm:$0xff] %v389_v26  ;;  %v393_v28 = vld [vmem:[%s1591_s7 + $0x1c0] sm:$0xff]  ;;  %v395_v29 = vld [vmem:[%s1591_s7 + $0x1d0] sm:$0xff]  ;;  %392 = vst [vmem:[%s1596_s8 + $0xd8] sm:$0xff] %v391_v27 }
  0x25   : > { %394 = vst [vmem:[%s1596_s8 + $0xe0] sm:$0xff] %v393_v28  ;;  %396 = vst [vmem:[%s1596_s8 + $0xe8] sm:$0xff] %v395_v29  ;;  %v397_v30 = vld [vmem:[%s1591_s7 + $0x1e0] sm:$0xff]  ;;  %v399_v31 = vld [vmem:[%s1591_s7 + $0x1f0] sm:$0xff] }
  0x26   : > { %v401_v32 = vld [vmem:[%s1591_s7 + $0x200] sm:$0xff]  ;;  %398 = vst [vmem:[%s1596_s8 + $0xf0] sm:$0xff] %v397_v30  ;;  %400 = vst [vmem:[%s1596_s8 + $0xf8] sm:$0xff] %v399_v31  ;;  %v403_v33 = vld [vmem:[%s1591_s7 + $0x210] sm:$0xff] }
  0x27   : > { %402 = vst [vmem:[%s1596_s8 + $0x100] sm:$0xff] %v401_v32  ;;  %v405_v34 = vld [vmem:[%s1591_s7 + $0x220] sm:$0xff]  ;;  %v407_v35 = vld [vmem:[%s1591_s7 + $0x230] sm:$0xff]  ;;  %404 = vst [vmem:[%s1596_s8 + $0x108] sm:$0xff] %v403_v33 }
  0x28   : > { %406 = vst [vmem:[%s1596_s8 + $0x110] sm:$0xff] %v405_v34  ;;  %408 = vst [vmem:[%s1596_s8 + $0x118] sm:$0xff] %v407_v35  ;;  %v409_v36 = vld [vmem:[%s1591_s7 + $0x240] sm:$0xff]  ;;  %v411_v37 = vld [vmem:[%s1591_s7 + $0x250] sm:$0xff] }
  0x29   : > { %v413_v38 = vld [vmem:[%s1591_s7 + $0x260] sm:$0xff]  ;;  %410 = vst [vmem:[%s1596_s8 + $0x120] sm:$0xff] %v409_v36  ;;  %412 = vst [vmem:[%s1596_s8 + $0x128] sm:$0xff] %v411_v37  ;;  %v415_v39 = vld [vmem:[%s1591_s7 + $0x270] sm:$0xff] }
  0x2a   : > { %414 = vst [vmem:[%s1596_s8 + $0x130] sm:$0xff] %v413_v38  ;;  %v417_v40 = vld [vmem:[%s1591_s7 + $0x280] sm:$0xff]  ;;  %v419_v41 = vld [vmem:[%s1591_s7 + $0x290] sm:$0xff]  ;;  %416 = vst [vmem:[%s1596_s8 + $0x138] sm:$0xff] %v415_v39 }
  0x2b   : > { %418 = vst [vmem:[%s1596_s8 + $0x140] sm:$0xff] %v417_v40  ;;  %420 = vst [vmem:[%s1596_s8 + $0x148] sm:$0xff] %v419_v41  ;;  %v421_v42 = vld [vmem:[%s1591_s7 + $0x2a0] sm:$0xff]  ;;  %v423_v43 = vld [vmem:[%s1591_s7 + $0x2b0] sm:$0xff] }
  0x2c   : > { %v425_v44 = vld [vmem:[%s1591_s7 + $0x2c0] sm:$0xff]  ;;  %422 = vst [vmem:[%s1596_s8 + $0x150] sm:$0xff] %v421_v42  ;;  %424 = vst [vmem:[%s1596_s8 + $0x158] sm:$0xff] %v423_v43  ;;  %v427_v45 = vld [vmem:[%s1591_s7 + $0x2d0] sm:$0xff] }
  0x2d   : > { %426 = vst [vmem:[%s1596_s8 + $0x160] sm:$0xff] %v425_v44  ;;  %v429_v46 = vld [vmem:[%s1591_s7 + $0x2e0] sm:$0xff]  ;;  %v431_v47 = vld [vmem:[%s1591_s7 + $0x2f0] sm:$0xff]  ;;  %428 = vst [vmem:[%s1596_s8 + $0x168] sm:$0xff] %v427_v45 }
  0x2e   : > { %430 = vst [vmem:[%s1596_s8 + $0x170] sm:$0xff] %v429_v46  ;;  %432 = vst [vmem:[%s1596_s8 + $0x178] sm:$0xff] %v431_v47  ;;  %v433_v48 = vld [vmem:[%s1591_s7 + $0x300] sm:$0xff]  ;;  %v435_v49 = vld [vmem:[%s1591_s7 + $0x310] sm:$0xff] }
  0x2f   : > { %v437_v50 = vld [vmem:[%s1591_s7 + $0x320] sm:$0xff]  ;;  %434 = vst [vmem:[%s1596_s8 + $0x180] sm:$0xff] %v433_v48  ;;  %436 = vst [vmem:[%s1596_s8 + $0x188] sm:$0xff] %v435_v49  ;;  %v439_v51 = vld [vmem:[%s1591_s7 + $0x330] sm:$0xff] }
  0x30   : > { %438 = vst [vmem:[%s1596_s8 + $0x190] sm:$0xff] %v437_v50  ;;  %v441_v52 = vld [vmem:[%s1591_s7 + $0x340] sm:$0xff]  ;;  %v443_v53 = vld [vmem:[%s1591_s7 + $0x350] sm:$0xff]  ;;  %440 = vst [vmem:[%s1596_s8 + $0x198] sm:$0xff] %v439_v51 }
  0x31   : > { %442 = vst [vmem:[%s1596_s8 + $0x1a0] sm:$0xff] %v441_v52  ;;  %444 = vst [vmem:[%s1596_s8 + $0x1a8] sm:$0xff] %v443_v53  ;;  %v445_v54 = vld [vmem:[%s1591_s7 + $0x360] sm:$0xff]  ;;  %v447_v55 = vld [vmem:[%s1591_s7 + $0x370] sm:$0xff] }
  0x32   : > { %v449_v56 = vld [vmem:[%s1591_s7 + $0x380] sm:$0xff]  ;;  %446 = vst [vmem:[%s1596_s8 + $0x1b0] sm:$0xff] %v445_v54  ;;  %448 = vst [vmem:[%s1596_s8 + $0x1b8] sm:$0xff] %v447_v55  ;;  %v451_v57 = vld [vmem:[%s1591_s7 + $0x390] sm:$0xff] }
  0x33   : > { %450 = vst [vmem:[%s1596_s8 + $0x1c0] sm:$0xff] %v449_v56  ;;  %v453_v58 = vld [vmem:[%s1591_s7 + $0x3a0] sm:$0xff]  ;;  %v455_v59 = vld [vmem:[%s1591_s7 + $0x3b0] sm:$0xff]  ;;  %452 = vst [vmem:[%s1596_s8 + $0x1c8] sm:$0xff] %v451_v57 }
  0x34   : > { %454 = vst [vmem:[%s1596_s8 + $0x1d0] sm:$0xff] %v453_v58  ;;  %456 = vst [vmem:[%s1596_s8 + $0x1d8] sm:$0xff] %v455_v59  ;;  %v457_v60 = vld [vmem:[%s1591_s7 + $0x3c0] sm:$0xff]  ;;  %v459_v61 = vld [vmem:[%s1591_s7 + $0x3d0] sm:$0xff] }
  0x35   : > { %v461_v62 = vld [vmem:[%s1591_s7 + $0x3e0] sm:$0xff]  ;;  %458 = vst [vmem:[%s1596_s8 + $0x1e0] sm:$0xff] %v457_v60  ;;  %460 = vst [vmem:[%s1596_s8 + $0x1e8] sm:$0xff] %v459_v61  ;;  %v463_v63 = vld [vmem:[%s1591_s7 + $0x3f0] sm:$0xff] }
  0x36   : > { %462 = vst [vmem:[%s1596_s8 + $0x1f0] sm:$0xff] %v461_v62  ;;  %464 = vst [vmem:[%s1596_s8 + $0x1f8] sm:$0xff] %v463_v63 }
  0x37 PF: > { %p1220_p7 = scmp.ge.s32.totalorder %s1507_s18, 1  ;;  %p477_p8 = scmp.lt.s32.totalorder %s1507_s18, 19 }
  0x39   : > { %p478_p9 = pnand %p1220_p7, %p477_p8 }
  0x3a   : > { %s484_s9 = sand.u32 (!%p478_p9), 1, %s1483_s12   ;;  %s1222_s10 = sshll.u32 (!%p478_p9), %s1491_s14, 2 }
  0x3b   : > { %481 = sbr.rel (%p478_p9) target bundleno = 358 (0x166), region = 66  ;;  %s1221_s11 = sshll.u32 (!%p478_p9), %s484_s9, 9 }
  0x3c   : > { %p527_p10 = scmp.lt.s32.totalorder (!%p478_p9), %s1222_s10, 35  ;;  %s1224_s21 = sshll.u32 (!%p478_p9), %s1495_s15, 1 }
  0x3d   : > { %p537_p11 = scmp.lt.s32.totalorder (!%p478_p9), %s1224_s21, 3  ;;  %s1745_s5 = scalar_lea.vmem (!%p478_p9), [#allocation3], %s1221_s11 }
  0x3e   : > { %p1227_p12 = scmp.ne.s32.totalorder (!%p478_p9), %s1491_s14, 0 }
  0x40   : > { %s1863_s10 = smov (!%p527_p10, %s1222_s10), 35  ;;  %s1865_s21 = smov (!%p537_p11, %s1224_s21), 3 }
  0x41   : > { %s1223_s22 = sshll.u32 %s1863_s10, 1  ;;  %s539_s12 = scalar_lea.vmem %s1848_s2, %s1865_s21 }
  0x42   : > { %s1731_s26 = scalar_lea.vmem %s1846_s0, %s1223_s22  ;;  %s1226_s29 = sshll.u32 %s1865_s21, 1 }
  0x43   : > { %s1743_s15 = scalar_lea.vmem %s1849_s3, %s1226_s29  ;;  %554 = sbr.rel (%p1227_p12) target bundleno = 74 (0x4a), region = 74 }
  0x48   : > { %v1509_v0 = vmov 0.0  }
  0x49   : > { %555 = vst [vmem:[#allocation2] sm:$0xff] %v1509_v0 }
  0x4a PF: > { %v1356_v1 = vld [vmem:[%s1745_s5 + $0x74] ss:$8 sps:$4 sm:$0xff]   ;;  %v1360_v3 = vld [vmem:[%s1745_s5 + $0x70] ss:$8 sps:$4 sm:$0xff]   ;;  %v1362_v5 = vld [vmem:[%s1745_s5 + $0x64] ss:$8 sps:$4 sm:$0xff]   ;;  %v627_v39 = vlaneseq }
  0x4b   : > { %v1358_v2 = vld [vmem:[%s1745_s5 + $0x174] ss:$8 sps:$4 sm:$0xff]   ;;  %964 = vmatprep.subr.bf16.mxu0 %v1356_v1  ;;  %v1361_v4 = vld [vmem:[%s1745_s5 + $0x170] ss:$8 sps:$4 sm:$0xff]   ;;  %v1364_v6 = vld [vmem:[%s1745_s5 + $0x164] ss:$8 sps:$4 sm:$0xff]  }
  0x4c   : > { %1005 = vmatprep.subr.bf16.mxu1 %v1358_v2  ;;  %965 = vmatpush1.bf16.msra.mxu0 %v1360_v3  ;;  %v1366_v7 = vld [vmem:[%s1745_s5 + $0x60] ss:$8 sps:$4 sm:$0xff]   ;;  %v1368_v9 = vld [vmem:[%s1745_s5 + $0x54] ss:$8 sps:$4 sm:$0xff]   ;;  %v1372_v11 = vld [vmem:[%s1745_s5 + $0x50] ss:$8 sps:$4 sm:$0xff]  }
  0x4d   : > { %1006 = vmatpush1.bf16.msra.mxu1 %v1361_v4  ;;  %966 = vmatprep.subr.bf16.mxu0 %v1362_v5  ;;  %v1367_v8 = vld [vmem:[%s1745_s5 + $0x160] ss:$8 sps:$4 sm:$0xff]   ;;  %v1370_v10 = vld [vmem:[%s1745_s5 + $0x154] ss:$8 sps:$4 sm:$0xff]   ;;  %v1373_v12 = vld [vmem:[%s1745_s5 + $0x150] ss:$8 sps:$4 sm:$0xff]  }
  0x4e   : > { %1007 = vmatprep.subr.bf16.mxu1 %v1364_v6  ;;  %v1374_v13 = vld [vmem:[%s1745_s5 + $0x44] ss:$8 sps:$4 sm:$0xff]   ;;  %v1378_v15 = vld [vmem:[%s1745_s5 + $0x40] ss:$8 sps:$4 sm:$0xff]   ;;  %v1380_v17 = vld [vmem:[%s1745_s5 + $0x34] ss:$8 sps:$4 sm:$0xff]  }
  0x4f   : > { %v1376_v14 = vld [vmem:[%s1745_s5 + $0x144] ss:$8 sps:$4 sm:$0xff]   ;;  %v1379_v16 = vld [vmem:[%s1745_s5 + $0x140] ss:$8 sps:$4 sm:$0xff]   ;;  %v1382_v18 = vld [vmem:[%s1745_s5 + $0x134] ss:$8 sps:$4 sm:$0xff]  }
  0x50   : > { %967 = vmatpush1.bf16.msra.mxu0 %v1366_v7  ;;  %v1384_v19 = vld [vmem:[%s1745_s5 + $0x30] ss:$8 sps:$4 sm:$0xff]   ;;  %v1386_v21 = vld [vmem:[%s1745_s5 + $0x24] ss:$8 sps:$4 sm:$0xff]   ;;  %v1390_v23 = vld [vmem:[%s1745_s5 + $0x20] ss:$8 sps:$4 sm:$0xff]  }
  0x51   : > { %1008 = vmatpush1.bf16.msra.mxu1 %v1367_v8  ;;  %968 = vmatprep.subr.bf16.mxu0 %v1368_v9  ;;  %v1385_v20 = vld [vmem:[%s1745_s5 + $0x130] ss:$8 sps:$4 sm:$0xff]   ;;  %v1388_v22 = vld [vmem:[%s1745_s5 + $0x124] ss:$8 sps:$4 sm:$0xff]   ;;  %v1391_v24 = vld [vmem:[%s1745_s5 + $0x120] ss:$8 sps:$4 sm:$0xff]  }
  0x52   : > { %1009 = vmatprep.subr.bf16.mxu1 %v1370_v10  ;;  %v1392_v25 = vld [vmem:[%s1745_s5 + $0x14] ss:$8 sps:$4 sm:$0xff]   ;;  %v1396_v27 = vld [vmem:[%s1745_s5 + $0x10] ss:$8 sps:$4 sm:$0xff]   ;;  %v1398_v29 = vld [vmem:[%s1745_s5 + $0x4] ss:$8 sps:$4 sm:$0xff]  }
  0x53   : > { %v1394_v26 = vld [vmem:[%s1745_s5 + $0x114] ss:$8 sps:$4 sm:$0xff]   ;;  %v1397_v28 = vld [vmem:[%s1745_s5 + $0x110] ss:$8 sps:$4 sm:$0xff]   ;;  %v1400_v30 = vld [vmem:[%s1745_s5 + $0x104] ss:$8 sps:$4 sm:$0xff]  }
  0x54   : > { %969 = vmatpush1.bf16.msra.mxu0 %v1372_v11  ;;  %v1402_v31 = vld [vmem:[%s1745_s5] ss:$8 sps:$4 sm:$0xff]   ;;  %v1404_v33 = vld [vmem:[%s1745_s5 + $0xf4] ss:$8 sps:$4 sm:$0xff]   ;;  %v1408_v35 = vld [vmem:[%s1745_s5 + $0xf0] ss:$8 sps:$4 sm:$0xff]  }
  0x55   : > { %1010 = vmatpush1.bf16.msra.mxu1 %v1373_v12  ;;  %970 = vmatprep.subr.bf16.mxu0 %v1374_v13  ;;  %v1403_v32 = vld [vmem:[%s1745_s5 + $0x100] ss:$8 sps:$4 sm:$0xff]   ;;  %v1406_v34 = vld [vmem:[%s1745_s5 + $0x1f4] ss:$8 sps:$4 sm:$0xff]   ;;  %v1409_v36 = vld [vmem:[%s1745_s5 + $0x1f0] ss:$8 sps:$4 sm:$0xff]  }
  0x56   : > { %1011 = vmatprep.subr.bf16.mxu1 %v1376_v14  ;;  %v1510_v37 = vmov 1983009808   ;;  %v1410_v40 = vld [vmem:[%s1745_s5 + $0xe4] ss:$8 sps:$4 sm:$0xff]   ;;  %v1414_v42 = vld [vmem:[%s1745_s5 + $0xe0] ss:$8 sps:$4 sm:$0xff]  }
  0x57   : > { %v625_v38 = vunpack.c.l.s4 %v1510_v37  ;;  %v1412_v41 = vld [vmem:[%s1745_s5 + $0x1e4] ss:$8 sps:$4 sm:$0xff]   ;;  %v1787_v44 = vshrl.u32 %v627_v39, 7  ;;  %v1415_v45 = vld [vmem:[%s1745_s5 + $0x1e0] ss:$8 sps:$4 sm:$0xff]   ;;  %v557_v53 = vld [vmem:[%s1731_s26] sm:$0xff] }
  0x58   : > { %971 = vmatpush1.bf16.msra.mxu0 %v1378_v15  ;;  %v1416_v46 = vld [vmem:[%s1745_s5 + $0xd4] ss:$8 sps:$4 sm:$0xff]   ;;  %v1420_v48 = vld [vmem:[%s1745_s5 + $0xd0] ss:$8 sps:$4 sm:$0xff]   ;;  %v1422_v51 = vld [vmem:[%s1745_s5 + $0xc4] ss:$8 sps:$4 sm:$0xff]   ;;  %v623_v55 = vcombine.high %v557_v53, %v557_v53 }
  0x59   : > { %1012 = vmatpush1.bf16.msra.mxu1 %v1379_v16  ;;  %972 = vmatprep.subr.bf16.mxu0 %v1380_v17  ;;  %v626_v43 = vunpack.c.0.s8 %v625_v38  ;;  %v1418_v47 = vld [vmem:[%s1745_s5 + $0x1d4] ss:$8 sps:$4 sm:$0xff]   ;;  %v1421_v49 = vld [vmem:[%s1745_s5 + $0x1d0] ss:$8 sps:$4 sm:$0xff]   ;;  %v1424_v52 = vld [vmem:[%s1745_s5 + $0x1c4] ss:$8 sps:$4 sm:$0xff]  }
  0x5a   : > { %1013 = vmatprep.subr.bf16.mxu1 %v1382_v18  ;;  %v1426_v56 = vld [vmem:[%s1745_s5 + $0xc0] ss:$8 sps:$4 sm:$0xff]   ;;  %v1428_v58 = vld [vmem:[%s1745_s5 + $0xb4] ss:$8 sps:$4 sm:$0xff]   ;;  %v1432_v63 = vld [vmem:[%s1745_s5 + $0xb0] ss:$8 sps:$4 sm:$0xff]  }
  0x5b   : > { %v629_v50 = vsub.s32 %v626_v43, %v1787_v44  ;;  %v1427_v57 = vld [vmem:[%s1745_s5 + $0x1c0] ss:$8 sps:$4 sm:$0xff]   ;;  %v1430_v59 = vld [vmem:[%s1745_s5 + $0x1b4] ss:$8 sps:$4 sm:$0xff]   ;;  %v1433_v0 = vld [vmem:[%s1745_s5 + $0x1b0] ss:$8 sps:$4 sm:$0xff]  }
  0x5c   : > { %973 = vmatpush1.bf16.msra.mxu0 %v1384_v19  ;;  %v1434_v1 = vld [vmem:[%s1745_s5 + $0xa4] ss:$8 sps:$4 sm:$0xff]   ;;  %v1438_v3 = vld [vmem:[%s1745_s5 + $0xa0] ss:$8 sps:$4 sm:$0xff]   ;;  %v1440_v5 = vld [vmem:[%s1745_s5 + $0x94] ss:$8 sps:$4 sm:$0xff]  }
  0x5d   : > { %1014 = vmatpush1.bf16.msra.mxu1 %v1385_v20  ;;  %974 = vmatprep.subr.bf16.mxu0 %v1386_v21  ;;  %v630_v54 = vrot.slane %v557_v53, %v629_v50  ;;  %v637_v61 = vrot.slane %v623_v55, %v629_v50  ;;  %v1436_v2 = vld [vmem:[%s1745_s5 + $0x1a4] ss:$8 sps:$4 sm:$0xff]   ;;  %v1439_v4 = vld [vmem:[%s1745_s5 + $0x1a0] ss:$8 sps:$4 sm:$0xff]   ;;  %v1442_v6 = vld [vmem:[%s1745_s5 + $0x194] ss:$8 sps:$4 sm:$0xff]  }
  0x5e   : > { %1015 = vmatprep.subr.bf16.mxu1 %v1388_v22  ;;  %v1444_v7 = vld [vmem:[%s1745_s5 + $0x90] ss:$8 sps:$4 sm:$0xff]   ;;  %v1446_v9 = vld [vmem:[%s1745_s5 + $0x84] ss:$8 sps:$4 sm:$0xff]   ;;  %v1450_v11 = vld [vmem:[%s1745_s5 + $0x80] ss:$8 sps:$4 sm:$0xff]  }
  0x5f   : > { %v638_v60 = vcombine.high %v630_v54, %v630_v54  ;;  %v639_v62 = vcombine.high %v637_v61, %v637_v61  ;;  %v1445_v8 = vld [vmem:[%s1745_s5 + $0x190] ss:$8 sps:$4 sm:$0xff]   ;;  %v1448_v10 = vld [vmem:[%s1745_s5 + $0x184] ss:$8 sps:$4 sm:$0xff]   ;;  %v1451_v12 = vld [vmem:[%s1745_s5 + $0x180] ss:$8 sps:$4 sm:$0xff]  }
  0x60   : > { %975 = vmatpush1.bf16.msra.mxu0 %v1390_v23  ;;  %v556_v19 = vld [vmem:[#allocation2] sm:$0xff]  ;;  %p1292_p13 = scmp.ne.s32.totalorder %s1491_s14, 8 }
  0x61   : > { %1016 = vmatpush1.bf16.msra.mxu1 %v1391_v24  ;;  %976 = vmatprep.subr.bf16.mxu0 %v1392_v25 }
  0x62   : > { %1017 = vmatprep.subr.bf16.mxu1 %v1394_v26  ;;  %996 = vmatprep.mubr.bf16.mxu0 %v638_v60 }
  0x63   : > { %1037 = vmatprep.mubr.bf16.mxu1 %v639_v62 }
  0x64   : > { %977 = vmatpush1.bf16.msra.mxu0 %v1396_v27 }
  0x65   : > { %1018 = vmatpush1.bf16.msra.mxu1 %v1397_v28  ;;  %978 = vmatprep.subr.bf16.mxu0 %v1398_v29 }
  0x66   : > { %1019 = vmatprep.subr.bf16.mxu1 %v1400_v30 }
  0x68   : > { %979 = vmatpush1.bf16.msra.mxu0 %v1402_v31 }
  0x69   : > { %1020 = vmatpush1.bf16.msra.mxu1 %v1403_v32  ;;  %980 = vmatprep.subr.bf16.mxu0 %v1404_v33 }
  0x6a   : > { %1021 = vmatprep.subr.bf16.mxu1 %v1406_v34 }
  0x6c   : > { %981 = vmatpush2.bf16.msra.mxu0 %v1408_v35 }
  0x6d   : > { %1022 = vmatpush2.bf16.msra.mxu1 %v1409_v36  ;;  %982 = vmatprep.subr.bf16.mxu0 %v1410_v40 }
  0x6e   : > { %1023 = vmatprep.subr.bf16.mxu1 %v1412_v41 }
  0x70   : > { %983 = vmatpush2.bf16.msra.mxu0 %v1414_v42 }
  0x71   : > { %1024 = vmatpush2.bf16.msra.mxu1 %v1415_v45  ;;  %984 = vmatprep.subr.bf16.mxu0 %v1416_v46 }
  0x72   : > { %1025 = vmatprep.subr.bf16.mxu1 %v1418_v47 }
  0x74   : > { %985 = vmatpush2.bf16.msra.mxu0 %v1420_v48 }
  0x75   : > { %1026 = vmatpush2.bf16.msra.mxu1 %v1421_v49  ;;  %986 = vmatprep.subr.bf16.mxu0 %v1422_v51 }
  0x76   : > { %1027 = vmatprep.subr.bf16.mxu1 %v1424_v52 }
  0x78   : > { %987 = vmatpush2.bf16.msra.mxu0 %v1426_v56 }
  0x79   : > { %1028 = vmatpush2.bf16.msra.mxu1 %v1427_v57  ;;  %988 = vmatprep.subr.bf16.mxu0 %v1428_v58 }
  0x7a   : > { %1029 = vmatprep.subr.bf16.mxu1 %v1430_v59 }
  0x7c   : > { %989 = vmatpush2.bf16.msra.mxu0 %v1432_v63 }
  0x7d   : > { %1030 = vmatpush2.bf16.msra.mxu1 %v1433_v0  ;;  %990 = vmatprep.subr.bf16.mxu0 %v1434_v1 }
  0x7e   : > { %1031 = vmatprep.subr.bf16.mxu1 %v1436_v2 }
  0x80   : > { %991 = vmatpush2.bf16.msra.mxu0 %v1438_v3 }
  0x81   : > { %1032 = vmatpush2.bf16.msra.mxu1 %v1439_v4  ;;  %992 = vmatprep.subr.bf16.mxu0 %v1440_v5 }
  0x82   : > { %1033 = vmatprep.subr.bf16.mxu1 %v1442_v6 }
  0x84   : > { %993 = vmatpush2.bf16.msra.mxu0 %v1444_v7 }
  0x85   : > { %1034 = vmatpush2.bf16.msra.mxu1 %v1445_v8  ;;  %994 = vmatprep.subr.bf16.mxu0 %v1446_v9 }
  0x86   : > { %1035 = vmatprep.subr.bf16.mxu1 %v1448_v10 }
  0x88   : > { %995 = vmatpush2.bf16.msra.mxu0 %v1450_v11 }
  0x89   : > { %1036 = vmatpush2.bf16.msra.mxu1 %v1451_v12 }
  0x8b   : > { %997 = vmatmul.mubr.bf16.vlgmr.msra.gmra.mxu0 %v630_v54 }
  0x8c   : > { %1038 = vmatmul.mubr.bf16.vlgmr.msra.gmra.mxu1 %v637_v61 }
 0x14b   : > { %v998_v13 = vpop.f32.mrf.mxu0 }
 0x14c   : > { %v1039_v14 = vpop.f32.mrf.mxu1 }
 0x14d   : > { %v1000_v15 = vpop.f32.mrf.mxu0  ;;  %v1040_v17 = vadd.f32 %v1039_v14, %v998_v13 }
 0x14e   : > { %v1041_v16 = vpop.f32.mrf.mxu1 }
 0x14f   : > { %v1042_v18 = vadd.f32 %v1041_v16, %v1000_v15  ;;  %v1002_v20 = vpop.f32.mrf.mxu0 }
 0x150   : > { %v1043_v21 = vpop.f32.mrf.mxu1 }
 0x151   : > { %v1048_v22 = vcombine.low %v1040_v17, %v1042_v18  ;;  %v1003_v23 = vpop.f32.mrf.mxu0  ;;  %1055 = sbr.rel (%p1292_p13) target bundleno = 358 (0x166), region = 78 }
 0x152   : > { %v1044_v24 = vpop.f32.mrf.mxu1 }
 0x153   : > { %v1050_v25 = vadd.f32 %v1048_v22, %v556_v19 }
 0x155   : > { %1051 = vst [vmem:[#allocation2] sm:$0xff] %v1050_v25 }
 0x156   : > { %v1057_v26 = vld [vmem:[%s539_s12] sm:$0x3]  ;;  %v1061_v27 = vsub.s32 0, %v1787_v44  ;;  %v1065_v28 = vsub.s32 1, %v1787_v44 }
 0x158   : > { %v1062_v29 = vrot.slane %v1057_v26, %v1061_v27  ;;  %v1066_v30 = vrot.slane %v1057_v26, %v1065_v28 }
 0x15a   : > { %v1067_v32 = vcombine.low %v1062_v29, %v1066_v30 }
 0x15c   : > { %v1056_v31 = vld [vmem:[#allocation2] sm:$0xff] }
 0x15d   : > { %v1069_v33 = vadd.f32 %v1067_v32, %v1056_v31 }
 0x15f   : > { %v1070_v34 = vmax.f32 %v1069_v33, 0.0 }
 0x161   : > { %v1072_v35 = vcombine.high %v1070_v34, %v1070_v34 }
 0x163   : > { %v1293_v36 = vpack.c.bf16 %v1072_v35, %v1070_v34 }
 0x165   : > { %1294 = vst.sshfl [vmem:[%s1743_s15] sm:$0x33 pattern:$0x76325410] %v1293_v36 }
 0x166 PF: > { %s13_s18 = sadd.s32 1, %s1507_s18   ;;  %s1850_s12 = smov %s1487_s13 }
 0x167   : > { %p10_p0 = scmp.ge.s32.totalorder %s13_s18, 20   ;;  %s1851_s13 = smov %s1582_s25 }
 0x168   : > { %s1852_s14 = smov %s1499_s16  ;;  %s1853_s15 = smov %s1503_s17 }
 0x169   : > { %s1854_s16 = smov %s1857_s19  ;;  %s1855_s17 = smov %s1861_s20 }
 0x16a   :  { %12 = sbr.rel (!%p10_p0) target bundleno = 4 (0x4), region = 119 }

// kernel: siamese_forward.42
= control target key start
LH: loop header
LB: loop body
LE: loop exit
PB: predicated region body
PF: predicated region fallthrough
CT: control target
= control target key end

     0   :  { %v699_v36 = vmov 1983009808   ;;  %v90_v38 = vlaneseq  ;;  %s926_s1 = inlined_call_operand.vmem [shape: bf16[512,256], index: 1, kind: input, shape index: {}]   ;;  %s927_s0 = inlined_call_operand.vmem [shape: bf16[4,512], index: 0, kind: input, shape index: {}]   ;;  %s928_s2 = inlined_call_operand.vmem [shape: f32[1,256], index: 2, kind: input, shape index: {}]   ;;  %s929_s3 = inlined_call_operand.vmem [shape: f32[4,256], index: 3, kind: output, shape index: {}]  }
   0x1   :  { %v602_v0 = vld [vmem:[%s926_s1 + $0x74] ss:$8 sps:$4 sm:$0xff]   ;;  %v606_v2 = vld [vmem:[%s926_s1 + $0x70] ss:$8 sps:$4 sm:$0xff]   ;;  %v608_v4 = vld [vmem:[%s926_s1 + $0x64] ss:$8 sps:$4 sm:$0xff]   ;;  %v88_v37 = vunpack.c.l.s4 %v699_v36 }
   0x2   :  { %v604_v1 = vld [vmem:[%s926_s1 + $0x174] ss:$8 sps:$4 sm:$0xff]   ;;  %427 = vmatprep.subr.bf16.mxu0 %v602_v0  ;;  %v607_v3 = vld [vmem:[%s926_s1 + $0x170] ss:$8 sps:$4 sm:$0xff]   ;;  %v610_v5 = vld [vmem:[%s926_s1 + $0x164] ss:$8 sps:$4 sm:$0xff]  }
   0x3   :  { %468 = vmatprep.subr.bf16.mxu1 %v604_v1  ;;  %428 = vmatpush1.bf16.msra.mxu0 %v606_v2  ;;  %v612_v6 = vld [vmem:[%s926_s1 + $0x60] ss:$8 sps:$4 sm:$0xff]   ;;  %v614_v8 = vld [vmem:[%s926_s1 + $0x54] ss:$8 sps:$4 sm:$0xff]   ;;  %v618_v10 = vld [vmem:[%s926_s1 + $0x50] ss:$8 sps:$4 sm:$0xff]   ;;  %v89_v42 = vunpack.c.0.s8 %v88_v37 }
   0x4   :  { %469 = vmatpush1.bf16.msra.mxu1 %v607_v3  ;;  %429 = vmatprep.subr.bf16.mxu0 %v608_v4  ;;  %v613_v7 = vld [vmem:[%s926_s1 + $0x160] ss:$8 sps:$4 sm:$0xff]   ;;  %v616_v9 = vld [vmem:[%s926_s1 + $0x154] ss:$8 sps:$4 sm:$0xff]   ;;  %v619_v11 = vld [vmem:[%s926_s1 + $0x150] ss:$8 sps:$4 sm:$0xff]  }
   0x5   :  { %470 = vmatprep.subr.bf16.mxu1 %v610_v5  ;;  %v620_v12 = vld [vmem:[%s926_s1 + $0x44] ss:$8 sps:$4 sm:$0xff]   ;;  %v624_v14 = vld [vmem:[%s926_s1 + $0x40] ss:$8 sps:$4 sm:$0xff]   ;;  %v626_v16 = vld [vmem:[%s926_s1 + $0x34] ss:$8 sps:$4 sm:$0xff]  }
   0x6   :  { %v622_v13 = vld [vmem:[%s926_s1 + $0x144] ss:$8 sps:$4 sm:$0xff]   ;;  %v625_v15 = vld [vmem:[%s926_s1 + $0x140] ss:$8 sps:$4 sm:$0xff]   ;;  %v628_v17 = vld [vmem:[%s926_s1 + $0x134] ss:$8 sps:$4 sm:$0xff]  }
   0x7   :  { %430 = vmatpush1.bf16.msra.mxu0 %v612_v6  ;;  %v630_v18 = vld [vmem:[%s926_s1 + $0x30] ss:$8 sps:$4 sm:$0xff]   ;;  %v632_v20 = vld [vmem:[%s926_s1 + $0x24] ss:$8 sps:$4 sm:$0xff]   ;;  %v636_v22 = vld [vmem:[%s926_s1 + $0x20] ss:$8 sps:$4 sm:$0xff]  }
   0x8   :  { %471 = vmatpush1.bf16.msra.mxu1 %v613_v7  ;;  %431 = vmatprep.subr.bf16.mxu0 %v614_v8  ;;  %v631_v19 = vld [vmem:[%s926_s1 + $0x130] ss:$8 sps:$4 sm:$0xff]   ;;  %v634_v21 = vld [vmem:[%s926_s1 + $0x124] ss:$8 sps:$4 sm:$0xff]   ;;  %v637_v23 = vld [vmem:[%s926_s1 + $0x120] ss:$8 sps:$4 sm:$0xff]  }
   0x9   :  { %472 = vmatprep.subr.bf16.mxu1 %v616_v9  ;;  %v638_v24 = vld [vmem:[%s926_s1 + $0x14] ss:$8 sps:$4 sm:$0xff]   ;;  %v642_v26 = vld [vmem:[%s926_s1 + $0x10] ss:$8 sps:$4 sm:$0xff]   ;;  %v644_v28 = vld [vmem:[%s926_s1 + $0x4] ss:$8 sps:$4 sm:$0xff]  }
   0xa   :  { %v640_v25 = vld [vmem:[%s926_s1 + $0x114] ss:$8 sps:$4 sm:$0xff]   ;;  %v643_v27 = vld [vmem:[%s926_s1 + $0x110] ss:$8 sps:$4 sm:$0xff]   ;;  %v646_v29 = vld [vmem:[%s926_s1 + $0x104] ss:$8 sps:$4 sm:$0xff]  }
   0xb   :  { %432 = vmatpush1.bf16.msra.mxu0 %v618_v10  ;;  %v648_v30 = vld [vmem:[%s926_s1] ss:$8 sps:$4 sm:$0xff]   ;;  %v650_v32 = vld [vmem:[%s926_s1 + $0xf4] ss:$8 sps:$4 sm:$0xff]   ;;  %v654_v34 = vld [vmem:[%s926_s1 + $0xf0] ss:$8 sps:$4 sm:$0xff]  }
   0xc   :  { %473 = vmatpush1.bf16.msra.mxu1 %v619_v11  ;;  %433 = vmatprep.subr.bf16.mxu0 %v620_v12  ;;  %v649_v31 = vld [vmem:[%s926_s1 + $0x100] ss:$8 sps:$4 sm:$0xff]   ;;  %v652_v33 = vld [vmem:[%s926_s1 + $0x1f4] ss:$8 sps:$4 sm:$0xff]   ;;  %v655_v35 = vld [vmem:[%s926_s1 + $0x1f0] ss:$8 sps:$4 sm:$0xff]  }
   0xd   :  { %474 = vmatprep.subr.bf16.mxu1 %v622_v13  ;;  %v656_v39 = vld [vmem:[%s926_s1 + $0xe4] ss:$8 sps:$4 sm:$0xff]   ;;  %v660_v41 = vld [vmem:[%s926_s1 + $0xe0] ss:$8 sps:$4 sm:$0xff]   ;;  %v837_v43 = vshrl.u32 %v90_v38, 7 }
   0xe   :  { %v658_v40 = vld [vmem:[%s926_s1 + $0x1e4] ss:$8 sps:$4 sm:$0xff]   ;;  %v661_v44 = vld [vmem:[%s926_s1 + $0x1e0] ss:$8 sps:$4 sm:$0xff]   ;;  %v662_v45 = vld [vmem:[%s926_s1 + $0xd4] ss:$8 sps:$4 sm:$0xff]  }
   0xf   :  { %434 = vmatpush1.bf16.msra.mxu0 %v624_v14  ;;  %v664_v46 = vld [vmem:[%s926_s1 + $0x1d4] ss:$8 sps:$4 sm:$0xff]   ;;  %v666_v47 = vld [vmem:[%s926_s1 + $0xd0] ss:$8 sps:$4 sm:$0xff]   ;;  %v92_v49 = vsub.s32 %v89_v42, %v837_v43  ;;  %v668_v50 = vld [vmem:[%s926_s1 + $0xc4] ss:$8 sps:$4 sm:$0xff]  }
  0x10   :  { %475 = vmatpush1.bf16.msra.mxu1 %v625_v15  ;;  %435 = vmatprep.subr.bf16.mxu0 %v626_v16  ;;  %v667_v48 = vld [vmem:[%s926_s1 + $0x1d0] ss:$8 sps:$4 sm:$0xff]   ;;  %v670_v51 = vld [vmem:[%s926_s1 + $0x1c4] ss:$8 sps:$4 sm:$0xff]   ;;  %v672_v55 = vld [vmem:[%s926_s1 + $0xc0] ss:$8 sps:$4 sm:$0xff]  }
  0x11   :  { %476 = vmatprep.subr.bf16.mxu1 %v628_v17  ;;  %v20_v52 = vld [vmem:[%s927_s0] sm:$0xff]  ;;  %v674_v57 = vld [vmem:[%s926_s1 + $0xb4] ss:$8 sps:$4 sm:$0xff]   ;;  %v678_v62 = vld [vmem:[%s926_s1 + $0xb0] ss:$8 sps:$4 sm:$0xff]   ;;  %v523_v12 = vsub.s32 0, %v837_v43 }
  0x12   :  { %v93_v53 = vrot.slane %v20_v52, %v92_v49  ;;  %v86_v54 = vcombine.high %v20_v52, %v20_v52  ;;  %v673_v56 = vld [vmem:[%s926_s1 + $0x1c0] ss:$8 sps:$4 sm:$0xff]   ;;  %v676_v58 = vld [vmem:[%s926_s1 + $0x1b4] ss:$8 sps:$4 sm:$0xff]   ;;  %v679_v63 = vld [vmem:[%s926_s1 + $0x1b0] ss:$8 sps:$4 sm:$0xff]  }
  0x13   :  { %436 = vmatpush1.bf16.msra.mxu0 %v630_v18  ;;  %v680_v0 = vld [vmem:[%s926_s1 + $0xa4] ss:$8 sps:$4 sm:$0xff]   ;;  %v684_v2 = vld [vmem:[%s926_s1 + $0xa0] ss:$8 sps:$4 sm:$0xff]   ;;  %v686_v4 = vld [vmem:[%s926_s1 + $0x94] ss:$8 sps:$4 sm:$0xff]  }
  0x14   :  { %477 = vmatpush1.bf16.msra.mxu1 %v631_v19  ;;  %437 = vmatprep.subr.bf16.mxu0 %v632_v20  ;;  %v101_v59 = vcombine.high %v93_v53, %v93_v53  ;;  %v100_v60 = vrot.slane %v86_v54, %v92_v49  ;;  %v682_v1 = vld [vmem:[%s926_s1 + $0x1a4] ss:$8 sps:$4 sm:$0xff]   ;;  %v685_v3 = vld [vmem:[%s926_s1 + $0x1a0] ss:$8 sps:$4 sm:$0xff]   ;;  %v688_v5 = vld [vmem:[%s926_s1 + $0x194] ss:$8 sps:$4 sm:$0xff]  }
  0x15   :  { %478 = vmatprep.subr.bf16.mxu1 %v634_v21  ;;  %v690_v6 = vld [vmem:[%s926_s1 + $0x90] ss:$8 sps:$4 sm:$0xff]   ;;  %v692_v8 = vld [vmem:[%s926_s1 + $0x84] ss:$8 sps:$4 sm:$0xff]   ;;  %v696_v10 = vld [vmem:[%s926_s1 + $0x80] ss:$8 sps:$4 sm:$0xff]  }
  0x16   :  { %459 = vmatprep.mubr.bf16.mxu0 %v101_v59  ;;  %v102_v61 = vcombine.high %v100_v60, %v100_v60  ;;  %v691_v7 = vld [vmem:[%s926_s1 + $0x190] ss:$8 sps:$4 sm:$0xff]   ;;  %v694_v9 = vld [vmem:[%s926_s1 + $0x184] ss:$8 sps:$4 sm:$0xff]   ;;  %v697_v11 = vld [vmem:[%s926_s1 + $0x180] ss:$8 sps:$4 sm:$0xff]  }
  0x17   :  { %438 = vmatpush1.bf16.msra.mxu0 %v636_v22  ;;  %v527_v13 = vsub.s32 1, %v837_v43  ;;  %v519_v14 = vld [vmem:[%s928_s2] sm:$0x3] }
  0x18   :  { %479 = vmatpush1.bf16.msra.mxu1 %v637_v23  ;;  %439 = vmatprep.subr.bf16.mxu0 %v638_v24  ;;  %v524_v15 = vrot.slane %v519_v14, %v523_v12 }
  0x19   :  { %480 = vmatprep.subr.bf16.mxu1 %v640_v25  ;;  %500 = vmatprep.mubr.bf16.mxu1 %v102_v61  ;;  %v528_v16 = vrot.slane %v519_v14, %v527_v13 }
  0x1b   :  { %440 = vmatpush1.bf16.msra.mxu0 %v642_v26  ;;  %v529_v23 = vcombine.low %v524_v15, %v528_v16 }
  0x1c   :  { %481 = vmatpush1.bf16.msra.mxu1 %v643_v27  ;;  %441 = vmatprep.subr.bf16.mxu0 %v644_v28 }
  0x1d   :  { %482 = vmatprep.subr.bf16.mxu1 %v646_v29 }
  0x1f   :  { %442 = vmatpush1.bf16.msra.mxu0 %v648_v30 }
  0x20   :  { %483 = vmatpush1.bf16.msra.mxu1 %v649_v31  ;;  %443 = vmatprep.subr.bf16.mxu0 %v650_v32 }
  0x21   :  { %484 = vmatprep.subr.bf16.mxu1 %v652_v33 }
  0x23   :  { %444 = vmatpush2.bf16.msra.mxu0 %v654_v34 }
  0x24   :  { %485 = vmatpush2.bf16.msra.mxu1 %v655_v35  ;;  %445 = vmatprep.subr.bf16.mxu0 %v656_v39 }
  0x25   :  { %486 = vmatprep.subr.bf16.mxu1 %v658_v40 }
  0x27   :  { %446 = vmatpush2.bf16.msra.mxu0 %v660_v41 }
  0x28   :  { %487 = vmatpush2.bf16.msra.mxu1 %v661_v44  ;;  %447 = vmatprep.subr.bf16.mxu0 %v662_v45 }
  0x29   :  { %488 = vmatprep.subr.bf16.mxu1 %v664_v46 }
  0x2b   :  { %448 = vmatpush2.bf16.msra.mxu0 %v666_v47 }
  0x2c   :  { %489 = vmatpush2.bf16.msra.mxu1 %v667_v48  ;;  %449 = vmatprep.subr.bf16.mxu0 %v668_v50 }
  0x2d   :  { %490 = vmatprep.subr.bf16.mxu1 %v670_v51 }
  0x2f   :  { %450 = vmatpush2.bf16.msra.mxu0 %v672_v55 }
  0x30   :  { %491 = vmatpush2.bf16.msra.mxu1 %v673_v56  ;;  %451 = vmatprep.subr.bf16.mxu0 %v674_v57 }
  0x31   :  { %492 = vmatprep.subr.bf16.mxu1 %v676_v58 }
  0x33   :  { %452 = vmatpush2.bf16.msra.mxu0 %v678_v62 }
  0x34   :  { %493 = vmatpush2.bf16.msra.mxu1 %v679_v63  ;;  %453 = vmatprep.subr.bf16.mxu0 %v680_v0 }
  0x35   :  { %494 = vmatprep.subr.bf16.mxu1 %v682_v1 }
  0x37   :  { %454 = vmatpush2.bf16.msra.mxu0 %v684_v2 }
  0x38   :  { %495 = vmatpush2.bf16.msra.mxu1 %v685_v3  ;;  %455 = vmatprep.subr.bf16.mxu0 %v686_v4 }
  0x39   :  { %496 = vmatprep.subr.bf16.mxu1 %v688_v5 }
  0x3b   :  { %456 = vmatpush2.bf16.msra.mxu0 %v690_v6 }
  0x3c   :  { %497 = vmatpush2.bf16.msra.mxu1 %v691_v7  ;;  %457 = vmatprep.subr.bf16.mxu0 %v692_v8 }
  0x3d   :  { %498 = vmatprep.subr.bf16.mxu1 %v694_v9 }
  0x3f   :  { %458 = vmatpush2.bf16.msra.mxu0 %v696_v10 }
  0x40   :  { %499 = vmatpush2.bf16.msra.mxu1 %v697_v11 }
  0x42   :  { %460 = vmatmul.mubr.bf16.vlgmr.msra.gmra.mxu0 %v93_v53 }
  0x43   :  { %501 = vmatmul.mubr.bf16.vlgmr.msra.gmra.mxu1 %v100_v60 }
 0x102   :  { %v461_v17 = vpop.f32.mrf.mxu0 }
 0x103   :  { %v502_v18 = vpop.f32.mrf.mxu1 }
 0x104   :  { %v463_v19 = vpop.f32.mrf.mxu0  ;;  %v503_v21 = vadd.f32 %v502_v18, %v461_v17 }
 0x105   :  { %v504_v20 = vpop.f32.mrf.mxu1 }
 0x106   :  { %v505_v22 = vadd.f32 %v504_v20, %v463_v19  ;;  %v465_v24 = vpop.f32.mrf.mxu0 }
 0x107   :  { %v506_v25 = vpop.f32.mrf.mxu1 }
 0x108   :  { %v511_v26 = vcombine.low %v503_v21, %v505_v22  ;;  %v466_v27 = vpop.f32.mrf.mxu0 }
 0x109   :  { %v507_v28 = vpop.f32.mrf.mxu1 }
 0x10a   :  { %v531_v29 = vadd.f32 %v529_v23, %v511_v26 }
 0x10c   :  { %532 = vst [vmem:[%s929_s3] sm:$0xff] %v531_v29 }

// kernel: siamese_forward.43
= control target key start
LH: loop header
LB: loop body
LE: loop exit
PB: predicated region body
PF: predicated region fallthrough
CT: control target
= control target key end

     0   :  { %v158_v38 = vlaneseq  ;;  %v2229_v39 = vmov 1966171168   ;;  %s2934_s1 = inlined_call_operand.vmem [shape: bf16[512,512], index: 1, kind: input, shape index: {}]   ;;  %s2935_s0 = inlined_call_operand.vmem [shape: bf16[2,512], index: 0, kind: input, shape index: {}]   ;;  %s2936_s3 = inlined_call_operand.vmem [shape: bf16[512,256], index: 3, kind: input, shape index: {}]   ;;  %s2937_s2 = inlined_call_operand.vmem [shape: f32[1,512], index: 2, kind: input, shape index: {}]   ;;  %s2938_s5 = inlined_call_operand.vmem [shape: bf16[256,128], index: 5, kind: input, shape index: {}]   ;;  %s2939_s4 = inlined_call_operand.vmem [shape: f32[1,256], index: 4, kind: input, shape index: {}]   ;;  %s2940_s6 = inlined_call_operand.vmem [shape: f32[1,128], index: 6, kind: input, shape index: {}]   ;;  %s2941_s7 = inlined_call_operand.vmem [shape: f32[2,128], index: 7, kind: output, shape index: {}]  }
   0x1   :  { %v1921_v0 = vld [vmem:[%s2934_s1 + $0xe4] ss:$16 sps:$4 sm:$0xff]   ;;  %v1925_v2 = vld [vmem:[%s2934_s1 + $0xe0] ss:$16 sps:$4 sm:$0xff]   ;;  %v188_v40 = vunpack.c.l.s4 %v2229_v39  ;;  %v2056_v39 = vld [vmem:[%s2934_s1 + $0x228] ss:$16 sps:$4 sm:$0xff]  }
   0x2   :  { %v1923_v1 = vld [vmem:[%s2934_s1 + $0x2e4] ss:$16 sps:$4 sm:$0xff]   ;;  %847 = vmatprep.subr.bf16.mxu0 %v1921_v0  ;;  %v1926_v3 = vld [vmem:[%s2934_s1 + $0x2e0] ss:$16 sps:$4 sm:$0xff]   ;;  %v2396_v45 = vshrl.u32 %v158_v38, 7 }
   0x3   :  { %888 = vmatprep.subr.bf16.mxu1 %v1923_v1  ;;  %v1927_v4 = vld [vmem:[%s2934_s1 + $0xc4] ss:$16 sps:$4 sm:$0xff]   ;;  %848 = vmatpush1.bf16.msra.mxu0 %v1925_v2  ;;  %v1931_v6 = vld [vmem:[%s2934_s1 + $0xc0] ss:$16 sps:$4 sm:$0xff]   ;;  %v189_v46 = vunpack.c.0.s8 %v188_v40  ;;  %v2053_v38 = vld [vmem:[%s2934_s1 + $0x28] ss:$16 sps:$4 sm:$0xff]  }
   0x4   :  { %889 = vmatpush1.bf16.msra.mxu1 %v1926_v3  ;;  %v1929_v5 = vld [vmem:[%s2934_s1 + $0x2c4] ss:$16 sps:$4 sm:$0xff]   ;;  %849 = vmatprep.subr.bf16.mxu0 %v1927_v4  ;;  %v1932_v7 = vld [vmem:[%s2934_s1 + $0x2c0] ss:$16 sps:$4 sm:$0xff]   ;;  %v2061_v40 = vld [vmem:[%s2934_s1 + $0xc] ss:$16 sps:$4 sm:$0xff]  }
   0x5   :  { %890 = vmatprep.subr.bf16.mxu1 %v1929_v5  ;;  %v1933_v8 = vld [vmem:[%s2934_s1 + $0xa4] ss:$16 sps:$4 sm:$0xff]   ;;  %v1937_v10 = vld [vmem:[%s2934_s1 + $0xa0] ss:$16 sps:$4 sm:$0xff]   ;;  %v192_v51 = vsub.s32 %v189_v46, %v2396_v45  ;;  %v2070_v46 = vld [vmem:[%s2934_s1 + $0x3ec] ss:$16 sps:$4 sm:$0xff]  }
   0x6   :  { %v1935_v9 = vld [vmem:[%s2934_s1 + $0x2a4] ss:$16 sps:$4 sm:$0xff]   ;;  %v1938_v11 = vld [vmem:[%s2934_s1 + $0x2a0] ss:$16 sps:$4 sm:$0xff]  }
   0x7   :  { %850 = vmatpush1.bf16.msra.mxu0 %v1931_v6  ;;  %v1939_v12 = vld [vmem:[%s2934_s1 + $0x84] ss:$16 sps:$4 sm:$0xff]   ;;  %v1943_v14 = vld [vmem:[%s2934_s1 + $0x80] ss:$16 sps:$4 sm:$0xff]  }
   0x8   :  { %891 = vmatpush1.bf16.msra.mxu1 %v1932_v7  ;;  %851 = vmatprep.subr.bf16.mxu0 %v1933_v8  ;;  %v1941_v13 = vld [vmem:[%s2934_s1 + $0x284] ss:$16 sps:$4 sm:$0xff]   ;;  %v1944_v15 = vld [vmem:[%s2934_s1 + $0x280] ss:$16 sps:$4 sm:$0xff]  }
   0x9   :  { %892 = vmatprep.subr.bf16.mxu1 %v1935_v9  ;;  %v1945_v16 = vld [vmem:[%s2934_s1 + $0x64] ss:$16 sps:$4 sm:$0xff]   ;;  %v1949_v18 = vld [vmem:[%s2934_s1 + $0x60] ss:$16 sps:$4 sm:$0xff]  }
   0xa   :  { %v1947_v17 = vld [vmem:[%s2934_s1 + $0x264] ss:$16 sps:$4 sm:$0xff]   ;;  %v1950_v19 = vld [vmem:[%s2934_s1 + $0x260] ss:$16 sps:$4 sm:$0xff]  }
   0xb   :  { %852 = vmatpush1.bf16.msra.mxu0 %v1937_v10  ;;  %v1951_v20 = vld [vmem:[%s2934_s1 + $0x44] ss:$16 sps:$4 sm:$0xff]   ;;  %v1955_v22 = vld [vmem:[%s2934_s1 + $0x40] ss:$16 sps:$4 sm:$0xff]  }
   0xc   :  { %893 = vmatpush1.bf16.msra.mxu1 %v1938_v11  ;;  %853 = vmatprep.subr.bf16.mxu0 %v1939_v12  ;;  %v1953_v21 = vld [vmem:[%s2934_s1 + $0x244] ss:$16 sps:$4 sm:$0xff]   ;;  %v1956_v23 = vld [vmem:[%s2934_s1 + $0x240] ss:$16 sps:$4 sm:$0xff]   ;;  %v2019_v11 = vld [vmem:[%s2934_s1 + $0xec] ss:$16 sps:$4 sm:$0xff]  }
   0xd   :  { %894 = vmatprep.subr.bf16.mxu1 %v1941_v13  ;;  %v1957_v24 = vld [vmem:[%s2934_s1 + $0x24] ss:$16 sps:$4 sm:$0xff]   ;;  %v1961_v26 = vld [vmem:[%s2934_s1 + $0x20] ss:$16 sps:$4 sm:$0xff]   ;;  %v2022_v12 = vld [vmem:[%s2934_s1 + $0x2ec] ss:$16 sps:$4 sm:$0xff]  }
   0xe   :  { %v1959_v25 = vld [vmem:[%s2934_s1 + $0x224] ss:$16 sps:$4 sm:$0xff]   ;;  %v1962_v27 = vld [vmem:[%s2934_s1 + $0x220] ss:$16 sps:$4 sm:$0xff]  }
   0xf   :  { %854 = vmatpush1.bf16.msra.mxu0 %v1943_v14  ;;  %v1963_v28 = vld [vmem:[%s2934_s1 + $0x4] ss:$16 sps:$4 sm:$0xff]   ;;  %v1967_v30 = vld [vmem:[%s2934_s1] ss:$16 sps:$4 sm:$0xff]   ;;  %v2017_v14 = vld [vmem:[%s2934_s1 + $0xe8] ss:$16 sps:$4 sm:$0xff]  }
  0x10   :  { %895 = vmatpush1.bf16.msra.mxu1 %v1944_v15  ;;  %855 = vmatprep.subr.bf16.mxu0 %v1945_v16  ;;  %v1965_v29 = vld [vmem:[%s2934_s1 + $0x204] ss:$16 sps:$4 sm:$0xff]   ;;  %v1968_v31 = vld [vmem:[%s2934_s1 + $0x200] ss:$16 sps:$4 sm:$0xff]   ;;  %v2020_v15 = vld [vmem:[%s2934_s1 + $0x2e8] ss:$16 sps:$4 sm:$0xff]  }
  0x11   :  { %896 = vmatprep.subr.bf16.mxu1 %v1947_v17  ;;  %v1969_v32 = vld [vmem:[%s2934_s1 + $0x1e4] ss:$16 sps:$4 sm:$0xff]   ;;  %v1973_v34 = vld [vmem:[%s2934_s1 + $0x1e0] ss:$16 sps:$4 sm:$0xff]   ;;  %v2025_v16 = vld [vmem:[%s2934_s1 + $0xcc] ss:$16 sps:$4 sm:$0xff]  }
  0x12   :  { %v1971_v33 = vld [vmem:[%s2934_s1 + $0x3e4] ss:$16 sps:$4 sm:$0xff]   ;;  %v1974_v35 = vld [vmem:[%s2934_s1 + $0x3e0] ss:$16 sps:$4 sm:$0xff]   ;;  %v2028_v17 = vld [vmem:[%s2934_s1 + $0x2cc] ss:$16 sps:$4 sm:$0xff]  }
  0x13   :  { %856 = vmatpush1.bf16.msra.mxu0 %v1949_v18  ;;  %v1975_v36 = vld [vmem:[%s2934_s1 + $0x1c4] ss:$16 sps:$4 sm:$0xff]   ;;  %v1979_v41 = vld [vmem:[%s2934_s1 + $0x1c0] ss:$16 sps:$4 sm:$0xff]   ;;  %v2023_v18 = vld [vmem:[%s2934_s1 + $0xc8] ss:$16 sps:$4 sm:$0xff]  }
  0x14   :  { %897 = vmatpush1.bf16.msra.mxu1 %v1950_v19  ;;  %857 = vmatprep.subr.bf16.mxu0 %v1951_v20  ;;  %v1977_v37 = vld [vmem:[%s2934_s1 + $0x3c4] ss:$16 sps:$4 sm:$0xff]   ;;  %v1980_v42 = vld [vmem:[%s2934_s1 + $0x3c0] ss:$16 sps:$4 sm:$0xff]   ;;  %v2026_v19 = vld [vmem:[%s2934_s1 + $0x2c8] ss:$16 sps:$4 sm:$0xff]  }
  0x15   :  { %898 = vmatprep.subr.bf16.mxu1 %v1953_v21  ;;  %v1981_v43 = vld [vmem:[%s2934_s1 + $0x1a4] ss:$16 sps:$4 sm:$0xff]   ;;  %v1985_v47 = vld [vmem:[%s2934_s1 + $0x1a0] ss:$16 sps:$4 sm:$0xff]   ;;  %v2031_v20 = vld [vmem:[%s2934_s1 + $0xac] ss:$16 sps:$4 sm:$0xff]  }
  0x16   :  { %v1983_v44 = vld [vmem:[%s2934_s1 + $0x3a4] ss:$16 sps:$4 sm:$0xff]   ;;  %v1986_v48 = vld [vmem:[%s2934_s1 + $0x3a0] ss:$16 sps:$4 sm:$0xff]   ;;  %v2034_v21 = vld [vmem:[%s2934_s1 + $0x2ac] ss:$16 sps:$4 sm:$0xff]  }
  0x17   :  { %858 = vmatpush1.bf16.msra.mxu0 %v1955_v22  ;;  %v1987_v49 = vld [vmem:[%s2934_s1 + $0x184] ss:$16 sps:$4 sm:$0xff]   ;;  %v1688_v52 = vld.sshfl [vmem:[%s2935_s0] sm:$0x33 pattern:$0x75316420] }
  0x18   :  { %899 = vmatpush1.bf16.msra.mxu1 %v1956_v23  ;;  %859 = vmatprep.subr.bf16.mxu0 %v1957_v24  ;;  %v1989_v50 = vld [vmem:[%s2934_s1 + $0x384] ss:$16 sps:$4 sm:$0xff]   ;;  %v1991_v53 = vld [vmem:[%s2934_s1 + $0x180] ss:$16 sps:$4 sm:$0xff]   ;;  %v186_v55 = vcombine.high %v1688_v52, %v1688_v52  ;;  %v2465_v9 = vrot.slane %v1688_v52, %v192_v51  ;;  %v2029_v22 = vld [vmem:[%s2934_s1 + $0xa8] ss:$16 sps:$4 sm:$0xff]  }
  0x19   :  { %900 = vmatprep.subr.bf16.mxu1 %v1959_v25  ;;  %v1992_v54 = vld [vmem:[%s2934_s1 + $0x380] ss:$16 sps:$4 sm:$0xff]   ;;  %v1993_v56 = vld [vmem:[%s2934_s1 + $0x164] ss:$16 sps:$4 sm:$0xff]   ;;  %v2032_v23 = vld [vmem:[%s2934_s1 + $0x2a8] ss:$16 sps:$4 sm:$0xff]  }
  0x1a   :  { %v1995_v57 = vld [vmem:[%s2934_s1 + $0x364] ss:$16 sps:$4 sm:$0xff]   ;;  %v200_v58 = vrot.slane %v186_v55, %v192_v51  ;;  %v1997_v59 = vld [vmem:[%s2934_s1 + $0x160] ss:$16 sps:$4 sm:$0xff]   ;;  %v2478_v13 = vcombine.high %v2465_v9, %v2465_v9  ;;  %v2037_v24 = vld [vmem:[%s2934_s1 + $0x8c] ss:$16 sps:$4 sm:$0xff]  }
  0x1b   :  { %860 = vmatpush1.bf16.msra.mxu0 %v1961_v26  ;;  %v1998_v60 = vld [vmem:[%s2934_s1 + $0x360] ss:$16 sps:$4 sm:$0xff]   ;;  %v1999_v62 = vld [vmem:[%s2934_s1 + $0x144] ss:$16 sps:$4 sm:$0xff]   ;;  %v2040_v25 = vld [vmem:[%s2934_s1 + $0x28c] ss:$16 sps:$4 sm:$0xff]  }
  0x1c   :  { %901 = vmatpush1.bf16.msra.mxu1 %v1962_v27  ;;  %861 = vmatprep.subr.bf16.mxu0 %v1963_v28  ;;  %v202_v61 = vcombine.high %v200_v58, %v200_v58  ;;  %v2001_v63 = vld [vmem:[%s2934_s1 + $0x344] ss:$16 sps:$4 sm:$0xff]   ;;  %v2003_v0 = vld [vmem:[%s2934_s1 + $0x140] ss:$16 sps:$4 sm:$0xff]   ;;  %v2035_v26 = vld [vmem:[%s2934_s1 + $0x88] ss:$16 sps:$4 sm:$0xff]  }
  0x1d   :  { %902 = vmatprep.subr.bf16.mxu1 %v1965_v29  ;;  %879 = vmatprep.mubr.bf16.mxu0 %v200_v58  ;;  %v2004_v1 = vld [vmem:[%s2934_s1 + $0x340] ss:$16 sps:$4 sm:$0xff]   ;;  %v2005_v2 = vld [vmem:[%s2934_s1 + $0x124] ss:$16 sps:$4 sm:$0xff]   ;;  %v2038_v27 = vld [vmem:[%s2934_s1 + $0x288] ss:$16 sps:$4 sm:$0xff]  }
  0x1e   :  { %920 = vmatprep.mubr.bf16.mxu1 %v202_v61  ;;  %v2007_v3 = vld [vmem:[%s2934_s1 + $0x324] ss:$16 sps:$4 sm:$0xff]   ;;  %v2009_v4 = vld [vmem:[%s2934_s1 + $0x120] ss:$16 sps:$4 sm:$0xff]   ;;  %v2043_v28 = vld [vmem:[%s2934_s1 + $0x6c] ss:$16 sps:$4 sm:$0xff]  }
  0x1f   :  { %862 = vmatpush1.bf16.msra.mxu0 %v1967_v30  ;;  %v2010_v5 = vld [vmem:[%s2934_s1 + $0x320] ss:$16 sps:$4 sm:$0xff]   ;;  %v2011_v6 = vld [vmem:[%s2934_s1 + $0x104] ss:$16 sps:$4 sm:$0xff]   ;;  %v2046_v29 = vld [vmem:[%s2934_s1 + $0x26c] ss:$16 sps:$4 sm:$0xff]  }
  0x20   :  { %903 = vmatpush1.bf16.msra.mxu1 %v1968_v31  ;;  %863 = vmatprep.subr.bf16.mxu0 %v1969_v32  ;;  %v2013_v7 = vld [vmem:[%s2934_s1 + $0x304] ss:$16 sps:$4 sm:$0xff]   ;;  %v2015_v8 = vld [vmem:[%s2934_s1 + $0x100] ss:$16 sps:$4 sm:$0xff]   ;;  %v2041_v30 = vld [vmem:[%s2934_s1 + $0x68] ss:$16 sps:$4 sm:$0xff]  }
  0x21   :  { %904 = vmatprep.subr.bf16.mxu1 %v1971_v33  ;;  %v2016_v10 = vld [vmem:[%s2934_s1 + $0x300] ss:$16 sps:$4 sm:$0xff]   ;;  %v2044_v31 = vld [vmem:[%s2934_s1 + $0x268] ss:$16 sps:$4 sm:$0xff]   ;;  %v2049_v32 = vld [vmem:[%s2934_s1 + $0x4c] ss:$16 sps:$4 sm:$0xff]  }
  0x22   :  { %v2052_v33 = vld [vmem:[%s2934_s1 + $0x24c] ss:$16 sps:$4 sm:$0xff]   ;;  %v2071_v51 = vld [vmem:[%s2934_s1 + $0x1c8] ss:$16 sps:$4 sm:$0xff]  }
  0x23   :  { %864 = vmatpush2.bf16.msra.mxu0 %v1973_v34  ;;  %v2047_v34 = vld [vmem:[%s2934_s1 + $0x48] ss:$16 sps:$4 sm:$0xff]  }
  0x24   :  { %905 = vmatpush2.bf16.msra.mxu1 %v1974_v35  ;;  %865 = vmatprep.subr.bf16.mxu0 %v1975_v36  ;;  %v2050_v35 = vld [vmem:[%s2934_s1 + $0x248] ss:$16 sps:$4 sm:$0xff]   ;;  %v2055_v36 = vld [vmem:[%s2934_s1 + $0x2c] ss:$16 sps:$4 sm:$0xff]  }
  0x25   :  { %906 = vmatprep.subr.bf16.mxu1 %v1977_v37  ;;  %v2058_v37 = vld [vmem:[%s2934_s1 + $0x22c] ss:$16 sps:$4 sm:$0xff]   ;;  %v2074_v52 = vld [vmem:[%s2934_s1 + $0x3c8] ss:$16 sps:$4 sm:$0xff]  }
  0x26   :  { %v2077_v55 = vld [vmem:[%s2934_s1 + $0x1a8] ss:$16 sps:$4 sm:$0xff]  }
  0x27   :  { %866 = vmatpush2.bf16.msra.mxu0 %v1979_v41  ;;  %v2064_v41 = vld [vmem:[%s2934_s1 + $0x20c] ss:$16 sps:$4 sm:$0xff]  }
  0x28   :  { %907 = vmatpush2.bf16.msra.mxu1 %v1980_v42  ;;  %867 = vmatprep.subr.bf16.mxu0 %v1981_v43  ;;  %v2059_v42 = vld [vmem:[%s2934_s1 + $0x8] ss:$16 sps:$4 sm:$0xff]  }
  0x29   :  { %908 = vmatprep.subr.bf16.mxu1 %v1983_v44  ;;  %v2062_v43 = vld [vmem:[%s2934_s1 + $0x208] ss:$16 sps:$4 sm:$0xff]   ;;  %v2067_v44 = vld [vmem:[%s2934_s1 + $0x1ec] ss:$16 sps:$4 sm:$0xff]  }
  0x2b   :  { %868 = vmatpush2.bf16.msra.mxu0 %v1985_v47  ;;  %v2065_v47 = vld [vmem:[%s2934_s1 + $0x1e8] ss:$16 sps:$4 sm:$0xff]  }
  0x2c   :  { %909 = vmatpush2.bf16.msra.mxu1 %v1986_v48  ;;  %869 = vmatprep.subr.bf16.mxu0 %v1987_v49  ;;  %v2068_v48 = vld [vmem:[%s2934_s1 + $0x3e8] ss:$16 sps:$4 sm:$0xff]   ;;  %v2073_v49 = vld [vmem:[%s2934_s1 + $0x1cc] ss:$16 sps:$4 sm:$0xff]  }
  0x2d   :  { %910 = vmatprep.subr.bf16.mxu1 %v1989_v50  ;;  %v2076_v50 = vld [vmem:[%s2934_s1 + $0x3cc] ss:$16 sps:$4 sm:$0xff]  }
  0x2f   :  { %870 = vmatpush2.bf16.msra.mxu0 %v1991_v53  ;;  %v2079_v53 = vld [vmem:[%s2934_s1 + $0x1ac] ss:$16 sps:$4 sm:$0xff]  }
  0x30   :  { %911 = vmatpush2.bf16.msra.mxu1 %v1992_v54  ;;  %871 = vmatprep.subr.bf16.mxu0 %v1993_v56  ;;  %v2082_v54 = vld [vmem:[%s2934_s1 + $0x3ac] ss:$16 sps:$4 sm:$0xff]   ;;  %v2080_v56 = vld [vmem:[%s2934_s1 + $0x3a8] ss:$16 sps:$4 sm:$0xff]  }
  0x31   :  { %912 = vmatprep.subr.bf16.mxu1 %v1995_v57  ;;  %v2085_v57 = vld [vmem:[%s2934_s1 + $0x18c] ss:$16 sps:$4 sm:$0xff]  }
  0x33   :  { %872 = vmatpush2.bf16.msra.mxu0 %v1997_v59  ;;  %v2083_v59 = vld [vmem:[%s2934_s1 + $0x188] ss:$16 sps:$4 sm:$0xff]  }
  0x34   :  { %913 = vmatpush2.bf16.msra.mxu1 %v1998_v60  ;;  %873 = vmatprep.subr.bf16.mxu0 %v1999_v62  ;;  %v2086_v60 = vld [vmem:[%s2934_s1 + $0x388] ss:$16 sps:$4 sm:$0xff]   ;;  %v2094_v62 = vld [vmem:[%s2934_s1 + $0x36c] ss:$16 sps:$4 sm:$0xff]  }
  0x35   :  { %914 = vmatprep.subr.bf16.mxu1 %v2001_v63  ;;  %v2089_v63 = vld [vmem:[%s2934_s1 + $0x168] ss:$16 sps:$4 sm:$0xff]  }
  0x37   :  { %874 = vmatpush2.bf16.msra.mxu0 %v2003_v0  ;;  %v2092_v0 = vld [vmem:[%s2934_s1 + $0x368] ss:$16 sps:$4 sm:$0xff]  }
  0x38   :  { %915 = vmatpush2.bf16.msra.mxu1 %v2004_v1  ;;  %875 = vmatprep.subr.bf16.mxu0 %v2005_v2  ;;  %v2097_v1 = vld [vmem:[%s2934_s1 + $0x14c] ss:$16 sps:$4 sm:$0xff]  }
  0x39   :  { %916 = vmatprep.subr.bf16.mxu1 %v2007_v3  ;;  %v2100_v2 = vld [vmem:[%s2934_s1 + $0x34c] ss:$16 sps:$4 sm:$0xff]   ;;  %v2095_v3 = vld [vmem:[%s2934_s1 + $0x148] ss:$16 sps:$4 sm:$0xff]  }
  0x3b   :  { %876 = vmatpush2.bf16.msra.mxu0 %v2009_v4  ;;  %v2098_v4 = vld [vmem:[%s2934_s1 + $0x348] ss:$16 sps:$4 sm:$0xff]  }
  0x3c   :  { %917 = vmatpush2.bf16.msra.mxu1 %v2010_v5  ;;  %877 = vmatprep.subr.bf16.mxu0 %v2011_v6  ;;  %v2103_v5 = vld [vmem:[%s2934_s1 + $0x12c] ss:$16 sps:$4 sm:$0xff]  }
  0x3d   :  { %918 = vmatprep.subr.bf16.mxu1 %v2013_v7  ;;  %v2106_v6 = vld [vmem:[%s2934_s1 + $0x32c] ss:$16 sps:$4 sm:$0xff]   ;;  %v2101_v7 = vld [vmem:[%s2934_s1 + $0x128] ss:$16 sps:$4 sm:$0xff]  }
  0x3f   :  { %878 = vmatpush2.bf16.msra.mxu0 %v2015_v8  ;;  %v2104_v8 = vld [vmem:[%s2934_s1 + $0x328] ss:$16 sps:$4 sm:$0xff]  }
  0x40   :  { %919 = vmatpush2.bf16.msra.mxu1 %v2016_v10  ;;  %929 = vmatprep.subr.bf16.mxu0 %v2019_v11  ;;  %v2109_v10 = vld [vmem:[%s2934_s1 + $0x10c] ss:$16 sps:$4 sm:$0xff]  }
  0x41   :  { %970 = vmatprep.subr.bf16.mxu1 %v2022_v12  ;;  %v2112_v11 = vld [vmem:[%s2934_s1 + $0x30c] ss:$16 sps:$4 sm:$0xff]   ;;  %v2107_v12 = vld [vmem:[%s2934_s1 + $0x108] ss:$16 sps:$4 sm:$0xff]  }
  0x42   :  { %880 = vmatmul.mubr.bf16.vlgmr.msra.gmra.mxu0 %v2465_v9 }
  0x43   :  { %921 = vmatmul.mubr.bf16.vlgmr.msra.gmra.mxu1 %v2478_v13  ;;  %930 = vmatpush1.bf16.msra.mxu0 %v2017_v14  ;;  %v2110_v14 = vld [vmem:[%s2934_s1 + $0x308] ss:$16 sps:$4 sm:$0xff]  }
  0x44   :  { %971 = vmatpush1.bf16.msra.mxu1 %v2020_v15  ;;  %931 = vmatprep.subr.bf16.mxu0 %v2025_v16  ;;  %v2115_v15 = vld [vmem:[%s2936_s3 + $0x74] ss:$8 sps:$4 sm:$0xff]   ;;  %v2113_v16 = vld [vmem:[%s2936_s3 + $0x70] ss:$8 sps:$4 sm:$0xff]  }
  0x45   :  { %972 = vmatprep.subr.bf16.mxu1 %v2028_v17  ;;  %961 = vmatprep.mubr.bf16.mxu0 %v200_v58  ;;  %v2088_v58 = vld [vmem:[%s2934_s1 + $0x38c] ss:$16 sps:$4 sm:$0xff]  }
  0x46   :  { %1002 = vmatprep.mubr.bf16.mxu1 %v202_v61  ;;  %v2091_v61 = vld [vmem:[%s2934_s1 + $0x16c] ss:$16 sps:$4 sm:$0xff]  }
  0x47   :  { %932 = vmatpush1.bf16.msra.mxu0 %v2023_v18  ;;  %v2118_v17 = vld [vmem:[%s2936_s3 + $0x64] ss:$8 sps:$4 sm:$0xff]   ;;  %v2116_v18 = vld [vmem:[%s2936_s3 + $0x60] ss:$8 sps:$4 sm:$0xff]  }
  0x48   :  { %973 = vmatpush1.bf16.msra.mxu1 %v2026_v19  ;;  %933 = vmatprep.subr.bf16.mxu0 %v2031_v20  ;;  %v2121_v19 = vld [vmem:[%s2936_s3 + $0x54] ss:$8 sps:$4 sm:$0xff]   ;;  %v2119_v20 = vld [vmem:[%s2936_s3 + $0x50] ss:$8 sps:$4 sm:$0xff]  }
  0x49   :  { %974 = vmatprep.subr.bf16.mxu1 %v2034_v21  ;;  %v2127_v21 = vld [vmem:[%s2936_s3 + $0x34] ss:$8 sps:$4 sm:$0xff]  }
  0x4b   :  { %934 = vmatpush1.bf16.msra.mxu0 %v2029_v22  ;;  %v2163_v22 = vld [vmem:[%s2936_s3 + $0x174] ss:$8 sps:$4 sm:$0xff]  }
  0x4c   :  { %975 = vmatpush1.bf16.msra.mxu1 %v2032_v23  ;;  %935 = vmatprep.subr.bf16.mxu0 %v2037_v24  ;;  %v2161_v23 = vld [vmem:[%s2936_s3 + $0x170] ss:$8 sps:$4 sm:$0xff]   ;;  %v2166_v24 = vld [vmem:[%s2936_s3 + $0x164] ss:$8 sps:$4 sm:$0xff]  }
  0x4d   :  { %976 = vmatprep.subr.bf16.mxu1 %v2040_v25  ;;  %v2125_v25 = vld [vmem:[%s2936_s3 + $0x30] ss:$8 sps:$4 sm:$0xff]  }
  0x4f   :  { %936 = vmatpush1.bf16.msra.mxu0 %v2035_v26  ;;  %v2164_v26 = vld [vmem:[%s2936_s3 + $0x160] ss:$8 sps:$4 sm:$0xff]  }
  0x50   :  { %977 = vmatpush1.bf16.msra.mxu1 %v2038_v27  ;;  %937 = vmatprep.subr.bf16.mxu0 %v2043_v28  ;;  %v2130_v27 = vld [vmem:[%s2936_s3 + $0x24] ss:$8 sps:$4 sm:$0xff]   ;;  %v2169_v28 = vld [vmem:[%s2936_s3 + $0x154] ss:$8 sps:$4 sm:$0xff]  }
  0x51   :  { %978 = vmatprep.subr.bf16.mxu1 %v2046_v29  ;;  %v2128_v29 = vld [vmem:[%s2936_s3 + $0x20] ss:$8 sps:$4 sm:$0xff]  }
  0x53   :  { %938 = vmatpush1.bf16.msra.mxu0 %v2041_v30  ;;  %v2167_v30 = vld [vmem:[%s2936_s3 + $0x150] ss:$8 sps:$4 sm:$0xff]  }
  0x54   :  { %979 = vmatpush1.bf16.msra.mxu1 %v2044_v31  ;;  %939 = vmatprep.subr.bf16.mxu0 %v2049_v32  ;;  %v2133_v31 = vld [vmem:[%s2936_s3 + $0x14] ss:$8 sps:$4 sm:$0xff]   ;;  %v2172_v32 = vld [vmem:[%s2936_s3 + $0x144] ss:$8 sps:$4 sm:$0xff]  }
  0x55   :  { %980 = vmatprep.subr.bf16.mxu1 %v2052_v33  ;;  %v2131_v33 = vld [vmem:[%s2936_s3 + $0x10] ss:$8 sps:$4 sm:$0xff]  }
  0x57   :  { %940 = vmatpush1.bf16.msra.mxu0 %v2047_v34  ;;  %v2170_v34 = vld [vmem:[%s2936_s3 + $0x140] ss:$8 sps:$4 sm:$0xff]  }
  0x58   :  { %981 = vmatpush1.bf16.msra.mxu1 %v2050_v35  ;;  %941 = vmatprep.subr.bf16.mxu0 %v2055_v36  ;;  %v2136_v35 = vld [vmem:[%s2936_s3 + $0x4] ss:$8 sps:$4 sm:$0xff]   ;;  %v2175_v36 = vld [vmem:[%s2936_s3 + $0x134] ss:$8 sps:$4 sm:$0xff]  }
  0x59   :  { %982 = vmatprep.subr.bf16.mxu1 %v2058_v37  ;;  %v2134_v37 = vld [vmem:[%s2936_s3] ss:$8 sps:$4 sm:$0xff]  }
  0x5b   :  { %942 = vmatpush1.bf16.msra.mxu0 %v2053_v38  ;;  %v2173_v38 = vld [vmem:[%s2936_s3 + $0x130] ss:$8 sps:$4 sm:$0xff]  }
  0x5c   :  { %983 = vmatpush1.bf16.msra.mxu1 %v2056_v39  ;;  %943 = vmatprep.subr.bf16.mxu0 %v2061_v40  ;;  %v2139_v39 = vld [vmem:[%s2936_s3 + $0xf4] ss:$8 sps:$4 sm:$0xff]   ;;  %v2178_v40 = vld [vmem:[%s2936_s3 + $0x124] ss:$8 sps:$4 sm:$0xff]  }
  0x5d   :  { %984 = vmatprep.subr.bf16.mxu1 %v2064_v41  ;;  %v2137_v41 = vld [vmem:[%s2936_s3 + $0xf0] ss:$8 sps:$4 sm:$0xff]  }
  0x5f   :  { %944 = vmatpush1.bf16.msra.mxu0 %v2059_v42  ;;  %v2176_v42 = vld [vmem:[%s2936_s3 + $0x120] ss:$8 sps:$4 sm:$0xff]  }
  0x60   :  { %985 = vmatpush1.bf16.msra.mxu1 %v2062_v43  ;;  %945 = vmatprep.subr.bf16.mxu0 %v2067_v44  ;;  %v2142_v43 = vld [vmem:[%s2936_s3 + $0xe4] ss:$8 sps:$4 sm:$0xff]   ;;  %v2181_v44 = vld [vmem:[%s2936_s3 + $0x114] ss:$8 sps:$4 sm:$0xff]  }
  0x61   :  { %986 = vmatprep.subr.bf16.mxu1 %v2070_v46  ;;  %v2140_v46 = vld [vmem:[%s2936_s3 + $0xe0] ss:$8 sps:$4 sm:$0xff]  }
  0x63   :  { %946 = vmatpush2.bf16.msra.mxu0 %v2065_v47  ;;  %v2179_v47 = vld [vmem:[%s2936_s3 + $0x110] ss:$8 sps:$4 sm:$0xff]  }
  0x64   :  { %987 = vmatpush2.bf16.msra.mxu1 %v2068_v48  ;;  %947 = vmatprep.subr.bf16.mxu0 %v2073_v49  ;;  %v2145_v48 = vld [vmem:[%s2936_s3 + $0xd4] ss:$8 sps:$4 sm:$0xff]   ;;  %v2184_v49 = vld [vmem:[%s2936_s3 + $0x104] ss:$8 sps:$4 sm:$0xff]  }
  0x65   :  { %988 = vmatprep.subr.bf16.mxu1 %v2076_v50  ;;  %v2143_v50 = vld [vmem:[%s2936_s3 + $0xd0] ss:$8 sps:$4 sm:$0xff]  }
  0x67   :  { %948 = vmatpush2.bf16.msra.mxu0 %v2071_v51  ;;  %v2182_v51 = vld [vmem:[%s2936_s3 + $0x100] ss:$8 sps:$4 sm:$0xff]  }
  0x68   :  { %989 = vmatpush2.bf16.msra.mxu1 %v2074_v52  ;;  %949 = vmatprep.subr.bf16.mxu0 %v2079_v53  ;;  %v2148_v52 = vld [vmem:[%s2936_s3 + $0xc4] ss:$8 sps:$4 sm:$0xff]   ;;  %v2187_v53 = vld [vmem:[%s2936_s3 + $0x1f4] ss:$8 sps:$4 sm:$0xff]  }
  0x69   :  { %990 = vmatprep.subr.bf16.mxu1 %v2082_v54  ;;  %v2146_v54 = vld [vmem:[%s2936_s3 + $0xc0] ss:$8 sps:$4 sm:$0xff]  }
  0x6b   :  { %950 = vmatpush2.bf16.msra.mxu0 %v2077_v55  ;;  %v2185_v55 = vld [vmem:[%s2936_s3 + $0x1f0] ss:$8 sps:$4 sm:$0xff]  }
  0x6c   :  { %991 = vmatpush2.bf16.msra.mxu1 %v2080_v56  ;;  %951 = vmatprep.subr.bf16.mxu0 %v2085_v57  ;;  %v2151_v56 = vld [vmem:[%s2936_s3 + $0xb4] ss:$8 sps:$4 sm:$0xff]   ;;  %v2190_v57 = vld [vmem:[%s2936_s3 + $0x1e4] ss:$8 sps:$4 sm:$0xff]  }
  0x6d   :  { %992 = vmatprep.subr.bf16.mxu1 %v2088_v58  ;;  %v2149_v58 = vld [vmem:[%s2936_s3 + $0xb0] ss:$8 sps:$4 sm:$0xff]  }
  0x6f   :  { %952 = vmatpush2.bf16.msra.mxu0 %v2083_v59  ;;  %v2188_v59 = vld [vmem:[%s2936_s3 + $0x1e0] ss:$8 sps:$4 sm:$0xff]  }
  0x70   :  { %993 = vmatpush2.bf16.msra.mxu1 %v2086_v60  ;;  %953 = vmatprep.subr.bf16.mxu0 %v2091_v61  ;;  %v2154_v60 = vld [vmem:[%s2936_s3 + $0xa4] ss:$8 sps:$4 sm:$0xff]   ;;  %v2193_v61 = vld [vmem:[%s2936_s3 + $0x1d4] ss:$8 sps:$4 sm:$0xff]  }
  0x71   :  { %994 = vmatprep.subr.bf16.mxu1 %v2094_v62  ;;  %v2152_v62 = vld [vmem:[%s2936_s3 + $0xa0] ss:$8 sps:$4 sm:$0xff]  }
  0x73   :  { %954 = vmatpush2.bf16.msra.mxu0 %v2089_v63  ;;  %v2191_v63 = vld [vmem:[%s2936_s3 + $0x1d0] ss:$8 sps:$4 sm:$0xff]  }
  0x74   :  { %995 = vmatpush2.bf16.msra.mxu1 %v2092_v0  ;;  %955 = vmatprep.subr.bf16.mxu0 %v2097_v1  ;;  %v2157_v0 = vld [vmem:[%s2936_s3 + $0x94] ss:$8 sps:$4 sm:$0xff]   ;;  %v2196_v1 = vld [vmem:[%s2936_s3 + $0x1c4] ss:$8 sps:$4 sm:$0xff]  }
  0x75   :  { %996 = vmatprep.subr.bf16.mxu1 %v2100_v2  ;;  %v2155_v2 = vld [vmem:[%s2936_s3 + $0x90] ss:$8 sps:$4 sm:$0xff]  }
  0x77   :  { %956 = vmatpush2.bf16.msra.mxu0 %v2095_v3  ;;  %v2194_v3 = vld [vmem:[%s2936_s3 + $0x1c0] ss:$8 sps:$4 sm:$0xff]  }
  0x78   :  { %997 = vmatpush2.bf16.msra.mxu1 %v2098_v4  ;;  %957 = vmatprep.subr.bf16.mxu0 %v2103_v5  ;;  %v2160_v4 = vld [vmem:[%s2936_s3 + $0x84] ss:$8 sps:$4 sm:$0xff]   ;;  %v2199_v5 = vld [vmem:[%s2936_s3 + $0x1b4] ss:$8 sps:$4 sm:$0xff]  }
  0x79   :  { %998 = vmatprep.subr.bf16.mxu1 %v2106_v6  ;;  %v2158_v6 = vld [vmem:[%s2936_s3 + $0x80] ss:$8 sps:$4 sm:$0xff]  }
  0x7b   :  { %958 = vmatpush2.bf16.msra.mxu0 %v2101_v7  ;;  %v2197_v7 = vld [vmem:[%s2936_s3 + $0x1b0] ss:$8 sps:$4 sm:$0xff]  }
  0x7c   :  { %999 = vmatpush2.bf16.msra.mxu1 %v2104_v8  ;;  %959 = vmatprep.subr.bf16.mxu0 %v2109_v10  ;;  %v2202_v8 = vld [vmem:[%s2936_s3 + $0x1a4] ss:$8 sps:$4 sm:$0xff]   ;;  %v2200_v10 = vld [vmem:[%s2936_s3 + $0x1a0] ss:$8 sps:$4 sm:$0xff]  }
  0x7d   :  { %1000 = vmatprep.subr.bf16.mxu1 %v2112_v11  ;;  %v2205_v11 = vld [vmem:[%s2936_s3 + $0x194] ss:$8 sps:$4 sm:$0xff]  }
  0x7f   :  { %960 = vmatpush2.bf16.msra.mxu0 %v2107_v12  ;;  %v2203_v12 = vld [vmem:[%s2936_s3 + $0x190] ss:$8 sps:$4 sm:$0xff]  }
  0x80   :  { %1001 = vmatpush2.bf16.msra.mxu1 %v2110_v14  ;;  %1415 = vmatprep.subr.bf16.mxu0 %v2115_v15  ;;  %v2208_v14 = vld [vmem:[%s2936_s3 + $0x184] ss:$8 sps:$4 sm:$0xff]   ;;  %v2206_v15 = vld [vmem:[%s2936_s3 + $0x180] ss:$8 sps:$4 sm:$0xff]  }
  0x81   :  { %1456 = vmatprep.subr.bf16.mxu1 %v2163_v22 }
  0x82   :  { %962 = vmatmul.mubr.bf16.vlgmr.msra.gmra.mxu0 %v2465_v9  ;;  %v2124_v9 = vld [vmem:[%s2936_s3 + $0x44] ss:$8 sps:$4 sm:$0xff]  }
  0x83   :  { %1003 = vmatmul.mubr.bf16.vlgmr.msra.gmra.mxu1 %v2478_v13  ;;  %1416 = vmatpush1.bf16.msra.mxu0 %v2113_v16  ;;  %v2122_v13 = vld [vmem:[%s2936_s3 + $0x40] ss:$8 sps:$4 sm:$0xff]   ;;  %v160_v16 = vsub.s32 0, %v2396_v45 }
  0x84   :  { %1417 = vmatprep.subr.bf16.mxu0 %v2118_v17  ;;  %1457 = vmatpush1.bf16.msra.mxu1 %v2161_v23  ;;  %v156_v17 = vld [vmem:[%s2937_s2] sm:$0xf] }
  0x85   :  { %1458 = vmatprep.subr.bf16.mxu1 %v2166_v24 }
  0x87   :  { %1418 = vmatpush1.bf16.msra.mxu0 %v2116_v18  ;;  %v164_v18 = vsub.s32 1, %v2396_v45 }
  0x88   :  { %1419 = vmatprep.subr.bf16.mxu0 %v2121_v19  ;;  %1459 = vmatpush1.bf16.msra.mxu1 %v2164_v26  ;;  %v161_v19 = vrot.slane %v156_v17, %v160_v16 }
  0x89   :  { %1460 = vmatprep.subr.bf16.mxu1 %v2169_v28 }
  0x8b   :  { %1420 = vmatpush1.bf16.msra.mxu0 %v2119_v20  ;;  %v165_v20 = vrot.slane %v156_v17, %v164_v18 }
  0x8c   :  { %1421 = vmatprep.subr.bf16.mxu0 %v2124_v9  ;;  %1461 = vmatpush1.bf16.msra.mxu1 %v2167_v30 }
  0x8d   :  { %1462 = vmatprep.subr.bf16.mxu1 %v2172_v32 }
  0x8f   :  { %1422 = vmatpush1.bf16.msra.mxu0 %v2122_v13 }
  0x90   :  { %1423 = vmatprep.subr.bf16.mxu0 %v2127_v21  ;;  %1463 = vmatpush1.bf16.msra.mxu1 %v2170_v34 }
  0x91   :  { %1464 = vmatprep.subr.bf16.mxu1 %v2175_v36  ;;  %v172_v36 = vsub.s32 3, %v2396_v45 }
  0x93   :  { %1424 = vmatpush1.bf16.msra.mxu0 %v2125_v25 }
  0x94   :  { %1425 = vmatprep.subr.bf16.mxu0 %v2130_v27  ;;  %1465 = vmatpush1.bf16.msra.mxu1 %v2173_v38  ;;  %v173_v38 = vrot.slane %v156_v17, %v172_v36 }
  0x95   :  { %1466 = vmatprep.subr.bf16.mxu1 %v2178_v40 }
  0x97   :  { %1426 = vmatpush1.bf16.msra.mxu0 %v2128_v29 }
  0x98   :  { %1427 = vmatprep.subr.bf16.mxu0 %v2133_v31  ;;  %1467 = vmatpush1.bf16.msra.mxu1 %v2176_v42 }
  0x99   :  { %1468 = vmatprep.subr.bf16.mxu1 %v2181_v44 }
  0x9b   :  { %1428 = vmatpush1.bf16.msra.mxu0 %v2131_v33 }
  0x9c   :  { %1429 = vmatprep.subr.bf16.mxu0 %v2136_v35  ;;  %1469 = vmatpush1.bf16.msra.mxu1 %v2179_v47  ;;  %v168_v35 = vsub.s32 2, %v2396_v45  ;;  %v1881_v45 = vld [vmem:[%s2940_s6] ss:$0 sm:$0xff] }
  0x9d   :  { %1470 = vmatprep.subr.bf16.mxu1 %v2184_v49 }
  0x9f   :  { %1430 = vmatpush1.bf16.msra.mxu0 %v2134_v37  ;;  %v169_v37 = vrot.slane %v156_v17, %v168_v35 }
  0xa0   :  { %1431 = vmatprep.subr.bf16.mxu0 %v2139_v39  ;;  %1471 = vmatpush1.bf16.msra.mxu1 %v2182_v51 }
  0xa1   :  { %1472 = vmatprep.subr.bf16.mxu1 %v2187_v53 }
  0xa3   :  { %1432 = vmatpush2.bf16.msra.mxu0 %v2137_v41 }
  0xa4   :  { %1433 = vmatprep.subr.bf16.mxu0 %v2142_v43  ;;  %1473 = vmatpush2.bf16.msra.mxu1 %v2185_v55 }
  0xa5   :  { %1474 = vmatprep.subr.bf16.mxu1 %v2190_v57  ;;  %v2210_v57 = vld [vmem:[%s2938_s5 + $0x38] sm:$0xff]  }
  0xa7   :  { %1434 = vmatpush2.bf16.msra.mxu0 %v2140_v46 }
  0xa8   :  { %1435 = vmatprep.subr.bf16.mxu0 %v2145_v48  ;;  %1475 = vmatpush2.bf16.msra.mxu1 %v2188_v59  ;;  %v2212_v59 = vld [vmem:[%s2938_s5 + $0x30] sm:$0xff]  }
  0xa9   :  { %1476 = vmatprep.subr.bf16.mxu1 %v2193_v61  ;;  %v2214_v61 = vld [vmem:[%s2938_s5 + $0x28] sm:$0xff]  }
  0xab   :  { %1436 = vmatpush2.bf16.msra.mxu0 %v2143_v50 }
  0xac   :  { %1437 = vmatprep.subr.bf16.mxu0 %v2148_v52  ;;  %1477 = vmatpush2.bf16.msra.mxu1 %v2191_v63  ;;  %v2216_v63 = vld [vmem:[%s2938_s5 + $0x20] sm:$0xff]  }
  0xad   :  { %1478 = vmatprep.subr.bf16.mxu1 %v2196_v1  ;;  %v2218_v1 = vld [vmem:[%s2938_s5 + $0x18] sm:$0xff]  }
  0xaf   :  { %1438 = vmatpush2.bf16.msra.mxu0 %v2146_v54 }
  0xb0   :  { %1439 = vmatprep.subr.bf16.mxu0 %v2151_v56  ;;  %1479 = vmatpush2.bf16.msra.mxu1 %v2194_v3  ;;  %v2209_v56 = vld [vmem:[%s2938_s5 + $0x78] sm:$0xff]   ;;  %v2220_v3 = vld [vmem:[%s2938_s5 + $0x10] sm:$0xff]  }
  0xb1   :  { %1480 = vmatprep.subr.bf16.mxu1 %v2199_v5  ;;  %v2222_v5 = vld [vmem:[%s2938_s5 + $0x8] sm:$0xff]  }
  0xb3   :  { %1440 = vmatpush2.bf16.msra.mxu0 %v2149_v58  ;;  %v2211_v58 = vld [vmem:[%s2938_s5 + $0x70] sm:$0xff]  }
  0xb4   :  { %1441 = vmatprep.subr.bf16.mxu0 %v2154_v60  ;;  %1481 = vmatpush2.bf16.msra.mxu1 %v2197_v7  ;;  %v2213_v60 = vld [vmem:[%s2938_s5 + $0x68] sm:$0xff]   ;;  %v2224_v7 = vld [vmem:[%s2938_s5] sm:$0xff]  }
  0xb5   :  { %1482 = vmatprep.subr.bf16.mxu1 %v2202_v8 }
  0xb7   :  { %1442 = vmatpush2.bf16.msra.mxu0 %v2152_v62  ;;  %v2215_v62 = vld [vmem:[%s2938_s5 + $0x60] sm:$0xff]  }
  0xb8   :  { %1443 = vmatprep.subr.bf16.mxu0 %v2157_v0  ;;  %1483 = vmatpush2.bf16.msra.mxu1 %v2200_v10  ;;  %v2217_v0 = vld [vmem:[%s2938_s5 + $0x58] sm:$0xff]  }
  0xb9   :  { %1484 = vmatprep.subr.bf16.mxu1 %v2205_v11 }
  0xbb   :  { %1444 = vmatpush2.bf16.msra.mxu0 %v2155_v2  ;;  %v2219_v2 = vld [vmem:[%s2938_s5 + $0x50] sm:$0xff]  }
  0xbc   :  { %1445 = vmatprep.subr.bf16.mxu0 %v2160_v4  ;;  %1485 = vmatpush2.bf16.msra.mxu1 %v2203_v12  ;;  %v2221_v4 = vld [vmem:[%s2938_s5 + $0x48] sm:$0xff]  }
  0xbd   :  { %1486 = vmatprep.subr.bf16.mxu1 %v2208_v14  ;;  %v1083_v14 = vld [vmem:[%s2939_s4] sm:$0x3] }
  0xbe   :  { %v1092_v17 = vrot.slane %v1083_v14, %v164_v18 }
  0xbf   :  { %1446 = vmatpush2.bf16.msra.mxu0 %v2158_v6  ;;  %v2223_v6 = vld [vmem:[%s2938_s5 + $0x40] sm:$0xff]  }
  0xc0   :  { %1487 = vmatpush2.bf16.msra.mxu1 %v2206_v15  ;;  %1898 = vmatprep.subr.bf16.mxu0 %v2209_v56  ;;  %v1088_v15 = vrot.slane %v1083_v14, %v160_v16 }
 0x102   :  { %v881_v9 = vpop.f32.mrf.mxu0 }
 0x103   :  { %v922_v13 = vpop.f32.mrf.mxu1  ;;  %v882_v21 = vadd.f32 %v881_v9, %v161_v19 }
 0x104   :  { %v883_v22 = vpop.f32.mrf.mxu0 }
 0x105   :  { %v924_v23 = vpop.f32.mrf.mxu1  ;;  %v923_v24 = vadd.f32 %v922_v13, %v882_v21  ;;  %v884_v25 = vadd.f32 %v883_v22, %v165_v20 }
 0x106   :  { %v885_v26 = vpop.f32.mrf.mxu0 }
 0x107   :  { %v926_v27 = vpop.f32.mrf.mxu1  ;;  %v925_v28 = vadd.f32 %v924_v23, %v884_v25  ;;  %v1011_v29 = vmax.f32 %v923_v24, 0.0 }
 0x108   :  { %v886_v30 = vpop.f32.mrf.mxu0 }
 0x109   :  { %v927_v31 = vpop.f32.mrf.mxu1  ;;  %v1012_v32 = vmax.f32 %v925_v28, 0.0  ;;  %v1015_v34 = vpack.c.bf16 %v1011_v29, %v1011_v29 }
 0x10b   :  { %v1016_v33 = vpack.c.bf16 %v1012_v32, %v1012_v32 }
 0x10d   :  { %1447 = vmatprep.mubr.bf16.mxu0 %v1016_v33 }
 0x10e   :  { %1448 = vmatmul.mubr.bf16.vlgmr.msra.gmra.mxu0 %v1015_v34 }
 0x10f   :  { %1899 = vmatpush3.bf16.msra.mxu0 %v2210_v57 }
 0x110   :  { %1900 = vmatprep.subr.bf16.mxu0 %v2211_v58 }
 0x113   :  { %1901 = vmatpush3.bf16.msra.mxu0 %v2212_v59 }
 0x114   :  { %1902 = vmatprep.subr.bf16.mxu0 %v2213_v60 }
 0x117   :  { %1903 = vmatpush3.bf16.msra.mxu0 %v2214_v61 }
 0x118   :  { %1904 = vmatprep.subr.bf16.mxu0 %v2215_v62 }
 0x11b   :  { %1905 = vmatpush3.bf16.msra.mxu0 %v2216_v63 }
 0x11c   :  { %1906 = vmatprep.subr.bf16.mxu0 %v2217_v0 }
 0x11f   :  { %1907 = vmatpush3.bf16.msra.mxu0 %v2218_v1 }
 0x120   :  { %1908 = vmatprep.subr.bf16.mxu0 %v2219_v2 }
 0x123   :  { %1909 = vmatpush3.bf16.msra.mxu0 %v2220_v3 }
 0x124   :  { %1910 = vmatprep.subr.bf16.mxu0 %v2221_v4 }
 0x127   :  { %1911 = vmatpush3.bf16.msra.mxu0 %v2222_v5 }
 0x128   :  { %1912 = vmatprep.subr.bf16.mxu0 %v2223_v6 }
 0x12b   :  { %1913 = vmatpush3.bf16.msra.mxu0 %v2224_v7 }
 0x142   :  { %v963_v39 = vpop.f32.mrf.mxu0 }
 0x143   :  { %v1004_v40 = vpop.f32.mrf.mxu1  ;;  %v964_v41 = vadd.f32 %v963_v39, %v169_v37 }
 0x144   :  { %v965_v42 = vpop.f32.mrf.mxu0 }
 0x145   :  { %v1006_v43 = vpop.f32.mrf.mxu1  ;;  %v1005_v44 = vadd.f32 %v1004_v40, %v964_v41  ;;  %v966_v46 = vadd.f32 %v965_v42, %v173_v38 }
 0x146   :  { %v967_v47 = vpop.f32.mrf.mxu0 }
 0x147   :  { %v1008_v48 = vpop.f32.mrf.mxu1  ;;  %v1007_v49 = vadd.f32 %v1006_v43, %v966_v46  ;;  %v1013_v50 = vmax.f32 %v1005_v44, 0.0 }
 0x148   :  { %v968_v51 = vpop.f32.mrf.mxu0 }
 0x149   :  { %v1009_v52 = vpop.f32.mrf.mxu1  ;;  %v1014_v53 = vmax.f32 %v1007_v49, 0.0  ;;  %v1017_v55 = vpack.c.bf16 %v1013_v50, %v1013_v50 }
 0x14b   :  { %v1018_v54 = vpack.c.bf16 %v1014_v53, %v1014_v53 }
 0x14d   :  { %1488 = vmatprep.mubr.bf16.mxu1 %v1018_v54 }
 0x14e   :  { %1489 = vmatmul.mubr.bf16.vlgmr.msra.gmra.mxu1 %v1017_v55 }
 0x1ce   :  { %v1449_v8 = vpop.f32.mrf.mxu0 }
 0x1cf   :  { %v1450_v19 = vadd.f32 %v1449_v8, %v1088_v15 }
 0x1d0   :  { %v1451_v10 = vpop.f32.mrf.mxu0 }
 0x1d1   :  { %v1452_v9 = vadd.f32 %v1451_v10, %v1092_v17 }
 0x1d2   :  { %v1453_v11 = vpop.f32.mrf.mxu0 }
 0x1d4   :  { %v1454_v12 = vpop.f32.mrf.mxu0 }
 0x20e   :  { %v1490_v20 = vpop.f32.mrf.mxu1 }
 0x20f   :  { %v1491_v13 = vadd.f32 %v1490_v20, %v1450_v19 }
 0x210   :  { %v1492_v21 = vpop.f32.mrf.mxu1 }
 0x211   :  { %v1493_v22 = vadd.f32 %v1492_v21, %v1452_v9  ;;  %v1497_v23 = vmax.f32 %v1491_v13, 0.0 }
 0x212   :  { %v1494_v24 = vpop.f32.mrf.mxu1 }
 0x213   :  { %v1498_v25 = vmax.f32 %v1493_v22, 0.0  ;;  %v1499_v28 = vpack.c.bf16 %v1497_v23, %v1497_v23 }
 0x214   :  { %v1495_v26 = vpop.f32.mrf.mxu1 }
 0x215   :  { %v1500_v27 = vpack.c.bf16 %v1498_v25, %v1498_v25 }
 0x217   :  { %1668 = vmatprep.mubr.bf16.mxu0 %v1500_v27 }
 0x218   :  { %1669 = vmatmul.mubr.bf16.vlgmr.msra.gmra.mxu0 %v1499_v28 }
 0x2d8   :  { %v1914_v29 = vpop.f32.mrf.mxu0 }
 0x2da   :  { %v1915_v16 = vpop.f32.mrf.mxu0 }
 0x2db   :  { %v1916_v18 = vadd.f32 %v1915_v16, %v1914_v29 }
 0x2dc   :  { %v1917_v30 = vpop.f32.mrf.mxu0 }
 0x2dd   :  { %v1671_v31 = vadd.f32 %v1916_v18, %v1881_v45 }
 0x2de   :  { %v1918_v32 = vpop.f32.mrf.mxu0 }
 0x2df   :  { %v1676_v33 = vsub.f32 0.0, %v1671_v31 }
 0x2e1   :  { %v1677_v34 = vmul.f32 1.442695, %v1676_v33 }
 0x2e3   :  { %2225 = vpow2.f32 %v1677_v34 }
 0x2f0   :  { %v2226_v35 = vpop.eup %2225 }
 0x2f1   :  { %v1679_v36 = vadd.f32 1.0, %v2226_v35 }
 0x2f3   :  { %2227 = vrcp.f32 %v1679_v36 }
 0x300   :  { %v2228_v37 = vpop.eup %2227 }
 0x301   :  { %v1681_v38 = vmax.f32 %v2228_v37, 0.0 }
 0x303   :  { %v1682_v39 = vmin.f32 %v1681_v38, 1.0 }
 0x305   :  { %1683 = vst [vmem:[%s2941_s7] sm:$0x3] %v1682_v39 }

</bundles_post_ra>
